<compile_context>
chip_gen: v5e
topology: v5e:2x2
jax: 0.10.0
libtpu: 0.0.40
codegen_flags: <defaults>
</compile_context>

<pallas_src>
import jax
import jax.numpy as jnp
from jax.experimental import pallas as pl
from jax.experimental.pallas import tpu as pltpu

EPS = 1e-5
LANE = 128                               # pad channel dims to the TPU lane width
# Planned-resident-bytes budget used when picking batch tiles.  Conservative so the
# same plan fits v7x's 64 MiB VMEM; on v5e/v6e (128 MiB physical) both constants can
# be raised toward ~96 MiB for larger tiles.
PLAN_VMEM_BUDGET = 32 * 1024 * 1024
VMEM_LIMIT = 48 * 1024 * 1024


def _round_up(n, m):
    return ((n + m - 1) // m) * m


def _pick_batch_tile(batch, per_item_bytes, fixed_bytes, budget=PLAN_VMEM_BUDGET):
    """Largest divisor of `batch` whose planned VMEM footprint fits the budget.

    The plan counts the double-buffered streamed blocks (per_item_bytes) AND the
    resident weight / scale / shift / output / scratch bytes (fixed_bytes), fixing the
    previous heuristic that only counted the streamed rows.  Tiling over whole images
    keeps the BN statistics exact without masking.
    """
    for t in range(batch, 0, -1):
        if batch % t == 0 and fixed_bytes + t * per_item_bytes <= budget:
            return t
    return 1


def _bn1d_train(h):
    # Training-mode BatchNorm1d (affine=False): batch stats, biased variance.
    mean = jnp.mean(h, axis=0, keepdims=True)
    var = jnp.maximum(jnp.mean(h * h, axis=0, keepdims=True) - mean * mean, 0.0)
    return (h - mean) * jax.lax.rsqrt(var + EPS)


# --------------------------- Pallas layer passes -----------------------------

def conv_pass1(x, kp, compute_dtype):
    """Pass 1: y = conv(x) (no im2col in HBM) + per-channel sum / sum-of-squares.

    The conv is expressed as a stride-1 tap accumulation over a transformed view of
    the padded NHWC input:
      * 3x3 / s1 / p1 layer:  xt = xp[:, :, None, :, :]            taps = (ky | q=0, kx)
      * 4x4 / s2 / p1 layer:  xt = xp.reshape(B, Hp/2, 2, Wp/2, 2C) taps = (p | q, a)
        with ky = 2p+q, kx = 2a+r and r folded into the channel dim (free reshape).
    The outer tap index (ky or p) is a grid axis, so the weight is streamed in
    kw*Cin*Cp blocks (partial K-tiling) and y is accumulated in an f32 VMEM scratch.
    """
    B, H, W, Cin = x.shape
    k, s, pad = kp["k"], kp["stride"], kp["pad"]
    Cp = kp["cp"]
    Ho = (H + 2 * pad - k) // s + 1
    Wo = (W + 2 * pad - k) // s + 1

    xp = jnp.pad(x, ((0, 0), (pad, pad), (pad, pad), (0, 0)))
    if s == 1:
        xt = xp[:, :, None, :, :]                              # [B, Hp, 1, Wp, Cin]
        KH, Q, KA = k, 1, k
    else:
        assert s == 2 and k == 4
        Hp, Wp = H + 2 * pad, W + 2 * pad
        assert Hp % 2 == 0 and Wp % 2 == 0
        xt = xp.reshape(B, Hp // 2, 2, Wp // 2, 2 * Cin)       # free parity split
        KH, Q, KA = 2, 2, 2
    _, Hs, _, Ws, Ce = xt.shape
    wt = kp["wt"]                                              # [KH, Q, KA, Ce, Cp]

    isz = jnp.dtype(compute_dtype).itemsize
    per_img = (2 * Hs * Q * Ws * Ce * isz          # double-buffered input block
               + 2 * Ho * Wo * Cp * isz            # double-buffered y output block
               + Ho * Wo * Cp * 4)                 # f32 accumulator scratch
    fixed = 2 * Q * KA * Ce * Cp * isz + 4 * 2 * Cp * 4
    TB = _pick_batch_tile(B, per_img, fixed)
    nB = B // TB
    R = TB * Ho * Wo

    def kernel(x_ref, w_ref, y_ref, sum_ref, ssq_ref, acc_ref):
        b = pl.program_id(0)
        t = pl.program_id(1)                       # outer filter-tap (row) index

        @pl.when(jnp.logical_and(b == 0, t == 0))
        def _():
            sum_ref[...] = jnp.zeros_like(sum_ref)
            ssq_ref[...] = jnp.zeros_like(ssq_ref)

        @pl.when(t == 0)
        def _():
            acc_ref[...] = jnp.zeros_like(acc_ref)

        part = None
        for q in range(Q):                         # static loops: all window slices
            for a in range(KA):                    # are static; only `t` (untiled H
                win = x_ref[:, pl.ds(t, Ho), q, a:a + Wo, :]   # dim) is dynamic
                d = jnp.dot(win.reshape(R, Ce), w_ref[0, q, a, :, :],
                            preferred_element_type=jnp.float32)
                part = d if part is None else part + d
        acc_ref[...] += part

        @pl.when(t == KH - 1)
        def _():
            yv = acc_ref[...]                      # f32 conv output for this tile
            y_ref[...] = yv.reshape(TB, Ho, Wo, Cp).astype(y_ref.dtype)
            # One-pass BN stats (E[y^2] - mean^2), accumulated in f32 from the f32 acc.
            sum_ref[...] += jnp.sum(yv, axis=0, keepdims=True)
            ssq_ref[...] += jnp.sum(yv * yv, axis=0, keepdims=True)

    y, ssum, ssq = pl.pallas_call(
        kernel,
        out_shape=(jax.ShapeDtypeStruct((B, Ho, Wo, Cp), compute_dtype),
                   jax.ShapeDtypeStruct((1, Cp), jnp.float32),
                   jax.ShapeDtypeStruct((1, Cp), jnp.float32)),
        grid=(nB, KH),
        in_specs=[pl.BlockSpec((TB, Hs, Q, Ws, Ce), lambda b, t: (b, 0, 0, 0, 0)),
                  pl.BlockSpec((1, Q, KA, Ce, Cp), lambda b, t: (t, 0, 0, 0, 0))],
        out_specs=(pl.BlockSpec((TB, Ho, Wo, Cp), lambda b, t: (b, 0, 0, 0)),
                   pl.BlockSpec((1, Cp), lambda b, t: (0, 0)),
                   pl.BlockSpec((1, Cp), lambda b, t: (0, 0))),
        scratch_shapes=[pltpu.VMEM((R, Cp), jnp.float32)],
        compiler_params=pltpu.CompilerParams(
            dimension_semantics=("arbitrary", "arbitrary"),
            vmem_limit_bytes=VMEM_LIMIT),
    )(xt, wt)
    return y, ssum, ssq


def bn_relu(y, scale, shift, compute_dtype):
    """Pass 2 (non-last layers): pure-VPU folded BN affine + ReLU over the saved y."""
    B, Ho, Wo, Cp = y.shape
    isz = jnp.dtype(compute_dtype).itemsize
    per_img = 4 * Ho * Wo * Cp * isz               # 2x in + 2x out blocks
    TB = _pick_batch_tile(B, per_img, 4 * 2 * Cp * 4)
    nB = B // TB

    def kernel(y_ref, s_ref, t_ref, o_ref):
        yv = y_ref[...].astype(jnp.float32)
        o_ref[...] = jnp.maximum(yv * s_ref[...] + t_ref[...], 0.0).astype(o_ref.dtype)

    return pl.pallas_call(
        kernel,
        out_shape=jax.ShapeDtypeStruct((B, Ho, Wo, Cp), compute_dtype),
        grid=(nB,),
        in_specs=[pl.BlockSpec((TB, Ho, Wo, Cp), lambda b: (b, 0, 0, 0)),
                  pl.BlockSpec((1, Cp), lambda b: (0, 0)),
                  pl.BlockSpec((1, Cp), lambda b: (0, 0))],
        out_specs=pl.BlockSpec((TB, Ho, Wo, Cp), lambda b: (b, 0, 0, 0)),
        compiler_params=pltpu.CompilerParams(
            dimension_semantics=("parallel",),
            vmem_limit_bytes=VMEM_LIMIT),
    )(y, scale, shift)


def pool_fc_head(y, scale, shift, w1p, w2p):
    """Pass 2 for the LAST conv layer, fused with avg_pool2d + the whole FC head.

    BN+ReLU is applied on the fly, per-image spatial means accumulate into a VMEM-
    resident [B, Cp] scratch (the last normalized activation never touches HBM), and
    the tiny Linear+BN1d+ReLU+Linear+BN1d head runs on the final grid step.
    """
    B, Ho, Wo, Cp = y.shape
    Op = w2p.shape[1]
    isz = y.dtype.itemsize
    per_img = 2 * Ho * Wo * Cp * isz + Cp * 4
    fixed = 2 * (Cp * Op + Op * Op) * 4 + 2 * B * Op * 4 + 4 * 2 * Cp * 4
    TB = _pick_batch_tile(B, per_img, fixed)
    nB = B // TB

    def kernel(y_ref, s_ref, t_ref, w1_ref, w2_ref, o_ref, pooled_ref):
        b = pl.program_id(0)
        z = jnp.maximum(y_ref[...].astype(jnp.float32) * s_ref[...] + t_ref[...], 0.0)
        pooled = jnp.mean(z, axis=(1, 2))                      # (TB, Cp)
        if nB == 1:
            pooled_ref[...] = pooled
        else:
            pooled_ref[pl.ds(pl.multiple_of(b * TB, TB), TB), :] = pooled

        @pl.when(b == nB - 1)
        def _():
            h = jnp.dot(pooled_ref[...], w1_ref[...], preferred_element_type=jnp.float32)
            h = jnp.maximum(_bn1d_train(h), 0.0)
            h = jnp.dot(h, w2_ref[...], preferred_element_type=jnp.float32)
            o_ref[...] = _bn1d_train(h)

    return pl.pallas_call(
        kernel,
        out_shape=jax.ShapeDtypeStruct((B, Op), jnp.float32),
        grid=(nB,),
        in_specs=[pl.BlockSpec((TB, Ho, Wo, Cp), lambda b: (b, 0, 0, 0)),
                  pl.BlockSpec((1, Cp), lambda b: (0, 0)),
                  pl.BlockSpec((1, Cp), lambda b: (0, 0)),
                  pl.BlockSpec((Cp, Op), lambda b: (0, 0)),
                  pl.BlockSpec((Op, Op), lambda b: (0, 0))],
        out_specs=pl.BlockSpec((B, Op), lambda b: (0, 0)),
        scratch_shapes=[pltpu.VMEM((B, Cp), jnp.float32)],
        compiler_params=pltpu.CompilerParams(
            dimension_semantics=("arbitrary",),
            vmem_limit_bytes=VMEM_LIMIT),
    )(y, scale, shift, w1p, w2p)


# --------------------------- parameters --------------------------------------

def init_params(key, in_dim, out_dim, n_proj_conv, hidden_dim):
    """Reference (PyTorch-layout) parameters."""
    conv_params = []
    last = in_dim
    layer_specs = [(3, 1, 1)] * n_proj_conv + [(4, 2, 1)]
    for (k, s, p) in layer_specs:
        cout = hidden_dim
        key, k1, k2, k3, k4 = jax.random.split(key, 5)
        w = 0.1 * jax.random.normal(k1, (cout, last, k, k), jnp.float32)   # OIHW
        b = 0.1 * jax.random.normal(k2, (cout,), jnp.float32)
        gamma = 1.0 + 0.1 * jax.random.normal(k3, (cout,), jnp.float32)
        beta = 0.1 * jax.random.normal(k4, (cout,), jnp.float32)
        conv_params.append(dict(k=k, stride=s, pad=p, w=w, b=b, gamma=gamma, beta=beta))
        last = cout
    key, k1, k2, k3, k4 = jax.random.split(key, 5)
    fw1 = 0.1 * jax.random.normal(k1, (out_dim, hidden_dim), jnp.float32)
    fb1 = 0.1 * jax.random.normal(k2, (out_dim,), jnp.float32)
    fw2 = 0.1 * jax.random.normal(k3, (out_dim, out_dim), jnp.float32)
    fb2 = 0.1 * jax.random.normal(k4, (out_dim,), jnp.float32)
    return conv_params, dict(w1=fw1, b1=fb1, w2=fw2, b2=fb2)


def make_kernel_params(conv_params, fc_params, compute_dtype):
    """Kernel-layout weights: tap layout, channel-padded, pre-cast ONCE (perf fix).

    The input-channel dim of every weight after the first is zero-padded to the
    previous layer's lane-padded width, so the channel-padded activation can be fed
    straight through without per-layer slicing; conv/fc biases are dropped (they
    cancel under training-mode BatchNorm).
    """
    kconv = []
    cin_feed = conv_params[0]["w"].shape[1]
    for p in conv_params:
        cout, cin, k, _ = p["w"].shape
        s = p["stride"]
        cp = _round_up(max(cout, LANE), LANE)
        w_hwio = jnp.transpose(p["w"], (2, 3, 1, 0))                   # [k,k,cin,cout]
        w_hwio = jnp.pad(w_hwio, ((0, 0), (0, 0),
                                  (0, cin_feed - cin), (0, cp - cout)))
        if s == 1:
            wt = w_hwio[:, None]                                       # [k,1,k,Cf,Cp]
        else:                                                          # 4x4 / stride 2
            wt = w_hwio.reshape(2, 2, 2, 2, cin_feed, cp)              # (p,q,a,r,Cf,Cp)
            wt = wt.reshape(2, 2, 2, 2 * cin_feed, cp)                 # merge (r,Cf)
        kconv.append(dict(
            k=k, stride=s, pad=p["pad"], cout=cout, cp=cp,
            wt=wt.astype(compute_dtype),
            gamma_p=jnp.pad(p["gamma"], (0, cp - cout)).astype(jnp.float32),
            beta_p=jnp.pad(p["beta"], (0, cp - cout)).astype(jnp.float32)))
        cin_feed = cp
    out_dim, hidden = fc_params["w1"].shape
    cp_last = kconv[-1]["cp"]
    op = _round_up(max(out_dim, LANE), LANE)
    w1p = jnp.zeros((cp_last, op), jnp.float32).at[:hidden, :out_dim].set(fc_params["w1"].T)
    w2p = jnp.zeros((op, op), jnp.float32).at[:out_dim, :out_dim].set(fc_params["w2"].T)
    return dict(conv=kconv, w1p=w1p, w2p=w2p, out_dim=out_dim)


# --------------------------- forward ------------------------------------------

def forward(x_nchw, kparams, compute_dtype=jnp.float32):
    # Single layout change: PyTorch NCHW -> NHWC, kept NHWC for the whole network.
    x = jnp.transpose(x_nchw, (0, 2, 3, 1)).astype(compute_dtype)
    convs = kparams["conv"]
    out = None
    for li, kp in enumerate(convs):
        y, ssum, ssq = conv_pass1(x, kp, compute_dtype)
        B, Ho, Wo, _ = y.shape
        M = B * Ho * Wo
        mean = ssum / M
        var = jnp.maximum(ssq / M - mean * mean, 0.0)      # biased one-pass variance
        scale = kp["gamma_p"][None, :] * jax.lax.rsqrt(var + EPS)
        shift = kp["beta_p"][None, :] - mean * scale       # folded BN affine
        if li + 1 < len(convs):
            # Padded channels stay exactly 0 (gamma_p/beta_p padded with 0) and the
            # next layer's weight has zero rows for them, so no channel slicing needed.
            x = bn_relu(y, scale, shift, compute_dtype)
        else:
            out = pool_fc_head(y, scale, shift, kparams["w1p"], kparams["w2p"])
    return out[:, :kparams["out_dim"]]


# --------------------------- pure-JAX reference --------------------------------

def reference(x, conv_params, fc_params):
    for p in conv_params:
        y = jax.lax.conv_general_dilated(
            x, p["w"], window_strides=(p["stride"],) * 2,
            padding=[(p["pad"], p["pad"])] * 2,
            dimension_numbers=("NCHW", "OIHW", "NCHW"),
            precision=jax.lax.Precision.HIGHEST)
        y = y + p["b"][None, :, None, None]
        mean = jnp.mean(y, axis=(0, 2, 3), keepdims=True)
        var = jnp.mean(jnp.square(y - mean), axis=(0, 2, 3), keepdims=True)
        y = (y - mean) * jax.lax.rsqrt(var + EPS)
        y = y * p["gamma"][None, :, None, None] + p["beta"][None, :, None, None]
        x = jnp.maximum(y, 0.0)
    pooled = jnp.mean(x, axis=(2, 3))

    def bn1d(h):
        m = jnp.mean(h, axis=0, keepdims=True)
        v = jnp.mean(jnp.square(h - m), axis=0, keepdims=True)
        return (h - m) * jax.lax.rsqrt(v + EPS)

    h = jnp.dot(pooled, fc_params["w1"].T, precision=jax.lax.Precision.HIGHEST) + fc_params["b1"]
    h = jnp.maximum(bn1d(h), 0.0)
    h = jnp.dot(h, fc_params["w2"].T, precision=jax.lax.Precision.HIGHEST) + fc_params["b2"]
    return bn1d(h)


if __name__ == "__main__":
    in_dim, out_dim, n_proj_conv, hidden_dim = 4, 16, 1, 32
    B, H = 2, 16
    key = jax.random.PRNGKey(0)
    key, kx, kp = jax.random.split(key, 3)
    x = jax.random.normal(kx, (B, in_dim, H, H), jnp.float32)          # NCHW, as PyTorch
    conv_params, fc_params = init_params(kp, in_dim, out_dim, n_proj_conv, hidden_dim)

    # Checked path: f32 MXU inputs (closest to PyTorch f32 numerics).
    kparams_f32 = make_kernel_params(conv_params, fc_params, jnp.float32)
    with jax.default_matmul_precision("highest"):
        out = jax.block_until_ready(forward(x, kparams_f32, compute_dtype=jnp.float32))
    ref = reference(x, conv_params, fc_params)
    assert out.shape == (B, out_dim)
    assert bool(jnp.all(jnp.isfinite(out)))
    assert bool(jnp.allclose(out, ref, atol=2e-2, rtol=2e-2)), \
        float(jnp.max(jnp.abs(out - ref)))

    # bf16 MXU path (per perf review: MXU-native, halves activation DMA bytes).  Only
    # shape / finiteness is asserted: the 2-sample BatchNorm1d head amplifies rounding
    # too much for a tight elementwise comparison at these toy shapes.
    kparams_bf16 = make_kernel_params(conv_params, fc_params, jnp.bfloat16)
    out_bf16 = jax.block_until_ready(forward(x, kparams_bf16, compute_dtype=jnp.bfloat16))
    assert out_bf16.shape == (B, out_dim)
    assert bool(jnp.all(jnp.isfinite(out_bf16)))

    print("KERNEL_OK")
</pallas_src>

<mosaic_0001>
module attributes {stable_mosaic.version = 11 : i64} {
  func.func @kernel(%arg0: i32, %arg1: i32, %arg2: memref<2x18x1x18x4xf32, #tpu.memory_space<vmem>>, %arg3: memref<1x1x3x4x128xf32, #tpu.memory_space<vmem>>, %arg4: memref<2x16x16x128xf32, #tpu.memory_space<vmem>>, %arg5: memref<1x128xf32, #tpu.memory_space<vmem>>, %arg6: memref<1x128xf32, #tpu.memory_space<vmem>>, %arg7: memref<512x128xf32, #tpu.memory_space<vmem>>) attributes {dimension_semantics = [#tpu.dimension_semantics<arbitrary>, #tpu.dimension_semantics<arbitrary>], iteration_bounds = array<i64: 1, 3>, scalar_prefetch = 0 : i64, scratch_operands = 1 : i64, tpu.core_type = #tpu.core_type<tc>, window_params = [{transform_indices = @transform_0, window_bounds = array<i64: 2, 18, 1, 18, 4>}, {transform_indices = @transform_1, window_bounds = array<i64: 1, 1, 3, 4, 128>}, {transform_indices = @transform_2, window_bounds = array<i64: 2, 16, 16, 128>}, {pipeline_mode = #tpu.pipeline_mode<synchronous>, transform_indices = @transform_3, window_bounds = array<i64: 1, 128>}, {pipeline_mode = #tpu.pipeline_mode<synchronous>, transform_indices = @transform_4, window_bounds = array<i64: 1, 128>}]} {
    %c0_i32 = arith.constant 0 : i32
    %0 = arith.cmpi eq, %arg0, %c0_i32 : i32
    %c0_i32_0 = arith.constant 0 : i32
    %1 = arith.cmpi eq, %arg1, %c0_i32_0 : i32
    %2 = arith.andi %0, %1 : i1
    %3 = arith.extui %2 : i1 to i32
    %c0_i32_1 = arith.constant 0 : i32
    %4 = arith.cmpi ne, %3, %c0_i32_1 : i32
    scf.if %4 {
      %cst_35 = arith.constant 0.000000e+00 : f32
      %37 = vector.broadcast %cst_35 : f32 to vector<1x128xf32>
      %c0_36 = arith.constant 0 : index
      %c0_37 = arith.constant 0 : index
      %38 = vector.load %arg5[%c0_36, %c0_37] : memref<1x128xf32, #tpu.memory_space<vmem>>, vector<1x128xf32>
      tpu.vector_store %arg5[%c0_36, %c0_37], %37 {strides = array<i32>} : memref<1x128xf32, #tpu.memory_space<vmem>>, vector<1x128xf32>,
      %cst_38 = arith.constant 0.000000e+00 : f32
      %39 = vector.broadcast %cst_38 : f32 to vector<1x128xf32>
      %c0_39 = arith.constant 0 : index
      %c0_40 = arith.constant 0 : index
      %40 = vector.load %arg6[%c0_39, %c0_40] : memref<1x128xf32, #tpu.memory_space<vmem>>, vector<1x128xf32>
      tpu.vector_store %arg6[%c0_39, %c0_40], %39 {strides = array<i32>} : memref<1x128xf32, #tpu.memory_space<vmem>>, vector<1x128xf32>,
    } else {
    }
    %c0_i32_2 = arith.constant 0 : i32
    %5 = arith.cmpi eq, %arg1, %c0_i32_2 : i32
    %6 = arith.extui %5 : i1 to i32
    %c0_i32_3 = arith.constant 0 : i32
    %7 = arith.cmpi ne, %6, %c0_i32_3 : i32
    scf.if %7 {
      %cst_35 = arith.constant 0.000000e+00 : f32
      %37 = vector.broadcast %cst_35 : f32 to vector<512x128xf32>
      %c0_36 = arith.constant 0 : index
      %c0_37 = arith.constant 0 : index
      %38 = vector.load %arg7[%c0_36, %c0_37] : memref<512x128xf32, #tpu.memory_space<vmem>>, vector<512x128xf32>
      tpu.vector_store %arg7[%c0_36, %c0_37], %37 {strides = array<i32>} : memref<512x128xf32, #tpu.memory_space<vmem>>, vector<512x128xf32>,
    } else {
    }
    %c0 = arith.constant 0 : index
    %8 = arith.index_cast %arg1 : i32 to index
    %c0_4 = arith.constant 0 : index
    %c0_5 = arith.constant 0 : index
    %c0_6 = arith.constant 0 : index
    %9 = vector.load %arg2[%c0, %8, %c0_4, %c0_5, %c0_6] : memref<2x18x1x18x4xf32, #tpu.memory_space<vmem>>, vector<2x16x1x16x4xf32>
    %10 = vector.shape_cast %9 : vector<2x16x1x16x4xf32> to vector<2x16x16x4xf32>
    %11 = vector.shape_cast %10 : vector<2x16x16x4xf32> to vector<512x4xf32>
    %c0_7 = arith.constant 0 : index
    %c0_8 = arith.constant 0 : index
    %c0_9 = arith.constant 0 : index
    %c0_10 = arith.constant 0 : index
    %c0_11 = arith.constant 0 : index
    %12 = vector.load %arg3[%c0_7, %c0_8, %c0_9, %c0_10, %c0_11] : memref<1x1x3x4x128xf32, #tpu.memory_space<vmem>>, vector<1x1x1x4x128xf32>
    %13 = vector.shape_cast %12 : vector<1x1x1x4x128xf32> to vector<4x128xf32>
    %cst = arith.constant dense<0.000000e+00> : vector<512x128xf32>
    %14 = tpu.matmul %11, %13, %cst {dimension_numbers = #tpu.dot_dimension_numbers<[1], [0], [0], [1], [0, 0, 1, 1], [], []>, precision = #tpu.contract_precision<fp32>} : vector<512x4xf32>, vector<4x128xf32>, vector<512x128xf32> -> vector<512x128xf32>
    %c0_12 = arith.constant 0 : index
    %15 = arith.index_cast %arg1 : i32 to index
    %c0_13 = arith.constant 0 : index
    %c1 = arith.constant 1 : index
    %c0_14 = arith.constant 0 : index
    %16 = vector.load %arg2[%c0_12, %15, %c0_13, %c1, %c0_14] : memref<2x18x1x18x4xf32, #tpu.memory_space<vmem>>, vector<2x16x1x16x4xf32>
    %17 = vector.shape_cast %16 : vector<2x16x1x16x4xf32> to vector<2x16x16x4xf32>
    %18 = vector.shape_cast %17 : vector<2x16x16x4xf32> to vector<512x4xf32>
    %c0_15 = arith.constant 0 : index
    %c0_16 = arith.constant 0 : index
    %c1_17 = arith.constant 1 : index
    %c0_18 = arith.constant 0 : index
    %c0_19 = arith.constant 0 : index
    %19 = vector.load %arg3[%c0_15, %c0_16, %c1_17, %c0_18, %c0_19] : memref<1x1x3x4x128xf32, #tpu.memory_space<vmem>>, vector<1x1x1x4x128xf32>
    %20 = vector.shape_cast %19 : vector<1x1x1x4x128xf32> to vector<4x128xf32>
    %cst_20 = arith.constant dense<0.000000e+00> : vector<512x128xf32>
    %21 = tpu.matmul %18, %20, %cst_20 {dimension_numbers = #tpu.dot_dimension_numbers<[1], [0], [0], [1], [0, 0, 1, 1], [], []>, precision = #tpu.contract_precision<fp32>} : vector<512x4xf32>, vector<4x128xf32>, vector<512x128xf32> -> vector<512x128xf32>
    %22 = arith.addf %14, %21 : vector<512x128xf32>
    %c0_21 = arith.constant 0 : index
    %23 = arith.index_cast %arg1 : i32 to index
    %c0_22 = arith.constant 0 : index
    %c2 = arith.constant 2 : index
    %c0_23 = arith.constant 0 : index
    %24 = vector.load %arg2[%c0_21, %23, %c0_22, %c2, %c0_23] : memref<2x18x1x18x4xf32, #tpu.memory_space<vmem>>, vector<2x16x1x16x4xf32>
    %25 = vector.shape_cast %24 : vector<2x16x1x16x4xf32> to vector<2x16x16x4xf32>
    %26 = vector.shape_cast %25 : vector<2x16x16x4xf32> to vector<512x4xf32>
    %c0_24 = arith.constant 0 : index
    %c0_25 = arith.constant 0 : index
    %c2_26 = arith.constant 2 : index
    %c0_27 = arith.constant 0 : index
    %c0_28 = arith.constant 0 : index
    %27 = vector.load %arg3[%c0_24, %c0_25, %c2_26, %c0_27, %c0_28] : memref<1x1x3x4x128xf32, #tpu.memory_space<vmem>>, vector<1x1x1x4x128xf32>
    %28 = vector.shape_cast %27 : vector<1x1x1x4x128xf32> to vector<4x128xf32>
    %cst_29 = arith.constant dense<0.000000e+00> : vector<512x128xf32>
    %29 = tpu.matmul %26, %28, %cst_29 {dimension_numbers = #tpu.dot_dimension_numbers<[1], [0], [0], [1], [0, 0, 1, 1], [], []>, precision = #tpu.contract_precision<fp32>} : vector<512x4xf32>, vector<4x128xf32>, vector<512x128xf32> -> vector<512x128xf32>
    %30 = arith.addf %22, %29 : vector<512x128xf32>
    %c0_30 = arith.constant 0 : index
    %c0_31 = arith.constant 0 : index
    %31 = vector.load %arg7[%c0_30, %c0_31] : memref<512x128xf32, #tpu.memory_space<vmem>>, vector<512x128xf32>
    %32 = arith.addf %31, %30 : vector<512x128xf32>
    %c0_32 = arith.constant 0 : index
    %c0_33 = arith.constant 0 : index
    %33 = vector.load %arg7[%c0_32, %c0_33] : memref<512x128xf32, #tpu.memory_space<vmem>>, vector<512x128xf32>
    tpu.vector_store %arg7[%c0_32, %c0_33], %32 {strides = array<i32>} : memref<512x128xf32, #tpu.memory_space<vmem>>, vector<512x128xf32>,
    %c2_i32 = arith.constant 2 : i32
    %34 = arith.cmpi eq, %arg1, %c2_i32 : i32
    %35 = arith.extui %34 : i1 to i32
    %c0_i32_34 = arith.constant 0 : i32
    %36 = arith.cmpi ne, %35, %c0_i32_34 : i32
    scf.if %36 {
      %c0_35 = arith.constant 0 : index
      %c0_36 = arith.constant 0 : index
      %37 = vector.load %arg7[%c0_35, %c0_36] : memref<512x128xf32, #tpu.memory_space<vmem>>, vector<512x128xf32>
      %38 = vector.shape_cast %37 : vector<512x128xf32> to vector<2x16x16x128xf32>
      %c0_37 = arith.constant 0 : index
      %c0_38 = arith.constant 0 : index
      %c0_39 = arith.constant 0 : index
      %c0_40 = arith.constant 0 : index
      %39 = vector.load %arg4[%c0_37, %c0_38, %c0_39, %c0_40] : memref<2x16x16x128xf32, #tpu.memory_space<vmem>>, vector<2x16x16x128xf32>
      tpu.vector_store %arg4[%c0_37, %c0_38, %c0_39, %c0_40], %38 {strides = array<i32>} : memref<2x16x16x128xf32, #tpu.memory_space<vmem>>, vector<2x16x16x128xf32>,
      %c0_41 = arith.constant 0 : index
      %c0_42 = arith.constant 0 : index
      %40 = vector.load %arg5[%c0_41, %c0_42] : memref<1x128xf32, #tpu.memory_space<vmem>>, vector<1x128xf32>
      %cst_43 = arith.constant dense<0.000000e+00> : vector<128xf32>
      %41 = vector.multi_reduction <add>, %37, %cst_43 [0] : vector<512x128xf32> to vector<128xf32>
      %42 = vector.shape_cast %41 : vector<128xf32> to vector<1x128xf32>
      %43 = arith.addf %40, %42 : vector<1x128xf32>
      %c0_44 = arith.constant 0 : index
      %c0_45 = arith.constant 0 : index
      %44 = vector.load %arg5[%c0_44, %c0_45] : memref<1x128xf32, #tpu.memory_space<vmem>>, vector<1x128xf32>
      tpu.vector_store %arg5[%c0_44, %c0_45], %43 {strides = array<i32>} : memref<1x128xf32, #tpu.memory_space<vmem>>, vector<1x128xf32>,
      %c0_46 = arith.constant 0 : index
      %c0_47 = arith.constant 0 : index
      %45 = vector.load %arg6[%c0_46, %c0_47] : memref<1x128xf32, #tpu.memory_space<vmem>>, vector<1x128xf32>
      %46 = arith.mulf %37, %37 : vector<512x128xf32>
      %cst_48 = arith.constant dense<0.000000e+00> : vector<128xf32>
      %47 = vector.multi_reduction <add>, %46, %cst_48 [0] : vector<512x128xf32> to vector<128xf32>
      %48 = vector.shape_cast %47 : vector<128xf32> to vector<1x128xf32>
      %49 = arith.addf %45, %48 : vector<1x128xf32>
      %c0_49 = arith.constant 0 : index
      %c0_50 = arith.constant 0 : index
      %50 = vector.load %arg6[%c0_49, %c0_50] : memref<1x128xf32, #tpu.memory_space<vmem>>, vector<1x128xf32>
      tpu.vector_store %arg6[%c0_49, %c0_50], %49 {strides = array<i32>} : memref<1x128xf32, #tpu.memory_space<vmem>>, vector<1x128xf32>,
    } else {
    }
    return
  }
  func.func @transform_0(%arg0: i32, %arg1: i32) -> (i32, i32, i32, i32, i32) {
    %c0_i32 = arith.constant 0 : i32
    %c0_i32_0 = arith.constant 0 : i32
    %c0_i32_1 = arith.constant 0 : i32
    %c0_i32_2 = arith.constant 0 : i32
    %c0_i32_3 = arith.constant 0 : i32
    return %arg0, %c0_i32, %c0_i32_0, %c0_i32_1, %c0_i32_2 : i32, i32, i32, i32, i32
  }
  func.func @transform_1(%arg0: i32, %arg1: i32) -> (i32, i32, i32, i32, i32) {
    %c0_i32 = arith.constant 0 : i32
    %c0_i32_0 = arith.constant 0 : i32
    %c0_i32_1 = arith.constant 0 : i32
    %c0_i32_2 = arith.constant 0 : i32
    %c0_i32_3 = arith.constant 0 : i32
    return %arg1, %c0_i32, %c0_i32_0, %c0_i32_1, %c0_i32_2 : i32, i32, i32, i32, i32
  }
  func.func @transform_2(%arg0: i32, %arg1: i32) -> (i32, i32, i32, i32) {
    %c0_i32 = arith.constant 0 : i32
    %c0_i32_0 = arith.constant 0 : i32
    %c0_i32_1 = arith.constant 0 : i32
    %c0_i32_2 = arith.constant 0 : i32
    return %arg0, %c0_i32, %c0_i32_0, %c0_i32_1 : i32, i32, i32, i32
  }
  func.func @transform_3(%arg0: i32, %arg1: i32) -> (i32, i32) {
    %c0_i32 = arith.constant 0 : i32
    %c0_i32_0 = arith.constant 0 : i32
    %c0_i32_1 = arith.constant 0 : i32
    return %c0_i32, %c0_i32_0 : i32, i32
  }
  func.func @transform_4(%arg0: i32, %arg1: i32) -> (i32, i32) {
    %c0_i32 = arith.constant 0 : i32
    %c0_i32_0 = arith.constant 0 : i32
    %c0_i32_1 = arith.constant 0 : i32
    return %c0_i32, %c0_i32_0 : i32, i32
  }
}

</mosaic_0001>

<bundles_post_ra>
// kernel: tpu_custom_call.1
= control target key start
LH: loop header
LB: loop body
LE: loop exit
PB: predicated region body
PF: predicated region fallthrough
CT: control target
= control target key end

     0   :  { %10 = vsyncpa [#allocation4], 0  ;;  %s12623_s0 = inlined_call_operand.vmem [shape: f32[2,18,1,18,4], index: 0, kind: input, shape index: {}]   ;;  %s12624_s1 = inlined_call_operand.vmem [shape: f32[3,1,3,4,128], index: 1, kind: input, shape index: {}]   ;;  %s12625_s2 = inlined_call_operand.hbm [shape: f32[2,16,16,128], index: 2, kind: output, shape index: {0}]   ;;  %s12626_s3 = inlined_call_operand.hbm [shape: f32[1,128], index: 3, kind: output, shape index: {1}]   ;;  %s12627_s4 = inlined_call_operand.hbm [shape: f32[1,128], index: 4, kind: output, shape index: {2}]  }
   0x1   :  { %11 = vsyncpa [#allocation6], 0  ;;  %s8326_s15 = smov 0   ;;  %s8328_s16 = smov 0  }
   0x2   :  { %s8330_s17 = smov 0  }
   0x3 LB: > { %s8106_s18 = sadd.s32 4294967295, %s8292_s17   ;;  %s26_s19 = sadd.s32 1, %s8288_s16  ;;  %s8292_s17 = sphi %s8330_s17, %s17_s17   ;;  %s8288_s16 = sphi %s8328_s16, %s14414_s16   ;;  %s8284_s15 = sphi %s8326_s15, %s14413_s15  }
   0x4   : > { %p27_p0 = scmp.ge.s32.totalorder %s26_s19, 3  ;;  %p8110_p1 = scmp.ge.s32.totalorder %s8292_s17, 1 }
   0x5   : > { %p183_p2 = scmp.lt.s32.totalorder %s8292_s17, 4 }
   0x6   : > { %s14416_s19 = smov (%p27_p0, %s26_s19), 0 }
   0x7   : > { %p184_p3 = pnand %p8110_p1, %p183_p2 }
   0x9   : > { %187 = sbr.rel (%p184_p3) target bundleno = 2709 (0xa95), region = 28 }
   0xe   : > { %p217_p4 = scmp.lt.s32.totalorder %s8284_s15, 2  ;;  %p224_p5 = scmp.eq.s32.totalorder %s8284_s15, 0 }
   0xf   : > { %v8294_v0 = vmov (%p224_p5), 0.0  }
  0x10   : > { %s218_s20 = scalar_select %p217_p4, %s8284_s15, 2  ;;  %229 = vst [vmem:[#allocation5] sm:$0x1] (%p224_p5), %v8294_v0 }
  0x11   : > { %228 = sbr.rel (!%p224_p5) target bundleno = 22 (0x16), region = 32  ;;  %230 = vst [vmem:[#allocation7] sm:$0x1] (%p224_p5), %v8294_v0 }
  0x12   : > { %s8128_s21 = smul.u32 12, %s218_s20 }
  0x14   : > { %s8353_s24 = scalar_lea.vmem %s12624_s1, %s8128_s21 }
  0x16 PF: > { %p8113_p6 = scmp.ne.s32.totalorder %s8284_s15, 0 }
  0x18   : > { %233 = sbr.rel (%p8113_p6) target bundleno = 94 (0x5e), region = 36 }
  0x1d   : > { %v8295_v1 = vmov 0.0  }
  0x1e   : > { %234 = vst [vmem:[#allocation2 + $0xb0] sm:$0xff] %v8295_v1 }
  0x1f   : > { %235 = vst [vmem:[#allocation2 + $0x1b0] sm:$0xff] %v8295_v1 }
  0x20   : > { %236 = vst [vmem:[#allocation2 + $0xd8] sm:$0xff] %v8295_v1 }
  0x21   : > { %237 = vst [vmem:[#allocation2 + $0x18] sm:$0xff] %v8295_v1 }
  0x22   : > { %238 = vst [vmem:[#allocation2 + $0x50] sm:$0xff] %v8295_v1 }
  0x23   : > { %239 = vst [vmem:[#allocation2 + $0x168] sm:$0xff] %v8295_v1 }
  0x24   : > { %240 = vst [vmem:[#allocation2 + $0x130] sm:$0xff] %v8295_v1 }
  0x25   : > { %241 = vst [vmem:[#allocation2 + $0x48] sm:$0xff] %v8295_v1 }
  0x26   : > { %242 = vst [vmem:[#allocation2 + $0x180] sm:$0xff] %v8295_v1 }
  0x27   : > { %243 = vst [vmem:[#allocation2 + $0x110] sm:$0xff] %v8295_v1 }
  0x28   : > { %244 = vst [vmem:[#allocation2 + $0x118] sm:$0xff] %v8295_v1 }
  0x29   : > { %245 = vst [vmem:[#allocation2 + $0x98] sm:$0xff] %v8295_v1 }
  0x2a   : > { %246 = vst [vmem:[#allocation2 + $0x120] sm:$0xff] %v8295_v1 }
  0x2b   : > { %247 = vst [vmem:[#allocation2 + $0x150] sm:$0xff] %v8295_v1 }
  0x2c   : > { %248 = vst [vmem:[#allocation2 + $0x108] sm:$0xff] %v8295_v1 }
  0x2d   : > { %249 = vst [vmem:[#allocation2 + $0x60] sm:$0xff] %v8295_v1 }
  0x2e   : > { %250 = vst [vmem:[#allocation2 + $0xe0] sm:$0xff] %v8295_v1 }
  0x2f   : > { %251 = vst [vmem:[#allocation2 + $0x188] sm:$0xff] %v8295_v1 }
  0x30   : > { %252 = vst [vmem:[#allocation2 + $0x138] sm:$0xff] %v8295_v1 }
  0x31   : > { %253 = vst [vmem:[#allocation2 + $0x140] sm:$0xff] %v8295_v1 }
  0x32   : > { %254 = vst [vmem:[#allocation2 + $0x80] sm:$0xff] %v8295_v1 }
  0x33   : > { %255 = vst [vmem:[#allocation2 + $0x1a8] sm:$0xff] %v8295_v1 }
  0x34   : > { %256 = vst [vmem:[#allocation2 + $0x1b8] sm:$0xff] %v8295_v1 }
  0x35   : > { %257 = vst [vmem:[#allocation2 + $0x28] sm:$0xff] %v8295_v1 }
  0x36   : > { %258 = vst [vmem:[#allocation2 + $0x1e8] sm:$0xff] %v8295_v1 }
  0x37   : > { %259 = vst [vmem:[#allocation2 + $0xf8] sm:$0xff] %v8295_v1 }
  0x38   : > { %260 = vst [vmem:[#allocation2 + $0x160] sm:$0xff] %v8295_v1 }
  0x39   : > { %261 = vst [vmem:[#allocation2 + $0x30] sm:$0xff] %v8295_v1 }
  0x3a   : > { %262 = vst [vmem:[#allocation2 + $0x1e0] sm:$0xff] %v8295_v1 }
  0x3b   : > { %263 = vst [vmem:[#allocation2] sm:$0xff] %v8295_v1 }
  0x3c   : > { %264 = vst [vmem:[#allocation2 + $0xf0] sm:$0xff] %v8295_v1 }
  0x3d   : > { %265 = vst [vmem:[#allocation2 + $0x8] sm:$0xff] %v8295_v1 }
  0x3e   : > { %266 = vst [vmem:[#allocation2 + $0x148] sm:$0xff] %v8295_v1 }
  0x3f   : > { %267 = vst [vmem:[#allocation2 + $0x1d0] sm:$0xff] %v8295_v1 }
  0x40   : > { %268 = vst [vmem:[#allocation2 + $0x100] sm:$0xff] %v8295_v1 }
  0x41   : > { %269 = vst [vmem:[#allocation2 + $0xc8] sm:$0xff] %v8295_v1 }
  0x42   : > { %270 = vst [vmem:[#allocation2 + $0x40] sm:$0xff] %v8295_v1 }
  0x43   : > { %271 = vst [vmem:[#allocation2 + $0x1f8] sm:$0xff] %v8295_v1 }
  0x44   : > { %272 = vst [vmem:[#allocation2 + $0x20] sm:$0xff] %v8295_v1 }
  0x45   : > { %273 = vst [vmem:[#allocation2 + $0x128] sm:$0xff] %v8295_v1 }
  0x46   : > { %274 = vst [vmem:[#allocation2 + $0x1a0] sm:$0xff] %v8295_v1 }
  0x47   : > { %275 = vst [vmem:[#allocation2 + $0x1f0] sm:$0xff] %v8295_v1 }
  0x48   : > { %276 = vst [vmem:[#allocation2 + $0xe8] sm:$0xff] %v8295_v1 }
  0x49   : > { %277 = vst [vmem:[#allocation2 + $0x78] sm:$0xff] %v8295_v1 }
  0x4a   : > { %278 = vst [vmem:[#allocation2 + $0x70] sm:$0xff] %v8295_v1 }
  0x4b   : > { %279 = vst [vmem:[#allocation2 + $0x90] sm:$0xff] %v8295_v1 }
  0x4c   : > { %280 = vst [vmem:[#allocation2 + $0x1d8] sm:$0xff] %v8295_v1 }
  0x4d   : > { %281 = vst [vmem:[#allocation2 + $0xd0] sm:$0xff] %v8295_v1 }
  0x4e   : > { %282 = vst [vmem:[#allocation2 + $0xb8] sm:$0xff] %v8295_v1 }
  0x4f   : > { %283 = vst [vmem:[#allocation2 + $0x88] sm:$0xff] %v8295_v1 }
  0x50   : > { %284 = vst [vmem:[#allocation2 + $0xa8] sm:$0xff] %v8295_v1 }
  0x51   : > { %285 = vst [vmem:[#allocation2 + $0x1c8] sm:$0xff] %v8295_v1 }
  0x52   : > { %286 = vst [vmem:[#allocation2 + $0x170] sm:$0xff] %v8295_v1 }
  0x53   : > { %287 = vst [vmem:[#allocation2 + $0x178] sm:$0xff] %v8295_v1 }
  0x54   : > { %288 = vst [vmem:[#allocation2 + $0x68] sm:$0xff] %v8295_v1 }
  0x55   : > { %289 = vst [vmem:[#allocation2 + $0x190] sm:$0xff] %v8295_v1 }
  0x56   : > { %290 = vst [vmem:[#allocation2 + $0x198] sm:$0xff] %v8295_v1 }
  0x57   : > { %291 = vst [vmem:[#allocation2 + $0x38] sm:$0xff] %v8295_v1 }
  0x58   : > { %292 = vst [vmem:[#allocation2 + $0xc0] sm:$0xff] %v8295_v1 }
  0x59   : > { %293 = vst [vmem:[#allocation2 + $0x1c0] sm:$0xff] %v8295_v1 }
  0x5a   : > { %294 = vst [vmem:[#allocation2 + $0x158] sm:$0xff] %v8295_v1 }
  0x5b   : > { %295 = vst [vmem:[#allocation2 + $0x10] sm:$0xff] %v8295_v1 }
  0x5c   : > { %296 = vst [vmem:[#allocation2 + $0x58] sm:$0xff] %v8295_v1 }
  0x5d   : > { %297 = vst [vmem:[#allocation2 + $0xa0] sm:$0xff] %v8295_v1 }
  0x5e PF: > { %v8114_v2 = vld [vmem:[%s8353_s24 + $0x4] sm:$0xf]  ;;  %vm624_vm0 = vcmask 1043456   ;;  %s298_s25 = smul.u32 24, %s8284_s15  ;;  %vm431_vm1 = vcmask 31744   ;;  %p8116_p7 = scmp.ne.s32.totalorder %s8284_s15, 2 }
  0x5f   : > { %v626_v3 = vsel %vm624_vm0, %v8114_v2, 0 }
  0x60   : > { %v643_v4 = vand.u32 4294901760, %v626_v3  ;;  %s8426_s28 = scalar_lea.vmem %s12623_s0, %s298_s25 }
  0x61   : > { %v397_v5 = vld [vmem:[%s8426_s28 + $0x1b1] sm:$0xff]  ;;  %v398_v6 = vld [vmem:[%s8426_s28 + $0x1b9] sm:$0xff]  ;;  %v365_v7 = vld [vmem:[%s8426_s28 + $0x1] sm:$0xff] }
  0x62   : > { %8126 = vmatpush.msra.mxu2 %v643_v4  ;;  %v1174_v8 = vsub.f32 %v626_v3, %v643_v4  ;;  %v529_v9 = vsel %vm431_vm1, %v397_v5, 0  ;;  %v532_v10 = vsel %vm431_vm1, %v398_v6, 0  ;;  %644 = vmatpush.msra.mxu0 %v643_v4  ;;  %v433_v11 = vsel %vm431_vm1, %v365_v7, 0  ;;  %v399_v12 = vld [vmem:[%s8426_s28 + $0x1c9] sm:$0xff]  ;;  %v367_v17 = vld [vmem:[%s8426_s28 + $0x19] sm:$0xff]  ;;  %v400_v37 = vld [vmem:[%s8426_s28 + $0x1d1] sm:$0xff] }
  0x63   : > { %v366_v13 = vld [vmem:[%s8426_s28 + $0x9] sm:$0xff]  ;;  %v8436_v14 = vand.u32 4294901760, %v529_v9  ;;  %v8438_v15 = vand.u32 4294901760, %v532_v10  ;;  %v8440_v16 = vand.u32 4294901760, %v433_v11  ;;  %v535_v19 = vsel %vm431_vm1, %v399_v12, 0  ;;  %v368_v40 = vld [vmem:[%s8426_s28 + $0x21] sm:$0xff] }
  0x64   : > { %v1175_v18 = vand.u32 4294901760, %v1174_v8  ;;  %1453 = vmatpush.msrb.mxu2 %v1174_v8  ;;  %v436_v20 = vsel %vm431_vm1, %v366_v13, 0  ;;  %v439_v26 = vsel %vm431_vm1, %v367_v17, 0  ;;  %v8463_v32 = vand.u32 4294901760, %v535_v19  ;;  %v401_v53 = vld [vmem:[%s8426_s28 + $0x1e1] sm:$0xff]  ;;  %v369_v54 = vld [vmem:[%s8426_s28 + $0x31] sm:$0xff] }
  0x65   : > { %13224 = vst [vmem:[#allocation10_spill] sm:$0xff] %v8436_v14  ;;  %v8446_v21 = vsub.f32 %v529_v9, %v8436_v14  ;;  %v8449_v22 = vsub.f32 %v532_v10, %v8438_v15  ;;  %v8452_v23 = vsub.f32 %v433_v11, %v8440_v16  ;;  %v8454_v24 = vand.u32 4294901760, %v436_v20  ;;  %v402_v3 = vld [vmem:[%s8426_s28 + $0x1e9] sm:$0xff] }
  0x66   : > { %13225 = vst [vmem:[#allocation11_spill] sm:$0xff] %v8438_v15  ;;  %v1176_v25 = vsub.f32 %v1174_v8, %v1175_v18  ;;  %2195 = vmatpush.msrb.mxu0 %v1175_v18  ;;  %v8472_v36 = vand.u32 4294901760, %v439_v26  ;;  %v8479_v41 = vsub.f32 %v535_v19, %v8463_v32  ;;  %v538_v44 = vsel %vm431_vm1, %v400_v37, 0 }
  0x67   : > { %13226 = vst [vmem:[#allocation12_spill] sm:$0xff] %v8446_v21  ;;  %v12636_v27 = vand.u32 4294901760, %v8446_v21  ;;  %v12649_v28 = vand.u32 4294901760, %v8452_v23  ;;  %v8460_v29 = vsub.f32 %v436_v20, %v8454_v24  ;;  %v12635_v31 = vand.u32 4294901760, %v8449_v22  ;;  %v403_v20 = vld [vmem:[%s8426_s28 + $0x1f9] sm:$0xff] }
  0x68   : > { %13227 = vst [vmem:[#allocation13_spill] sm:$0xff] %v8449_v22  ;;  %v1177_v30 = vand.u32 4294901760, %v1176_v25  ;;  %v8489_v45 = vsub.f32 %v439_v26, %v8472_v36  ;;  %v442_v46 = vsel %vm431_vm1, %v368_v40, 0  ;;  %v12634_v47 = vand.u32 4294901760, %v8479_v41  ;;  %v371_v25 = vld [vmem:[%s8426_s28 + $0x49] sm:$0xff] }
  0x69   : > { %13228 = vst [vmem:[#allocation14_spill] sm:$0xff] %v8463_v32  ;;  %v904_v33 = vsub.f32 %v8446_v21, %v12636_v27  ;;  %v648_v34 = vsub.f32 %v8452_v23, %v12649_v28  ;;  %v12648_v35 = vand.u32 4294901760, %v8460_v29  ;;  %v912_v42 = vsub.f32 %v8449_v22, %v12635_v31  ;;  %v408_v31 = vld [vmem:[%s8426_s28 + $0x231] sm:$0xff]  ;;  %v418_v21 = vld [vmem:[%s8426_s28 + $0x2a9] sm:$0xff] }
  0x6a   : > { %8127 = vmatpush.msra.mxu3 %v1177_v30  ;;  %1178 = vmatpush.msra.mxu1 %v1177_v30  ;;  %13229 = vst [vmem:[#allocation15_spill] sm:$0xff] %v8479_v41  ;;  %v8493_v48 = vand.u32 4294901760, %v538_v44  ;;  %v12645_v51 = vand.u32 4294901760, %v8489_v45  ;;  %v8496_v52 = vand.u32 4294901760, %v442_v46  ;;  %v920_v55 = vsub.f32 %v8479_v41, %v12634_v47  ;;  %v417_v41 = vld [vmem:[%s8426_s28 + $0x2a1] sm:$0xff] }
  0x6b   : > { %v905_v38 = vand.u32 4294901760, %v904_v33  ;;  %1308 = vmatmul.f32.vlgmr.msra.gmra.mxu3 %v8436_v14  ;;  %v649_v39 = vand.u32 4294901760, %v648_v34  ;;  %1180 = vmatmul.f32.vlgmr.msra.gmra.mxu1 %v8440_v16  ;;  %v656_v43 = vsub.f32 %v8460_v29, %v12648_v35  ;;  %v913_v49 = vand.u32 4294901760, %v912_v42 }
  0x6c   : > { %1791 = vmatpush.msrb.mxu3 %v643_v4  ;;  %2469 = vmatpush.msrb.mxu1 %v643_v4  ;;  %13230 = vst [vmem:[#allocation16_spill] sm:$0xff] %v8493_v48  ;;  %v8506_v56 = vsub.f32 %v538_v44, %v8493_v48  ;;  %v664_v57 = vsub.f32 %v8489_v45, %v12645_v51  ;;  %v541_v59 = vsel %vm431_vm1, %v401_v53, 0  ;;  %v445_v60 = vsel %vm431_vm1, %v369_v54, 0  ;;  %v370_v4 = vld [vmem:[%s8426_s28 + $0x39] sm:$0xff] }
  0x6d   : > { %906 = vmatmul.f32.vlgmr.msra.gmra.mxu2 %v905_v38  ;;  %650 = vmatmul.f32.vlgmr.msra.gmra.mxu0 %v649_v39  ;;  %v657_v50 = vand.u32 4294901760, %v656_v43  ;;  %v8512_v58 = vsub.f32 %v442_v46, %v8496_v52  ;;  %v921_v61 = vand.u32 4294901760, %v920_v55  ;;  %v8517_v0 = vand.u32 4294901760, %v541_v59 }
  0x6e   : > { %13231 = vst [vmem:[#allocation17_spill] sm:$0xff] %v8506_v56  ;;  %v12632_v62 = vand.u32 4294901760, %v8506_v56  ;;  %v665_v63 = vand.u32 4294901760, %v664_v57  ;;  %v8520_v2 = vand.u32 4294901760, %v445_v60  ;;  %v544_v8 = vsel %vm431_vm1, %v402_v3, 0 }
  0x6f   : > { %13232 = vst [vmem:[#allocation18_spill] sm:$0xff] %v8517_v0  ;;  %v12644_v1 = vand.u32 4294901760, %v8512_v58  ;;  %v8530_v6 = vsub.f32 %v541_v59, %v8517_v0  ;;  %v448_v10 = vsel %vm431_vm1, %v370_v4, 0  ;;  %v8540_v12 = vand.u32 4294901760, %v544_v8 }
  0x70   : > { %v928_v5 = vsub.f32 %v8506_v56, %v12632_v62  ;;  %v8537_v9 = vsub.f32 %v445_v60, %v8520_v2  ;;  %v8544_v19 = vand.u32 4294901760, %v448_v10  ;;  %v547_v34 = vsel %vm431_vm1, %v403_v20, 0 }
  0x71   : > { %13233 = vst [vmem:[#allocation19_spill] sm:$0xff] %v8530_v6  ;;  %v672_v7 = vsub.f32 %v8512_v58, %v12644_v1  ;;  %v12631_v13 = vand.u32 4294901760, %v8530_v6  ;;  %v8551_v26 = vsub.f32 %v544_v8, %v8540_v12  ;;  %v451_v38 = vsel %vm431_vm1, %v371_v25, 0  ;;  %v405_v8 = vld [vmem:[%s8426_s28 + $0x211] sm:$0xff] }
  0x72   : > { %v929_v11 = vand.u32 4294901760, %v928_v5  ;;  %13234 = vst [vmem:[#allocation20_spill] sm:$0xff] %v8540_v12  ;;  %v12643_v18 = vand.u32 4294901760, %v8537_v9  ;;  %v8561_v37 = vsub.f32 %v448_v10, %v8544_v19  ;;  %v8565_v40 = vand.u32 4294901760, %v547_v34  ;;  %v373_v10 = vld [vmem:[%s8426_s28 + $0x61] sm:$0xff] }
  0x73   : > { %1312 = vmatmul.f32.gmra.mxu3 %v8438_v15  ;;  %1184 = vmatmul.f32.gmra.mxu1 %v8454_v24  ;;  %v673_v17 = vand.u32 4294901760, %v672_v7  ;;  %13235 = vst [vmem:[#allocation21_spill] sm:$0xff] %v8551_v26  ;;  %v936_v30 = vsub.f32 %v8530_v6, %v12631_v13  ;;  %v12630_v39 = vand.u32 4294901760, %v8551_v26  ;;  %v8568_v46 = vand.u32 4294901760, %v451_v38 }
  0x74   : > { %v680_v33 = vsub.f32 %v8537_v9, %v12643_v18  ;;  %13236 = vst [vmem:[#allocation22_spill] sm:$0xff] %v8565_v40  ;;  %v12641_v44 = vand.u32 4294901760, %v8561_v37  ;;  %v8578_v54 = vsub.f32 %v547_v34, %v8565_v40  ;;  %v553_v25 = vsel %vm431_vm1, %v405_v8, 0 }
  0x75   : > { %914 = vmatmul.f32.gmra.mxu2 %v913_v49  ;;  %658 = vmatmul.f32.gmra.mxu0 %v657_v50  ;;  %v937_v42 = vand.u32 4294901760, %v936_v30  ;;  %v404_v49 = vld [vmem:[%s8426_s28 + $0x201] sm:$0xff]  ;;  %v372_v50 = vld [vmem:[%s8426_s28 + $0x51] sm:$0xff]  ;;  %v944_v53 = vsub.f32 %v8551_v26, %v12630_v39  ;;  %v8584_v57 = vsub.f32 %v451_v38, %v8568_v46  ;;  %v8612_v38 = vand.u32 4294901760, %v553_v25 }
  0x76   : > { %v681_v43 = vand.u32 4294901760, %v680_v33  ;;  %13237 = vst [vmem:[#allocation23_spill] sm:$0xff] %v8578_v54  ;;  %v688_v55 = vsub.f32 %v8561_v37, %v12641_v44  ;;  %v550_v59 = vsel %vm431_vm1, %v404_v49, 0  ;;  %v454_v60 = vsel %vm431_vm1, %v372_v50, 0  ;;  %v409_v44 = vld [vmem:[%s8426_s28 + $0x241] sm:$0xff] }
  0x77   : > { %v8589_v4 = vand.u32 4294901760, %v550_v59  ;;  %v12639_v5 = vand.u32 4294901760, %v8584_v57  ;;  %v8592_v7 = vand.u32 4294901760, %v454_v60  ;;  %v457_v33 = vsel %vm431_vm1, %v373_v10, 0  ;;  %13240 = vst [vmem:[#allocation26_spill] sm:$0xff] %v8612_v38 }
  0x78   : > { %v689_v3 = vand.u32 4294901760, %v688_v55  ;;  %v8616_v50 = vand.u32 4294901760, %v457_v33  ;;  %v374_v55 = vld [vmem:[%s8426_s28 + $0x69] sm:$0xff] }
  0x79   : > { %13238 = vst [vmem:[#allocation24_spill] sm:$0xff] %v8589_v4  ;;  %v696_v20 = vsub.f32 %v8584_v57, %v12639_v5  ;;  %v8609_v30 = vsub.f32 %v454_v60, %v8592_v7  ;;  %v460_v10 = vsel %vm431_vm1, %v374_v55, 0 }
  0x7a   : > { %v8633_v8 = vsub.f32 %v457_v33, %v8616_v50  ;;  %v375_v33 = vld [vmem:[%s8426_s28 + $0x79] sm:$0xff] }
  0x7b   : > { %1316 = vmatmul.f32.gmra.mxu3 %v8463_v32  ;;  %1188 = vmatmul.f32.gmra.mxu1 %v8472_v36  ;;  %v12638_v49 = vand.u32 4294901760, %v8609_v30  ;;  %v463_v13 = vsel %vm431_vm1, %v375_v33, 0 }
  0x7d   : > { %922 = vmatmul.f32.gmra.mxu2 %v921_v61  ;;  %666 = vmatmul.f32.gmra.mxu0 %v665_v63  ;;  %v945_v61 = vand.u32 4294901760, %v944_v53  ;;  %v12629_v63 = vand.u32 4294901760, %v8578_v54  ;;  %v406_v53 = vld [vmem:[%s8426_s28 + $0x219] sm:$0xff] }
  0x83   : > { %1320 = vmatmul.f32.gmra.mxu3 %v8493_v48  ;;  %1192 = vmatmul.f32.gmra.mxu1 %v8496_v52 }
  0x85   : > { %930 = vmatmul.f32.gmra.mxu2 %v929_v11  ;;  %674 = vmatmul.f32.gmra.mxu0 %v673_v17  ;;  %v952_v11 = vsub.f32 %v8578_v54, %v12629_v63  ;;  %v8602_v17 = vsub.f32 %v550_v59, %v8589_v4  ;;  %v8623_v59 = vsub.f32 %v553_v25, %v8612_v38 }
  0x87   : > { %13239 = vst [vmem:[#allocation25_spill] sm:$0xff] %v8602_v17  ;;  %v953_v34 = vand.u32 4294901760, %v952_v11  ;;  %v12633_v11 = vand.u32 4294901760, %v8623_v59 }
  0x88   : > { %13241 = vst [vmem:[#allocation27_spill] sm:$0xff] %v8623_v59 }
  0x89   : > { %v968_v55 = vsub.f32 %v8623_v59, %v12633_v11 }
  0x8b   : > { %1324 = vmatmul.f32.gmra.mxu3 %v8517_v0  ;;  %1196 = vmatmul.f32.gmra.mxu1 %v8520_v2  ;;  %v969_v62 = vand.u32 4294901760, %v968_v55 }
  0x8d   : > { %938 = vmatmul.f32.gmra.mxu2 %v937_v42  ;;  %682 = vmatmul.f32.gmra.mxu0 %v681_v43  ;;  %v12628_v42 = vand.u32 4294901760, %v8602_v17  ;;  %v697_v43 = vand.u32 4294901760, %v696_v20 }
  0x8f   : > { %v960_v60 = vsub.f32 %v8602_v17, %v12628_v42  ;;  %v12637_v42 = vand.u32 4294901760, %v8633_v8  ;;  %v414_v17 = vld [vmem:[%s8426_s28 + $0x279] sm:$0xff] }
  0x91   : > { %v961_v25 = vand.u32 4294901760, %v960_v60  ;;  %v712_v60 = vsub.f32 %v8633_v8, %v12637_v42 }
  0x93   : > { %1328 = vmatmul.f32.gmra.mxu3 %v8540_v12  ;;  %1200 = vmatmul.f32.gmra.mxu1 %v8544_v19  ;;  %v713_v47 = vand.u32 4294901760, %v712_v60  ;;  %v562_v60 = vsel %vm431_vm1, %v408_v31, 0  ;;  %v377_v31 = vld [vmem:[%s8426_s28 + $0x91] sm:$0xff] }
  0x94   : > { %v8684_v5 = vand.u32 4294901760, %v562_v60 }
  0x95   : > { %946 = vmatmul.f32.gmra.mxu2 %v945_v61  ;;  %690 = vmatmul.f32.gmra.mxu0 %v689_v3  ;;  %v704_v61 = vsub.f32 %v8609_v30, %v12638_v49  ;;  %v556_v3 = vsel %vm431_vm1, %v406_v53, 0  ;;  %v407_v53 = vld [vmem:[%s8426_s28 + $0x229] sm:$0xff] }
  0x96   : > { %v8637_v20 = vand.u32 4294901760, %v556_v3  ;;  %v559_v39 = vsel %vm431_vm1, %v407_v53, 0  ;;  %13246 = vst [vmem:[#allocation32_spill] sm:$0xff] %v8684_v5 }
  0x98   : > { %13242 = vst [vmem:[#allocation28_spill] sm:$0xff] %v8637_v20  ;;  %v8650_v63 = vsub.f32 %v556_v3, %v8637_v20  ;;  %v8661_v3 = vand.u32 4294901760, %v559_v39 }
  0x9a   : > { %13243 = vst [vmem:[#allocation29_spill] sm:$0xff] %v8650_v63  ;;  %v12640_v11 = vand.u32 4294901760, %v8650_v63  ;;  %v8674_v33 = vsub.f32 %v559_v39, %v8661_v3 }
  0x9b   : > { %1332 = vmatmul.f32.gmra.mxu3 %v8565_v40  ;;  %1204 = vmatmul.f32.gmra.mxu1 %v8568_v46  ;;  %13244 = vst [vmem:[#allocation30_spill] sm:$0xff] %v8661_v3 }
  0x9c   : > { %v976_v53 = vsub.f32 %v8650_v63, %v12640_v11  ;;  %13245 = vst [vmem:[#allocation31_spill] sm:$0xff] %v8674_v33 }
  0x9d   : > { %954 = vmatmul.f32.gmra.mxu2 %v953_v34  ;;  %698 = vmatmul.f32.gmra.mxu0 %v697_v43  ;;  %v705_v34 = vand.u32 4294901760, %v704_v61  ;;  %v8640_v43 = vand.u32 4294901760, %v460_v10 }
  0x9e   : > { %v977_v49 = vand.u32 4294901760, %v976_v53 }
  0x9f   : > { %v8656_v61 = vsub.f32 %v460_v10, %v8640_v43  ;;  %v376_v10 = vld [vmem:[%s8426_s28 + $0x81] sm:$0xff] }
  0xa0   : > { %v466_v42 = vsel %vm431_vm1, %v376_v10, 0 }
  0xa1   : > { %v8688_v11 = vand.u32 4294901760, %v466_v42 }
  0xa3   : > { %1336 = vmatmul.f32.gmra.mxu3 %v8589_v4  ;;  %1208 = vmatmul.f32.gmra.mxu1 %v8592_v7 }
  0xa5   : > { %962 = vmatmul.f32.gmra.mxu2 %v961_v25  ;;  %706 = vmatmul.f32.gmra.mxu0 %v705_v34  ;;  %v12642_v25 = vand.u32 4294901760, %v8656_v61  ;;  %v8664_v34 = vand.u32 4294901760, %v463_v13 }
  0xa7   : > { %v720_v55 = vsub.f32 %v8656_v61, %v12642_v25  ;;  %v8681_v27 = vsub.f32 %v463_v13, %v8664_v34  ;;  %v8695_v13 = vsub.f32 %v562_v60, %v8684_v5  ;;  %v8705_v25 = vsub.f32 %v466_v42, %v8688_v11  ;;  %v378_v42 = vld [vmem:[%s8426_s28 + $0x99] sm:$0xff] }
  0xa8   : > { %v469_v60 = vsel %vm431_vm1, %v377_v31, 0  ;;  %v472_v28 = vsel %vm431_vm1, %v378_v42, 0 }
  0xa9   : > { %v12647_v39 = vand.u32 4294901760, %v8681_v27  ;;  %13247 = vst [vmem:[#allocation33_spill] sm:$0xff] %v8695_v13  ;;  %v12652_v18 = vand.u32 4294901760, %v8695_v13 }
  0xab   : > { %1340 = vmatmul.f32.gmra.mxu3 %v8612_v38  ;;  %1212 = vmatmul.f32.gmra.mxu1 %v8616_v50  ;;  %v728_v53 = vsub.f32 %v8681_v27, %v12647_v39  ;;  %v992_v31 = vsub.f32 %v8695_v13, %v12652_v18 }
  0xad   : > { %970 = vmatmul.f32.gmra.mxu2 %v969_v62  ;;  %714 = vmatmul.f32.gmra.mxu0 %v713_v47  ;;  %v12646_v62 = vand.u32 4294901760, %v8674_v33  ;;  %v721_v47 = vand.u32 4294901760, %v720_v55  ;;  %v565_v55 = vsel %vm431_vm1, %v409_v44, 0  ;;  %v729_v51 = vand.u32 4294901760, %v728_v53  ;;  %v410_v44 = vld [vmem:[%s8426_s28 + $0x249] sm:$0xff] }
  0xae   : > { %v568_v35 = vsel %vm431_vm1, %v410_v44, 0 }
  0xaf   : > { %v984_v10 = vsub.f32 %v8674_v33, %v12646_v62  ;;  %v12657_v62 = vand.u32 4294901760, %v8705_v25  ;;  %v411_v33 = vld [vmem:[%s8426_s28 + $0x259] sm:$0xff] }
  0xb1   : > { %v985_v1 = vand.u32 4294901760, %v984_v10  ;;  %v736_v10 = vsub.f32 %v8705_v25, %v12657_v62 }
  0xb3   : > { %1344 = vmatmul.f32.gmra.mxu3 %v8637_v20  ;;  %1216 = vmatmul.f32.gmra.mxu1 %v8640_v43  ;;  %v737_v13 = vand.u32 4294901760, %v736_v10  ;;  %v571_v10 = vsel %vm431_vm1, %v411_v33, 0  ;;  %v380_v33 = vld [vmem:[%s8426_s28 + $0xb1] sm:$0xff] }
  0xb4   : > { %v8756_v63 = vand.u32 4294901760, %v571_v10 }
  0xb5   : > { %978 = vmatmul.f32.gmra.mxu2 %v977_v49  ;;  %722 = vmatmul.f32.gmra.mxu0 %v721_v47  ;;  %v8709_v49 = vand.u32 4294901760, %v565_v55  ;;  %v8712_v47 = vand.u32 4294901760, %v469_v60 }
  0xb6   : > { %13252 = vst [vmem:[#allocation38_spill] sm:$0xff] %v8756_v63 }
  0xb7   : > { %13248 = vst [vmem:[#allocation34_spill] sm:$0xff] %v8709_v49  ;;  %v8722_v39 = vsub.f32 %v565_v55, %v8709_v49  ;;  %v8728_v53 = vsub.f32 %v469_v60, %v8712_v47  ;;  %v8733_v55 = vand.u32 4294901760, %v568_v35  ;;  %v379_v60 = vld [vmem:[%s8426_s28 + $0xa9] sm:$0xff] }
  0xb9   : > { %13249 = vst [vmem:[#allocation35_spill] sm:$0xff] %v8722_v39  ;;  %v12664_v18 = vand.u32 4294901760, %v8722_v39  ;;  %v8746_v42 = vsub.f32 %v568_v35, %v8733_v55 }
  0xba   : > { %13250 = vst [vmem:[#allocation36_spill] sm:$0xff] %v8733_v55 }
  0xbb   : > { %1348 = vmatmul.f32.gmra.mxu3 %v8661_v3  ;;  %1220 = vmatmul.f32.gmra.mxu1 %v8664_v34  ;;  %v993_v3 = vand.u32 4294901760, %v992_v31  ;;  %v1000_v44 = vsub.f32 %v8722_v39, %v12664_v18  ;;  %13251 = vst [vmem:[#allocation37_spill] sm:$0xff] %v8746_v42  ;;  %v412_v39 = vld [vmem:[%s8426_s28 + $0x261] sm:$0xff] }
  0xbd   : > { %986 = vmatmul.f32.gmra.mxu2 %v985_v1  ;;  %730 = vmatmul.f32.gmra.mxu0 %v729_v51  ;;  %v12667_v1 = vand.u32 4294901760, %v8728_v53  ;;  %v8736_v51 = vand.u32 4294901760, %v472_v28  ;;  %v1001_v20 = vand.u32 4294901760, %v1000_v44 }
  0xbf   : > { %v744_v31 = vsub.f32 %v8728_v53, %v12667_v1  ;;  %v8753_v62 = vsub.f32 %v472_v28, %v8736_v51  ;;  %v8767_v28 = vsub.f32 %v571_v10, %v8756_v63  ;;  %v478_v10 = vsel %vm431_vm1, %v380_v33, 0 }
  0xc1   : > { %v12675_v35 = vand.u32 4294901760, %v8753_v62  ;;  %13253 = vst [vmem:[#allocation39_spill] sm:$0xff] %v8767_v28 }
  0xc3   : > { %1352 = vmatmul.f32.gmra.mxu3 %v8684_v5  ;;  %1224 = vmatmul.f32.gmra.mxu1 %v8688_v11  ;;  %v475_v5 = vsel %vm431_vm1, %v379_v60, 0  ;;  %v752_v44 = vsub.f32 %v8753_v62, %v12675_v35 }
  0xc4   : > { %v8760_v18 = vand.u32 4294901760, %v475_v5 }
  0xc5   : > { %994 = vmatmul.f32.gmra.mxu2 %v993_v3  ;;  %738 = vmatmul.f32.gmra.mxu0 %v737_v13  ;;  %v12674_v3 = vand.u32 4294901760, %v8746_v42  ;;  %v745_v13 = vand.u32 4294901760, %v744_v31  ;;  %v574_v31 = vsel %vm431_vm1, %v412_v39, 0  ;;  %v753_v59 = vand.u32 4294901760, %v752_v44  ;;  %v413_v39 = vld [vmem:[%s8426_s28 + $0x271] sm:$0xff] }
  0xc6   : > { %v8777_v1 = vsub.f32 %v475_v5, %v8760_v18  ;;  %v381_v5 = vld [vmem:[%s8426_s28 + $0xc1] sm:$0xff] }
  0xc7   : > { %v1008_v60 = vsub.f32 %v8746_v42, %v12674_v3  ;;  %v481_v42 = vsel %vm431_vm1, %v381_v5, 0 }
  0xc8   : > { %v12687_v3 = vand.u32 4294901760, %v8777_v1 }
  0xc9   : > { %v1009_v38 = vand.u32 4294901760, %v1008_v60 }
  0xca   : > { %v760_v60 = vsub.f32 %v8777_v1, %v12687_v3 }
  0xcb   : > { %1356 = vmatmul.f32.gmra.mxu3 %v8709_v49  ;;  %1228 = vmatmul.f32.gmra.mxu1 %v8712_v47  ;;  %v12682_v49 = vand.u32 4294901760, %v8767_v28 }
  0xcd   : > { %1002 = vmatmul.f32.gmra.mxu2 %v1001_v20  ;;  %746 = vmatmul.f32.gmra.mxu0 %v745_v13  ;;  %v8781_v20 = vand.u32 4294901760, %v574_v31  ;;  %v8784_v13 = vand.u32 4294901760, %v478_v10  ;;  %v1016_v33 = vsub.f32 %v8767_v28, %v12682_v49  ;;  %v761_v28 = vand.u32 4294901760, %v760_v60 }
  0xce   : > { %v580_v60 = vsel %vm431_vm1, %v414_v17, 0  ;;  %v383_v17 = vld [vmem:[%s8426_s28 + $0xd9] sm:$0xff] }
  0xcf   : > { %13254 = vst [vmem:[#allocation40_spill] sm:$0xff] %v8781_v20  ;;  %v8794_v35 = vsub.f32 %v574_v31, %v8781_v20  ;;  %v8800_v44 = vsub.f32 %v478_v10, %v8784_v13  ;;  %v1017_v4 = vand.u32 4294901760, %v1016_v33  ;;  %v382_v10 = vld [vmem:[%s8426_s28 + $0xc9] sm:$0xff]  ;;  %v8828_v54 = vand.u32 4294901760, %v580_v60 }
  0xd1   : > { %13255 = vst [vmem:[#allocation41_spill] sm:$0xff] %v8794_v35  ;;  %v12694_v49 = vand.u32 4294901760, %v8794_v35 }
  0xd2   : > { %13258 = vst [vmem:[#allocation44_spill] sm:$0xff] %v8828_v54 }
  0xd3   : > { %1360 = vmatmul.f32.gmra.mxu3 %v8733_v55  ;;  %1232 = vmatmul.f32.gmra.mxu1 %v8736_v51  ;;  %v577_v55 = vsel %vm431_vm1, %v413_v39, 0  ;;  %v1024_v39 = vsub.f32 %v8794_v35, %v12694_v49  ;;  %v415_v35 = vld [vmem:[%s8426_s28 + $0x289] sm:$0xff] }
  0xd4   : > { %v8805_v31 = vand.u32 4294901760, %v577_v55 }
  0xd5   : > { %1010 = vmatmul.f32.gmra.mxu2 %v1009_v38  ;;  %754 = vmatmul.f32.gmra.mxu0 %v753_v59  ;;  %v12697_v38 = vand.u32 4294901760, %v8800_v44  ;;  %v8808_v59 = vand.u32 4294901760, %v481_v42  ;;  %v1025_v40 = vand.u32 4294901760, %v1024_v39 }
  0xd6   : > { %13256 = vst [vmem:[#allocation42_spill] sm:$0xff] %v8805_v31  ;;  %v8818_v5 = vsub.f32 %v577_v55, %v8805_v31 }
  0xd7   : > { %v768_v33 = vsub.f32 %v8800_v44, %v12697_v38  ;;  %v8825_v3 = vsub.f32 %v481_v42, %v8808_v59  ;;  %v8839_v42 = vsub.f32 %v580_v60, %v8828_v54  ;;  %v487_v60 = vsel %vm431_vm1, %v383_v17, 0 }
  0xd8   : > { %13257 = vst [vmem:[#allocation43_spill] sm:$0xff] %v8818_v5  ;;  %v8858_v26 = vand.u32 4294901760, %v487_v60 }
  0xd9   : > { %v12707_v55 = vand.u32 4294901760, %v8825_v3  ;;  %13259 = vst [vmem:[#allocation45_spill] sm:$0xff] %v8839_v42 }
  0xda   : > { %13261 = vst [vmem:[#allocation47_spill] sm:$0xff] %v8858_v26 }
  0xdb   : > { %1364 = vmatmul.f32.gmra.mxu3 %v8756_v63  ;;  %1236 = vmatmul.f32.gmra.mxu1 %v8760_v18  ;;  %v484_v63 = vsel %vm431_vm1, %v382_v10, 0  ;;  %v776_v39 = vsub.f32 %v8825_v3, %v12707_v55 }
  0xdc   : > { %v8832_v49 = vand.u32 4294901760, %v484_v63 }
  0xdd   : > { %1018 = vmatmul.f32.gmra.mxu2 %v1017_v4  ;;  %762 = vmatmul.f32.gmra.mxu0 %v761_v28  ;;  %v12702_v4 = vand.u32 4294901760, %v8818_v5  ;;  %v769_v28 = vand.u32 4294901760, %v768_v33  ;;  %v583_v33 = vsel %vm431_vm1, %v415_v35, 0  ;;  %v416_v35 = vld [vmem:[%s8426_s28 + $0x291] sm:$0xff] }
  0xde   : > { %v8849_v38 = vsub.f32 %v484_v63, %v8832_v49  ;;  %v8855_v12 = vand.u32 4294901760, %v583_v33  ;;  %v384_v63 = vld [vmem:[%s8426_s28 + $0xe1] sm:$0xff] }
  0xdf   : > { %v1032_v10 = vsub.f32 %v8818_v5, %v12702_v4  ;;  %v490_v48 = vsel %vm431_vm1, %v384_v63, 0  ;;  %v385_v63 = vld [vmem:[%s8426_s28 + $0xf1] sm:$0xff] }
  0xe0   : > { %13260 = vst [vmem:[#allocation46_spill] sm:$0xff] %v8855_v12  ;;  %v12721_v5 = vand.u32 4294901760, %v8849_v38  ;;  %v8870_v0 = vsub.f32 %v583_v33, %v8855_v12  ;;  %v8888_v32 = vand.u32 4294901760, %v490_v48  ;;  %v493_v15 = vsel %vm431_vm1, %v385_v63, 0  ;;  %v386_v63 = vld [vmem:[%s8426_s28 + $0xf9] sm:$0xff] }
  0xe1   : > { %v1033_v4 = vand.u32 4294901760, %v1032_v10  ;;  %v8918_v14 = vand.u32 4294901760, %v493_v15 }
  0xe2   : > { %13262 = vst [vmem:[#allocation48_spill] sm:$0xff] %v8870_v0  ;;  %v784_v10 = vsub.f32 %v8849_v38, %v12721_v5 }
  0xe3   : > { %1368 = vmatmul.f32.gmra.mxu3 %v8781_v20  ;;  %1240 = vmatmul.f32.gmra.mxu1 %v8784_v13  ;;  %13267 = vst [vmem:[#allocation53_spill] sm:$0xff] %v8888_v32 }
  0xe4   : > { %v785_v5 = vand.u32 4294901760, %v784_v10  ;;  %v589_v10 = vsel %vm431_vm1, %v417_v41, 0  ;;  %13273 = vst [vmem:[#allocation59_spill] sm:$0xff] %v8918_v14 }
  0xe5   : > { %1026 = vmatmul.f32.gmra.mxu2 %v1025_v40  ;;  %770 = vmatmul.f32.gmra.mxu0 %v769_v28  ;;  %v12716_v40 = vand.u32 4294901760, %v8839_v42  ;;  %v777_v28 = vand.u32 4294901760, %v776_v39  ;;  %v586_v39 = vsel %vm431_vm1, %v416_v35, 0 }
  0xe7   : > { %v1040_v17 = vsub.f32 %v8839_v42, %v12716_v40 }
  0xe8   : > { %v8852_v20 = vpop.f32.mrf.mxu1 }
  0xe9   : > { %v1041_v42 = vand.u32 4294901760, %v1040_v17 }
  0xea   : > { %v8860_v55 = vpop.f32.mrf.mxu0 }
  0xeb   : > { %1372 = vmatmul.f32.gmra.mxu3 %v8805_v31  ;;  %1244 = vmatmul.f32.gmra.mxu1 %v8808_v59  ;;  %v8877_v31 = vsub.f32 %v487_v60, %v8858_v26 }
  0xed   : > { %1034 = vmatmul.f32.gmra.mxu2 %v1033_v4  ;;  %778 = vmatmul.f32.gmra.mxu0 %v777_v28  ;;  %13263 = vst [vmem:[#allocation49_spill] sm:$0xff] %v8877_v31  ;;  %v12730_v4 = vand.u32 4294901760, %v8870_v0  ;;  %v8883_v28 = vand.u32 4294901760, %v586_v39  ;;  %v12735_v35 = vand.u32 4294901760, %v8877_v31 }
  0xee   : > { %v1309_v6 = vpop.f32.mrf.mxu3 }
  0xef   : > { %13265 = vst [vmem:[#allocation51_spill] sm:$0xff] %v8883_v28  ;;  %v1048_v17 = vsub.f32 %v8870_v0, %v12730_v4 }
  0xf0   : > { %v907_v40 = vpop.f32.mrf.mxu2  ;;  %v8880_v33 = vpop.f32.mrf.mxu1 }
  0xf1   : > { %13264 = vst [vmem:[#allocation50_spill] sm:$0xff] %v8880_v33  ;;  %v8885_v56 = vadd.f32 %v1309_v6, %v907_v40  ;;  %v8900_v6 = vsub.f32 %v586_v39, %v8883_v28  ;;  %v792_v40 = vsub.f32 %v8877_v31, %v12735_v35  ;;  %v1049_v0 = vand.u32 4294901760, %v1048_v17  ;;  %v394_v31 = vld [vmem:[%s8426_s28 + $0x159] sm:$0xff] }
  0xf2   : > { %v8890_v60 = vpop.f32.mrf.mxu0 }
  0xf3   : > { %13266 = vst [vmem:[#allocation52_spill] sm:$0xff] %v8885_v56  ;;  %1376 = vmatmul.f32.gmra.mxu3 %v8828_v54  ;;  %1248 = vmatmul.f32.gmra.mxu1 %v8832_v49  ;;  %v8907_v54 = vsub.f32 %v490_v48, %v8888_v32  ;;  %v793_v35 = vand.u32 4294901760, %v792_v40  ;;  %v592_v40 = vsel %vm431_vm1, %v418_v21, 0 }
  0xf4   : > { %13268 = vst [vmem:[#allocation54_spill] sm:$0xff] %v8900_v6 }
  0xf5   : > { %1042 = vmatmul.f32.gmra.mxu2 %v1041_v42  ;;  %786 = vmatmul.f32.gmra.mxu0 %v785_v5  ;;  %13269 = vst [vmem:[#allocation55_spill] sm:$0xff] %v8907_v54  ;;  %v12742_v5 = vand.u32 4294901760, %v8900_v6  ;;  %v8913_v42 = vand.u32 4294901760, %v589_v10  ;;  %v12745_v41 = vand.u32 4294901760, %v8907_v54 }
  0xf6   : > { %v1313_v56 = vpop.f32.mrf.mxu3 }
  0xf7   : > { %13271 = vst [vmem:[#allocation57_spill] sm:$0xff] %v8913_v42  ;;  %v1056_v17 = vsub.f32 %v8900_v6, %v12742_v5 }
  0xf8   : > { %v915_v4 = vpop.f32.mrf.mxu2  ;;  %v8910_v39 = vpop.f32.mrf.mxu1 }
  0xf9   : > { %13270 = vst [vmem:[#allocation56_spill] sm:$0xff] %v8910_v39  ;;  %v8915_v22 = vadd.f32 %v1313_v56, %v915_v4  ;;  %v8930_v56 = vsub.f32 %v589_v10, %v8913_v42  ;;  %v800_v4 = vsub.f32 %v8907_v54, %v12745_v41  ;;  %v496_v39 = vsel %vm431_vm1, %v386_v63, 0  ;;  %v387_v63 = vld [vmem:[%s8426_s28 + $0x109] sm:$0xff] }
  0xfa   : > { %v8920_v48 = vpop.f32.mrf.mxu0  ;;  %v1057_v6 = vand.u32 4294901760, %v1056_v17  ;;  %v8948_v54 = vand.u32 4294901760, %v496_v39 }
  0xfb   : > { %13272 = vst [vmem:[#allocation58_spill] sm:$0xff] %v8915_v22  ;;  %1380 = vmatmul.f32.gmra.mxu3 %v8855_v12  ;;  %1252 = vmatmul.f32.gmra.mxu1 %v8858_v26  ;;  %v8937_v12 = vsub.f32 %v493_v15, %v8918_v14  ;;  %v801_v41 = vand.u32 4294901760, %v800_v4  ;;  %v419_v26 = vld [vmem:[%s8426_s28 + $0x2b9] sm:$0xff] }
  0xfc   : > { %13274 = vst [vmem:[#allocation60_spill] sm:$0xff] %v8920_v48  ;;  %v595_v4 = vsel %vm431_vm1, %v419_v26, 0 }
  0xfd   : > { %13275 = vst [vmem:[#allocation61_spill] sm:$0xff] %v8930_v56  ;;  %1050 = vmatmul.f32.gmra.mxu2 %v1049_v0  ;;  %794 = vmatmul.f32.gmra.mxu0 %v793_v35  ;;  %v12752_v0 = vand.u32 4294901760, %v8930_v56  ;;  %v8943_v35 = vand.u32 4294901760, %v592_v40  ;;  %v12755_v21 = vand.u32 4294901760, %v8937_v12 }
  0xfe   : > { %13276 = vst [vmem:[#allocation62_spill] sm:$0xff] %v8937_v12  ;;  %v1317_v22 = vpop.f32.mrf.mxu3 }
  0xff   : > { %13278 = vst [vmem:[#allocation64_spill] sm:$0xff] %v8943_v35  ;;  %v1064_v17 = vsub.f32 %v8930_v56, %v12752_v0 }
 0x100   : > { %v923_v5 = vpop.f32.mrf.mxu2  ;;  %v8940_v10 = vpop.f32.mrf.mxu1  ;;  %13280 = vst [vmem:[#allocation66_spill] sm:$0xff] %v8948_v54 }
 0x101   : > { %13277 = vst [vmem:[#allocation63_spill] sm:$0xff] %v8940_v10  ;;  %v8945_v48 = vadd.f32 %v1317_v22, %v923_v5  ;;  %v8960_v22 = vsub.f32 %v592_v40, %v8943_v35  ;;  %v808_v5 = vsub.f32 %v8937_v12, %v12755_v21  ;;  %v499_v10 = vsel %vm431_vm1, %v387_v63, 0  ;;  %v388_v63 = vld [vmem:[%s8426_s28 + $0x111] sm:$0xff] }
 0x102   : > { %v8950_v15 = vpop.f32.mrf.mxu0  ;;  %v1065_v56 = vand.u32 4294901760, %v1064_v17  ;;  %v8978_v12 = vand.u32 4294901760, %v499_v10 }
 0x103   : > { %13279 = vst [vmem:[#allocation65_spill] sm:$0xff] %v8945_v48  ;;  %1384 = vmatmul.f32.gmra.mxu3 %v8883_v28  ;;  %1256 = vmatmul.f32.gmra.mxu1 %v8888_v32  ;;  %v8967_v28 = vsub.f32 %v496_v39, %v8948_v54  ;;  %v809_v21 = vand.u32 4294901760, %v808_v5  ;;  %v420_v32 = vld [vmem:[%s8426_s28 + $0x2c1] sm:$0xff] }
 0x104   : > { %13281 = vst [vmem:[#allocation67_spill] sm:$0xff] %v8950_v15  ;;  %v598_v5 = vsel %vm431_vm1, %v420_v32, 0 }
 0x105   : > { %13282 = vst [vmem:[#allocation68_spill] sm:$0xff] %v8960_v22  ;;  %1058 = vmatmul.f32.gmra.mxu2 %v1057_v6  ;;  %802 = vmatmul.f32.gmra.mxu0 %v801_v41  ;;  %v12762_v6 = vand.u32 4294901760, %v8960_v22  ;;  %v8973_v41 = vand.u32 4294901760, %v595_v4  ;;  %v12765_v26 = vand.u32 4294901760, %v8967_v28 }
 0x106   : > { %13283 = vst [vmem:[#allocation69_spill] sm:$0xff] %v8967_v28  ;;  %v1321_v48 = vpop.f32.mrf.mxu3 }
 0x107   : > { %13285 = vst [vmem:[#allocation71_spill] sm:$0xff] %v8973_v41  ;;  %v1072_v17 = vsub.f32 %v8960_v22, %v12762_v6 }
 0x108   : > { %v931_v0 = vpop.f32.mrf.mxu2  ;;  %v8970_v40 = vpop.f32.mrf.mxu1  ;;  %13287 = vst [vmem:[#allocation73_spill] sm:$0xff] %v8978_v12 }
 0x109   : > { %13284 = vst [vmem:[#allocation70_spill] sm:$0xff] %v8970_v40  ;;  %v8975_v15 = vadd.f32 %v1321_v48, %v931_v0  ;;  %v8990_v48 = vsub.f32 %v595_v4, %v8973_v41  ;;  %v816_v0 = vsub.f32 %v8967_v28, %v12765_v26  ;;  %v502_v40 = vsel %vm431_vm1, %v388_v63, 0  ;;  %v389_v63 = vld [vmem:[%s8426_s28 + $0x121] sm:$0xff] }
 0x10a   : > { %v8980_v39 = vpop.f32.mrf.mxu0  ;;  %v1073_v22 = vand.u32 4294901760, %v1072_v17  ;;  %v9008_v28 = vand.u32 4294901760, %v502_v40 }
 0x10b   : > { %13286 = vst [vmem:[#allocation72_spill] sm:$0xff] %v8975_v15  ;;  %1388 = vmatmul.f32.gmra.mxu3 %v8913_v42  ;;  %1260 = vmatmul.f32.gmra.mxu1 %v8918_v14  ;;  %v8997_v42 = vsub.f32 %v499_v10, %v8978_v12  ;;  %v817_v26 = vand.u32 4294901760, %v816_v0  ;;  %v421_v14 = vld [vmem:[%s8426_s28 + $0x2d1] sm:$0xff] }
 0x10c   : > { %13288 = vst [vmem:[#allocation74_spill] sm:$0xff] %v8980_v39  ;;  %v601_v0 = vsel %vm431_vm1, %v421_v14, 0 }
 0x10d   : > { %13289 = vst [vmem:[#allocation75_spill] sm:$0xff] %v8990_v48  ;;  %1066 = vmatmul.f32.gmra.mxu2 %v1065_v56  ;;  %810 = vmatmul.f32.gmra.mxu0 %v809_v21  ;;  %v12772_v56 = vand.u32 4294901760, %v8990_v48  ;;  %v9003_v21 = vand.u32 4294901760, %v598_v5  ;;  %v12775_v32 = vand.u32 4294901760, %v8997_v42 }
 0x10e   : > { %13290 = vst [vmem:[#allocation76_spill] sm:$0xff] %v8997_v42  ;;  %v1325_v15 = vpop.f32.mrf.mxu3 }
 0x10f   : > { %13292 = vst [vmem:[#allocation78_spill] sm:$0xff] %v9003_v21  ;;  %v1080_v17 = vsub.f32 %v8990_v48, %v12772_v56 }
 0x110   : > { %v939_v6 = vpop.f32.mrf.mxu2  ;;  %v9000_v4 = vpop.f32.mrf.mxu1  ;;  %13294 = vst [vmem:[#allocation80_spill] sm:$0xff] %v9008_v28 }
 0x111   : > { %13291 = vst [vmem:[#allocation77_spill] sm:$0xff] %v9000_v4  ;;  %v9005_v39 = vadd.f32 %v1325_v15, %v939_v6  ;;  %v9020_v15 = vsub.f32 %v598_v5, %v9003_v21  ;;  %v824_v6 = vsub.f32 %v8997_v42, %v12775_v32  ;;  %v505_v4 = vsel %vm431_vm1, %v389_v63, 0  ;;  %v390_v63 = vld [vmem:[%s8426_s28 + $0x129] sm:$0xff] }
 0x112   : > { %v9010_v10 = vpop.f32.mrf.mxu0  ;;  %v1081_v48 = vand.u32 4294901760, %v1080_v17  ;;  %v9038_v42 = vand.u32 4294901760, %v505_v4 }
 0x113   : > { %13293 = vst [vmem:[#allocation79_spill] sm:$0xff] %v9005_v39  ;;  %1392 = vmatmul.f32.gmra.mxu3 %v8943_v35  ;;  %1264 = vmatmul.f32.gmra.mxu1 %v8948_v54  ;;  %v9027_v35 = vsub.f32 %v502_v40, %v9008_v28  ;;  %v825_v32 = vand.u32 4294901760, %v824_v6  ;;  %v422_v54 = vld [vmem:[%s8426_s28 + $0x2d9] sm:$0xff] }
 0x114   : > { %13295 = vst [vmem:[#allocation81_spill] sm:$0xff] %v9010_v10  ;;  %v604_v6 = vsel %vm431_vm1, %v422_v54, 0 }
 0x115   : > { %13296 = vst [vmem:[#allocation82_spill] sm:$0xff] %v9020_v15  ;;  %1074 = vmatmul.f32.gmra.mxu2 %v1073_v22  ;;  %818 = vmatmul.f32.gmra.mxu0 %v817_v26  ;;  %v12782_v22 = vand.u32 4294901760, %v9020_v15  ;;  %v9033_v26 = vand.u32 4294901760, %v601_v0  ;;  %v12785_v14 = vand.u32 4294901760, %v9027_v35 }
 0x116   : > { %13297 = vst [vmem:[#allocation83_spill] sm:$0xff] %v9027_v35  ;;  %v1329_v39 = vpop.f32.mrf.mxu3 }
 0x117   : > { %13299 = vst [vmem:[#allocation85_spill] sm:$0xff] %v9033_v26  ;;  %v1088_v17 = vsub.f32 %v9020_v15, %v12782_v22 }
 0x118   : > { %v947_v56 = vpop.f32.mrf.mxu2  ;;  %v9030_v5 = vpop.f32.mrf.mxu1  ;;  %13301 = vst [vmem:[#allocation87_spill] sm:$0xff] %v9038_v42 }
 0x119   : > { %13298 = vst [vmem:[#allocation84_spill] sm:$0xff] %v9030_v5  ;;  %v9035_v10 = vadd.f32 %v1329_v39, %v947_v56  ;;  %v9050_v39 = vsub.f32 %v601_v0, %v9033_v26  ;;  %v832_v56 = vsub.f32 %v9027_v35, %v12785_v14  ;;  %v508_v5 = vsel %vm431_vm1, %v390_v63, 0  ;;  %v391_v63 = vld [vmem:[%s8426_s28 + $0x139] sm:$0xff] }
 0x11a   : > { %v9040_v40 = vpop.f32.mrf.mxu0  ;;  %v1089_v15 = vand.u32 4294901760, %v1088_v17  ;;  %v9068_v35 = vand.u32 4294901760, %v508_v5 }
 0x11b   : > { %13300 = vst [vmem:[#allocation86_spill] sm:$0xff] %v9035_v10  ;;  %1396 = vmatmul.f32.gmra.mxu3 %v8973_v41  ;;  %1268 = vmatmul.f32.gmra.mxu1 %v8978_v12  ;;  %v9057_v41 = vsub.f32 %v505_v4, %v9038_v42  ;;  %v833_v14 = vand.u32 4294901760, %v832_v56  ;;  %v423_v12 = vld [vmem:[%s8426_s28 + $0x2e9] sm:$0xff] }
 0x11c   : > { %13302 = vst [vmem:[#allocation88_spill] sm:$0xff] %v9040_v40  ;;  %v607_v56 = vsel %vm431_vm1, %v423_v12, 0 }
 0x11d   : > { %13303 = vst [vmem:[#allocation89_spill] sm:$0xff] %v9050_v39  ;;  %1082 = vmatmul.f32.gmra.mxu2 %v1081_v48  ;;  %826 = vmatmul.f32.gmra.mxu0 %v825_v32  ;;  %v12792_v48 = vand.u32 4294901760, %v9050_v39  ;;  %v9063_v32 = vand.u32 4294901760, %v604_v6  ;;  %v12795_v54 = vand.u32 4294901760, %v9057_v41 }
 0x11e   : > { %13304 = vst [vmem:[#allocation90_spill] sm:$0xff] %v9057_v41  ;;  %v1333_v10 = vpop.f32.mrf.mxu3 }
 0x11f   : > { %13306 = vst [vmem:[#allocation92_spill] sm:$0xff] %v9063_v32  ;;  %v1096_v17 = vsub.f32 %v9050_v39, %v12792_v48 }
 0x120   : > { %v955_v22 = vpop.f32.mrf.mxu2  ;;  %v9060_v0 = vpop.f32.mrf.mxu1  ;;  %13308 = vst [vmem:[#allocation94_spill] sm:$0xff] %v9068_v35 }
 0x121   : > { %13305 = vst [vmem:[#allocation91_spill] sm:$0xff] %v9060_v0  ;;  %v9065_v40 = vadd.f32 %v1333_v10, %v955_v22  ;;  %v9080_v10 = vsub.f32 %v604_v6, %v9063_v32  ;;  %v840_v22 = vsub.f32 %v9057_v41, %v12795_v54  ;;  %v511_v0 = vsel %vm431_vm1, %v391_v63, 0  ;;  %v392_v63 = vld [vmem:[%s8426_s28 + $0x141] sm:$0xff] }
 0x122   : > { %v9070_v4 = vpop.f32.mrf.mxu0  ;;  %v1097_v39 = vand.u32 4294901760, %v1096_v17  ;;  %v9098_v41 = vand.u32 4294901760, %v511_v0 }
 0x123   : > { %13307 = vst [vmem:[#allocation93_spill] sm:$0xff] %v9065_v40  ;;  %1400 = vmatmul.f32.gmra.mxu3 %v9003_v21  ;;  %1272 = vmatmul.f32.gmra.mxu1 %v9008_v28  ;;  %v9087_v21 = vsub.f32 %v508_v5, %v9068_v35  ;;  %v841_v54 = vand.u32 4294901760, %v840_v22  ;;  %v424_v28 = vld [vmem:[%s8426_s28 + $0x2f1] sm:$0xff] }
 0x124   : > { %13309 = vst [vmem:[#allocation95_spill] sm:$0xff] %v9070_v4  ;;  %v610_v22 = vsel %vm431_vm1, %v424_v28, 0 }
 0x125   : > { %13310 = vst [vmem:[#allocation96_spill] sm:$0xff] %v9080_v10  ;;  %1090 = vmatmul.f32.gmra.mxu2 %v1089_v15  ;;  %834 = vmatmul.f32.gmra.mxu0 %v833_v14  ;;  %v12802_v15 = vand.u32 4294901760, %v9080_v10  ;;  %v9093_v14 = vand.u32 4294901760, %v607_v56  ;;  %v12805_v12 = vand.u32 4294901760, %v9087_v21 }
 0x126   : > { %13311 = vst [vmem:[#allocation97_spill] sm:$0xff] %v9087_v21  ;;  %v1337_v40 = vpop.f32.mrf.mxu3 }
 0x127   : > { %13313 = vst [vmem:[#allocation99_spill] sm:$0xff] %v9093_v14  ;;  %v1104_v17 = vsub.f32 %v9080_v10, %v12802_v15 }
 0x128   : > { %v963_v48 = vpop.f32.mrf.mxu2  ;;  %v9090_v6 = vpop.f32.mrf.mxu1  ;;  %13315 = vst [vmem:[#allocation101_spill] sm:$0xff] %v9098_v41 }
 0x129   : > { %13312 = vst [vmem:[#allocation98_spill] sm:$0xff] %v9090_v6  ;;  %v9095_v4 = vadd.f32 %v1337_v40, %v963_v48  ;;  %v9110_v40 = vsub.f32 %v607_v56, %v9093_v14  ;;  %v848_v48 = vsub.f32 %v9087_v21, %v12805_v12  ;;  %v514_v6 = vsel %vm431_vm1, %v392_v63, 0  ;;  %v393_v63 = vld [vmem:[%s8426_s28 + $0x151] sm:$0xff] }
 0x12a   : > { %v9100_v5 = vpop.f32.mrf.mxu0  ;;  %v1105_v10 = vand.u32 4294901760, %v1104_v17  ;;  %v9128_v21 = vand.u32 4294901760, %v514_v6 }
 0x12b   : > { %13314 = vst [vmem:[#allocation100_spill] sm:$0xff] %v9095_v4  ;;  %1404 = vmatmul.f32.gmra.mxu3 %v9033_v26  ;;  %1276 = vmatmul.f32.gmra.mxu1 %v9038_v42  ;;  %v9117_v26 = vsub.f32 %v511_v0, %v9098_v41  ;;  %v849_v12 = vand.u32 4294901760, %v848_v48  ;;  %v425_v42 = vld [vmem:[%s8426_s28 + $0x301] sm:$0xff] }
 0x12c   : > { %13316 = vst [vmem:[#allocation102_spill] sm:$0xff] %v9100_v5  ;;  %v613_v48 = vsel %vm431_vm1, %v425_v42, 0 }
 0x12d   : > { %13317 = vst [vmem:[#allocation103_spill] sm:$0xff] %v9110_v40  ;;  %1098 = vmatmul.f32.gmra.mxu2 %v1097_v39  ;;  %842 = vmatmul.f32.gmra.mxu0 %v841_v54  ;;  %v12812_v39 = vand.u32 4294901760, %v9110_v40  ;;  %v9123_v54 = vand.u32 4294901760, %v610_v22  ;;  %v12815_v28 = vand.u32 4294901760, %v9117_v26 }
 0x12e   : > { %13318 = vst [vmem:[#allocation104_spill] sm:$0xff] %v9117_v26  ;;  %v1341_v4 = vpop.f32.mrf.mxu3 }
 0x12f   : > { %13320 = vst [vmem:[#allocation106_spill] sm:$0xff] %v9123_v54  ;;  %v1112_v17 = vsub.f32 %v9110_v40, %v12812_v39 }
 0x130   : > { %v971_v15 = vpop.f32.mrf.mxu2  ;;  %v9120_v56 = vpop.f32.mrf.mxu1  ;;  %13322 = vst [vmem:[#allocation108_spill] sm:$0xff] %v9128_v21 }
 0x131   : > { %13319 = vst [vmem:[#allocation105_spill] sm:$0xff] %v9120_v56  ;;  %v9125_v5 = vadd.f32 %v1341_v4, %v971_v15  ;;  %v9140_v4 = vsub.f32 %v610_v22, %v9123_v54  ;;  %v856_v15 = vsub.f32 %v9117_v26, %v12815_v28  ;;  %v517_v56 = vsel %vm431_vm1, %v393_v63, 0 }
 0x132   : > { %v9130_v0 = vpop.f32.mrf.mxu0  ;;  %v1113_v40 = vand.u32 4294901760, %v1112_v17  ;;  %v9158_v42 = vand.u32 4294901760, %v517_v56 }
 0x133   : > { %13321 = vst [vmem:[#allocation107_spill] sm:$0xff] %v9125_v5  ;;  %1408 = vmatmul.f32.gmra.mxu3 %v9063_v32  ;;  %1280 = vmatmul.f32.gmra.mxu1 %v9068_v35  ;;  %v9147_v32 = vsub.f32 %v514_v6, %v9128_v21  ;;  %v857_v28 = vand.u32 4294901760, %v856_v15  ;;  %v426_v35 = vld [vmem:[%s8426_s28 + $0x309] sm:$0xff] }
 0x134   : > { %13323 = vst [vmem:[#allocation109_spill] sm:$0xff] %v9130_v0  ;;  %v616_v17 = vsel %vm431_vm1, %v426_v35, 0  ;;  %v9177_v15 = vsub.f32 %v517_v56, %v9158_v42 }
 0x135   : > { %13324 = vst [vmem:[#allocation110_spill] sm:$0xff] %v9140_v4  ;;  %1106 = vmatmul.f32.gmra.mxu2 %v1105_v10  ;;  %850 = vmatmul.f32.gmra.mxu0 %v849_v12  ;;  %v12824_v10 = vand.u32 4294901760, %v9140_v4  ;;  %v9153_v12 = vand.u32 4294901760, %v613_v48  ;;  %v12827_v26 = vand.u32 4294901760, %v9147_v32 }
 0x136   : > { %13325 = vst [vmem:[#allocation111_spill] sm:$0xff] %v9147_v32  ;;  %v1345_v5 = vpop.f32.mrf.mxu3  ;;  %v12835_v56 = vand.u32 4294901760, %v9177_v15 }
 0x137   : > { %13327 = vst [vmem:[#allocation113_spill] sm:$0xff] %v9153_v12  ;;  %v1120_v63 = vsub.f32 %v9140_v4, %v12824_v10 }
 0x138   : > { %v979_v39 = vpop.f32.mrf.mxu2  ;;  %v9150_v22 = vpop.f32.mrf.mxu1  ;;  %13329 = vst [vmem:[#allocation115_spill] sm:$0xff] %v9158_v42 }
 0x139   : > { %13326 = vst [vmem:[#allocation112_spill] sm:$0xff] %v9150_v22  ;;  %v9155_v0 = vadd.f32 %v1345_v5, %v979_v39  ;;  %v9170_v5 = vsub.f32 %v613_v48, %v9153_v12  ;;  %v864_v39 = vsub.f32 %v9147_v32, %v12827_v26  ;;  %v1121_v4 = vand.u32 4294901760, %v1120_v63 }
 0x13a   : > { %v9160_v6 = vpop.f32.mrf.mxu0  ;;  %13332 = vst [vmem:[#allocation118_spill] sm:$0xff] %v9177_v15 }
 0x13b   : > { %13328 = vst [vmem:[#allocation114_spill] sm:$0xff] %v9155_v0  ;;  %1412 = vmatmul.f32.gmra.mxu3 %v9093_v14  ;;  %1284 = vmatmul.f32.gmra.mxu1 %v9098_v41  ;;  %v520_v14 = vsel %vm431_vm1, %v394_v31, 0  ;;  %v12832_v26 = vand.u32 4294901760, %v9170_v5  ;;  %v865_v35 = vand.u32 4294901760, %v864_v39  ;;  %v395_v31 = vld [vmem:[%s8426_s28 + $0x169] sm:$0xff] }
 0x13c   : > { %13330 = vst [vmem:[#allocation116_spill] sm:$0xff] %v9160_v6  ;;  %v427_v6 = vld [vmem:[%s8426_s28 + $0x319] sm:$0xff] }
 0x13d   : > { %13331 = vst [vmem:[#allocation117_spill] sm:$0xff] %v9170_v5  ;;  %1114 = vmatmul.f32.gmra.mxu2 %v1113_v40  ;;  %858 = vmatmul.f32.gmra.mxu0 %v857_v28  ;;  %v9182_v40 = vand.u32 4294901760, %v616_v17  ;;  %v9184_v28 = vand.u32 4294901760, %v520_v14  ;;  %v619_v39 = vsel %vm431_vm1, %v427_v6, 0 }
 0x13e   : > { %v1349_v0 = vpop.f32.mrf.mxu3 }
 0x13f   : > { %13334 = vst [vmem:[#allocation120_spill] sm:$0xff] %v9182_v40  ;;  %v9197_v63 = vsub.f32 %v616_v17, %v9182_v40  ;;  %v523_v17 = vsel %vm431_vm1, %v395_v31, 0  ;;  %v396_v31 = vld [vmem:[%s8426_s28 + $0x171] sm:$0xff] }
 0x140   : > { %v987_v10 = vpop.f32.mrf.mxu2  ;;  %v9180_v48 = vpop.f32.mrf.mxu1  ;;  %13335 = vst [vmem:[#allocation121_spill] sm:$0xff] %v9184_v28 }
 0x141   : > { %13333 = vst [vmem:[#allocation119_spill] sm:$0xff] %v9180_v48  ;;  %v9186_v22 = vadd.f32 %v1349_v0, %v987_v10  ;;  %v9200_v48 = vsub.f32 %v520_v14, %v9184_v28  ;;  %v1128_v0 = vsub.f32 %v9170_v5, %v12832_v26  ;;  %v872_v10 = vsub.f32 %v9177_v15, %v12835_v56 }
 0x142   : > { %v9190_v32 = vpop.f32.mrf.mxu0  ;;  %13338 = vst [vmem:[#allocation124_spill] sm:$0xff] %v9197_v63  ;;  %v9218_v15 = vand.u32 4294901760, %v523_v17 }
 0x143   : > { %13336 = vst [vmem:[#allocation122_spill] sm:$0xff] %v9186_v22  ;;  %1416 = vmatmul.f32.gmra.mxu3 %v9123_v54  ;;  %1288 = vmatmul.f32.gmra.mxu1 %v9128_v21  ;;  %v12849_v26 = vand.u32 4294901760, %v9200_v48  ;;  %v1129_v5 = vand.u32 4294901760, %v1128_v0  ;;  %v873_v56 = vand.u32 4294901760, %v872_v10  ;;  %v428_v21 = vld [vmem:[%s8426_s28 + $0x321] sm:$0xff] }
 0x144   : > { %13337 = vst [vmem:[#allocation123_spill] sm:$0xff] %v9190_v32  ;;  %v9213_v32 = vand.u32 4294901760, %v619_v39  ;;  %v622_v0 = vsel %vm431_vm1, %v428_v21, 0  ;;  %v9237_v10 = vsub.f32 %v523_v17, %v9218_v15 }
 0x145   : > { %13339 = vst [vmem:[#allocation125_spill] sm:$0xff] %v9200_v48  ;;  %1122 = vmatmul.f32.gmra.mxu2 %v1121_v4  ;;  %866 = vmatmul.f32.gmra.mxu0 %v865_v35  ;;  %v12842_v4 = vand.u32 4294901760, %v9197_v63 }
 0x146   : > { %v1353_v54 = vpop.f32.mrf.mxu3  ;;  %v12859_v17 = vand.u32 4294901760, %v9237_v10 }
 0x148   : > { %v995_v22 = vpop.f32.mrf.mxu2  ;;  %v9210_v14 = vpop.f32.mrf.mxu1 }
 0x149   : > { %13340 = vst [vmem:[#allocation126_spill] sm:$0xff] %v9210_v14  ;;  %v9216_v35 = vadd.f32 %v1353_v54, %v995_v22  ;;  %v1136_v14 = vsub.f32 %v9197_v63, %v12842_v4  ;;  %v9230_v54 = vsub.f32 %v619_v39, %v9213_v32  ;;  %v880_v22 = vsub.f32 %v9200_v48, %v12849_v26 }
 0x14a   : > { %v9220_v6 = vpop.f32.mrf.mxu0  ;;  %v526_v4 = vsel %vm431_vm1, %v396_v31, 0 }
 0x14b   : > { %13341 = vst [vmem:[#allocation127_spill] sm:$0xff] %v9216_v35  ;;  %1420 = vmatmul.f32.gmra.mxu3 %v9153_v12  ;;  %1292 = vmatmul.f32.gmra.mxu1 %v9158_v42  ;;  %v364_v12 = vld [vmem:[%s8353_s24] sm:$0xf]  ;;  %v1137_v42 = vand.u32 4294901760, %v1136_v14  ;;  %v12856_v26 = vand.u32 4294901760, %v9230_v54  ;;  %v9250_v33 = vand.u32 4294901760, %v526_v4 }
 0x14c   : > { %13342 = vst [vmem:[#allocation128_spill] sm:$0xff] %v9220_v6  ;;  %v2920_v6 = vsel %vm624_vm0, %v364_v12, 0 }
 0x14d   : > { %13343 = vst [vmem:[#allocation129_spill] sm:$0xff] %v9230_v54  ;;  %1130 = vmatmul.f32.gmra.mxu2 %v1129_v5  ;;  %874 = vmatmul.f32.gmra.mxu0 %v873_v56  ;;  %v2937_v63 = vand.u32 4294901760, %v2920_v6  ;;  %v881_v5 = vand.u32 4294901760, %v880_v22  ;;  %v9245_v56 = vand.u32 4294901760, %v622_v0  ;;  %v1144_v31 = vsub.f32 %v9230_v54, %v12856_v26 }
 0x14e   : > { %v1357_v35 = vpop.f32.mrf.mxu3  ;;  %v9266_v22 = vsub.f32 %v526_v4, %v9250_v33 }
 0x14f   : > { %13345 = vst [vmem:[#allocation131_spill] sm:$0xff] %v9245_v56  ;;  %2938 = vmatpush.msra.mxu2 %v2937_v63  ;;  %v3468_v48 = vsub.f32 %v2920_v6, %v2937_v63  ;;  %4085 = vmatpush.msra.mxu1 %v2937_v63  ;;  %v888_v6 = vsub.f32 %v9237_v10, %v12859_v17 }
 0x150   : > { %v1003_v39 = vpop.f32.mrf.mxu2  ;;  %v9242_v41 = vpop.f32.mrf.mxu1 }
 0x151   : > { %13344 = vst [vmem:[#allocation130_spill] sm:$0xff] %v9242_v41  ;;  %v9247_v21 = vadd.f32 %v1357_v35, %v1003_v39  ;;  %v3469_v14 = vand.u32 4294901760, %v3468_v48  ;;  %v9260_v35 = vsub.f32 %v622_v0, %v9245_v56  ;;  %3747 = vmatpush.msra.mxu0 %v3468_v48 }
 0x152   : > { %v9252_v12 = vpop.f32.mrf.mxu0 }
 0x153   : > { %13346 = vst [vmem:[#allocation132_spill] sm:$0xff] %v9247_v21  ;;  %1424 = vmatmul.f32.gmra.mxu3 %v9182_v40  ;;  %1296 = vmatmul.f32.gmra.mxu1 %v9184_v28  ;;  %v3470_v39 = vsub.f32 %v3468_v48, %v3469_v14  ;;  %v12860_v0 = vand.u32 4294901760, %v9260_v35 }
 0x154   : > { %13347 = vst [vmem:[#allocation133_spill] sm:$0xff] %v9252_v12  ;;  %v1145_v12 = vand.u32 4294901760, %v1144_v31 }
 0x155   : > { %13348 = vst [vmem:[#allocation134_spill] sm:$0xff] %v9260_v35  ;;  %1138 = vmatmul.f32.gmra.mxu2 %v1137_v42  ;;  %882 = vmatmul.f32.gmra.mxu0 %v881_v5  ;;  %v3471_v21 = vand.u32 4294901760, %v3470_v39  ;;  %v889_v42 = vand.u32 4294901760, %v888_v6  ;;  %v12861_v5 = vand.u32 4294901760, %v9266_v22  ;;  %v1152_v48 = vsub.f32 %v9260_v35, %v12860_v0 }
 0x156   : > { %v1361_v40 = vpop.f32.mrf.mxu3 }
 0x157   : > { %3472 = vmatpush.msra.mxu3 %v3471_v21  ;;  %v1153_v6 = vand.u32 4294901760, %v1152_v48 }
 0x158   : > { %v1011_v41 = vpop.f32.mrf.mxu2  ;;  %v9268_v28 = vpop.f32.mrf.mxu1 }
 0x159   : > { %v9270_v26 = vadd.f32 %v1361_v40, %v1011_v41  ;;  %v896_v41 = vsub.f32 %v9266_v22, %v12861_v5 }
 0x15a   : > { %v9274_v54 = vpop.f32.mrf.mxu0 }
 0x15b   : > { %1428 = vmatmul.f32.gmra.mxu3 %v9213_v32  ;;  %1300 = vmatmul.f32.gmra.mxu1 %v9218_v15  ;;  %v897_v39 = vand.u32 4294901760, %v896_v41 }
 0x15d   : > { %1146 = vmatmul.f32.gmra.mxu2 %v1145_v12  ;;  %890 = vmatmul.f32.gmra.mxu0 %v889_v42 }
 0x15e   : > { %v1365_v40 = vpop.f32.mrf.mxu3 }
 0x160   : > { %v1019_v4 = vpop.f32.mrf.mxu2  ;;  %v9284_v31 = vpop.f32.mrf.mxu1 }
 0x161   : > { %v9286_v21 = vadd.f32 %v1365_v40, %v1019_v4  ;;  %v13350_v40 = vand.u32 4294901760, %v8452_v23 }
 0x162   : > { %v9288_v17 = vpop.f32.mrf.mxu0 }
 0x163   : > { %1432 = vmatmul.f32.gmra.mxu3 %v9245_v56  ;;  %1304 = vmatmul.f32.gmra.mxu1 %v9250_v33  ;;  %v13388_v56 = vld [vmem:[#allocation47_spill] sm:$0xff] }
 0x165   : > { %1154 = vmatmul.f32.gmra.mxu2 %v1153_v6  ;;  %898 = vmatmul.f32.gmra.mxu0 %v897_v39 }
 0x166   : > { %v1369_v12 = vpop.f32.mrf.mxu3 }
 0x168   : > { %v1027_v42 = vpop.f32.mrf.mxu2  ;;  %v9292_v0 = vpop.f32.mrf.mxu1 }
 0x169   : > { %v9294_v5 = vadd.f32 %v1369_v12, %v1027_v42  ;;  %v13352_v12 = vand.u32 4294901760, %v8460_v29 }
 0x16a   : > { %v9296_v35 = vpop.f32.mrf.mxu0 }
 0x16b   : > { %13349 = vst [vmem:[#allocation135_spill] sm:$0xff] %v9294_v5  ;;  %1795 = vmatmul.f32.vlgmr.msrb.gmra.mxu3 %v13350_v40  ;;  %2471 = vmatmul.f32.vlgmr.msrb.gmra.mxu1 %v8440_v16  ;;  %v13354_v40 = vand.u32 4294901760, %v8489_v45  ;;  %v13386_v5 = vld [vmem:[#allocation49_spill] sm:$0xff] }
 0x16c   : > { %4763 = vmatpush.msrb.mxu3 %v2937_v63 }
 0x16d   : > { %1456 = vmatmul.f32.vlgmr.msrb.gmra.mxu2 %v8452_v23  ;;  %2197 = vmatmul.f32.vlgmr.msrb.gmra.mxu0 %v8440_v16 }
 0x16e   : > { %v1373_v48 = vpop.f32.mrf.mxu3  ;;  %4489 = vmatpush.msrb.mxu2 %v3469_v14 }
 0x170   : > { %v1035_v41 = vpop.f32.mrf.mxu2  ;;  %v9303_v4 = vpop.f32.mrf.mxu1 }
 0x171   : > { %v9305_v6 = vadd.f32 %v1373_v48, %v1035_v41 }
 0x172   : > { %v9307_v39 = vpop.f32.mrf.mxu0 }
 0x173   : > { %13351 = vst [vmem:[#allocation136_spill] sm:$0xff] %v9305_v6  ;;  %1801 = vmatmul.f32.gmra.mxu3 %v13352_v12  ;;  %2475 = vmatmul.f32.gmra.mxu1 %v8454_v24 }
 0x175   : > { %1461 = vmatmul.f32.gmra.mxu2 %v8460_v29  ;;  %2201 = vmatmul.f32.gmra.mxu0 %v8454_v24 }
 0x176   : > { %v1377_v23 = vpop.f32.mrf.mxu3 }
 0x178   : > { %v1043_v16 = vpop.f32.mrf.mxu2  ;;  %v9314_v63 = vpop.f32.mrf.mxu1 }
 0x179   : > { %v9316_v14 = vadd.f32 %v1377_v23, %v1043_v16  ;;  %v13356_v23 = vand.u32 4294901760, %v8512_v58 }
 0x17a   : > { %v9318_v42 = vpop.f32.mrf.mxu0 }
 0x17b   : > { %13353 = vst [vmem:[#allocation137_spill] sm:$0xff] %v9316_v14  ;;  %1807 = vmatmul.f32.gmra.mxu3 %v13354_v40  ;;  %2479 = vmatmul.f32.gmra.mxu1 %v8472_v36 }
 0x17d   : > { %1466 = vmatmul.f32.gmra.mxu2 %v8489_v45  ;;  %2205 = vmatmul.f32.gmra.mxu0 %v8472_v36 }
 0x17e   : > { %v1381_v29 = vpop.f32.mrf.mxu3 }
 0x180   : > { %v1051_v48 = vpop.f32.mrf.mxu2  ;;  %v9325_v24 = vpop.f32.mrf.mxu1 }
 0x181   : > { %v9327_v41 = vadd.f32 %v1381_v29, %v1051_v48  ;;  %v13358_v29 = vand.u32 4294901760, %v8537_v9 }
 0x182   : > { %v9329_v12 = vpop.f32.mrf.mxu0 }
 0x183   : > { %13355 = vst [vmem:[#allocation138_spill] sm:$0xff] %v9327_v41  ;;  %1813 = vmatmul.f32.gmra.mxu3 %v13356_v23  ;;  %2483 = vmatmul.f32.gmra.mxu1 %v8496_v52 }
 0x185   : > { %1471 = vmatmul.f32.gmra.mxu2 %v8512_v58  ;;  %2209 = vmatmul.f32.gmra.mxu0 %v8496_v52 }
 0x186   : > { %v1385_v45 = vpop.f32.mrf.mxu3 }
 0x188   : > { %v1059_v16 = vpop.f32.mrf.mxu2  ;;  %v9336_v36 = vpop.f32.mrf.mxu1 }
 0x189   : > { %v9338_v40 = vadd.f32 %v1385_v45, %v1059_v16  ;;  %v13360_v45 = vand.u32 4294901760, %v8561_v37 }
 0x18a   : > { %v9340_v14 = vpop.f32.mrf.mxu0 }
 0x18b   : > { %13357 = vst [vmem:[#allocation139_spill] sm:$0xff] %v9338_v40  ;;  %1819 = vmatmul.f32.gmra.mxu3 %v13358_v29  ;;  %2487 = vmatmul.f32.gmra.mxu1 %v8520_v2 }
 0x18d   : > { %1476 = vmatmul.f32.gmra.mxu2 %v8537_v9  ;;  %2213 = vmatmul.f32.gmra.mxu0 %v8520_v2 }
 0x18e   : > { %v1389_v58 = vpop.f32.mrf.mxu3 }
 0x190   : > { %v1067_v48 = vpop.f32.mrf.mxu2  ;;  %v9347_v52 = vpop.f32.mrf.mxu1 }
 0x191   : > { %v9349_v23 = vadd.f32 %v1389_v58, %v1067_v48  ;;  %v13362_v58 = vand.u32 4294901760, %v8584_v57 }
 0x192   : > { %v9351_v41 = vpop.f32.mrf.mxu0 }
 0x193   : > { %13359 = vst [vmem:[#allocation140_spill] sm:$0xff] %v9349_v23  ;;  %1825 = vmatmul.f32.gmra.mxu3 %v13360_v45  ;;  %2491 = vmatmul.f32.gmra.mxu1 %v8544_v19 }
 0x195   : > { %1481 = vmatmul.f32.gmra.mxu2 %v8561_v37  ;;  %2217 = vmatmul.f32.gmra.mxu0 %v8544_v19 }
 0x196   : > { %v1393_v9 = vpop.f32.mrf.mxu3 }
 0x198   : > { %v1075_v16 = vpop.f32.mrf.mxu2  ;;  %v9358_v2 = vpop.f32.mrf.mxu1 }
 0x199   : > { %v9360_v29 = vadd.f32 %v1393_v9, %v1075_v16  ;;  %v13364_v9 = vand.u32 4294901760, %v8609_v30 }
 0x19a   : > { %v9362_v40 = vpop.f32.mrf.mxu0 }
 0x19b   : > { %13361 = vst [vmem:[#allocation141_spill] sm:$0xff] %v9360_v29  ;;  %1831 = vmatmul.f32.gmra.mxu3 %v13362_v58  ;;  %2495 = vmatmul.f32.gmra.mxu1 %v8568_v46 }
 0x19d   : > { %1486 = vmatmul.f32.gmra.mxu2 %v8584_v57  ;;  %2221 = vmatmul.f32.gmra.mxu0 %v8568_v46 }
 0x19e   : > { %v1397_v37 = vpop.f32.mrf.mxu3 }
 0x1a0   : > { %v1083_v48 = vpop.f32.mrf.mxu2  ;;  %v9369_v19 = vpop.f32.mrf.mxu1 }
 0x1a1   : > { %v9371_v45 = vadd.f32 %v1397_v37, %v1083_v48  ;;  %v13366_v37 = vand.u32 4294901760, %v8633_v8 }
 0x1a2   : > { %v9373_v23 = vpop.f32.mrf.mxu0 }
 0x1a3   : > { %13363 = vst [vmem:[#allocation142_spill] sm:$0xff] %v9371_v45  ;;  %1837 = vmatmul.f32.gmra.mxu3 %v13364_v9  ;;  %2499 = vmatmul.f32.gmra.mxu1 %v8592_v7 }
 0x1a5   : > { %1491 = vmatmul.f32.gmra.mxu2 %v8609_v30  ;;  %2225 = vmatmul.f32.gmra.mxu0 %v8592_v7 }
 0x1a6   : > { %v1401_v57 = vpop.f32.mrf.mxu3 }
 0x1a8   : > { %v1091_v16 = vpop.f32.mrf.mxu2  ;;  %v9380_v46 = vpop.f32.mrf.mxu1 }
 0x1a9   : > { %v9382_v58 = vadd.f32 %v1401_v57, %v1091_v16  ;;  %v13368_v57 = vand.u32 4294901760, %v8656_v61 }
 0x1aa   : > { %v9384_v29 = vpop.f32.mrf.mxu0 }
 0x1ab   : > { %13365 = vst [vmem:[#allocation143_spill] sm:$0xff] %v9382_v58  ;;  %1843 = vmatmul.f32.gmra.mxu3 %v13366_v37  ;;  %2503 = vmatmul.f32.gmra.mxu1 %v8616_v50 }
 0x1ad   : > { %1496 = vmatmul.f32.gmra.mxu2 %v8633_v8  ;;  %2229 = vmatmul.f32.gmra.mxu0 %v8616_v50 }
 0x1ae   : > { %v1405_v30 = vpop.f32.mrf.mxu3 }
 0x1b0   : > { %v1099_v48 = vpop.f32.mrf.mxu2  ;;  %v9391_v7 = vpop.f32.mrf.mxu1 }
 0x1b1   : > { %v9393_v9 = vadd.f32 %v1405_v30, %v1099_v48  ;;  %v13370_v30 = vand.u32 4294901760, %v8681_v27 }
 0x1b2   : > { %v9395_v45 = vpop.f32.mrf.mxu0 }
 0x1b3   : > { %13367 = vst [vmem:[#allocation144_spill] sm:$0xff] %v9393_v9  ;;  %1849 = vmatmul.f32.gmra.mxu3 %v13368_v57  ;;  %2507 = vmatmul.f32.gmra.mxu1 %v8640_v43 }
 0x1b5   : > { %1501 = vmatmul.f32.gmra.mxu2 %v8656_v61  ;;  %2233 = vmatmul.f32.gmra.mxu0 %v8640_v43 }
 0x1b6   : > { %v1409_v8 = vpop.f32.mrf.mxu3 }
 0x1b8   : > { %v1107_v16 = vpop.f32.mrf.mxu2  ;;  %v9402_v50 = vpop.f32.mrf.mxu1 }
 0x1b9   : > { %v9404_v37 = vadd.f32 %v1409_v8, %v1107_v16  ;;  %v13372_v8 = vand.u32 4294901760, %v8705_v25 }
 0x1ba   : > { %v9406_v58 = vpop.f32.mrf.mxu0 }
 0x1bb   : > { %13369 = vst [vmem:[#allocation145_spill] sm:$0xff] %v9404_v37  ;;  %1855 = vmatmul.f32.gmra.mxu3 %v13370_v30  ;;  %2511 = vmatmul.f32.gmra.mxu1 %v8664_v34 }
 0x1bd   : > { %1506 = vmatmul.f32.gmra.mxu2 %v8681_v27  ;;  %2237 = vmatmul.f32.gmra.mxu0 %v8664_v34 }
 0x1be   : > { %v1413_v61 = vpop.f32.mrf.mxu3 }
 0x1c0   : > { %v1115_v48 = vpop.f32.mrf.mxu2  ;;  %v9413_v43 = vpop.f32.mrf.mxu1 }
 0x1c1   : > { %v9415_v57 = vadd.f32 %v1413_v61, %v1115_v48  ;;  %v13374_v61 = vand.u32 4294901760, %v8728_v53 }
 0x1c2   : > { %v9417_v9 = vpop.f32.mrf.mxu0 }
 0x1c3   : > { %13371 = vst [vmem:[#allocation146_spill] sm:$0xff] %v9415_v57  ;;  %1861 = vmatmul.f32.gmra.mxu3 %v13372_v8  ;;  %2515 = vmatmul.f32.gmra.mxu1 %v8688_v11 }
 0x1c5   : > { %1511 = vmatmul.f32.gmra.mxu2 %v8705_v25  ;;  %2241 = vmatmul.f32.gmra.mxu0 %v8688_v11 }
 0x1c6   : > { %v1417_v27 = vpop.f32.mrf.mxu3 }
 0x1c8   : > { %v1123_v16 = vpop.f32.mrf.mxu2  ;;  %v9424_v34 = vpop.f32.mrf.mxu1 }
 0x1c9   : > { %v9426_v30 = vadd.f32 %v1417_v27, %v1123_v16  ;;  %v13376_v27 = vand.u32 4294901760, %v8753_v62 }
 0x1ca   : > { %v9428_v37 = vpop.f32.mrf.mxu0 }
 0x1cb   : > { %13373 = vst [vmem:[#allocation147_spill] sm:$0xff] %v9426_v30  ;;  %1867 = vmatmul.f32.gmra.mxu3 %v13374_v61  ;;  %2519 = vmatmul.f32.gmra.mxu1 %v8712_v47 }
 0x1cd   : > { %1516 = vmatmul.f32.gmra.mxu2 %v8728_v53  ;;  %2245 = vmatmul.f32.gmra.mxu0 %v8712_v47 }
 0x1ce   : > { %v1421_v25 = vpop.f32.mrf.mxu3 }
 0x1d0   : > { %v1131_v48 = vpop.f32.mrf.mxu2  ;;  %v9435_v11 = vpop.f32.mrf.mxu1 }
 0x1d1   : > { %v9437_v8 = vadd.f32 %v1421_v25, %v1131_v48  ;;  %v13378_v25 = vand.u32 4294901760, %v8777_v1 }
 0x1d2   : > { %v9439_v57 = vpop.f32.mrf.mxu0 }
 0x1d3   : > { %13375 = vst [vmem:[#allocation148_spill] sm:$0xff] %v9437_v8  ;;  %1873 = vmatmul.f32.gmra.mxu3 %v13376_v27  ;;  %2523 = vmatmul.f32.gmra.mxu1 %v8736_v51 }
 0x1d5   : > { %1521 = vmatmul.f32.gmra.mxu2 %v8753_v62  ;;  %2249 = vmatmul.f32.gmra.mxu0 %v8736_v51 }
 0x1d6   : > { %v1425_v53 = vpop.f32.mrf.mxu3 }
 0x1d8   : > { %v1139_v16 = vpop.f32.mrf.mxu2  ;;  %v9446_v47 = vpop.f32.mrf.mxu1 }
 0x1d9   : > { %v9448_v61 = vadd.f32 %v1425_v53, %v1139_v16  ;;  %v13380_v53 = vand.u32 4294901760, %v8800_v44 }
 0x1da   : > { %v9450_v30 = vpop.f32.mrf.mxu0 }
 0x1db   : > { %13377 = vst [vmem:[#allocation149_spill] sm:$0xff] %v9448_v61  ;;  %1879 = vmatmul.f32.gmra.mxu3 %v13378_v25  ;;  %2527 = vmatmul.f32.gmra.mxu1 %v8760_v18 }
 0x1dd   : > { %1526 = vmatmul.f32.gmra.mxu2 %v8777_v1  ;;  %2253 = vmatmul.f32.gmra.mxu0 %v8760_v18 }
 0x1de   : > { %v1429_v62 = vpop.f32.mrf.mxu3 }
 0x1e0   : > { %v1147_v48 = vpop.f32.mrf.mxu2  ;;  %v9457_v51 = vpop.f32.mrf.mxu1 }
 0x1e1   : > { %v9459_v27 = vadd.f32 %v1429_v62, %v1147_v48  ;;  %v13382_v62 = vand.u32 4294901760, %v8825_v3 }
 0x1e2   : > { %v9461_v8 = vpop.f32.mrf.mxu0 }
 0x1e3   : > { %13379 = vst [vmem:[#allocation150_spill] sm:$0xff] %v9459_v27  ;;  %1885 = vmatmul.f32.gmra.mxu3 %v13380_v53  ;;  %2531 = vmatmul.f32.gmra.mxu1 %v8784_v13 }
 0x1e5   : > { %1531 = vmatmul.f32.gmra.mxu2 %v8800_v44  ;;  %2257 = vmatmul.f32.gmra.mxu0 %v8784_v13  ;;  %v1182_v44 = vadd.f32 %v8852_v20, %v8860_v55 }
 0x1e6   : > { %v1433_v1 = vpop.f32.mrf.mxu3 }
 0x1e8   : > { %v1155_v16 = vpop.f32.mrf.mxu2  ;;  %v2472_v18 = vpop.f32.mrf.mxu1 }
 0x1e9   : > { %v9468_v25 = vadd.f32 %v1433_v1, %v1155_v16  ;;  %v13383_v16 = vand.u32 4294901760, %v8849_v38 }
 0x1ea   : > { %v2198_v61 = vpop.f32.mrf.mxu0 }
 0x1eb   : > { %13381 = vst [vmem:[#allocation151_spill] sm:$0xff] %v9468_v25  ;;  %1891 = vmatmul.f32.gmra.mxu3 %v13382_v62  ;;  %2535 = vmatmul.f32.gmra.mxu1 %v8808_v59 }
 0x1ed   : > { %1536 = vmatmul.f32.gmra.mxu2 %v8825_v3  ;;  %2261 = vmatmul.f32.gmra.mxu0 %v8808_v59  ;;  %v13384_v59 = vld [vmem:[#allocation50_spill] sm:$0xff] }
 0x1ee   : > { %v1796_v48 = vpop.f32.mrf.mxu3  ;;  %v1186_v25 = vadd.f32 %v13384_v59, %v8890_v60  ;;  %v13390_v60 = vld [vmem:[#allocation56_spill] sm:$0xff] }
 0x1f0   : > { %v1457_v13 = vpop.f32.mrf.mxu2  ;;  %v2476_v53 = vpop.f32.mrf.mxu1 }
 0x1f1   : > { %v1458_v27 = vadd.f32 %v1457_v13, %v1182_v44 }
 0x1f2   : > { %v2202_v6 = vpop.f32.mrf.mxu0 }
 0x1f3   : > { %v1797_v1 = vadd.f32 %v1796_v48, %v1458_v27  ;;  %1897 = vmatmul.f32.gmra.mxu3 %v13383_v16  ;;  %2539 = vmatmul.f32.gmra.mxu1 %v8832_v49  ;;  %v13387_v16 = vand.u32 4294901760, %v13386_v5 }
 0x1f5   : > { %v2199_v62 = vadd.f32 %v2198_v61, %v1797_v1  ;;  %1541 = vmatmul.f32.gmra.mxu2 %v8849_v38  ;;  %2265 = vmatmul.f32.gmra.mxu0 %v8832_v49  ;;  %v13389_v38 = vld [vmem:[#allocation60_spill] sm:$0xff] }
 0x1f6   : > { %v1802_v3 = vpop.f32.mrf.mxu3 }
 0x1f7   : > { %v9484_v20 = vadd.f32 %v2472_v18, %v2199_v62  ;;  %v1190_v18 = vadd.f32 %v13390_v60, %v13389_v38 }
 0x1f8   : > { %v1462_v55 = vpop.f32.mrf.mxu2  ;;  %v2480_v44 = vpop.f32.mrf.mxu1 }
 0x1f9   : > { %13385 = vst [vmem:[#allocation50_spill] sm:$0xff] %v9484_v20  ;;  %v1463_v13 = vadd.f32 %v1462_v55, %v1186_v25  ;;  %v13394_v20 = vld [vmem:[#allocation53_spill] sm:$0xff] }
 0x1fa   : > { %v2206_v27 = vpop.f32.mrf.mxu0 }
 0x1fb   : > { %v1803_v48 = vadd.f32 %v1802_v3, %v1463_v13  ;;  %1903 = vmatmul.f32.gmra.mxu3 %v13387_v16  ;;  %2543 = vmatmul.f32.gmra.mxu1 %v13388_v56  ;;  %v13392_v13 = vld [vmem:[#allocation55_spill] sm:$0xff] }
 0x1fc   : > { %v13393_v16 = vand.u32 4294901760, %v13392_v13 }
 0x1fd   : > { %v2203_v61 = vadd.f32 %v2202_v6, %v1803_v48  ;;  %1546 = vmatmul.f32.gmra.mxu2 %v13386_v5  ;;  %2269 = vmatmul.f32.gmra.mxu0 %v13388_v56  ;;  %v13395_v5 = vld [vmem:[#allocation67_spill] sm:$0xff] }
 0x1fe   : > { %v1808_v49 = vpop.f32.mrf.mxu3  ;;  %v13396_v48 = vld [vmem:[#allocation63_spill] sm:$0xff] }
 0x1ff   : > { %v9493_v1 = vadd.f32 %v2476_v53, %v2203_v61  ;;  %v1194_v53 = vadd.f32 %v13396_v48, %v13395_v5 }
 0x200   : > { %v1467_v62 = vpop.f32.mrf.mxu2  ;;  %v2484_v25 = vpop.f32.mrf.mxu1 }
 0x201   : > { %13391 = vst [vmem:[#allocation49_spill] sm:$0xff] %v9493_v1  ;;  %v1468_v59 = vadd.f32 %v1467_v62, %v1190_v18  ;;  %v13400_v1 = vld [vmem:[#allocation59_spill] sm:$0xff] }
 0x202   : > { %v2210_v3 = vpop.f32.mrf.mxu0 }
 0x203   : > { %v1809_v55 = vadd.f32 %v1808_v49, %v1468_v59  ;;  %1909 = vmatmul.f32.gmra.mxu3 %v13393_v16  ;;  %2547 = vmatmul.f32.gmra.mxu1 %v13394_v20  ;;  %v13398_v59 = vld [vmem:[#allocation62_spill] sm:$0xff] }
 0x204   : > { %v13399_v16 = vand.u32 4294901760, %v13398_v59 }
 0x205   : > { %v2207_v6 = vadd.f32 %v2206_v27, %v1809_v55  ;;  %1551 = vmatmul.f32.gmra.mxu2 %v13392_v13  ;;  %2273 = vmatmul.f32.gmra.mxu0 %v13394_v20  ;;  %v13401_v55 = vld [vmem:[#allocation74_spill] sm:$0xff] }
 0x206   : > { %v1814_v56 = vpop.f32.mrf.mxu3  ;;  %v13402_v13 = vld [vmem:[#allocation70_spill] sm:$0xff] }
 0x207   : > { %v9502_v61 = vadd.f32 %v2480_v44, %v2207_v6  ;;  %v1198_v44 = vadd.f32 %v13402_v13, %v13401_v55 }
 0x208   : > { %v1472_v38 = vpop.f32.mrf.mxu2  ;;  %v2488_v60 = vpop.f32.mrf.mxu1 }
 0x209   : > { %13397 = vst [vmem:[#allocation47_spill] sm:$0xff] %v9502_v61  ;;  %v1473_v18 = vadd.f32 %v1472_v38, %v1194_v53  ;;  %v13406_v61 = vld [vmem:[#allocation66_spill] sm:$0xff] }
 0x20a   : > { %v2214_v49 = vpop.f32.mrf.mxu0 }
 0x20b   : > { %v1815_v62 = vadd.f32 %v1814_v56, %v1473_v18  ;;  %1915 = vmatmul.f32.gmra.mxu3 %v13399_v16  ;;  %2551 = vmatmul.f32.gmra.mxu1 %v13400_v1  ;;  %v13404_v18 = vld [vmem:[#allocation69_spill] sm:$0xff] }
 0x20c   : > { %v13405_v16 = vand.u32 4294901760, %v13404_v18 }
 0x20d   : > { %v2211_v27 = vadd.f32 %v2210_v3, %v1815_v62  ;;  %1556 = vmatmul.f32.gmra.mxu2 %v13398_v59  ;;  %2277 = vmatmul.f32.gmra.mxu0 %v13400_v1  ;;  %v13407_v62 = vld [vmem:[#allocation81_spill] sm:$0xff] }
 0x20e   : > { %v1820_v20 = vpop.f32.mrf.mxu3  ;;  %v13408_v59 = vld [vmem:[#allocation77_spill] sm:$0xff] }
 0x20f   : > { %v9511_v6 = vadd.f32 %v2484_v25, %v2211_v27  ;;  %v1202_v25 = vadd.f32 %v13408_v59, %v13407_v62 }
 0x210   : > { %v1477_v5 = vpop.f32.mrf.mxu2  ;;  %v2492_v48 = vpop.f32.mrf.mxu1 }
 0x211   : > { %13403 = vst [vmem:[#allocation60_spill] sm:$0xff] %v9511_v6  ;;  %v1478_v53 = vadd.f32 %v1477_v5, %v1198_v44  ;;  %v13412_v6 = vld [vmem:[#allocation73_spill] sm:$0xff] }
 0x212   : > { %v2218_v56 = vpop.f32.mrf.mxu0 }
 0x213   : > { %v1821_v38 = vadd.f32 %v1820_v20, %v1478_v53  ;;  %1921 = vmatmul.f32.gmra.mxu3 %v13405_v16  ;;  %2555 = vmatmul.f32.gmra.mxu1 %v13406_v61  ;;  %v13410_v53 = vld [vmem:[#allocation76_spill] sm:$0xff] }
 0x214   : > { %v13411_v16 = vand.u32 4294901760, %v13410_v53 }
 0x215   : > { %v2215_v3 = vadd.f32 %v2214_v49, %v1821_v38  ;;  %1561 = vmatmul.f32.gmra.mxu2 %v13404_v18  ;;  %2281 = vmatmul.f32.gmra.mxu0 %v13406_v61  ;;  %v13413_v38 = vld [vmem:[#allocation88_spill] sm:$0xff] }
 0x216   : > { %v1826_v1 = vpop.f32.mrf.mxu3  ;;  %v13414_v18 = vld [vmem:[#allocation84_spill] sm:$0xff] }
 0x217   : > { %v9520_v27 = vadd.f32 %v2488_v60, %v2215_v3  ;;  %v1206_v60 = vadd.f32 %v13414_v18, %v13413_v38 }
 0x218   : > { %v1482_v55 = vpop.f32.mrf.mxu2  ;;  %v2496_v13 = vpop.f32.mrf.mxu1 }
 0x219   : > { %13409 = vst [vmem:[#allocation56_spill] sm:$0xff] %v9520_v27  ;;  %v1483_v44 = vadd.f32 %v1482_v55, %v1202_v25  ;;  %v13418_v27 = vld [vmem:[#allocation80_spill] sm:$0xff] }
 0x21a   : > { %v2222_v20 = vpop.f32.mrf.mxu0 }
 0x21b   : > { %v1827_v5 = vadd.f32 %v1826_v1, %v1483_v44  ;;  %1927 = vmatmul.f32.gmra.mxu3 %v13411_v16  ;;  %2559 = vmatmul.f32.gmra.mxu1 %v13412_v6  ;;  %v13416_v44 = vld [vmem:[#allocation83_spill] sm:$0xff] }
 0x21c   : > { %v13417_v16 = vand.u32 4294901760, %v13416_v44 }
 0x21d   : > { %v2219_v49 = vadd.f32 %v2218_v56, %v1827_v5  ;;  %1566 = vmatmul.f32.gmra.mxu2 %v13410_v53  ;;  %2285 = vmatmul.f32.gmra.mxu0 %v13412_v6  ;;  %v13419_v5 = vld [vmem:[#allocation95_spill] sm:$0xff] }
 0x21e   : > { %v1832_v61 = vpop.f32.mrf.mxu3  ;;  %v13420_v53 = vld [vmem:[#allocation91_spill] sm:$0xff] }
 0x21f   : > { %v9529_v3 = vadd.f32 %v2492_v48, %v2219_v49  ;;  %v1210_v48 = vadd.f32 %v13420_v53, %v13419_v5 }
 0x220   : > { %v1487_v62 = vpop.f32.mrf.mxu2  ;;  %v2500_v59 = vpop.f32.mrf.mxu1 }
 0x221   : > { %13415 = vst [vmem:[#allocation55_spill] sm:$0xff] %v9529_v3  ;;  %v1488_v25 = vadd.f32 %v1487_v62, %v1206_v60  ;;  %v13424_v3 = vld [vmem:[#allocation87_spill] sm:$0xff] }
 0x222   : > { %v2226_v1 = vpop.f32.mrf.mxu0 }
 0x223   : > { %v1833_v55 = vadd.f32 %v1832_v61, %v1488_v25  ;;  %1933 = vmatmul.f32.gmra.mxu3 %v13417_v16  ;;  %2563 = vmatmul.f32.gmra.mxu1 %v13418_v27  ;;  %v13422_v25 = vld [vmem:[#allocation90_spill] sm:$0xff] }
 0x224   : > { %v13423_v16 = vand.u32 4294901760, %v13422_v25 }
 0x225   : > { %v2223_v56 = vadd.f32 %v2222_v20, %v1833_v55  ;;  %1571 = vmatmul.f32.gmra.mxu2 %v13416_v44  ;;  %2289 = vmatmul.f32.gmra.mxu0 %v13418_v27  ;;  %v13425_v55 = vld [vmem:[#allocation102_spill] sm:$0xff] }
 0x226   : > { %v1838_v6 = vpop.f32.mrf.mxu3  ;;  %v13426_v44 = vld [vmem:[#allocation98_spill] sm:$0xff] }
 0x227   : > { %v9538_v49 = vadd.f32 %v2496_v13, %v2223_v56  ;;  %v1214_v13 = vadd.f32 %v13426_v44, %v13425_v55 }
 0x228   : > { %v1492_v38 = vpop.f32.mrf.mxu2  ;;  %v2504_v18 = vpop.f32.mrf.mxu1 }
 0x229   : > { %13421 = vst [vmem:[#allocation53_spill] sm:$0xff] %v9538_v49  ;;  %v1493_v60 = vadd.f32 %v1492_v38, %v1210_v48  ;;  %v13430_v49 = vld [vmem:[#allocation94_spill] sm:$0xff] }
 0x22a   : > { %v2230_v61 = vpop.f32.mrf.mxu0 }
 0x22b   : > { %v1839_v62 = vadd.f32 %v1838_v6, %v1493_v60  ;;  %1939 = vmatmul.f32.gmra.mxu3 %v13423_v16  ;;  %2567 = vmatmul.f32.gmra.mxu1 %v13424_v3  ;;  %v13428_v60 = vld [vmem:[#allocation97_spill] sm:$0xff] }
 0x22c   : > { %v13429_v16 = vand.u32 4294901760, %v13428_v60 }
 0x22d   : > { %v2227_v20 = vadd.f32 %v2226_v1, %v1839_v62  ;;  %1576 = vmatmul.f32.gmra.mxu2 %v13422_v25  ;;  %2293 = vmatmul.f32.gmra.mxu0 %v13424_v3  ;;  %v13431_v62 = vld [vmem:[#allocation109_spill] sm:$0xff] }
 0x22e   : > { %v1844_v27 = vpop.f32.mrf.mxu3  ;;  %v13432_v25 = vld [vmem:[#allocation105_spill] sm:$0xff] }
 0x22f   : > { %v9547_v56 = vadd.f32 %v2500_v59, %v2227_v20  ;;  %v1218_v59 = vadd.f32 %v13432_v25, %v13431_v62 }
 0x230   : > { %v1497_v5 = vpop.f32.mrf.mxu2  ;;  %v2508_v53 = vpop.f32.mrf.mxu1 }
 0x231   : > { %13427 = vst [vmem:[#allocation67_spill] sm:$0xff] %v9547_v56  ;;  %v1498_v48 = vadd.f32 %v1497_v5, %v1214_v13  ;;  %v13436_v56 = vld [vmem:[#allocation101_spill] sm:$0xff] }
 0x232   : > { %v2234_v6 = vpop.f32.mrf.mxu0 }
 0x233   : > { %v1845_v38 = vadd.f32 %v1844_v27, %v1498_v48  ;;  %1945 = vmatmul.f32.gmra.mxu3 %v13429_v16  ;;  %2571 = vmatmul.f32.gmra.mxu1 %v13430_v49  ;;  %v13434_v48 = vld [vmem:[#allocation104_spill] sm:$0xff] }
 0x234   : > { %v13435_v16 = vand.u32 4294901760, %v13434_v48 }
 0x235   : > { %v2231_v1 = vadd.f32 %v2230_v61, %v1845_v38  ;;  %1581 = vmatmul.f32.gmra.mxu2 %v13428_v60  ;;  %2297 = vmatmul.f32.gmra.mxu0 %v13430_v49  ;;  %v13437_v38 = vld [vmem:[#allocation116_spill] sm:$0xff] }
 0x236   : > { %v1850_v3 = vpop.f32.mrf.mxu3  ;;  %v13438_v60 = vld [vmem:[#allocation112_spill] sm:$0xff] }
 0x237   : > { %v9556_v20 = vadd.f32 %v2504_v18, %v2231_v1  ;;  %v1222_v18 = vadd.f32 %v13438_v60, %v13437_v38 }
 0x238   : > { %v1502_v55 = vpop.f32.mrf.mxu2  ;;  %v2512_v44 = vpop.f32.mrf.mxu1 }
 0x239   : > { %13433 = vst [vmem:[#allocation63_spill] sm:$0xff] %v9556_v20  ;;  %v1503_v13 = vadd.f32 %v1502_v55, %v1218_v59  ;;  %v13442_v20 = vld [vmem:[#allocation108_spill] sm:$0xff] }
 0x23a   : > { %v2238_v27 = vpop.f32.mrf.mxu0 }
 0x23b   : > { %v1851_v5 = vadd.f32 %v1850_v3, %v1503_v13  ;;  %1951 = vmatmul.f32.gmra.mxu3 %v13435_v16  ;;  %2575 = vmatmul.f32.gmra.mxu1 %v13436_v56  ;;  %v13440_v13 = vld [vmem:[#allocation111_spill] sm:$0xff] }
 0x23c   : > { %v13441_v16 = vand.u32 4294901760, %v13440_v13 }
 0x23d   : > { %v2235_v61 = vadd.f32 %v2234_v6, %v1851_v5  ;;  %1586 = vmatmul.f32.gmra.mxu2 %v13434_v48  ;;  %2301 = vmatmul.f32.gmra.mxu0 %v13436_v56  ;;  %v13443_v5 = vld [vmem:[#allocation123_spill] sm:$0xff] }
 0x23e   : > { %v1856_v49 = vpop.f32.mrf.mxu3  ;;  %v13444_v48 = vld [vmem:[#allocation119_spill] sm:$0xff] }
 0x23f   : > { %v9565_v1 = vadd.f32 %v2508_v53, %v2235_v61  ;;  %v1226_v53 = vadd.f32 %v13444_v48, %v13443_v5 }
 0x240   : > { %v1507_v62 = vpop.f32.mrf.mxu2  ;;  %v2516_v25 = vpop.f32.mrf.mxu1 }
 0x241   : > { %13439 = vst [vmem:[#allocation62_spill] sm:$0xff] %v9565_v1  ;;  %v1508_v59 = vadd.f32 %v1507_v62, %v1222_v18  ;;  %v13448_v1 = vld [vmem:[#allocation115_spill] sm:$0xff] }
 0x242   : > { %v2242_v3 = vpop.f32.mrf.mxu0 }
 0x243   : > { %v1857_v55 = vadd.f32 %v1856_v49, %v1508_v59  ;;  %1957 = vmatmul.f32.gmra.mxu3 %v13441_v16  ;;  %2579 = vmatmul.f32.gmra.mxu1 %v13442_v20  ;;  %v13446_v59 = vld [vmem:[#allocation118_spill] sm:$0xff] }
 0x244   : > { %v13447_v16 = vand.u32 4294901760, %v13446_v59 }
 0x245   : > { %v2239_v6 = vadd.f32 %v2238_v27, %v1857_v55  ;;  %1591 = vmatmul.f32.gmra.mxu2 %v13440_v13  ;;  %2305 = vmatmul.f32.gmra.mxu0 %v13442_v20  ;;  %v13449_v55 = vld [vmem:[#allocation128_spill] sm:$0xff]  ;;  %v13450_v13 = vld [vmem:[#allocation126_spill] sm:$0xff] }
 0x246   : > { %v1862_v56 = vpop.f32.mrf.mxu3 }
 0x247   : > { %v9574_v61 = vadd.f32 %v2512_v44, %v2239_v6  ;;  %v1230_v44 = vadd.f32 %v13450_v13, %v13449_v55 }
 0x248   : > { %v1512_v38 = vpop.f32.mrf.mxu2  ;;  %v2520_v60 = vpop.f32.mrf.mxu1 }
 0x249   : > { %13445 = vst [vmem:[#allocation59_spill] sm:$0xff] %v9574_v61  ;;  %v1513_v18 = vadd.f32 %v1512_v38, %v1226_v53  ;;  %v13453_v61 = vld [vmem:[#allocation121_spill] sm:$0xff] }
 0x24a   : > { %v2246_v49 = vpop.f32.mrf.mxu0 }
 0x24b   : > { %v1863_v62 = vadd.f32 %v1862_v56, %v1513_v18  ;;  %1963 = vmatmul.f32.gmra.mxu3 %v13447_v16  ;;  %2583 = vmatmul.f32.gmra.mxu1 %v13448_v1  ;;  %v13451_v18 = vld [vmem:[#allocation125_spill] sm:$0xff] }
 0x24c   : > { %v13452_v16 = vand.u32 4294901760, %v13451_v18 }
 0x24d   : > { %v2243_v27 = vadd.f32 %v2242_v3, %v1863_v62  ;;  %1596 = vmatmul.f32.gmra.mxu2 %v13446_v59  ;;  %2309 = vmatmul.f32.gmra.mxu0 %v13448_v1  ;;  %v13454_v62 = vld [vmem:[#allocation133_spill] sm:$0xff]  ;;  %v13455_v59 = vld [vmem:[#allocation130_spill] sm:$0xff] }
 0x24e   : > { %v1868_v20 = vpop.f32.mrf.mxu3 }
 0x24f   : > { %v9583_v6 = vadd.f32 %v2516_v25, %v2243_v27  ;;  %v1234_v25 = vadd.f32 %v13455_v59, %v13454_v62  ;;  %v13457_v59 = vand.u32 4294901760, %v9266_v22 }
 0x250   : > { %v1517_v5 = vpop.f32.mrf.mxu2  ;;  %v2524_v48 = vpop.f32.mrf.mxu1 }
 0x251   : > { %v1518_v53 = vadd.f32 %v1517_v5, %v1230_v44 }
 0x252   : > { %v2250_v56 = vpop.f32.mrf.mxu0 }
 0x253   : > { %v1869_v38 = vadd.f32 %v1868_v20, %v1518_v53  ;;  %1969 = vmatmul.f32.gmra.mxu3 %v13452_v16  ;;  %2587 = vmatmul.f32.gmra.mxu1 %v13453_v61  ;;  %v13456_v53 = vand.u32 4294901760, %v9237_v10 }
 0x255   : > { %v2247_v3 = vadd.f32 %v2246_v49, %v1869_v38  ;;  %1601 = vmatmul.f32.gmra.mxu2 %v13451_v18  ;;  %2313 = vmatmul.f32.gmra.mxu0 %v13453_v61 }
 0x256   : > { %v1874_v1 = vpop.f32.mrf.mxu3 }
 0x257   : > { %v9592_v27 = vadd.f32 %v2520_v60, %v2247_v3  ;;  %v1238_v60 = vadd.f32 %v9268_v28, %v9274_v54  ;;  %v1242_v28 = vadd.f32 %v9284_v31, %v9288_v17  ;;  %v1246_v17 = vadd.f32 %v9292_v0, %v9296_v35 }
 0x258   : > { %v1522_v55 = vpop.f32.mrf.mxu2  ;;  %v2528_v13 = vpop.f32.mrf.mxu1  ;;  %v1250_v35 = vadd.f32 %v9303_v4, %v9307_v39  ;;  %v1254_v4 = vadd.f32 %v9314_v63, %v9318_v42  ;;  %v1258_v63 = vadd.f32 %v9325_v24, %v9329_v12  ;;  %v1262_v24 = vadd.f32 %v9336_v36, %v9340_v14 }
 0x259   : > { %v1523_v44 = vadd.f32 %v1522_v55, %v1234_v25  ;;  %v1266_v14 = vadd.f32 %v9347_v52, %v9351_v41  ;;  %v1270_v41 = vadd.f32 %v9358_v2, %v9362_v40  ;;  %v1274_v40 = vadd.f32 %v9369_v19, %v9373_v23 }
 0x25a   : > { %v2254_v20 = vpop.f32.mrf.mxu0  ;;  %v1278_v23 = vadd.f32 %v9380_v46, %v9384_v29  ;;  %v1282_v29 = vadd.f32 %v9391_v7, %v9395_v45  ;;  %v1286_v45 = vadd.f32 %v9402_v50, %v9406_v58  ;;  %v1290_v58 = vadd.f32 %v9413_v43, %v9417_v9 }
 0x25b   : > { %v1875_v5 = vadd.f32 %v1874_v1, %v1523_v44  ;;  %1975 = vmatmul.f32.gmra.mxu3 %v13456_v53  ;;  %2591 = vmatmul.f32.gmra.mxu1 %v9218_v15  ;;  %v1294_v9 = vadd.f32 %v9424_v34, %v9428_v37  ;;  %v1298_v37 = vadd.f32 %v9435_v11, %v9439_v57 }
 0x25c   : > { %v1302_v57 = vadd.f32 %v9446_v47, %v9450_v30  ;;  %v1306_v30 = vadd.f32 %v9457_v51, %v9461_v8 }
 0x25d   : > { %v2251_v49 = vadd.f32 %v2250_v56, %v1875_v5  ;;  %1606 = vmatmul.f32.gmra.mxu2 %v9237_v10  ;;  %2317 = vmatmul.f32.gmra.mxu0 %v9218_v15  ;;  %v13458_v5 = vld [vmem:[#allocation12_spill] sm:$0xff] }
 0x25e   : > { %v1880_v61 = vpop.f32.mrf.mxu3  ;;  %v13459_v53 = vand.u32 4294901760, %v13458_v5 }
 0x25f   : > { %v9601_v38 = vadd.f32 %v2524_v48, %v2251_v49  ;;  %v13460_v49 = vld [vmem:[#allocation10_spill] sm:$0xff] }
 0x260   : > { %v1527_v18 = vpop.f32.mrf.mxu2  ;;  %v2532_v16 = vpop.f32.mrf.mxu1 }
 0x261   : > { %v1528_v3 = vadd.f32 %v1527_v18, %v1238_v60 }
 0x262   : > { %v2258_v1 = vpop.f32.mrf.mxu0 }
 0x263   : > { %v1881_v62 = vadd.f32 %v1880_v61, %v1528_v3  ;;  %1981 = vmatmul.f32.gmra.mxu3 %v13457_v59  ;;  %2595 = vmatmul.f32.gmra.mxu1 %v9250_v33  ;;  %v13461_v3 = vld [vmem:[#allocation13_spill] sm:$0xff]  ;;  %v13463_v59 = vld [vmem:[#allocation11_spill] sm:$0xff] }
 0x265   : > { %v2255_v56 = vadd.f32 %v2254_v20, %v1881_v62  ;;  %1611 = vmatmul.f32.gmra.mxu2 %v9266_v22  ;;  %2321 = vmatmul.f32.gmra.mxu0 %v9250_v33  ;;  %v13462_v62 = vand.u32 4294901760, %v13461_v3 }
 0x266   : > { %v1886_v15 = vpop.f32.mrf.mxu3 }
 0x267   : > { %v9610_v54 = vadd.f32 %v2528_v13, %v2255_v56 }
 0x268   : > { %v1532_v10 = vpop.f32.mrf.mxu2  ;;  %v2536_v48 = vpop.f32.mrf.mxu1 }
 0x269   : > { %v1533_v25 = vadd.f32 %v1532_v10, %v1242_v28 }
 0x26a   : > { %v2262_v55 = vpop.f32.mrf.mxu0 }
 0x26b   : > { %v1887_v44 = vadd.f32 %v1886_v15, %v1533_v25  ;;  %1987 = vmatmul.f32.gmra.mxu3 %v13459_v53  ;;  %2599 = vmatmul.f32.gmra.mxu1 %v13460_v49  ;;  %v13466_v53 = vld [vmem:[#allocation14_spill] sm:$0xff] }
 0x26d   : > { %v2259_v20 = vadd.f32 %v2258_v1, %v1887_v44  ;;  %1616 = vmatmul.f32.gmra.mxu2 %v13458_v5  ;;  %2325 = vmatmul.f32.gmra.mxu0 %v13460_v49  ;;  %v13464_v44 = vld [vmem:[#allocation15_spill] sm:$0xff] }
 0x26e   : > { %v1892_v33 = vpop.f32.mrf.mxu3  ;;  %v13465_v5 = vand.u32 4294901760, %v13464_v44 }
 0x26f   : > { %v9619_v22 = vadd.f32 %v2532_v16, %v2259_v20 }
 0x270   : > { %v1537_v31 = vpop.f32.mrf.mxu2  ;;  %v2540_v13 = vpop.f32.mrf.mxu1 }
 0x271   : > { %v1538_v61 = vadd.f32 %v1537_v31, %v1246_v17 }
 0x272   : > { %v2266_v60 = vpop.f32.mrf.mxu0 }
 0x273   : > { %v1893_v18 = vadd.f32 %v1892_v33, %v1538_v61  ;;  %1993 = vmatmul.f32.gmra.mxu3 %v13462_v62  ;;  %2603 = vmatmul.f32.gmra.mxu1 %v13463_v59  ;;  %v13467_v61 = vld [vmem:[#allocation17_spill] sm:$0xff] }
 0x275   : > { %v2263_v1 = vadd.f32 %v2262_v55, %v1893_v18  ;;  %1621 = vmatmul.f32.gmra.mxu2 %v13461_v3  ;;  %2329 = vmatmul.f32.gmra.mxu0 %v13463_v59  ;;  %v13468_v18 = vand.u32 4294901760, %v13467_v61  ;;  %v13469_v3 = vld [vmem:[#allocation16_spill] sm:$0xff] }
 0x276   : > { %v1898_v56 = vpop.f32.mrf.mxu3 }
 0x277   : > { %v9628_v0 = vadd.f32 %v2536_v48, %v2263_v1 }
 0x278   : > { %v1542_v16 = vpop.f32.mrf.mxu2  ;;  %v2544_v15 = vpop.f32.mrf.mxu1 }
 0x279   : > { %v1543_v28 = vadd.f32 %v1542_v16, %v1250_v35  ;;  %v13470_v16 = vld [vmem:[#allocation19_spill] sm:$0xff] }
 0x27a   : > { %v2270_v10 = vpop.f32.mrf.mxu0 }
 0x27b   : > { %v1899_v25 = vadd.f32 %v1898_v56, %v1543_v28  ;;  %1999 = vmatmul.f32.gmra.mxu3 %v13465_v5  ;;  %2607 = vmatmul.f32.gmra.mxu1 %v13466_v53  ;;  %v13471_v28 = vand.u32 4294901760, %v13470_v16 }
 0x27d   : > { %v2267_v55 = vadd.f32 %v2266_v60, %v1899_v25  ;;  %1626 = vmatmul.f32.gmra.mxu2 %v13464_v44  ;;  %2333 = vmatmul.f32.gmra.mxu0 %v13466_v53  ;;  %v13472_v25 = vld [vmem:[#allocation18_spill] sm:$0xff] }
 0x27e   : > { %v1904_v49 = vpop.f32.mrf.mxu3 }
 0x27f   : > { %v9637_v39 = vadd.f32 %v2540_v13, %v2267_v55 }
 0x280   : > { %v1547_v48 = vpop.f32.mrf.mxu2  ;;  %v2548_v20 = vpop.f32.mrf.mxu1 }
 0x281   : > { %v1548_v33 = vadd.f32 %v1547_v48, %v1254_v4  ;;  %v13473_v4 = vld [vmem:[#allocation21_spill] sm:$0xff] }
 0x282   : > { %v2274_v17 = vpop.f32.mrf.mxu0  ;;  %v13474_v48 = vand.u32 4294901760, %v13473_v4 }
 0x283   : > { %v1905_v31 = vadd.f32 %v1904_v49, %v1548_v33  ;;  %2005 = vmatmul.f32.gmra.mxu3 %v13468_v18  ;;  %2611 = vmatmul.f32.gmra.mxu1 %v13469_v3  ;;  %v13475_v33 = vld [vmem:[#allocation20_spill] sm:$0xff] }
 0x285   : > { %v2271_v60 = vadd.f32 %v2270_v10, %v1905_v31  ;;  %1631 = vmatmul.f32.gmra.mxu2 %v13467_v61  ;;  %2337 = vmatmul.f32.gmra.mxu0 %v13469_v3 }
 0x286   : > { %v1910_v62 = vpop.f32.mrf.mxu3 }
 0x287   : > { %v9646_v42 = vadd.f32 %v2544_v15, %v2271_v60 }
 0x288   : > { %v1552_v13 = vpop.f32.mrf.mxu2  ;;  %v2552_v59 = vpop.f32.mrf.mxu1 }
 0x289   : > { %v1553_v1 = vadd.f32 %v1552_v13, %v1258_v63  ;;  %v13478_v13 = vld [vmem:[#allocation22_spill] sm:$0xff] }
 0x28a   : > { %v2278_v56 = vpop.f32.mrf.mxu0 }
 0x28b   : > { %v1911_v35 = vadd.f32 %v1910_v62, %v1553_v1  ;;  %2011 = vmatmul.f32.gmra.mxu3 %v13471_v28  ;;  %2615 = vmatmul.f32.gmra.mxu1 %v13472_v25  ;;  %v13476_v62 = vld [vmem:[#allocation23_spill] sm:$0xff] }
 0x28c   : > { %v13477_v63 = vand.u32 4294901760, %v13476_v62 }
 0x28d   : > { %v2275_v10 = vadd.f32 %v2274_v17, %v1911_v35  ;;  %1636 = vmatmul.f32.gmra.mxu2 %v13470_v16  ;;  %2341 = vmatmul.f32.gmra.mxu0 %v13472_v25 }
 0x28e   : > { %v1916_v44 = vpop.f32.mrf.mxu3 }
 0x28f   : > { %v9655_v12 = vadd.f32 %v2548_v20, %v2275_v10  ;;  %v13479_v10 = vld [vmem:[#allocation25_spill] sm:$0xff] }
 0x290   : > { %v1557_v15 = vpop.f32.mrf.mxu2  ;;  %v2556_v5 = vpop.f32.mrf.mxu1 }
 0x291   : > { %v1558_v53 = vadd.f32 %v1557_v15, %v1262_v24  ;;  %v13481_v24 = vld [vmem:[#allocation24_spill] sm:$0xff] }
 0x292   : > { %v2282_v55 = vpop.f32.mrf.mxu0 }
 0x293   : > { %v1917_v49 = vadd.f32 %v1916_v44, %v1558_v53  ;;  %2017 = vmatmul.f32.gmra.mxu3 %v13474_v48  ;;  %2619 = vmatmul.f32.gmra.mxu1 %v13475_v33  ;;  %v13480_v44 = vand.u32 4294901760, %v13479_v10 }
 0x295   : > { %v2279_v17 = vadd.f32 %v2278_v56, %v1917_v49  ;;  %1641 = vmatmul.f32.gmra.mxu2 %v13473_v4  ;;  %2345 = vmatmul.f32.gmra.mxu0 %v13475_v33  ;;  %v13482_v33 = vld [vmem:[#allocation27_spill] sm:$0xff] }
 0x296   : > { %v1922_v31 = vpop.f32.mrf.mxu3 }
 0x297   : > { %v9664_v36 = vadd.f32 %v2552_v59, %v2279_v17  ;;  %v13483_v17 = vand.u32 4294901760, %v13482_v33 }
 0x298   : > { %v1562_v20 = vpop.f32.mrf.mxu2  ;;  %v2560_v61 = vpop.f32.mrf.mxu1 }
 0x299   : > { %v1563_v18 = vadd.f32 %v1562_v20, %v1266_v14 }
 0x29a   : > { %v2286_v3 = vpop.f32.mrf.mxu0 }
 0x29b   : > { %v1923_v60 = vadd.f32 %v1922_v31, %v1563_v18  ;;  %2023 = vmatmul.f32.gmra.mxu3 %v13477_v63  ;;  %2623 = vmatmul.f32.gmra.mxu1 %v13478_v13  ;;  %v13484_v31 = vld [vmem:[#allocation26_spill] sm:$0xff]  ;;  %v13485_v63 = vld [vmem:[#allocation29_spill] sm:$0xff] }
 0x29d   : > { %v2283_v1 = vadd.f32 %v2282_v55, %v1923_v60  ;;  %1646 = vmatmul.f32.gmra.mxu2 %v13476_v62  ;;  %2349 = vmatmul.f32.gmra.mxu0 %v13478_v13  ;;  %v13486_v13 = vand.u32 4294901760, %v13485_v63 }
 0x29e   : > { %v1928_v56 = vpop.f32.mrf.mxu3 }
 0x29f   : > { %v9673_v52 = vadd.f32 %v2556_v5, %v2283_v1  ;;  %v13487_v1 = vld [vmem:[#allocation28_spill] sm:$0xff] }
 0x2a0   : > { %v1567_v59 = vpop.f32.mrf.mxu2  ;;  %v2564_v35 = vpop.f32.mrf.mxu1 }
 0x2a1   : > { %v1568_v16 = vadd.f32 %v1567_v59, %v1270_v41 }
 0x2a2   : > { %v2290_v28 = vpop.f32.mrf.mxu0 }
 0x2a3   : > { %v1929_v25 = vadd.f32 %v1928_v56, %v1568_v16  ;;  %2029 = vmatmul.f32.gmra.mxu3 %v13480_v44  ;;  %2627 = vmatmul.f32.gmra.mxu1 %v13481_v24 }
 0x2a5   : > { %v2287_v15 = vadd.f32 %v2286_v3, %v1929_v25  ;;  %1651 = vmatmul.f32.gmra.mxu2 %v13479_v10  ;;  %2353 = vmatmul.f32.gmra.mxu0 %v13481_v24  ;;  %v13488_v10 = vld [vmem:[#allocation31_spill] sm:$0xff]  ;;  %v13490_v24 = vld [vmem:[#allocation30_spill] sm:$0xff] }
 0x2a6   : > { %v1934_v53 = vpop.f32.mrf.mxu3  ;;  %v13489_v44 = vand.u32 4294901760, %v13488_v10 }
 0x2a7   : > { %v9682_v2 = vadd.f32 %v2560_v61, %v2287_v15 }
 0x2a8   : > { %v1572_v5 = vpop.f32.mrf.mxu2  ;;  %v2568_v55 = vpop.f32.mrf.mxu1 }
 0x2a9   : > { %v1573_v49 = vadd.f32 %v1572_v5, %v1274_v40 }
 0x2aa   : > { %v2294_v4 = vpop.f32.mrf.mxu0 }
 0x2ab   : > { %v1935_v48 = vadd.f32 %v1934_v53, %v1573_v49  ;;  %2035 = vmatmul.f32.gmra.mxu3 %v13483_v17  ;;  %2631 = vmatmul.f32.gmra.mxu1 %v13484_v31  ;;  %v13493_v17 = vld [vmem:[#allocation32_spill] sm:$0xff] }
 0x2ad   : > { %v2291_v14 = vadd.f32 %v2290_v28, %v1935_v48  ;;  %1656 = vmatmul.f32.gmra.mxu2 %v13482_v33  ;;  %2357 = vmatmul.f32.gmra.mxu0 %v13484_v31  ;;  %v13491_v48 = vld [vmem:[#allocation33_spill] sm:$0xff] }
 0x2ae   : > { %v1940_v20 = vpop.f32.mrf.mxu3  ;;  %v13492_v33 = vand.u32 4294901760, %v13491_v48 }
 0x2af   : > { %v9691_v19 = vadd.f32 %v2564_v35, %v2291_v14 }
 0x2b0   : > { %v1577_v61 = vpop.f32.mrf.mxu2  ;;  %v2572_v18 = vpop.f32.mrf.mxu1 }
 0x2b1   : > { %v1578_v3 = vadd.f32 %v1577_v61, %v1278_v23 }
 0x2b2   : > { %v2298_v60 = vpop.f32.mrf.mxu0 }
 0x2b3   : > { %v1941_v62 = vadd.f32 %v1940_v20, %v1578_v3  ;;  %2041 = vmatmul.f32.gmra.mxu3 %v13486_v13  ;;  %2635 = vmatmul.f32.gmra.mxu1 %v13487_v1 }
 0x2b5   : > { %v2295_v56 = vadd.f32 %v2294_v4, %v1941_v62  ;;  %1661 = vmatmul.f32.gmra.mxu2 %v13485_v63  ;;  %2361 = vmatmul.f32.gmra.mxu0 %v13487_v1  ;;  %v13496_v63 = vld [vmem:[#allocation34_spill] sm:$0xff] }
 0x2b6   : > { %v1946_v41 = vpop.f32.mrf.mxu3 }
 0x2b7   : > { %v9700_v46 = vadd.f32 %v2568_v55, %v2295_v56 }
 0x2b8   : > { %v1582_v59 = vpop.f32.mrf.mxu2  ;;  %v2576_v35 = vpop.f32.mrf.mxu1 }
 0x2b9   : > { %v1583_v16 = vadd.f32 %v1582_v59, %v1282_v29 }
 0x2ba   : > { %v2302_v28 = vpop.f32.mrf.mxu0 }
 0x2bb   : > { %v1947_v25 = vadd.f32 %v1946_v41, %v1583_v16  ;;  %2047 = vmatmul.f32.gmra.mxu3 %v13489_v44  ;;  %2639 = vmatmul.f32.gmra.mxu1 %v13490_v24  ;;  %v13497_v16 = vld [vmem:[#allocation37_spill] sm:$0xff] }
 0x2bd   : > { %v2299_v15 = vadd.f32 %v2298_v60, %v1947_v25  ;;  %1666 = vmatmul.f32.gmra.mxu2 %v13488_v10  ;;  %2365 = vmatmul.f32.gmra.mxu0 %v13490_v24  ;;  %v13494_v60 = vld [vmem:[#allocation35_spill] sm:$0xff]  ;;  %v13499_v25 = vld [vmem:[#allocation36_spill] sm:$0xff] }
 0x2be   : > { %v1952_v53 = vpop.f32.mrf.mxu3  ;;  %v13495_v62 = vand.u32 4294901760, %v13494_v60 }
 0x2bf   : > { %v9709_v7 = vadd.f32 %v2572_v18, %v2299_v15 }
 0x2c0   : > { %v1587_v40 = vpop.f32.mrf.mxu2  ;;  %v2580_v5 = vpop.f32.mrf.mxu1 }
 0x2c1   : > { %v1588_v55 = vadd.f32 %v1587_v40, %v1286_v45 }
 0x2c2   : > { %v2306_v49 = vpop.f32.mrf.mxu0 }
 0x2c3   : > { %v1953_v4 = vadd.f32 %v1952_v53, %v1588_v55  ;;  %2053 = vmatmul.f32.gmra.mxu3 %v13492_v33  ;;  %2643 = vmatmul.f32.gmra.mxu1 %v13493_v17 }
 0x2c5   : > { %v2303_v31 = vadd.f32 %v2302_v28, %v1953_v4  ;;  %1671 = vmatmul.f32.gmra.mxu2 %v13491_v48  ;;  %2369 = vmatmul.f32.gmra.mxu0 %v13493_v17  ;;  %v13498_v28 = vand.u32 4294901760, %v13497_v16 }
 0x2c6   : > { %v1958_v14 = vpop.f32.mrf.mxu3 }
 0x2c7   : > { %v9718_v50 = vadd.f32 %v2576_v35, %v2303_v31 }
 0x2c8   : > { %v1592_v20 = vpop.f32.mrf.mxu2  ;;  %v2584_v23 = vpop.f32.mrf.mxu1 }
 0x2c9   : > { %v1593_v61 = vadd.f32 %v1592_v20, %v1290_v58  ;;  %v13503_v20 = vld [vmem:[#allocation41_spill] sm:$0xff] }
 0x2ca   : > { %v2310_v18 = vpop.f32.mrf.mxu0 }
 0x2cb   : > { %v1959_v3 = vadd.f32 %v1958_v14, %v1593_v61  ;;  %2059 = vmatmul.f32.gmra.mxu3 %v13495_v62  ;;  %2647 = vmatmul.f32.gmra.mxu1 %v13496_v63  ;;  %v13505_v61 = vld [vmem:[#allocation40_spill] sm:$0xff] }
 0x2cd   : > { %v2307_v13 = vadd.f32 %v2306_v49, %v1959_v3  ;;  %1676 = vmatmul.f32.gmra.mxu2 %v13494_v60  ;;  %2373 = vmatmul.f32.gmra.mxu0 %v13496_v63  ;;  %v13502_v49 = vld [vmem:[#allocation38_spill] sm:$0xff] }
 0x2ce   : > { %v1964_v1 = vpop.f32.mrf.mxu3 }
 0x2cf   : > { %v9727_v43 = vadd.f32 %v2580_v5, %v2307_v13  ;;  %v13500_v5 = vld [vmem:[#allocation39_spill] sm:$0xff] }
 0x2d0   : > { %v1597_v56 = vpop.f32.mrf.mxu2  ;;  %v2588_v41 = vpop.f32.mrf.mxu1  ;;  %v13501_v55 = vand.u32 4294901760, %v13500_v5 }
 0x2d1   : > { %v1598_v29 = vadd.f32 %v1597_v56, %v1294_v9  ;;  %v13506_v9 = vld [vmem:[#allocation43_spill] sm:$0xff] }
 0x2d2   : > { %v2314_v59 = vpop.f32.mrf.mxu0  ;;  %v13507_v56 = vand.u32 4294901760, %v13506_v9 }
 0x2d3   : > { %v1965_v35 = vadd.f32 %v1964_v1, %v1598_v29  ;;  %2065 = vmatmul.f32.gmra.mxu3 %v13498_v28  ;;  %2651 = vmatmul.f32.gmra.mxu1 %v13499_v25 }
 0x2d5   : > { %v2311_v10 = vadd.f32 %v2310_v18, %v1965_v35  ;;  %1681 = vmatmul.f32.gmra.mxu2 %v13497_v16  ;;  %2377 = vmatmul.f32.gmra.mxu0 %v13499_v25  ;;  %v13509_v16 = vld [vmem:[#allocation52_spill] sm:$0xff] }
 0x2d6   : > { %v1970_v44 = vpop.f32.mrf.mxu3 }
 0x2d7   : > { %v9736_v34 = vadd.f32 %v2584_v23, %v2311_v10  ;;  %v13504_v23 = vand.u32 4294901760, %v13503_v20 }
 0x2d8   : > { %v1602_v24 = vpop.f32.mrf.mxu2  ;;  %v2592_v15 = vpop.f32.mrf.mxu1 }
 0x2d9   : > { %v1603_v53 = vadd.f32 %v1602_v24, %v1298_v37  ;;  %v13512_v24 = vld [vmem:[#allocation44_spill] sm:$0xff] }
 0x2da   : > { %v2318_v45 = vpop.f32.mrf.mxu0 }
 0x2db   : > { %v1971_v40 = vadd.f32 %v1970_v44, %v1603_v53  ;;  %2071 = vmatmul.f32.gmra.mxu3 %v13501_v55  ;;  %2655 = vmatmul.f32.gmra.mxu1 %v13502_v49  ;;  %v13510_v44 = vld [vmem:[#allocation45_spill] sm:$0xff]  ;;  %v13513_v55 = vld [vmem:[#allocation58_spill] sm:$0xff] }
 0x2dc   : > { %v13511_v37 = vand.u32 4294901760, %v13510_v44 }
 0x2dd   : > { %v2315_v4 = vadd.f32 %v2314_v59, %v1971_v40  ;;  %1686 = vmatmul.f32.gmra.mxu2 %v13500_v5  ;;  %2381 = vmatmul.f32.gmra.mxu0 %v13502_v49 }
 0x2de   : > { %v1976_v48 = vpop.f32.mrf.mxu3 }
 0x2df   : > { %v9745_v11 = vadd.f32 %v2588_v41, %v2315_v4  ;;  %v13508_v41 = vld [vmem:[#allocation42_spill] sm:$0xff] }
 0x2e0   : > { %v1607_v33 = vpop.f32.mrf.mxu2  ;;  %v2596_v17 = vpop.f32.mrf.mxu1 }
 0x2e1   : > { %v1608_v31 = vadd.f32 %v1607_v33, %v1302_v57  ;;  %v13514_v57 = vld [vmem:[#allocation48_spill] sm:$0xff] }
 0x2e2   : > { %v2322_v14 = vpop.f32.mrf.mxu0  ;;  %v13515_v33 = vand.u32 4294901760, %v13514_v57 }
 0x2e3   : > { %v1977_v58 = vadd.f32 %v1976_v48, %v1608_v31  ;;  %2077 = vmatmul.f32.gmra.mxu3 %v13504_v23  ;;  %2659 = vmatmul.f32.gmra.mxu1 %v13505_v61 }
 0x2e5   : > { %v2319_v18 = vadd.f32 %v2318_v45, %v1977_v58  ;;  %1691 = vmatmul.f32.gmra.mxu2 %v13503_v20  ;;  %2385 = vmatmul.f32.gmra.mxu0 %v13505_v61  ;;  %v13517_v61 = vld [vmem:[#allocation65_spill] sm:$0xff] }
 0x2e6   : > { %v1982_v3 = vpop.f32.mrf.mxu3 }
 0x2e7   : > { %v9754_v47 = vadd.f32 %v2592_v15, %v2319_v18 }
 0x2e8   : > { %v1612_v60 = vpop.f32.mrf.mxu2  ;;  %v2600_v62 = vpop.f32.mrf.mxu1 }
 0x2e9   : > { %v1613_v63 = vadd.f32 %v1612_v60, %v1306_v30  ;;  %v13518_v60 = vld [vmem:[#allocation54_spill] sm:$0xff] }
 0x2ea   : > { %v2326_v13 = vpop.f32.mrf.mxu0 }
 0x2eb   : > { %v1983_v1 = vadd.f32 %v1982_v3, %v1613_v63  ;;  %2083 = vmatmul.f32.gmra.mxu3 %v13507_v56  ;;  %2663 = vmatmul.f32.gmra.mxu1 %v13508_v41  ;;  %v13520_v63 = vld [vmem:[#allocation51_spill] sm:$0xff] }
 0x2ed   : > { %v2323_v29 = vadd.f32 %v2322_v14, %v1983_v1  ;;  %1696 = vmatmul.f32.gmra.mxu2 %v13506_v9  ;;  %2389 = vmatmul.f32.gmra.mxu0 %v13508_v41 }
 0x2ee   : > { %v1988_v59 = vpop.f32.mrf.mxu3 }
 0x2ef   : > { %v9761_v35 = vadd.f32 %v2596_v17, %v2323_v29  ;;  %v13516_v17 = vld [vmem:[#allocation46_spill] sm:$0xff]  ;;  %v13521_v29 = vld [vmem:[#allocation72_spill] sm:$0xff] }
 0x2f0   : > { %v1617_v8 = vpop.f32.mrf.mxu2  ;;  %v2604_v51 = vpop.f32.mrf.mxu1 }
 0x2f1   : > { %v1618_v28 = vadd.f32 %v1617_v8, %v13509_v16  ;;  %v13522_v16 = vld [vmem:[#allocation61_spill] sm:$0xff] }
 0x2f2   : > { %v2330_v25 = vpop.f32.mrf.mxu0 }
 0x2f3   : > { %v1989_v10 = vadd.f32 %v1988_v59, %v1618_v28  ;;  %2089 = vmatmul.f32.gmra.mxu3 %v13511_v37  ;;  %2667 = vmatmul.f32.gmra.mxu1 %v13512_v24  ;;  %v13523_v28 = vand.u32 4294901760, %v13522_v16 }
 0x2f5   : > { %v2327_v15 = vadd.f32 %v2326_v13, %v1989_v10  ;;  %1701 = vmatmul.f32.gmra.mxu2 %v13510_v44  ;;  %2393 = vmatmul.f32.gmra.mxu0 %v13512_v24 }
 0x2f6   : > { %v1994_v53 = vpop.f32.mrf.mxu3 }
 0x2f7   : > { %v9769_v45 = vadd.f32 %v2600_v62, %v2327_v15  ;;  %v13519_v62 = vand.u32 4294901760, %v13518_v60 }
 0x2f8   : > { %v1622_v40 = vpop.f32.mrf.mxu2  ;;  %v2608_v5 = vpop.f32.mrf.mxu1 }
 0x2f9   : > { %v1623_v49 = vadd.f32 %v1622_v40, %v13513_v55 }
 0x2fa   : > { %v2334_v4 = vpop.f32.mrf.mxu0 }
 0x2fb   : > { %v1995_v48 = vadd.f32 %v1994_v53, %v1623_v49  ;;  %2095 = vmatmul.f32.gmra.mxu3 %v13515_v33  ;;  %2671 = vmatmul.f32.gmra.mxu1 %v13516_v17  ;;  %v13525_v53 = vld [vmem:[#allocation79_spill] sm:$0xff]  ;;  %v13526_v49 = vld [vmem:[#allocation68_spill] sm:$0xff] }
 0x2fd   : > { %v2331_v31 = vadd.f32 %v2330_v25, %v1995_v48  ;;  %1706 = vmatmul.f32.gmra.mxu2 %v13514_v57  ;;  %2397 = vmatmul.f32.gmra.mxu0 %v13516_v17  ;;  %v13524_v25 = vld [vmem:[#allocation57_spill] sm:$0xff]  ;;  %v13528_v48 = vld [vmem:[#allocation64_spill] sm:$0xff] }
 0x2fe   : > { %v2000_v14 = vpop.f32.mrf.mxu3 }
 0x2ff   : > { %v9777_v58 = vadd.f32 %v2604_v51, %v2331_v31 }
 0x300   : > { %v1627_v20 = vpop.f32.mrf.mxu2  ;;  %v2612_v23 = vpop.f32.mrf.mxu1 }
 0x301   : > { %v1628_v18 = vadd.f32 %v1627_v20, %v13517_v61  ;;  %v13529_v20 = vld [vmem:[#allocation86_spill] sm:$0xff] }
 0x302   : > { %v2338_v3 = vpop.f32.mrf.mxu0 }
 0x303   : > { %v2001_v30 = vadd.f32 %v2000_v14, %v1628_v18  ;;  %2101 = vmatmul.f32.gmra.mxu3 %v13519_v62  ;;  %2675 = vmatmul.f32.gmra.mxu1 %v13520_v63 }
 0x305   : > { %v2335_v13 = vadd.f32 %v2334_v4, %v2001_v30  ;;  %1711 = vmatmul.f32.gmra.mxu2 %v13518_v60  ;;  %2401 = vmatmul.f32.gmra.mxu0 %v13520_v63  ;;  %v13527_v4 = vand.u32 4294901760, %v13526_v49  ;;  %v13532_v60 = vld [vmem:[#allocation71_spill] sm:$0xff] }
 0x306   : > { %v2006_v1 = vpop.f32.mrf.mxu3 }
 0x307   : > { %v9785_v9 = vadd.f32 %v2608_v5, %v2335_v13 }
 0x308   : > { %v1632_v56 = vpop.f32.mrf.mxu2  ;;  %v2616_v41 = vpop.f32.mrf.mxu1 }
 0x309   : > { %v1633_v59 = vadd.f32 %v1632_v56, %v13521_v29 }
 0x30a   : > { %v2342_v8 = vpop.f32.mrf.mxu0 }
 0x30b   : > { %v2007_v51 = vadd.f32 %v2006_v1, %v1633_v59  ;;  %2107 = vmatmul.f32.gmra.mxu3 %v13523_v28  ;;  %2679 = vmatmul.f32.gmra.mxu1 %v13524_v25  ;;  %v13536_v28 = vld [vmem:[#allocation78_spill] sm:$0xff] }
 0x30d   : > { %v2339_v10 = vadd.f32 %v2338_v3, %v2007_v51  ;;  %1716 = vmatmul.f32.gmra.mxu2 %v13522_v16  ;;  %2405 = vmatmul.f32.gmra.mxu0 %v13524_v25  ;;  %v13530_v3 = vld [vmem:[#allocation75_spill] sm:$0xff]  ;;  %v13534_v51 = vld [vmem:[#allocation82_spill] sm:$0xff] }
 0x30e   : > { %v2012_v44 = vpop.f32.mrf.mxu3  ;;  %v13531_v30 = vand.u32 4294901760, %v13530_v3  ;;  %v13535_v16 = vand.u32 4294901760, %v13534_v51 }
 0x30f   : > { %v9793_v37 = vadd.f32 %v2612_v23, %v2339_v10 }
 0x310   : > { %v1637_v24 = vpop.f32.mrf.mxu2  ;;  %v2620_v15 = vpop.f32.mrf.mxu1 }
 0x311   : > { %v1638_v40 = vadd.f32 %v1637_v24, %v13525_v53  ;;  %v13537_v53 = vld [vmem:[#allocation100_spill] sm:$0xff] }
 0x312   : > { %v2346_v5 = vpop.f32.mrf.mxu0 }
 0x313   : > { %v2013_v55 = vadd.f32 %v2012_v44, %v1638_v40  ;;  %2113 = vmatmul.f32.gmra.mxu3 %v13527_v4  ;;  %2683 = vmatmul.f32.gmra.mxu1 %v13528_v48 }
 0x315   : > { %v2343_v57 = vadd.f32 %v2342_v8, %v2013_v55  ;;  %1721 = vmatmul.f32.gmra.mxu2 %v13526_v49  ;;  %2409 = vmatmul.f32.gmra.mxu0 %v13528_v48  ;;  %v13538_v49 = vld [vmem:[#allocation89_spill] sm:$0xff] }
 0x316   : > { %v2018_v33 = vpop.f32.mrf.mxu3  ;;  %v13539_v4 = vand.u32 4294901760, %v13538_v49  ;;  %v13540_v48 = vld [vmem:[#allocation85_spill] sm:$0xff] }
 0x317   : > { %v9801_v17 = vadd.f32 %v2616_v41, %v2343_v57  ;;  %v13533_v41 = vld [vmem:[#allocation93_spill] sm:$0xff] }
 0x318   : > { %v1642_v31 = vpop.f32.mrf.mxu2  ;;  %v2624_v14 = vpop.f32.mrf.mxu1 }
 0x319   : > { %v1643_v23 = vadd.f32 %v1642_v31, %v13529_v20 }
 0x31a   : > { %v2350_v61 = vpop.f32.mrf.mxu0 }
 0x31b   : > { %v2019_v18 = vadd.f32 %v2018_v33, %v1643_v23  ;;  %2119 = vmatmul.f32.gmra.mxu3 %v13531_v30  ;;  %2687 = vmatmul.f32.gmra.mxu1 %v13532_v60  ;;  %v13541_v23 = vld [vmem:[#allocation107_spill] sm:$0xff]  ;;  %v13542_v30 = vld [vmem:[#allocation96_spill] sm:$0xff] }
 0x31d   : > { %v2347_v62 = vadd.f32 %v2346_v5, %v2019_v18  ;;  %1726 = vmatmul.f32.gmra.mxu2 %v13530_v3  ;;  %2413 = vmatmul.f32.gmra.mxu0 %v13532_v60  ;;  %v13543_v60 = vand.u32 4294901760, %v13542_v30 }
 0x31e   : > { %v2024_v63 = vpop.f32.mrf.mxu3 }
 0x31f   : > { %v9809_v13 = vadd.f32 %v2620_v15, %v2347_v62  ;;  %v13544_v62 = vld [vmem:[#allocation92_spill] sm:$0xff] }
 0x320   : > { %v1647_v1 = vpop.f32.mrf.mxu2  ;;  %v2628_v56 = vpop.f32.mrf.mxu1 }
 0x321   : > { %v1648_v29 = vadd.f32 %v1647_v1, %v13533_v41 }
 0x322   : > { %v2354_v59 = vpop.f32.mrf.mxu0 }
 0x323   : > { %v2025_v8 = vadd.f32 %v2024_v63, %v1648_v29  ;;  %2125 = vmatmul.f32.gmra.mxu3 %v13535_v16  ;;  %2691 = vmatmul.f32.gmra.mxu1 %v13536_v28 }
 0x325   : > { %v2351_v25 = vadd.f32 %v2350_v61, %v2025_v8  ;;  %1731 = vmatmul.f32.gmra.mxu2 %v13534_v51  ;;  %2417 = vmatmul.f32.gmra.mxu0 %v13536_v28  ;;  %v13546_v28 = vld [vmem:[#allocation103_spill] sm:$0xff] }
 0x326   : > { %v2030_v10 = vpop.f32.mrf.mxu3 }
 0x327   : > { %v9817_v44 = vadd.f32 %v2624_v14, %v2351_v25  ;;  %v13547_v25 = vand.u32 4294901760, %v13546_v28 }
 0x328   : > { %v1652_v24 = vpop.f32.mrf.mxu2  ;;  %v2632_v15 = vpop.f32.mrf.mxu1 }
 0x329   : > { %v1653_v40 = vadd.f32 %v1652_v24, %v13537_v53 }
 0x32a   : > { %v2358_v5 = vpop.f32.mrf.mxu0 }
 0x32b   : > { %v2031_v55 = vadd.f32 %v2030_v10, %v1653_v40  ;;  %2131 = vmatmul.f32.gmra.mxu3 %v13539_v4  ;;  %2695 = vmatmul.f32.gmra.mxu1 %v13540_v48  ;;  %v13548_v10 = vld [vmem:[#allocation99_spill] sm:$0xff] }
 0x32d   : > { %v2355_v57 = vadd.f32 %v2354_v59, %v2031_v55  ;;  %1736 = vmatmul.f32.gmra.mxu2 %v13538_v49  ;;  %2421 = vmatmul.f32.gmra.mxu0 %v13540_v48  ;;  %v13545_v59 = vld [vmem:[#allocation114_spill] sm:$0xff] }
 0x32e   : > { %v2036_v33 = vpop.f32.mrf.mxu3  ;;  %v13549_v55 = vld [vmem:[#allocation122_spill] sm:$0xff] }
 0x32f   : > { %v9825_v31 = vadd.f32 %v2628_v56, %v2355_v57  ;;  %v13550_v57 = vld [vmem:[#allocation110_spill] sm:$0xff] }
 0x330   : > { %v1657_v14 = vpop.f32.mrf.mxu2  ;;  %v2636_v20 = vpop.f32.mrf.mxu1 }
 0x331   : > { %v1658_v61 = vadd.f32 %v1657_v14, %v13541_v23  ;;  %v13552_v14 = vld [vmem:[#allocation106_spill] sm:$0xff] }
 0x332   : > { %v2362_v18 = vpop.f32.mrf.mxu0 }
 0x333   : > { %v2037_v3 = vadd.f32 %v2036_v33, %v1658_v61  ;;  %2137 = vmatmul.f32.gmra.mxu3 %v13543_v60  ;;  %2699 = vmatmul.f32.gmra.mxu1 %v13544_v62  ;;  %v13551_v33 = vand.u32 4294901760, %v13550_v57 }
 0x335   : > { %v2359_v63 = vadd.f32 %v2358_v5, %v2037_v3  ;;  %1741 = vmatmul.f32.gmra.mxu2 %v13542_v30  ;;  %2425 = vmatmul.f32.gmra.mxu0 %v13544_v62  ;;  %v13553_v30 = vld [vmem:[#allocation127_spill] sm:$0xff] }
 0x336   : > { %v2042_v1 = vpop.f32.mrf.mxu3 }
 0x337   : > { %v9833_v41 = vadd.f32 %v2632_v15, %v2359_v63 }
 0x338   : > { %v1662_v56 = vpop.f32.mrf.mxu2  ;;  %v2640_v29 = vpop.f32.mrf.mxu1 }
 0x339   : > { %v1663_v8 = vadd.f32 %v1662_v56, %v13545_v59  ;;  %v13556_v59 = vld [vmem:[#allocation113_spill] sm:$0xff] }
 0x33a   : > { %v2366_v51 = vpop.f32.mrf.mxu0 }
 0x33b   : > { %v2043_v16 = vadd.f32 %v2042_v1, %v1663_v8  ;;  %2143 = vmatmul.f32.gmra.mxu3 %v13547_v25  ;;  %2703 = vmatmul.f32.gmra.mxu1 %v13548_v10  ;;  %v13554_v1 = vld [vmem:[#allocation117_spill] sm:$0xff]  ;;  %v13557_v25 = vld [vmem:[#allocation132_spill] sm:$0xff] }
 0x33c   : > { %v13555_v56 = vand.u32 4294901760, %v13554_v1 }
 0x33d   : > { %v2363_v24 = vadd.f32 %v2362_v18, %v2043_v16  ;;  %1746 = vmatmul.f32.gmra.mxu2 %v13546_v28  ;;  %2429 = vmatmul.f32.gmra.mxu0 %v13548_v10 }
 0x33e   : > { %v2048_v53 = vpop.f32.mrf.mxu3 }
 0x33f   : > { %v9841_v40 = vadd.f32 %v2636_v20, %v2363_v24 }
 0x340   : > { %v1667_v15 = vpop.f32.mrf.mxu2  ;;  %v2644_v5 = vpop.f32.mrf.mxu1 }
 0x341   : > { %v1668_v49 = vadd.f32 %v1667_v15, %v13549_v55  ;;  %v13558_v15 = vld [vmem:[#allocation124_spill] sm:$0xff] }
 0x342   : > { %v2370_v4 = vpop.f32.mrf.mxu0  ;;  %v13559_v55 = vand.u32 4294901760, %v13558_v15 }
 0x343   : > { %v2049_v48 = vadd.f32 %v2048_v53, %v1668_v49  ;;  %2149 = vmatmul.f32.gmra.mxu3 %v13551_v33  ;;  %2707 = vmatmul.f32.gmra.mxu1 %v13552_v14  ;;  %v13560_v49 = vld [vmem:[#allocation120_spill] sm:$0xff] }
 0x345   : > { %v2367_v23 = vadd.f32 %v2366_v51, %v2049_v48  ;;  %1751 = vmatmul.f32.gmra.mxu2 %v13550_v57  ;;  %2433 = vmatmul.f32.gmra.mxu0 %v13552_v14  ;;  %v8115_v14 = vld [vmem:[%s8353_s24 + $0x8] sm:$0xf] }
 0x346   : > { %v2054_v61 = vpop.f32.mrf.mxu3 }
 0x347   : > { %v9849_v18 = vadd.f32 %v2640_v29, %v2367_v23 }
 0x348   : > { %v1672_v20 = vpop.f32.mrf.mxu2  ;;  %v2648_v3 = vpop.f32.mrf.mxu1 }
 0x349   : > { %v1673_v60 = vadd.f32 %v1672_v20, %v13553_v30  ;;  %v5280_v20 = vsel %vm624_vm0, %v8115_v14, 0 }
 0x34a   : > { %v2374_v62 = vpop.f32.mrf.mxu0 }
 0x34b   : > { %v2055_v63 = vadd.f32 %v2054_v61, %v1673_v60  ;;  %2155 = vmatmul.f32.gmra.mxu3 %v13555_v56  ;;  %2711 = vmatmul.f32.gmra.mxu1 %v13556_v59  ;;  %v13561_v56 = vld [vmem:[#allocation129_spill] sm:$0xff] }
 0x34d   : > { %v2371_v8 = vadd.f32 %v2370_v4, %v2055_v63  ;;  %1756 = vmatmul.f32.gmra.mxu2 %v13554_v1  ;;  %2437 = vmatmul.f32.gmra.mxu0 %v13556_v59  ;;  %v300_v4 = vld [vmem:[%s8426_s28] sm:$0xff]  ;;  %v13562_v59 = vand.u32 4294901760, %v13561_v56 }
 0x34e   : > { %v2060_v51 = vpop.f32.mrf.mxu3  ;;  %v2728_v57 = vsel %vm431_vm1, %v300_v4, 0 }
 0x34f   : > { %v9857_v29 = vadd.f32 %v2644_v5, %v2371_v8  ;;  %v9872_v60 = vand.u32 4294901760, %v2728_v57  ;;  %v301_v8 = vld [vmem:[%s8426_s28 + $0x8] sm:$0xff] }
 0x350   : > { %v1677_v16 = vpop.f32.mrf.mxu2  ;;  %v2652_v28 = vpop.f32.mrf.mxu1 }
 0x351   : > { %v1678_v10 = vadd.f32 %v1677_v16, %v13557_v25 }
 0x352   : > { %v2378_v24 = vpop.f32.mrf.mxu0 }
 0x353   : > { %v2061_v53 = vadd.f32 %v2060_v51, %v1678_v10  ;;  %2161 = vmatmul.f32.gmra.mxu3 %v13559_v55  ;;  %2715 = vmatmul.f32.gmra.mxu1 %v13560_v49  ;;  %v2731_v10 = vsel %vm431_vm1, %v301_v8, 0 }
 0x355   : > { %v2375_v48 = vadd.f32 %v2374_v62, %v2061_v53  ;;  %1761 = vmatmul.f32.gmra.mxu2 %v13558_v15  ;;  %2441 = vmatmul.f32.gmra.mxu0 %v13560_v49  ;;  %v5297_v62 = vand.u32 4294901760, %v5280_v20 }
 0x356   : > { %v2066_v5 = vpop.f32.mrf.mxu3 }
 0x357   : > { %v9867_v33 = vadd.f32 %v2648_v3, %v2375_v48  ;;  %v5828_v3 = vsub.f32 %v5280_v20, %v5297_v62  ;;  %5298 = vmatpush.msrb.mxu0 %v5297_v62  ;;  %v13566_v20 = vld [vmem:[#allocation131_spill] sm:$0xff] }
 0x358   : > { %v1682_v23 = vpop.f32.mrf.mxu2  ;;  %v2656_v61 = vpop.f32.mrf.mxu1 }
 0x359   : > { %v1683_v30 = vadd.f32 %v1682_v23, %v9270_v26  ;;  %v2940_v26 = vsub.f32 %v2728_v57, %v9872_v60  ;;  %v5829_v16 = vand.u32 4294901760, %v5828_v3  ;;  %v13564_v23 = vld [vmem:[#allocation134_spill] sm:$0xff] }
 0x35a   : > { %v2382_v63 = vpop.f32.mrf.mxu0  ;;  %v13565_v57 = vand.u32 4294901760, %v13564_v23 }
 0x35b   : > { %v2067_v1 = vadd.f32 %v2066_v5, %v1683_v30  ;;  %2167 = vmatmul.f32.gmra.mxu3 %v13562_v59  ;;  %2719 = vmatmul.f32.gmra.mxu1 %v9213_v32  ;;  %v5830_v15 = vsub.f32 %v5828_v3, %v5829_v16  ;;  %v2941_v48 = vand.u32 4294901760, %v2940_v26  ;;  %v302_v30 = vld [vmem:[%s8426_s28 + $0x18] sm:$0xff] }
 0x35c   : > { %v2734_v59 = vsel %vm431_vm1, %v302_v30, 0 }
 0x35d   : > { %v2379_v51 = vadd.f32 %v2378_v24, %v2067_v1  ;;  %1766 = vmatmul.f32.gmra.mxu2 %v13561_v56  ;;  %2445 = vmatmul.f32.gmra.mxu0 %v9213_v32  ;;  %v9885_v24 = vand.u32 4294901760, %v2731_v10  ;;  %v5831_v5 = vand.u32 4294901760, %v5830_v15  ;;  %v2942_v1 = vsub.f32 %v2940_v26, %v2941_v48  ;;  %v13567_v15 = vld [vmem:[#allocation135_spill] sm:$0xff] }
 0x35e   : > { %v2072_v25 = vpop.f32.mrf.mxu3 }
 0x35f   : > { %v9882_v53 = vadd.f32 %v2652_v28, %v2379_v51  ;;  %13563 = vst [vmem:[#allocation74_spill] sm:$0xff] %v9885_v24  ;;  %5832 = vmatpush.msrb.mxu1 %v5831_v5 }
 0x360   : > { %v1687_v55 = vpop.f32.mrf.mxu2  ;;  %v2660_v49 = vpop.f32.mrf.mxu1 }
 0x361   : > { %v1688_v4 = vadd.f32 %v1687_v55, %v9286_v21  ;;  %v2948_v21 = vsub.f32 %v2731_v10, %v9885_v24 }
 0x362   : > { %v2386_v14 = vpop.f32.mrf.mxu0 }
 0x363   : > { %v2073_v32 = vadd.f32 %v2072_v25, %v1688_v4  ;;  %2173 = vmatmul.f32.gmra.mxu3 %v13565_v57  ;;  %2723 = vmatmul.f32.gmra.mxu1 %v13566_v20  ;;  %v2943_v4 = vand.u32 4294901760, %v2942_v1  ;;  %v2949_v5 = vand.u32 4294901760, %v2948_v21  ;;  %v303_v57 = vld [vmem:[%s8426_s28 + $0x20] sm:$0xff] }
 0x365   : > { %v2383_v28 = vadd.f32 %v2382_v63, %v2073_v32  ;;  %1771 = vmatmul.f32.gmra.mxu2 %v13564_v23  ;;  %2449 = vmatmul.f32.gmra.mxu0 %v13566_v20  ;;  %v9898_v63 = vand.u32 4294901760, %v2734_v59 }
 0x366   : > { %v2078_v56 = vpop.f32.mrf.mxu3 }
 0x367   : > { %v9895_v8 = vadd.f32 %v2656_v61, %v2383_v28  ;;  %13568 = vst [vmem:[#allocation70_spill] sm:$0xff] %v9898_v63  ;;  %v2950_v61 = vsub.f32 %v2948_v21, %v2949_v5  ;;  %v2956_v20 = vsub.f32 %v2734_v59, %v9898_v63  ;;  %v2737_v28 = vsel %vm431_vm1, %v303_v57, 0  ;;  %v304_v59 = vld [vmem:[%s8426_s28 + $0x30] sm:$0xff] }
 0x368   : > { %v1692_v51 = vpop.f32.mrf.mxu2  ;;  %v2664_v25 = vpop.f32.mrf.mxu1  ;;  %v2740_v57 = vsel %vm431_vm1, %v304_v59, 0 }
 0x369   : > { %v1693_v55 = vadd.f32 %v1692_v51, %v13567_v15 }
 0x36a   : > { %v2390_v32 = vpop.f32.mrf.mxu0 }
 0x36b   : > { %v2079_v23 = vadd.f32 %v2078_v56, %v1693_v55  ;;  %3474 = vmatmul.f32.vlgmr.msra.gmra.mxu3 %v9872_v60  ;;  %4089 = vmatmul.f32.vlgmr.msra.gmra.mxu1 %v2941_v48  ;;  %v13569_v48 = vld [vmem:[#allocation136_spill] sm:$0xff]  ;;  %v2951_v55 = vand.u32 4294901760, %v2950_v61 }
 0x36c   : > { %6445 = vmatpush.msra.mxu3 %v5297_v62  ;;  %7123 = vmatpush.msra.mxu1 %v5297_v62  ;;  %v2957_v62 = vand.u32 4294901760, %v2956_v20 }
 0x36d   : > { %v2387_v10 = vadd.f32 %v2386_v14, %v2079_v23  ;;  %2944 = vmatmul.f32.vlgmr.msra.gmra.mxu2 %v2943_v4  ;;  %3750 = vmatmul.f32.vlgmr.msra.gmra.mxu0 %v2940_v26  ;;  %v9907_v14 = vand.u32 4294901760, %v2737_v28 }
 0x36e   : > { %v2084_v30 = vpop.f32.mrf.mxu3  ;;  %6107 = vmatpush.msra.mxu2 %v5828_v3  ;;  %6849 = vmatpush.msra.mxu0 %v5829_v16  ;;  %v2958_v3 = vsub.f32 %v2956_v20, %v2957_v62 }
 0x36f   : > { %v9904_v1 = vadd.f32 %v2660_v49, %v2387_v10  ;;  %13570 = vst [vmem:[#allocation69_spill] sm:$0xff] %v9907_v14  ;;  %v2964_v16 = vsub.f32 %v2737_v28, %v9907_v14 }
 0x370   : > { %v1697_v56 = vpop.f32.mrf.mxu2  ;;  %v2668_v51 = vpop.f32.mrf.mxu1 }
 0x371   : > { %v1698_v15 = vadd.f32 %v1697_v56, %v13569_v48  ;;  %v13572_v48 = vld [vmem:[#allocation137_spill] sm:$0xff] }
 0x372   : > { %v2394_v4 = vpop.f32.mrf.mxu0 }
 0x373   : > { %v2085_v26 = vadd.f32 %v2084_v30, %v1698_v15  ;;  %3478 = vmatmul.f32.gmra.mxu3 %v9885_v24  ;;  %4095 = vmatmul.f32.gmra.mxu1 %v2949_v5  ;;  %v2959_v15 = vand.u32 4294901760, %v2958_v3  ;;  %v2965_v24 = vand.u32 4294901760, %v2964_v16  ;;  %v9916_v5 = vand.u32 4294901760, %v2740_v57 }
 0x375   : > { %v2391_v23 = vadd.f32 %v2390_v32, %v2085_v26  ;;  %2952 = vmatmul.f32.gmra.mxu2 %v2951_v55  ;;  %3755 = vmatmul.f32.gmra.mxu0 %v2948_v21  ;;  %13573 = vst [vmem:[#allocation81_spill] sm:$0xff] %v9916_v5  ;;  %v305_v21 = vld [vmem:[%s8426_s28 + $0x38] sm:$0xff]  ;;  %v2966_v26 = vsub.f32 %v2964_v16, %v2965_v24 }
 0x376   : > { %v2090_v49 = vpop.f32.mrf.mxu3 }
 0x377   : > { %v9913_v10 = vadd.f32 %v2664_v25, %v2391_v23  ;;  %v2972_v25 = vsub.f32 %v2740_v57, %v9916_v5  ;;  %v2743_v23 = vsel %vm431_vm1, %v305_v21, 0 }
 0x378   : > { %v1702_v61 = vpop.f32.mrf.mxu2  ;;  %v2672_v56 = vpop.f32.mrf.mxu1 }
 0x379   : > { %13571 = vst [vmem:[#allocation66_spill] sm:$0xff] %v9913_v10  ;;  %v1703_v30 = vadd.f32 %v1702_v61, %v13572_v48  ;;  %v13575_v10 = vld [vmem:[#allocation138_spill] sm:$0xff] }
 0x37a   : > { %v2398_v32 = vpop.f32.mrf.mxu0 }
 0x37b   : > { %v2091_v55 = vadd.f32 %v2090_v49, %v1703_v30  ;;  %3482 = vmatmul.f32.gmra.mxu3 %v9898_v63  ;;  %4101 = vmatmul.f32.gmra.mxu1 %v2957_v62  ;;  %v2967_v30 = vand.u32 4294901760, %v2966_v26  ;;  %v2973_v63 = vand.u32 4294901760, %v2972_v25  ;;  %v9925_v62 = vand.u32 4294901760, %v2743_v23 }
 0x37d   : > { %v2395_v28 = vadd.f32 %v2394_v4, %v2091_v55  ;;  %2960 = vmatmul.f32.gmra.mxu2 %v2959_v15  ;;  %3760 = vmatmul.f32.gmra.mxu0 %v2956_v20  ;;  %13576 = vst [vmem:[#allocation76_spill] sm:$0xff] %v9925_v62  ;;  %v306_v20 = vld [vmem:[%s8426_s28 + $0x48] sm:$0xff]  ;;  %v2974_v55 = vsub.f32 %v2972_v25, %v2973_v63 }
 0x37e   : > { %v2096_v59 = vpop.f32.mrf.mxu3 }
 0x37f   : > { %v9922_v3 = vadd.f32 %v2668_v51, %v2395_v28  ;;  %v2980_v51 = vsub.f32 %v2743_v23, %v9925_v62 }
 0x380   : > { %v1707_v61 = vpop.f32.mrf.mxu2  ;;  %v2676_v48 = vpop.f32.mrf.mxu1 }
 0x381   : > { %13574 = vst [vmem:[#allocation77_spill] sm:$0xff] %v9922_v3  ;;  %v1708_v49 = vadd.f32 %v1707_v61, %v13575_v10  ;;  %v2746_v10 = vsel %vm431_vm1, %v306_v20, 0  ;;  %v13578_v3 = vld [vmem:[#allocation139_spill] sm:$0xff] }
 0x382   : > { %v2402_v4 = vpop.f32.mrf.mxu0 }
 0x383   : > { %v2097_v15 = vadd.f32 %v2096_v59, %v1708_v49  ;;  %3486 = vmatmul.f32.gmra.mxu3 %v9907_v14  ;;  %4107 = vmatmul.f32.gmra.mxu1 %v2965_v24  ;;  %v2975_v49 = vand.u32 4294901760, %v2974_v55  ;;  %v2981_v14 = vand.u32 4294901760, %v2980_v51  ;;  %v9934_v24 = vand.u32 4294901760, %v2746_v10 }
 0x385   : > { %v2399_v57 = vadd.f32 %v2398_v32, %v2097_v15  ;;  %2968 = vmatmul.f32.gmra.mxu2 %v2967_v30  ;;  %3765 = vmatmul.f32.gmra.mxu0 %v2964_v16  ;;  %13579 = vst [vmem:[#allocation88_spill] sm:$0xff] %v9934_v24  ;;  %v307_v16 = vld [vmem:[%s8426_s28 + $0x50] sm:$0xff]  ;;  %v2982_v15 = vsub.f32 %v2980_v51, %v2981_v14 }
 0x386   : > { %v2102_v21 = vpop.f32.mrf.mxu3 }
 0x387   : > { %v9931_v28 = vadd.f32 %v2672_v56, %v2399_v57  ;;  %v2988_v56 = vsub.f32 %v2746_v10, %v9934_v24 }
 0x388   : > { %v1712_v26 = vpop.f32.mrf.mxu2  ;;  %v2680_v61 = vpop.f32.mrf.mxu1 }
 0x389   : > { %13577 = vst [vmem:[#allocation73_spill] sm:$0xff] %v9931_v28  ;;  %v1713_v59 = vadd.f32 %v1712_v26, %v13578_v3  ;;  %v2749_v3 = vsel %vm431_vm1, %v307_v16, 0  ;;  %v13581_v28 = vld [vmem:[#allocation140_spill] sm:$0xff] }
 0x38a   : > { %v2406_v32 = vpop.f32.mrf.mxu0 }
 0x38b   : > { %v2103_v30 = vadd.f32 %v2102_v21, %v1713_v59  ;;  %3490 = vmatmul.f32.gmra.mxu3 %v9916_v5  ;;  %4113 = vmatmul.f32.gmra.mxu1 %v2973_v63  ;;  %v2983_v59 = vand.u32 4294901760, %v2982_v15  ;;  %v2989_v5 = vand.u32 4294901760, %v2988_v56  ;;  %v9943_v63 = vand.u32 4294901760, %v2749_v3 }
 0x38d   : > { %v2403_v23 = vadd.f32 %v2402_v4, %v2103_v30  ;;  %2976 = vmatmul.f32.gmra.mxu2 %v2975_v49  ;;  %3770 = vmatmul.f32.gmra.mxu0 %v2972_v25  ;;  %13582 = vst [vmem:[#allocation83_spill] sm:$0xff] %v9943_v63  ;;  %v308_v25 = vld [vmem:[%s8426_s28 + $0x60] sm:$0xff]  ;;  %v2990_v30 = vsub.f32 %v2988_v56, %v2989_v5 }
 0x38e   : > { %v2108_v20 = vpop.f32.mrf.mxu3 }
 0x38f   : > { %v9940_v57 = vadd.f32 %v2676_v48, %v2403_v23  ;;  %v2996_v48 = vsub.f32 %v2749_v3, %v9943_v63 }
 0x390   : > { %v1717_v55 = vpop.f32.mrf.mxu2  ;;  %v2684_v26 = vpop.f32.mrf.mxu1 }
 0x391   : > { %13580 = vst [vmem:[#allocation84_spill] sm:$0xff] %v9940_v57  ;;  %v1718_v21 = vadd.f32 %v1717_v55, %v13581_v28  ;;  %v2752_v28 = vsel %vm431_vm1, %v308_v25, 0  ;;  %v13584_v57 = vld [vmem:[#allocation141_spill] sm:$0xff] }
 0x392   : > { %v2410_v4 = vpop.f32.mrf.mxu0 }
 0x393   : > { %v2109_v49 = vadd.f32 %v2108_v20, %v1718_v21  ;;  %3494 = vmatmul.f32.gmra.mxu3 %v9925_v62  ;;  %4119 = vmatmul.f32.gmra.mxu1 %v2981_v14  ;;  %v2991_v21 = vand.u32 4294901760, %v2990_v30  ;;  %v2997_v62 = vand.u32 4294901760, %v2996_v48  ;;  %v9952_v14 = vand.u32 4294901760, %v2752_v28 }
 0x395   : > { %v2407_v10 = vadd.f32 %v2406_v32, %v2109_v49  ;;  %2984 = vmatmul.f32.gmra.mxu2 %v2983_v59  ;;  %3775 = vmatmul.f32.gmra.mxu0 %v2980_v51  ;;  %13585 = vst [vmem:[#allocation95_spill] sm:$0xff] %v9952_v14  ;;  %v309_v51 = vld [vmem:[%s8426_s28 + $0x68] sm:$0xff]  ;;  %v2998_v49 = vsub.f32 %v2996_v48, %v2997_v62 }
 0x396   : > { %v2114_v16 = vpop.f32.mrf.mxu3 }
 0x397   : > { %v9949_v23 = vadd.f32 %v2680_v61, %v2407_v10  ;;  %v3004_v61 = vsub.f32 %v2752_v28, %v9952_v14 }
 0x398   : > { %v1722_v15 = vpop.f32.mrf.mxu2  ;;  %v2688_v55 = vpop.f32.mrf.mxu1 }
 0x399   : > { %13583 = vst [vmem:[#allocation80_spill] sm:$0xff] %v9949_v23  ;;  %v1723_v20 = vadd.f32 %v1722_v15, %v13584_v57  ;;  %v2755_v57 = vsel %vm431_vm1, %v309_v51, 0  ;;  %v13587_v23 = vld [vmem:[#allocation142_spill] sm:$0xff] }
 0x39a   : > { %v2414_v32 = vpop.f32.mrf.mxu0 }
 0x39b   : > { %v2115_v59 = vadd.f32 %v2114_v16, %v1723_v20  ;;  %3498 = vmatmul.f32.gmra.mxu3 %v9934_v24  ;;  %4125 = vmatmul.f32.gmra.mxu1 %v2989_v5  ;;  %v2999_v20 = vand.u32 4294901760, %v2998_v49  ;;  %v3005_v24 = vand.u32 4294901760, %v3004_v61  ;;  %v9961_v5 = vand.u32 4294901760, %v2755_v57 }
 0x39d   : > { %v2411_v3 = vadd.f32 %v2410_v4, %v2115_v59  ;;  %2992 = vmatmul.f32.gmra.mxu2 %v2991_v21  ;;  %3780 = vmatmul.f32.gmra.mxu0 %v2988_v56  ;;  %13588 = vst [vmem:[#allocation90_spill] sm:$0xff] %v9961_v5  ;;  %v310_v56 = vld [vmem:[%s8426_s28 + $0x78] sm:$0xff]  ;;  %v3006_v59 = vsub.f32 %v3004_v61, %v3005_v24 }
 0x39e   : > { %v2120_v25 = vpop.f32.mrf.mxu3 }
 0x39f   : > { %v9958_v10 = vadd.f32 %v2684_v26, %v2411_v3  ;;  %v3012_v26 = vsub.f32 %v2755_v57, %v9961_v5 }
 0x3a0   : > { %v1727_v30 = vpop.f32.mrf.mxu2  ;;  %v2692_v15 = vpop.f32.mrf.mxu1 }
 0x3a1   : > { %13586 = vst [vmem:[#allocation91_spill] sm:$0xff] %v9958_v10  ;;  %v1728_v16 = vadd.f32 %v1727_v30, %v13587_v23  ;;  %v2758_v23 = vsel %vm431_vm1, %v310_v56, 0  ;;  %v13590_v10 = vld [vmem:[#allocation143_spill] sm:$0xff] }
 0x3a2   : > { %v2418_v4 = vpop.f32.mrf.mxu0 }
 0x3a3   : > { %v2121_v21 = vadd.f32 %v2120_v25, %v1728_v16  ;;  %3502 = vmatmul.f32.gmra.mxu3 %v9943_v63  ;;  %4131 = vmatmul.f32.gmra.mxu1 %v2997_v62  ;;  %v3007_v16 = vand.u32 4294901760, %v3006_v59  ;;  %v3013_v63 = vand.u32 4294901760, %v3012_v26  ;;  %v9970_v62 = vand.u32 4294901760, %v2758_v23 }
 0x3a5   : > { %v2415_v28 = vadd.f32 %v2414_v32, %v2121_v21  ;;  %3000 = vmatmul.f32.gmra.mxu2 %v2999_v20  ;;  %3785 = vmatmul.f32.gmra.mxu0 %v2996_v48  ;;  %13591 = vst [vmem:[#allocation102_spill] sm:$0xff] %v9970_v62  ;;  %v311_v48 = vld [vmem:[%s8426_s28 + $0x80] sm:$0xff]  ;;  %v3014_v21 = vsub.f32 %v3012_v26, %v3013_v63 }
 0x3a6   : > { %v2126_v51 = vpop.f32.mrf.mxu3 }
 0x3a7   : > { %v9967_v3 = vadd.f32 %v2688_v55, %v2415_v28  ;;  %v3020_v55 = vsub.f32 %v2758_v23, %v9970_v62 }
 0x3a8   : > { %v1732_v49 = vpop.f32.mrf.mxu2  ;;  %v2696_v30 = vpop.f32.mrf.mxu1 }
 0x3a9   : > { %13589 = vst [vmem:[#allocation87_spill] sm:$0xff] %v9967_v3  ;;  %v1733_v25 = vadd.f32 %v1732_v49, %v13590_v10  ;;  %v2761_v10 = vsel %vm431_vm1, %v311_v48, 0  ;;  %v13593_v3 = vld [vmem:[#allocation144_spill] sm:$0xff] }
 0x3aa   : > { %v2422_v32 = vpop.f32.mrf.mxu0 }
 0x3ab   : > { %v2127_v20 = vadd.f32 %v2126_v51, %v1733_v25  ;;  %3506 = vmatmul.f32.gmra.mxu3 %v9952_v14  ;;  %4137 = vmatmul.f32.gmra.mxu1 %v3005_v24  ;;  %v3015_v25 = vand.u32 4294901760, %v3014_v21  ;;  %v3021_v14 = vand.u32 4294901760, %v3020_v55  ;;  %v9979_v24 = vand.u32 4294901760, %v2761_v10 }
 0x3ad   : > { %v2419_v57 = vadd.f32 %v2418_v4, %v2127_v20  ;;  %3008 = vmatmul.f32.gmra.mxu2 %v3007_v16  ;;  %3790 = vmatmul.f32.gmra.mxu0 %v3004_v61  ;;  %13594 = vst [vmem:[#allocation97_spill] sm:$0xff] %v9979_v24  ;;  %v312_v61 = vld [vmem:[%s8426_s28 + $0x90] sm:$0xff]  ;;  %v3022_v20 = vsub.f32 %v3020_v55, %v3021_v14 }
 0x3ae   : > { %v2132_v56 = vpop.f32.mrf.mxu3 }
 0x3af   : > { %v9976_v28 = vadd.f32 %v2692_v15, %v2419_v57  ;;  %v3028_v15 = vsub.f32 %v2761_v10, %v9979_v24 }
 0x3b0   : > { %v1737_v59 = vpop.f32.mrf.mxu2  ;;  %v2700_v49 = vpop.f32.mrf.mxu1 }
 0x3b1   : > { %13592 = vst [vmem:[#allocation98_spill] sm:$0xff] %v9976_v28  ;;  %v1738_v51 = vadd.f32 %v1737_v59, %v13593_v3  ;;  %v2764_v3 = vsel %vm431_vm1, %v312_v61, 0  ;;  %v13596_v28 = vld [vmem:[#allocation145_spill] sm:$0xff] }
 0x3b2   : > { %v2426_v4 = vpop.f32.mrf.mxu0 }
 0x3b3   : > { %v2133_v16 = vadd.f32 %v2132_v56, %v1738_v51  ;;  %3510 = vmatmul.f32.gmra.mxu3 %v9961_v5  ;;  %4143 = vmatmul.f32.gmra.mxu1 %v3013_v63  ;;  %v3023_v51 = vand.u32 4294901760, %v3022_v20  ;;  %v3029_v5 = vand.u32 4294901760, %v3028_v15  ;;  %v9988_v63 = vand.u32 4294901760, %v2764_v3 }
 0x3b5   : > { %v2423_v23 = vadd.f32 %v2422_v32, %v2133_v16  ;;  %3016 = vmatmul.f32.gmra.mxu2 %v3015_v25  ;;  %3795 = vmatmul.f32.gmra.mxu0 %v3012_v26  ;;  %13597 = vst [vmem:[#allocation109_spill] sm:$0xff] %v9988_v63  ;;  %v313_v26 = vld [vmem:[%s8426_s28 + $0x98] sm:$0xff]  ;;  %v3030_v16 = vsub.f32 %v3028_v15, %v3029_v5 }
 0x3b6   : > { %v2138_v48 = vpop.f32.mrf.mxu3 }
 0x3b7   : > { %v9985_v57 = vadd.f32 %v2696_v30, %v2423_v23  ;;  %v3036_v30 = vsub.f32 %v2764_v3, %v9988_v63 }
 0x3b8   : > { %v1742_v21 = vpop.f32.mrf.mxu2  ;;  %v2704_v59 = vpop.f32.mrf.mxu1 }
 0x3b9   : > { %13595 = vst [vmem:[#allocation94_spill] sm:$0xff] %v9985_v57  ;;  %v1743_v56 = vadd.f32 %v1742_v21, %v13596_v28  ;;  %v2767_v28 = vsel %vm431_vm1, %v313_v26, 0  ;;  %v13599_v57 = vld [vmem:[#allocation146_spill] sm:$0xff] }
 0x3ba   : > { %v2430_v32 = vpop.f32.mrf.mxu0 }
 0x3bb   : > { %v2139_v25 = vadd.f32 %v2138_v48, %v1743_v56  ;;  %3514 = vmatmul.f32.gmra.mxu3 %v9970_v62  ;;  %4149 = vmatmul.f32.gmra.mxu1 %v3021_v14  ;;  %v3031_v56 = vand.u32 4294901760, %v3030_v16  ;;  %v3037_v62 = vand.u32 4294901760, %v3036_v30  ;;  %v9997_v14 = vand.u32 4294901760, %v2767_v28 }
 0x3bd   : > { %v2427_v10 = vadd.f32 %v2426_v4, %v2139_v25  ;;  %3024 = vmatmul.f32.gmra.mxu2 %v3023_v51  ;;  %3800 = vmatmul.f32.gmra.mxu0 %v3020_v55  ;;  %13600 = vst [vmem:[#allocation104_spill] sm:$0xff] %v9997_v14  ;;  %v314_v55 = vld [vmem:[%s8426_s28 + $0xa8] sm:$0xff]  ;;  %v3038_v25 = vsub.f32 %v3036_v30, %v3037_v62 }
 0x3be   : > { %v2144_v61 = vpop.f32.mrf.mxu3 }
 0x3bf   : > { %v9994_v23 = vadd.f32 %v2700_v49, %v2427_v10  ;;  %v3044_v49 = vsub.f32 %v2767_v28, %v9997_v14 }
 0x3c0   : > { %v1747_v20 = vpop.f32.mrf.mxu2  ;;  %v2708_v21 = vpop.f32.mrf.mxu1 }
 0x3c1   : > { %13598 = vst [vmem:[#allocation105_spill] sm:$0xff] %v9994_v23  ;;  %v1748_v48 = vadd.f32 %v1747_v20, %v13599_v57  ;;  %v2770_v57 = vsel %vm431_vm1, %v314_v55, 0  ;;  %v13602_v23 = vld [vmem:[#allocation147_spill] sm:$0xff] }
 0x3c2   : > { %v2434_v4 = vpop.f32.mrf.mxu0 }
 0x3c3   : > { %v2145_v51 = vadd.f32 %v2144_v61, %v1748_v48  ;;  %3518 = vmatmul.f32.gmra.mxu3 %v9979_v24  ;;  %4155 = vmatmul.f32.gmra.mxu1 %v3029_v5  ;;  %v3039_v48 = vand.u32 4294901760, %v3038_v25  ;;  %v3045_v24 = vand.u32 4294901760, %v3044_v49  ;;  %v10006_v5 = vand.u32 4294901760, %v2770_v57 }
 0x3c5   : > { %v2431_v3 = vadd.f32 %v2430_v32, %v2145_v51  ;;  %3032 = vmatmul.f32.gmra.mxu2 %v3031_v56  ;;  %3805 = vmatmul.f32.gmra.mxu0 %v3028_v15  ;;  %13603 = vst [vmem:[#allocation116_spill] sm:$0xff] %v10006_v5  ;;  %v315_v15 = vld [vmem:[%s8426_s28 + $0xb0] sm:$0xff]  ;;  %v3046_v51 = vsub.f32 %v3044_v49, %v3045_v24 }
 0x3c6   : > { %v2150_v26 = vpop.f32.mrf.mxu3 }
 0x3c7   : > { %v10003_v10 = vadd.f32 %v2704_v59, %v2431_v3  ;;  %v3052_v59 = vsub.f32 %v2770_v57, %v10006_v5 }
 0x3c8   : > { %v1752_v16 = vpop.f32.mrf.mxu2  ;;  %v2712_v20 = vpop.f32.mrf.mxu1 }
 0x3c9   : > { %13601 = vst [vmem:[#allocation101_spill] sm:$0xff] %v10003_v10  ;;  %v1753_v61 = vadd.f32 %v1752_v16, %v13602_v23  ;;  %v2773_v23 = vsel %vm431_vm1, %v315_v15, 0  ;;  %v13605_v10 = vld [vmem:[#allocation148_spill] sm:$0xff] }
 0x3ca   : > { %v2438_v32 = vpop.f32.mrf.mxu0 }
 0x3cb   : > { %v2151_v56 = vadd.f32 %v2150_v26, %v1753_v61  ;;  %3522 = vmatmul.f32.gmra.mxu3 %v9988_v63  ;;  %4161 = vmatmul.f32.gmra.mxu1 %v3037_v62  ;;  %v3047_v61 = vand.u32 4294901760, %v3046_v51  ;;  %v3053_v63 = vand.u32 4294901760, %v3052_v59  ;;  %v10015_v62 = vand.u32 4294901760, %v2773_v23 }
 0x3cd   : > { %v2435_v28 = vadd.f32 %v2434_v4, %v2151_v56  ;;  %3040 = vmatmul.f32.gmra.mxu2 %v3039_v48  ;;  %3810 = vmatmul.f32.gmra.mxu0 %v3036_v30  ;;  %13606 = vst [vmem:[#allocation111_spill] sm:$0xff] %v10015_v62  ;;  %v316_v30 = vld [vmem:[%s8426_s28 + $0xc0] sm:$0xff]  ;;  %v3054_v56 = vsub.f32 %v3052_v59, %v3053_v63 }
 0x3ce   : > { %v2156_v55 = vpop.f32.mrf.mxu3 }
 0x3cf   : > { %v10012_v3 = vadd.f32 %v2708_v21, %v2435_v28  ;;  %v3060_v21 = vsub.f32 %v2773_v23, %v10015_v62 }
 0x3d0   : > { %v1757_v25 = vpop.f32.mrf.mxu2  ;;  %v2716_v16 = vpop.f32.mrf.mxu1 }
 0x3d1   : > { %13604 = vst [vmem:[#allocation112_spill] sm:$0xff] %v10012_v3  ;;  %v1758_v26 = vadd.f32 %v1757_v25, %v13605_v10  ;;  %v2776_v10 = vsel %vm431_vm1, %v316_v30, 0  ;;  %v13608_v3 = vld [vmem:[#allocation149_spill] sm:$0xff] }
 0x3d2   : > { %v2442_v4 = vpop.f32.mrf.mxu0 }
 0x3d3   : > { %v2157_v48 = vadd.f32 %v2156_v55, %v1758_v26  ;;  %3526 = vmatmul.f32.gmra.mxu3 %v9997_v14  ;;  %4167 = vmatmul.f32.gmra.mxu1 %v3045_v24  ;;  %v3055_v26 = vand.u32 4294901760, %v3054_v56  ;;  %v3061_v14 = vand.u32 4294901760, %v3060_v21  ;;  %v10024_v24 = vand.u32 4294901760, %v2776_v10 }
 0x3d5   : > { %v2439_v57 = vadd.f32 %v2438_v32, %v2157_v48  ;;  %3048 = vmatmul.f32.gmra.mxu2 %v3047_v61  ;;  %3815 = vmatmul.f32.gmra.mxu0 %v3044_v49  ;;  %13609 = vst [vmem:[#allocation123_spill] sm:$0xff] %v10024_v24  ;;  %v317_v49 = vld [vmem:[%s8426_s28 + $0xc8] sm:$0xff]  ;;  %v3062_v48 = vsub.f32 %v3060_v21, %v3061_v14 }
 0x3d6   : > { %v2162_v15 = vpop.f32.mrf.mxu3 }
 0x3d7   : > { %v10021_v28 = vadd.f32 %v2712_v20, %v2439_v57  ;;  %v3068_v20 = vsub.f32 %v2776_v10, %v10024_v24 }
 0x3d8   : > { %v1762_v51 = vpop.f32.mrf.mxu2  ;;  %v2720_v25 = vpop.f32.mrf.mxu1 }
 0x3d9   : > { %13607 = vst [vmem:[#allocation108_spill] sm:$0xff] %v10021_v28  ;;  %v1763_v55 = vadd.f32 %v1762_v51, %v13608_v3  ;;  %v2779_v3 = vsel %vm431_vm1, %v317_v49, 0  ;;  %v13611_v28 = vld [vmem:[#allocation150_spill] sm:$0xff] }
 0x3da   : > { %v2446_v32 = vpop.f32.mrf.mxu0 }
 0x3db   : > { %v2163_v61 = vadd.f32 %v2162_v15, %v1763_v55  ;;  %3530 = vmatmul.f32.gmra.mxu3 %v10006_v5  ;;  %4173 = vmatmul.f32.gmra.mxu1 %v3053_v63  ;;  %v3063_v55 = vand.u32 4294901760, %v3062_v48  ;;  %v3069_v5 = vand.u32 4294901760, %v3068_v20  ;;  %v10033_v63 = vand.u32 4294901760, %v2779_v3 }
 0x3dd   : > { %v2443_v23 = vadd.f32 %v2442_v4, %v2163_v61  ;;  %3056 = vmatmul.f32.gmra.mxu2 %v3055_v26  ;;  %3820 = vmatmul.f32.gmra.mxu0 %v3052_v59  ;;  %13612 = vst [vmem:[#allocation118_spill] sm:$0xff] %v10033_v63  ;;  %v318_v59 = vld [vmem:[%s8426_s28 + $0xd8] sm:$0xff]  ;;  %v3070_v61 = vsub.f32 %v3068_v20, %v3069_v5 }
 0x3de   : > { %v2168_v30 = vpop.f32.mrf.mxu3 }
 0x3df   : > { %v10030_v57 = vadd.f32 %v2716_v16, %v2443_v23  ;;  %v3076_v16 = vsub.f32 %v2779_v3, %v10033_v63 }
 0x3e0   : > { %v1767_v56 = vpop.f32.mrf.mxu2  ;;  %v2724_v51 = vpop.f32.mrf.mxu1 }
 0x3e1   : > { %13610 = vst [vmem:[#allocation119_spill] sm:$0xff] %v10030_v57  ;;  %v1768_v15 = vadd.f32 %v1767_v56, %v13611_v28  ;;  %v2782_v28 = vsel %vm431_vm1, %v318_v59, 0  ;;  %v13614_v57 = vld [vmem:[#allocation151_spill] sm:$0xff] }
 0x3e2   : > { %v2450_v4 = vpop.f32.mrf.mxu0 }
 0x3e3   : > { %v2169_v26 = vadd.f32 %v2168_v30, %v1768_v15  ;;  %3534 = vmatmul.f32.gmra.mxu3 %v10015_v62  ;;  %4179 = vmatmul.f32.gmra.mxu1 %v3061_v14  ;;  %v3071_v15 = vand.u32 4294901760, %v3070_v61  ;;  %v3077_v62 = vand.u32 4294901760, %v3076_v16  ;;  %v10042_v14 = vand.u32 4294901760, %v2782_v28 }
 0x3e5   : > { %v2447_v10 = vadd.f32 %v2446_v32, %v2169_v26  ;;  %3064 = vmatmul.f32.gmra.mxu2 %v3063_v55  ;;  %3825 = vmatmul.f32.gmra.mxu0 %v3060_v21  ;;  %13615 = vst [vmem:[#allocation128_spill] sm:$0xff] %v10042_v14  ;;  %v319_v21 = vld [vmem:[%s8426_s28 + $0xe0] sm:$0xff]  ;;  %v3078_v26 = vsub.f32 %v3076_v16, %v3077_v62 }
 0x3e6   : > { %v2174_v49 = vpop.f32.mrf.mxu3 }
 0x3e7   : > { %v10039_v23 = vadd.f32 %v2720_v25, %v2447_v10  ;;  %v3084_v25 = vsub.f32 %v2782_v28, %v10042_v14 }
 0x3e8   : > { %v1772_v48 = vpop.f32.mrf.mxu2  ;;  %v4090_v56 = vpop.f32.mrf.mxu1 }
 0x3e9   : > { %13613 = vst [vmem:[#allocation115_spill] sm:$0xff] %v10039_v23  ;;  %v1773_v30 = vadd.f32 %v1772_v48, %v13614_v57  ;;  %v2785_v57 = vsel %vm431_vm1, %v319_v21, 0  ;;  %v13617_v23 = vld [vmem:[#allocation50_spill] sm:$0xff] }
 0x3ea   : > { %v3751_v32 = vpop.f32.mrf.mxu0 }
 0x3eb   : > { %v2175_v55 = vadd.f32 %v2174_v49, %v1773_v30  ;;  %3538 = vmatmul.f32.gmra.mxu3 %v10024_v24  ;;  %4185 = vmatmul.f32.gmra.mxu1 %v3069_v5  ;;  %v3079_v30 = vand.u32 4294901760, %v3078_v26  ;;  %v3085_v24 = vand.u32 4294901760, %v3084_v25  ;;  %v10051_v5 = vand.u32 4294901760, %v2785_v57 }
 0x3ed   : > { %v2451_v3 = vadd.f32 %v2450_v4, %v2175_v55  ;;  %3072 = vmatmul.f32.gmra.mxu2 %v3071_v15  ;;  %3830 = vmatmul.f32.gmra.mxu0 %v3068_v20  ;;  %13618 = vst [vmem:[#allocation125_spill] sm:$0xff] %v10051_v5  ;;  %v320_v20 = vld [vmem:[%s8426_s28 + $0xf0] sm:$0xff]  ;;  %v3086_v55 = vsub.f32 %v3084_v25, %v3085_v24 }
 0x3ee   : > { %v3475_v59 = vpop.f32.mrf.mxu3 }
 0x3ef   : > { %v10048_v10 = vadd.f32 %v2724_v51, %v2451_v3  ;;  %v3092_v51 = vsub.f32 %v2785_v57, %v10051_v5 }
 0x3f0   : > { %v2945_v61 = vpop.f32.mrf.mxu2  ;;  %v4096_v48 = vpop.f32.mrf.mxu1 }
 0x3f1   : > { %13616 = vst [vmem:[#allocation126_spill] sm:$0xff] %v10048_v10  ;;  %v2946_v49 = vadd.f32 %v2945_v61, %v13617_v23  ;;  %v2788_v23 = vsel %vm431_vm1, %v320_v20, 0  ;;  %v13620_v10 = vld [vmem:[#allocation49_spill] sm:$0xff] }
 0x3f2   : > { %v3756_v4 = vpop.f32.mrf.mxu0 }
 0x3f3   : > { %v3476_v15 = vadd.f32 %v3475_v59, %v2946_v49  ;;  %3542 = vmatmul.f32.gmra.mxu3 %v10033_v63  ;;  %4191 = vmatmul.f32.gmra.mxu1 %v3077_v62  ;;  %v3087_v49 = vand.u32 4294901760, %v3086_v55  ;;  %v3093_v63 = vand.u32 4294901760, %v3092_v51  ;;  %v10060_v62 = vand.u32 4294901760, %v2788_v23 }
 0x3f5   : > { %v3752_v28 = vadd.f32 %v3751_v32, %v3476_v15  ;;  %3080 = vmatmul.f32.gmra.mxu2 %v3079_v30  ;;  %3835 = vmatmul.f32.gmra.mxu0 %v3076_v16  ;;  %13621 = vst [vmem:[#allocation133_spill] sm:$0xff] %v10060_v62  ;;  %v321_v16 = vld [vmem:[%s8426_s28 + $0xf8] sm:$0xff]  ;;  %v3094_v15 = vsub.f32 %v3092_v51, %v3093_v63 }
 0x3f6   : > { %v3479_v21 = vpop.f32.mrf.mxu3 }
 0x3f7   : > { %v10057_v3 = vadd.f32 %v4090_v56, %v3752_v28  ;;  %v3100_v56 = vsub.f32 %v2788_v23, %v10060_v62 }
 0x3f8   : > { %v2953_v26 = vpop.f32.mrf.mxu2  ;;  %v4102_v61 = vpop.f32.mrf.mxu1 }
 0x3f9   : > { %13619 = vst [vmem:[#allocation121_spill] sm:$0xff] %v10057_v3  ;;  %v2954_v59 = vadd.f32 %v2953_v26, %v13620_v10  ;;  %v2791_v10 = vsel %vm431_vm1, %v321_v16, 0  ;;  %v13623_v3 = vld [vmem:[#allocation47_spill] sm:$0xff] }
 0x3fa   : > { %v3761_v32 = vpop.f32.mrf.mxu0 }
 0x3fb   : > { %v3480_v30 = vadd.f32 %v3479_v21, %v2954_v59  ;;  %3546 = vmatmul.f32.gmra.mxu3 %v10042_v14  ;;  %4197 = vmatmul.f32.gmra.mxu1 %v3085_v24  ;;  %v3095_v59 = vand.u32 4294901760, %v3094_v15  ;;  %v3101_v14 = vand.u32 4294901760, %v3100_v56  ;;  %v10069_v24 = vand.u32 4294901760, %v2791_v10 }
 0x3fd   : > { %v3757_v57 = vadd.f32 %v3756_v4, %v3480_v30  ;;  %3088 = vmatmul.f32.gmra.mxu2 %v3087_v49  ;;  %3840 = vmatmul.f32.gmra.mxu0 %v3084_v25  ;;  %13624 = vst [vmem:[#allocation12_spill] sm:$0xff] %v10069_v24  ;;  %v322_v25 = vld [vmem:[%s8426_s28 + $0x108] sm:$0xff]  ;;  %v3102_v30 = vsub.f32 %v3100_v56, %v3101_v14 }
 0x3fe   : > { %v3483_v20 = vpop.f32.mrf.mxu3 }
 0x3ff   : > { %v10066_v28 = vadd.f32 %v4096_v48, %v3757_v57  ;;  %v3108_v48 = vsub.f32 %v2791_v10, %v10069_v24 }
 0x400   : > { %v2961_v55 = vpop.f32.mrf.mxu2  ;;  %v4108_v26 = vpop.f32.mrf.mxu1 }
 0x401   : > { %13622 = vst [vmem:[#allocation130_spill] sm:$0xff] %v10066_v28  ;;  %v2962_v21 = vadd.f32 %v2961_v55, %v13623_v3  ;;  %v2794_v3 = vsel %vm431_vm1, %v322_v25, 0  ;;  %v13626_v28 = vld [vmem:[#allocation60_spill] sm:$0xff] }
 0x402   : > { %v3766_v4 = vpop.f32.mrf.mxu0 }
 0x403   : > { %v3484_v49 = vadd.f32 %v3483_v20, %v2962_v21  ;;  %3550 = vmatmul.f32.gmra.mxu3 %v10051_v5  ;;  %4203 = vmatmul.f32.gmra.mxu1 %v3093_v63  ;;  %v3103_v21 = vand.u32 4294901760, %v3102_v30  ;;  %v3109_v5 = vand.u32 4294901760, %v3108_v48  ;;  %v10078_v63 = vand.u32 4294901760, %v2794_v3 }
 0x405   : > { %v3762_v23 = vadd.f32 %v3761_v32, %v3484_v49  ;;  %3096 = vmatmul.f32.gmra.mxu2 %v3095_v59  ;;  %3845 = vmatmul.f32.gmra.mxu0 %v3092_v51  ;;  %13627 = vst [vmem:[#allocation13_spill] sm:$0xff] %v10078_v63  ;;  %v323_v51 = vld [vmem:[%s8426_s28 + $0x110] sm:$0xff]  ;;  %v3110_v49 = vsub.f32 %v3108_v48, %v3109_v5 }
 0x406   : > { %v3487_v16 = vpop.f32.mrf.mxu3 }
 0x407   : > { %v10075_v57 = vadd.f32 %v4102_v61, %v3762_v23  ;;  %v3116_v61 = vsub.f32 %v2794_v3, %v10078_v63 }
 0x408   : > { %v2969_v15 = vpop.f32.mrf.mxu2  ;;  %v4114_v55 = vpop.f32.mrf.mxu1 }
 0x409   : > { %13625 = vst [vmem:[#allocation10_spill] sm:$0xff] %v10075_v57  ;;  %v2970_v20 = vadd.f32 %v2969_v15, %v13626_v28  ;;  %v2797_v28 = vsel %vm431_vm1, %v323_v51, 0  ;;  %v13629_v57 = vld [vmem:[#allocation56_spill] sm:$0xff] }
 0x40a   : > { %v3771_v32 = vpop.f32.mrf.mxu0 }
 0x40b   : > { %v3488_v59 = vadd.f32 %v3487_v16, %v2970_v20  ;;  %3554 = vmatmul.f32.gmra.mxu3 %v10060_v62  ;;  %4209 = vmatmul.f32.gmra.mxu1 %v3101_v14  ;;  %v3111_v20 = vand.u32 4294901760, %v3110_v49  ;;  %v3117_v62 = vand.u32 4294901760, %v3116_v61  ;;  %v10087_v14 = vand.u32 4294901760, %v2797_v28 }
 0x40d   : > { %v3767_v10 = vadd.f32 %v3766_v4, %v3488_v59  ;;  %3104 = vmatmul.f32.gmra.mxu2 %v3103_v21  ;;  %3850 = vmatmul.f32.gmra.mxu0 %v3100_v56  ;;  %13630 = vst [vmem:[#allocation15_spill] sm:$0xff] %v10087_v14  ;;  %v324_v56 = vld [vmem:[%s8426_s28 + $0x120] sm:$0xff]  ;;  %v3118_v59 = vsub.f32 %v3116_v61, %v3117_v62 }
 0x40e   : > { %v3491_v25 = vpop.f32.mrf.mxu3 }
 0x40f   : > { %v10084_v23 = vadd.f32 %v4108_v26, %v3767_v10  ;;  %v3124_v26 = vsub.f32 %v2797_v28, %v10087_v14 }
 0x410   : > { %v2977_v30 = vpop.f32.mrf.mxu2  ;;  %v4120_v15 = vpop.f32.mrf.mxu1 }
 0x411   : > { %13628 = vst [vmem:[#allocation11_spill] sm:$0xff] %v10084_v23  ;;  %v2978_v16 = vadd.f32 %v2977_v30, %v13629_v57  ;;  %v2800_v57 = vsel %vm431_vm1, %v324_v56, 0  ;;  %v13632_v23 = vld [vmem:[#allocation55_spill] sm:$0xff] }
 0x412   : > { %v3776_v4 = vpop.f32.mrf.mxu0 }
 0x413   : > { %v3492_v21 = vadd.f32 %v3491_v25, %v2978_v16  ;;  %3558 = vmatmul.f32.gmra.mxu3 %v10069_v24  ;;  %4215 = vmatmul.f32.gmra.mxu1 %v3109_v5  ;;  %v3119_v16 = vand.u32 4294901760, %v3118_v59  ;;  %v3125_v24 = vand.u32 4294901760, %v3124_v26  ;;  %v10096_v5 = vand.u32 4294901760, %v2800_v57 }
 0x415   : > { %v3772_v3 = vadd.f32 %v3771_v32, %v3492_v21  ;;  %3112 = vmatmul.f32.gmra.mxu2 %v3111_v20  ;;  %3855 = vmatmul.f32.gmra.mxu0 %v3108_v48  ;;  %13633 = vst [vmem:[#allocation17_spill] sm:$0xff] %v10096_v5  ;;  %v325_v48 = vld [vmem:[%s8426_s28 + $0x128] sm:$0xff]  ;;  %v3126_v21 = vsub.f32 %v3124_v26, %v3125_v24 }
 0x416   : > { %v3495_v51 = vpop.f32.mrf.mxu3 }
 0x417   : > { %v10093_v10 = vadd.f32 %v4114_v55, %v3772_v3  ;;  %v3132_v55 = vsub.f32 %v2800_v57, %v10096_v5 }
 0x418   : > { %v2985_v49 = vpop.f32.mrf.mxu2  ;;  %v4126_v30 = vpop.f32.mrf.mxu1 }
 0x419   : > { %13631 = vst [vmem:[#allocation14_spill] sm:$0xff] %v10093_v10  ;;  %v2986_v25 = vadd.f32 %v2985_v49, %v13632_v23  ;;  %v2803_v23 = vsel %vm431_vm1, %v325_v48, 0  ;;  %v13635_v10 = vld [vmem:[#allocation53_spill] sm:$0xff] }
 0x41a   : > { %v3781_v32 = vpop.f32.mrf.mxu0 }
 0x41b   : > { %v3496_v20 = vadd.f32 %v3495_v51, %v2986_v25  ;;  %3562 = vmatmul.f32.gmra.mxu3 %v10078_v63  ;;  %4221 = vmatmul.f32.gmra.mxu1 %v3117_v62  ;;  %v3127_v25 = vand.u32 4294901760, %v3126_v21  ;;  %v3133_v63 = vand.u32 4294901760, %v3132_v55  ;;  %v10105_v62 = vand.u32 4294901760, %v2803_v23 }
 0x41d   : > { %v3777_v28 = vadd.f32 %v3776_v4, %v3496_v20  ;;  %3120 = vmatmul.f32.gmra.mxu2 %v3119_v16  ;;  %3860 = vmatmul.f32.gmra.mxu0 %v3116_v61  ;;  %13636 = vst [vmem:[#allocation19_spill] sm:$0xff] %v10105_v62  ;;  %v326_v61 = vld [vmem:[%s8426_s28 + $0x138] sm:$0xff]  ;;  %v3134_v20 = vsub.f32 %v3132_v55, %v3133_v63 }
 0x41e   : > { %v3499_v56 = vpop.f32.mrf.mxu3 }
 0x41f   : > { %v10102_v3 = vadd.f32 %v4120_v15, %v3777_v28  ;;  %v3140_v15 = vsub.f32 %v2803_v23, %v10105_v62 }
 0x420   : > { %v2993_v59 = vpop.f32.mrf.mxu2  ;;  %v4132_v49 = vpop.f32.mrf.mxu1 }
 0x421   : > { %13634 = vst [vmem:[#allocation16_spill] sm:$0xff] %v10102_v3  ;;  %v2994_v51 = vadd.f32 %v2993_v59, %v13635_v10  ;;  %v2806_v10 = vsel %vm431_vm1, %v326_v61, 0  ;;  %v13638_v3 = vld [vmem:[#allocation67_spill] sm:$0xff] }
 0x422   : > { %v3786_v4 = vpop.f32.mrf.mxu0 }
 0x423   : > { %v3500_v16 = vadd.f32 %v3499_v56, %v2994_v51  ;;  %3566 = vmatmul.f32.gmra.mxu3 %v10087_v14  ;;  %4227 = vmatmul.f32.gmra.mxu1 %v3125_v24  ;;  %v3135_v51 = vand.u32 4294901760, %v3134_v20  ;;  %v3141_v14 = vand.u32 4294901760, %v3140_v15  ;;  %v10114_v24 = vand.u32 4294901760, %v2806_v10 }
 0x425   : > { %v3782_v57 = vadd.f32 %v3781_v32, %v3500_v16  ;;  %3128 = vmatmul.f32.gmra.mxu2 %v3127_v25  ;;  %3865 = vmatmul.f32.gmra.mxu0 %v3124_v26  ;;  %13639 = vst [vmem:[#allocation21_spill] sm:$0xff] %v10114_v24  ;;  %v327_v26 = vld [vmem:[%s8426_s28 + $0x140] sm:$0xff]  ;;  %v3142_v16 = vsub.f32 %v3140_v15, %v3141_v14 }
 0x426   : > { %v3503_v48 = vpop.f32.mrf.mxu3 }
 0x427   : > { %v10111_v28 = vadd.f32 %v4126_v30, %v3782_v57  ;;  %v3148_v30 = vsub.f32 %v2806_v10, %v10114_v24 }
 0x428   : > { %v3001_v21 = vpop.f32.mrf.mxu2  ;;  %v4138_v59 = vpop.f32.mrf.mxu1 }
 0x429   : > { %13637 = vst [vmem:[#allocation18_spill] sm:$0xff] %v10111_v28  ;;  %v3002_v56 = vadd.f32 %v3001_v21, %v13638_v3  ;;  %v2809_v3 = vsel %vm431_vm1, %v327_v26, 0  ;;  %v13641_v28 = vld [vmem:[#allocation63_spill] sm:$0xff] }
 0x42a   : > { %v3791_v32 = vpop.f32.mrf.mxu0 }
 0x42b   : > { %v3504_v25 = vadd.f32 %v3503_v48, %v3002_v56  ;;  %3570 = vmatmul.f32.gmra.mxu3 %v10096_v5  ;;  %4233 = vmatmul.f32.gmra.mxu1 %v3133_v63  ;;  %v3143_v56 = vand.u32 4294901760, %v3142_v16  ;;  %v3149_v5 = vand.u32 4294901760, %v3148_v30  ;;  %v10123_v63 = vand.u32 4294901760, %v2809_v3 }
 0x42d   : > { %v3787_v23 = vadd.f32 %v3786_v4, %v3504_v25  ;;  %3136 = vmatmul.f32.gmra.mxu2 %v3135_v51  ;;  %3870 = vmatmul.f32.gmra.mxu0 %v3132_v55  ;;  %13642 = vst [vmem:[#allocation23_spill] sm:$0xff] %v10123_v63  ;;  %v328_v55 = vld [vmem:[%s8426_s28 + $0x150] sm:$0xff]  ;;  %v3150_v25 = vsub.f32 %v3148_v30, %v3149_v5 }
 0x42e   : > { %v3507_v61 = vpop.f32.mrf.mxu3 }
 0x42f   : > { %v10120_v57 = vadd.f32 %v4132_v49, %v3787_v23  ;;  %v3156_v49 = vsub.f32 %v2809_v3, %v10123_v63 }
 0x430   : > { %v3009_v20 = vpop.f32.mrf.mxu2  ;;  %v4144_v21 = vpop.f32.mrf.mxu1 }
 0x431   : > { %13640 = vst [vmem:[#allocation20_spill] sm:$0xff] %v10120_v57  ;;  %v3010_v48 = vadd.f32 %v3009_v20, %v13641_v28  ;;  %v2812_v28 = vsel %vm431_vm1, %v328_v55, 0  ;;  %v13644_v57 = vld [vmem:[#allocation62_spill] sm:$0xff] }
 0x432   : > { %v3796_v4 = vpop.f32.mrf.mxu0 }
 0x433   : > { %v3508_v51 = vadd.f32 %v3507_v61, %v3010_v48  ;;  %3574 = vmatmul.f32.gmra.mxu3 %v10105_v62  ;;  %4239 = vmatmul.f32.gmra.mxu1 %v3141_v14  ;;  %v3151_v48 = vand.u32 4294901760, %v3150_v25  ;;  %v3157_v62 = vand.u32 4294901760, %v3156_v49  ;;  %v10132_v14 = vand.u32 4294901760, %v2812_v28 }
 0x435   : > { %v3792_v10 = vadd.f32 %v3791_v32, %v3508_v51  ;;  %3144 = vmatmul.f32.gmra.mxu2 %v3143_v56  ;;  %3875 = vmatmul.f32.gmra.mxu0 %v3140_v15  ;;  %13645 = vst [vmem:[#allocation25_spill] sm:$0xff] %v10132_v14  ;;  %v329_v15 = vld [vmem:[%s8426_s28 + $0x158] sm:$0xff]  ;;  %v3158_v51 = vsub.f32 %v3156_v49, %v3157_v62 }
 0x436   : > { %v3511_v26 = vpop.f32.mrf.mxu3 }
 0x437   : > { %v10129_v23 = vadd.f32 %v4138_v59, %v3792_v10  ;;  %v3164_v59 = vsub.f32 %v2812_v28, %v10132_v14 }
 0x438   : > { %v3017_v16 = vpop.f32.mrf.mxu2  ;;  %v4150_v20 = vpop.f32.mrf.mxu1 }
 0x439   : > { %13643 = vst [vmem:[#allocation22_spill] sm:$0xff] %v10129_v23  ;;  %v3018_v61 = vadd.f32 %v3017_v16, %v13644_v57  ;;  %v2815_v57 = vsel %vm431_vm1, %v329_v15, 0  ;;  %v13646_v23 = vld [vmem:[#allocation59_spill] sm:$0xff] }
 0x43a   : > { %v3801_v32 = vpop.f32.mrf.mxu0 }
 0x43b   : > { %v3512_v56 = vadd.f32 %v3511_v26, %v3018_v61  ;;  %3578 = vmatmul.f32.gmra.mxu3 %v10114_v24  ;;  %4245 = vmatmul.f32.gmra.mxu1 %v3149_v5  ;;  %v3159_v61 = vand.u32 4294901760, %v3158_v51  ;;  %v3165_v24 = vand.u32 4294901760, %v3164_v59  ;;  %v10141_v5 = vand.u32 4294901760, %v2815_v57 }
 0x43d   : > { %v3797_v3 = vadd.f32 %v3796_v4, %v3512_v56  ;;  %3152 = vmatmul.f32.gmra.mxu2 %v3151_v48  ;;  %3880 = vmatmul.f32.gmra.mxu0 %v3148_v30  ;;  %13647 = vst [vmem:[#allocation24_spill] sm:$0xff] %v10141_v5  ;;  %v330_v30 = vld [vmem:[%s8426_s28 + $0x168] sm:$0xff]  ;;  %v3166_v56 = vsub.f32 %v3164_v59, %v3165_v24 }
 0x43e   : > { %v3515_v55 = vpop.f32.mrf.mxu3 }
 0x43f   : > { %v10138_v10 = vadd.f32 %v4144_v21, %v3797_v3  ;;  %v3172_v21 = vsub.f32 %v2815_v57, %v10141_v5 }
 0x440   : > { %v3025_v25 = vpop.f32.mrf.mxu2  ;;  %v4156_v16 = vpop.f32.mrf.mxu1 }
 0x441   : > { %v3026_v26 = vadd.f32 %v3025_v25, %v13646_v23  ;;  %v2818_v23 = vsel %vm431_vm1, %v330_v30, 0 }
 0x442   : > { %v3806_v4 = vpop.f32.mrf.mxu0 }
 0x443   : > { %v3516_v48 = vadd.f32 %v3515_v55, %v3026_v26  ;;  %3582 = vmatmul.f32.gmra.mxu3 %v10123_v63  ;;  %4251 = vmatmul.f32.gmra.mxu1 %v3157_v62  ;;  %v3167_v26 = vand.u32 4294901760, %v3166_v56  ;;  %v3173_v63 = vand.u32 4294901760, %v3172_v21  ;;  %v10150_v62 = vand.u32 4294901760, %v2818_v23 }
 0x445   : > { %v3802_v28 = vadd.f32 %v3801_v32, %v3516_v48  ;;  %3160 = vmatmul.f32.gmra.mxu2 %v3159_v61  ;;  %3885 = vmatmul.f32.gmra.mxu0 %v3156_v49  ;;  %13648 = vst [vmem:[#allocation27_spill] sm:$0xff] %v10150_v62  ;;  %v331_v49 = vld [vmem:[%s8426_s28 + $0x170] sm:$0xff]  ;;  %v3174_v48 = vsub.f32 %v3172_v21, %v3173_v63 }
 0x446   : > { %v3519_v15 = vpop.f32.mrf.mxu3 }
 0x447   : > { %v10147_v3 = vadd.f32 %v4150_v20, %v3802_v28  ;;  %v3180_v20 = vsub.f32 %v2818_v23, %v10150_v62 }
 0x448   : > { %v3033_v51 = vpop.f32.mrf.mxu2  ;;  %v4162_v25 = vpop.f32.mrf.mxu1 }
 0x449   : > { %v3034_v55 = vadd.f32 %v3033_v51, %v9583_v6  ;;  %v2821_v6 = vsel %vm431_vm1, %v331_v49, 0 }
 0x44a   : > { %v3811_v32 = vpop.f32.mrf.mxu0 }
 0x44b   : > { %v3520_v61 = vadd.f32 %v3519_v15, %v3034_v55  ;;  %3586 = vmatmul.f32.gmra.mxu3 %v10132_v14  ;;  %4257 = vmatmul.f32.gmra.mxu1 %v3165_v24  ;;  %v3175_v55 = vand.u32 4294901760, %v3174_v48  ;;  %v3181_v14 = vand.u32 4294901760, %v3180_v20  ;;  %v10159_v24 = vand.u32 4294901760, %v2821_v6 }
 0x44d   : > { %v3807_v57 = vadd.f32 %v3806_v4, %v3520_v61  ;;  %3168 = vmatmul.f32.gmra.mxu2 %v3167_v26  ;;  %3890 = vmatmul.f32.gmra.mxu0 %v3164_v59  ;;  %13649 = vst [vmem:[#allocation26_spill] sm:$0xff] %v10159_v24  ;;  %v332_v59 = vld [vmem:[%s8426_s28 + $0x1b0] sm:$0xff]  ;;  %v3182_v61 = vsub.f32 %v3180_v20, %v3181_v14 }
 0x44e   : > { %v3523_v30 = vpop.f32.mrf.mxu3 }
 0x44f   : > { %v10156_v28 = vadd.f32 %v4156_v16, %v3807_v57  ;;  %v3188_v16 = vsub.f32 %v2821_v6, %v10159_v24 }
 0x450   : > { %v3041_v56 = vpop.f32.mrf.mxu2  ;;  %v4168_v51 = vpop.f32.mrf.mxu1 }
 0x451   : > { %v3042_v15 = vadd.f32 %v3041_v56, %v9592_v27  ;;  %v2824_v27 = vsel %vm431_vm1, %v332_v59, 0 }
 0x452   : > { %v3816_v4 = vpop.f32.mrf.mxu0 }
 0x453   : > { %v3524_v26 = vadd.f32 %v3523_v30, %v3042_v15  ;;  %3590 = vmatmul.f32.gmra.mxu3 %v10141_v5  ;;  %4263 = vmatmul.f32.gmra.mxu1 %v3173_v63  ;;  %v3183_v15 = vand.u32 4294901760, %v3182_v61  ;;  %v3189_v5 = vand.u32 4294901760, %v3188_v16  ;;  %v10168_v63 = vand.u32 4294901760, %v2824_v27 }
 0x455   : > { %v3812_v23 = vadd.f32 %v3811_v32, %v3524_v26  ;;  %3176 = vmatmul.f32.gmra.mxu2 %v3175_v55  ;;  %3895 = vmatmul.f32.gmra.mxu0 %v3172_v21  ;;  %13650 = vst [vmem:[#allocation29_spill] sm:$0xff] %v10168_v63  ;;  %v333_v21 = vld [vmem:[%s8426_s28 + $0x1b8] sm:$0xff]  ;;  %v3190_v26 = vsub.f32 %v3188_v16, %v3189_v5 }
 0x456   : > { %v3527_v49 = vpop.f32.mrf.mxu3 }
 0x457   : > { %v10165_v57 = vadd.f32 %v4162_v25, %v3812_v23  ;;  %v3196_v25 = vsub.f32 %v2824_v27, %v10168_v63 }
 0x458   : > { %v3049_v48 = vpop.f32.mrf.mxu2  ;;  %v4174_v56 = vpop.f32.mrf.mxu1 }
 0x459   : > { %v3050_v30 = vadd.f32 %v3049_v48, %v9601_v38  ;;  %v2827_v38 = vsel %vm431_vm1, %v333_v21, 0 }
 0x45a   : > { %v3821_v32 = vpop.f32.mrf.mxu0 }
 0x45b   : > { %v3528_v55 = vadd.f32 %v3527_v49, %v3050_v30  ;;  %3594 = vmatmul.f32.gmra.mxu3 %v10150_v62  ;;  %4269 = vmatmul.f32.gmra.mxu1 %v3181_v14  ;;  %v3191_v30 = vand.u32 4294901760, %v3190_v26  ;;  %v3197_v62 = vand.u32 4294901760, %v3196_v25  ;;  %v10177_v14 = vand.u32 4294901760, %v2827_v38 }
 0x45d   : > { %v3817_v6 = vadd.f32 %v3816_v4, %v3528_v55  ;;  %3184 = vmatmul.f32.gmra.mxu2 %v3183_v15  ;;  %3900 = vmatmul.f32.gmra.mxu0 %v3180_v20  ;;  %13651 = vst [vmem:[#allocation28_spill] sm:$0xff] %v10177_v14  ;;  %v334_v20 = vld [vmem:[%s8426_s28 + $0x1c8] sm:$0xff]  ;;  %v3198_v55 = vsub.f32 %v3196_v25, %v3197_v62 }
 0x45e   : > { %v3531_v59 = vpop.f32.mrf.mxu3 }
 0x45f   : > { %v10174_v23 = vadd.f32 %v4168_v51, %v3817_v6  ;;  %v3204_v51 = vsub.f32 %v2827_v38, %v10177_v14 }
 0x460   : > { %v3057_v61 = vpop.f32.mrf.mxu2  ;;  %v4180_v48 = vpop.f32.mrf.mxu1 }
 0x461   : > { %v3058_v49 = vadd.f32 %v3057_v61, %v9610_v54  ;;  %v2830_v54 = vsel %vm431_vm1, %v334_v20, 0 }
 0x462   : > { %v3826_v4 = vpop.f32.mrf.mxu0 }
 0x463   : > { %v3532_v15 = vadd.f32 %v3531_v59, %v3058_v49  ;;  %3598 = vmatmul.f32.gmra.mxu3 %v10159_v24  ;;  %4275 = vmatmul.f32.gmra.mxu1 %v3189_v5  ;;  %v3199_v49 = vand.u32 4294901760, %v3198_v55  ;;  %v3205_v24 = vand.u32 4294901760, %v3204_v51  ;;  %v10186_v5 = vand.u32 4294901760, %v2830_v54 }
 0x465   : > { %v3822_v27 = vadd.f32 %v3821_v32, %v3532_v15  ;;  %3192 = vmatmul.f32.gmra.mxu2 %v3191_v30  ;;  %3905 = vmatmul.f32.gmra.mxu0 %v3188_v16  ;;  %13652 = vst [vmem:[#allocation31_spill] sm:$0xff] %v10186_v5  ;;  %v335_v16 = vld [vmem:[%s8426_s28 + $0x1d0] sm:$0xff]  ;;  %v3206_v15 = vsub.f32 %v3204_v51, %v3205_v24 }
 0x466   : > { %v3535_v21 = vpop.f32.mrf.mxu3 }
 0x467   : > { %v10183_v6 = vadd.f32 %v4174_v56, %v3822_v27  ;;  %v3212_v56 = vsub.f32 %v2830_v54, %v10186_v5 }
 0x468   : > { %v3065_v26 = vpop.f32.mrf.mxu2  ;;  %v4186_v61 = vpop.f32.mrf.mxu1 }
 0x469   : > { %v3066_v59 = vadd.f32 %v3065_v26, %v9619_v22  ;;  %v2833_v22 = vsel %vm431_vm1, %v335_v16, 0 }
 0x46a   : > { %v3831_v32 = vpop.f32.mrf.mxu0 }
 0x46b   : > { %v3536_v30 = vadd.f32 %v3535_v21, %v3066_v59  ;;  %3602 = vmatmul.f32.gmra.mxu3 %v10168_v63  ;;  %4281 = vmatmul.f32.gmra.mxu1 %v3197_v62  ;;  %v3207_v59 = vand.u32 4294901760, %v3206_v15  ;;  %v3213_v63 = vand.u32 4294901760, %v3212_v56  ;;  %v10195_v62 = vand.u32 4294901760, %v2833_v22 }
 0x46d   : > { %v3827_v38 = vadd.f32 %v3826_v4, %v3536_v30  ;;  %3200 = vmatmul.f32.gmra.mxu2 %v3199_v49  ;;  %3910 = vmatmul.f32.gmra.mxu0 %v3196_v25  ;;  %13653 = vst [vmem:[#allocation30_spill] sm:$0xff] %v10195_v62  ;;  %v336_v25 = vld [vmem:[%s8426_s28 + $0x1e0] sm:$0xff]  ;;  %v3214_v30 = vsub.f32 %v3212_v56, %v3213_v63 }
 0x46e   : > { %v3539_v20 = vpop.f32.mrf.mxu3 }
 0x46f   : > { %v10192_v27 = vadd.f32 %v4180_v48, %v3827_v38  ;;  %v3220_v48 = vsub.f32 %v2833_v22, %v10195_v62 }
 0x470   : > { %v3073_v55 = vpop.f32.mrf.mxu2  ;;  %v4192_v26 = vpop.f32.mrf.mxu1 }
 0x471   : > { %v3074_v21 = vadd.f32 %v3073_v55, %v9628_v0  ;;  %v2836_v0 = vsel %vm431_vm1, %v336_v25, 0 }
 0x472   : > { %v3836_v4 = vpop.f32.mrf.mxu0 }
 0x473   : > { %v3540_v49 = vadd.f32 %v3539_v20, %v3074_v21  ;;  %3606 = vmatmul.f32.gmra.mxu3 %v10177_v14  ;;  %4287 = vmatmul.f32.gmra.mxu1 %v3205_v24  ;;  %v3215_v21 = vand.u32 4294901760, %v3214_v30  ;;  %v3221_v14 = vand.u32 4294901760, %v3220_v48  ;;  %v10204_v24 = vand.u32 4294901760, %v2836_v0 }
 0x475   : > { %v3832_v54 = vadd.f32 %v3831_v32, %v3540_v49  ;;  %3208 = vmatmul.f32.gmra.mxu2 %v3207_v59  ;;  %3915 = vmatmul.f32.gmra.mxu0 %v3204_v51  ;;  %13654 = vst [vmem:[#allocation33_spill] sm:$0xff] %v10204_v24  ;;  %v337_v51 = vld [vmem:[%s8426_s28 + $0x1e8] sm:$0xff]  ;;  %v3222_v49 = vsub.f32 %v3220_v48, %v3221_v14 }
 0x476   : > { %v3543_v16 = vpop.f32.mrf.mxu3 }
 0x477   : > { %v10201_v38 = vadd.f32 %v4186_v61, %v3832_v54  ;;  %v3228_v61 = vsub.f32 %v2836_v0, %v10204_v24 }
 0x478   : > { %v3081_v15 = vpop.f32.mrf.mxu2  ;;  %v4198_v55 = vpop.f32.mrf.mxu1 }
 0x479   : > { %v3082_v20 = vadd.f32 %v3081_v15, %v9637_v39  ;;  %v2839_v39 = vsel %vm431_vm1, %v337_v51, 0 }
 0x47a   : > { %v3841_v32 = vpop.f32.mrf.mxu0 }
 0x47b   : > { %v3544_v59 = vadd.f32 %v3543_v16, %v3082_v20  ;;  %3610 = vmatmul.f32.gmra.mxu3 %v10186_v5  ;;  %4293 = vmatmul.f32.gmra.mxu1 %v3213_v63  ;;  %v3223_v20 = vand.u32 4294901760, %v3222_v49  ;;  %v3229_v5 = vand.u32 4294901760, %v3228_v61  ;;  %v10213_v63 = vand.u32 4294901760, %v2839_v39 }
 0x47d   : > { %v3837_v22 = vadd.f32 %v3836_v4, %v3544_v59  ;;  %3216 = vmatmul.f32.gmra.mxu2 %v3215_v21  ;;  %3920 = vmatmul.f32.gmra.mxu0 %v3212_v56  ;;  %13655 = vst [vmem:[#allocation32_spill] sm:$0xff] %v10213_v63  ;;  %v338_v56 = vld [vmem:[%s8426_s28 + $0x1f8] sm:$0xff]  ;;  %v3230_v59 = vsub.f32 %v3228_v61, %v3229_v5 }
 0x47e   : > { %v3547_v25 = vpop.f32.mrf.mxu3 }
 0x47f   : > { %v10210_v54 = vadd.f32 %v4192_v26, %v3837_v22  ;;  %v3236_v26 = vsub.f32 %v2839_v39, %v10213_v63 }
 0x480   : > { %v3089_v30 = vpop.f32.mrf.mxu2  ;;  %v4204_v15 = vpop.f32.mrf.mxu1 }
 0x481   : > { %v3090_v16 = vadd.f32 %v3089_v30, %v9646_v42  ;;  %v2842_v42 = vsel %vm431_vm1, %v338_v56, 0 }
 0x482   : > { %v3846_v4 = vpop.f32.mrf.mxu0 }
 0x483   : > { %v3548_v21 = vadd.f32 %v3547_v25, %v3090_v16  ;;  %3614 = vmatmul.f32.gmra.mxu3 %v10195_v62  ;;  %4299 = vmatmul.f32.gmra.mxu1 %v3221_v14  ;;  %v3231_v16 = vand.u32 4294901760, %v3230_v59  ;;  %v3237_v62 = vand.u32 4294901760, %v3236_v26  ;;  %v10222_v14 = vand.u32 4294901760, %v2842_v42 }
 0x485   : > { %v3842_v0 = vadd.f32 %v3841_v32, %v3548_v21  ;;  %3224 = vmatmul.f32.gmra.mxu2 %v3223_v20  ;;  %3925 = vmatmul.f32.gmra.mxu0 %v3220_v48  ;;  %13656 = vst [vmem:[#allocation35_spill] sm:$0xff] %v10222_v14  ;;  %v339_v48 = vld [vmem:[%s8426_s28 + $0x200] sm:$0xff]  ;;  %v3238_v21 = vsub.f32 %v3236_v26, %v3237_v62 }
 0x486   : > { %v3551_v51 = vpop.f32.mrf.mxu3 }
 0x487   : > { %v10219_v22 = vadd.f32 %v4198_v55, %v3842_v0  ;;  %v3244_v55 = vsub.f32 %v2842_v42, %v10222_v14 }
 0x488   : > { %v3097_v49 = vpop.f32.mrf.mxu2  ;;  %v4210_v30 = vpop.f32.mrf.mxu1 }
 0x489   : > { %v3098_v25 = vadd.f32 %v3097_v49, %v9655_v12  ;;  %v2845_v12 = vsel %vm431_vm1, %v339_v48, 0 }
 0x48a   : > { %v3851_v32 = vpop.f32.mrf.mxu0 }
 0x48b   : > { %v3552_v20 = vadd.f32 %v3551_v51, %v3098_v25  ;;  %3618 = vmatmul.f32.gmra.mxu3 %v10204_v24  ;;  %4305 = vmatmul.f32.gmra.mxu1 %v3229_v5  ;;  %v3239_v25 = vand.u32 4294901760, %v3238_v21  ;;  %v3245_v24 = vand.u32 4294901760, %v3244_v55  ;;  %v10231_v5 = vand.u32 4294901760, %v2845_v12 }
 0x48d   : > { %v3847_v39 = vadd.f32 %v3846_v4, %v3552_v20  ;;  %3232 = vmatmul.f32.gmra.mxu2 %v3231_v16  ;;  %3930 = vmatmul.f32.gmra.mxu0 %v3228_v61  ;;  %13657 = vst [vmem:[#allocation34_spill] sm:$0xff] %v10231_v5  ;;  %v340_v61 = vld [vmem:[%s8426_s28 + $0x210] sm:$0xff]  ;;  %v3246_v20 = vsub.f32 %v3244_v55, %v3245_v24 }
 0x48e   : > { %v3555_v56 = vpop.f32.mrf.mxu3 }
 0x48f   : > { %v10228_v0 = vadd.f32 %v4204_v15, %v3847_v39  ;;  %v3252_v15 = vsub.f32 %v2845_v12, %v10231_v5 }
 0x490   : > { %v3105_v59 = vpop.f32.mrf.mxu2  ;;  %v4216_v49 = vpop.f32.mrf.mxu1 }
 0x491   : > { %v3106_v51 = vadd.f32 %v3105_v59, %v9664_v36  ;;  %v2848_v36 = vsel %vm431_vm1, %v340_v61, 0 }
 0x492   : > { %v3856_v4 = vpop.f32.mrf.mxu0 }
 0x493   : > { %v3556_v16 = vadd.f32 %v3555_v56, %v3106_v51  ;;  %3622 = vmatmul.f32.gmra.mxu3 %v10213_v63  ;;  %4311 = vmatmul.f32.gmra.mxu1 %v3237_v62  ;;  %v3247_v51 = vand.u32 4294901760, %v3246_v20  ;;  %v3253_v63 = vand.u32 4294901760, %v3252_v15  ;;  %v10240_v62 = vand.u32 4294901760, %v2848_v36 }
 0x495   : > { %v3852_v42 = vadd.f32 %v3851_v32, %v3556_v16  ;;  %3240 = vmatmul.f32.gmra.mxu2 %v3239_v25  ;;  %3935 = vmatmul.f32.gmra.mxu0 %v3236_v26  ;;  %13658 = vst [vmem:[#allocation37_spill] sm:$0xff] %v10240_v62  ;;  %v341_v26 = vld [vmem:[%s8426_s28 + $0x218] sm:$0xff]  ;;  %v3254_v16 = vsub.f32 %v3252_v15, %v3253_v63 }
 0x496   : > { %v3559_v48 = vpop.f32.mrf.mxu3 }
 0x497   : > { %v10237_v39 = vadd.f32 %v4210_v30, %v3852_v42  ;;  %v3260_v30 = vsub.f32 %v2848_v36, %v10240_v62 }
 0x498   : > { %v3113_v21 = vpop.f32.mrf.mxu2  ;;  %v4222_v59 = vpop.f32.mrf.mxu1 }
 0x499   : > { %v3114_v56 = vadd.f32 %v3113_v21, %v9673_v52  ;;  %v2851_v52 = vsel %vm431_vm1, %v341_v26, 0 }
 0x49a   : > { %v3861_v32 = vpop.f32.mrf.mxu0 }
 0x49b   : > { %v3560_v25 = vadd.f32 %v3559_v48, %v3114_v56  ;;  %3626 = vmatmul.f32.gmra.mxu3 %v10222_v14  ;;  %4317 = vmatmul.f32.gmra.mxu1 %v3245_v24  ;;  %v3255_v56 = vand.u32 4294901760, %v3254_v16  ;;  %v3261_v14 = vand.u32 4294901760, %v3260_v30  ;;  %v10249_v24 = vand.u32 4294901760, %v2851_v52 }
 0x49d   : > { %v3857_v12 = vadd.f32 %v3856_v4, %v3560_v25  ;;  %3248 = vmatmul.f32.gmra.mxu2 %v3247_v51  ;;  %3940 = vmatmul.f32.gmra.mxu0 %v3244_v55  ;;  %13659 = vst [vmem:[#allocation36_spill] sm:$0xff] %v10249_v24  ;;  %v342_v55 = vld [vmem:[%s8426_s28 + $0x228] sm:$0xff]  ;;  %v3262_v25 = vsub.f32 %v3260_v30, %v3261_v14 }
 0x49e   : > { %v3563_v61 = vpop.f32.mrf.mxu3 }
 0x49f   : > { %v10246_v42 = vadd.f32 %v4216_v49, %v3857_v12  ;;  %v3268_v49 = vsub.f32 %v2851_v52, %v10249_v24 }
 0x4a0   : > { %v3121_v20 = vpop.f32.mrf.mxu2  ;;  %v4228_v21 = vpop.f32.mrf.mxu1 }
 0x4a1   : > { %v3122_v48 = vadd.f32 %v3121_v20, %v9682_v2  ;;  %v2854_v2 = vsel %vm431_vm1, %v342_v55, 0 }
 0x4a2   : > { %v3866_v4 = vpop.f32.mrf.mxu0 }
 0x4a3   : > { %v3564_v51 = vadd.f32 %v3563_v61, %v3122_v48  ;;  %3630 = vmatmul.f32.gmra.mxu3 %v10231_v5  ;;  %4323 = vmatmul.f32.gmra.mxu1 %v3253_v63  ;;  %v3263_v48 = vand.u32 4294901760, %v3262_v25  ;;  %v3269_v5 = vand.u32 4294901760, %v3268_v49  ;;  %v10258_v63 = vand.u32 4294901760, %v2854_v2 }
 0x4a5   : > { %v3862_v36 = vadd.f32 %v3861_v32, %v3564_v51  ;;  %3256 = vmatmul.f32.gmra.mxu2 %v3255_v56  ;;  %3945 = vmatmul.f32.gmra.mxu0 %v3252_v15  ;;  %13660 = vst [vmem:[#allocation39_spill] sm:$0xff] %v10258_v63  ;;  %v343_v15 = vld [vmem:[%s8426_s28 + $0x230] sm:$0xff]  ;;  %v3270_v51 = vsub.f32 %v3268_v49, %v3269_v5 }
 0x4a6   : > { %v3567_v26 = vpop.f32.mrf.mxu3 }
 0x4a7   : > { %v10255_v12 = vadd.f32 %v4222_v59, %v3862_v36  ;;  %v3276_v59 = vsub.f32 %v2854_v2, %v10258_v63 }
 0x4a8   : > { %v3129_v16 = vpop.f32.mrf.mxu2  ;;  %v4234_v20 = vpop.f32.mrf.mxu1 }
 0x4a9   : > { %v3130_v61 = vadd.f32 %v3129_v16, %v9691_v19  ;;  %v2857_v19 = vsel %vm431_vm1, %v343_v15, 0 }
 0x4aa   : > { %v3871_v32 = vpop.f32.mrf.mxu0 }
 0x4ab   : > { %v3568_v56 = vadd.f32 %v3567_v26, %v3130_v61  ;;  %3634 = vmatmul.f32.gmra.mxu3 %v10240_v62  ;;  %4329 = vmatmul.f32.gmra.mxu1 %v3261_v14  ;;  %v3271_v61 = vand.u32 4294901760, %v3270_v51  ;;  %v3277_v62 = vand.u32 4294901760, %v3276_v59  ;;  %v10267_v14 = vand.u32 4294901760, %v2857_v19 }
 0x4ad   : > { %v3867_v52 = vadd.f32 %v3866_v4, %v3568_v56  ;;  %3264 = vmatmul.f32.gmra.mxu2 %v3263_v48  ;;  %3950 = vmatmul.f32.gmra.mxu0 %v3260_v30  ;;  %13661 = vst [vmem:[#allocation38_spill] sm:$0xff] %v10267_v14  ;;  %v344_v30 = vld [vmem:[%s8426_s28 + $0x240] sm:$0xff]  ;;  %v3278_v56 = vsub.f32 %v3276_v59, %v3277_v62 }
 0x4ae   : > { %v3571_v55 = vpop.f32.mrf.mxu3 }
 0x4af   : > { %v10264_v36 = vadd.f32 %v4228_v21, %v3867_v52  ;;  %v3284_v21 = vsub.f32 %v2857_v19, %v10267_v14 }
 0x4b0   : > { %v3137_v25 = vpop.f32.mrf.mxu2  ;;  %v4240_v16 = vpop.f32.mrf.mxu1 }
 0x4b1   : > { %v3138_v26 = vadd.f32 %v3137_v25, %v9700_v46  ;;  %v2860_v46 = vsel %vm431_vm1, %v344_v30, 0 }
 0x4b2   : > { %v3876_v4 = vpop.f32.mrf.mxu0 }
 0x4b3   : > { %v3572_v48 = vadd.f32 %v3571_v55, %v3138_v26  ;;  %3638 = vmatmul.f32.gmra.mxu3 %v10249_v24  ;;  %4335 = vmatmul.f32.gmra.mxu1 %v3269_v5  ;;  %v3279_v26 = vand.u32 4294901760, %v3278_v56  ;;  %v3285_v24 = vand.u32 4294901760, %v3284_v21  ;;  %v10276_v5 = vand.u32 4294901760, %v2860_v46 }
 0x4b5   : > { %v3872_v2 = vadd.f32 %v3871_v32, %v3572_v48  ;;  %3272 = vmatmul.f32.gmra.mxu2 %v3271_v61  ;;  %3955 = vmatmul.f32.gmra.mxu0 %v3268_v49  ;;  %13662 = vst [vmem:[#allocation41_spill] sm:$0xff] %v10276_v5  ;;  %v345_v49 = vld [vmem:[%s8426_s28 + $0x248] sm:$0xff]  ;;  %v3286_v48 = vsub.f32 %v3284_v21, %v3285_v24 }
 0x4b6   : > { %v3575_v15 = vpop.f32.mrf.mxu3 }
 0x4b7   : > { %v10273_v52 = vadd.f32 %v4234_v20, %v3872_v2  ;;  %v3292_v20 = vsub.f32 %v2860_v46, %v10276_v5 }
 0x4b8   : > { %v3145_v51 = vpop.f32.mrf.mxu2  ;;  %v4246_v25 = vpop.f32.mrf.mxu1 }
 0x4b9   : > { %v3146_v55 = vadd.f32 %v3145_v51, %v9709_v7  ;;  %v2863_v7 = vsel %vm431_vm1, %v345_v49, 0 }
 0x4ba   : > { %v3881_v32 = vpop.f32.mrf.mxu0 }
 0x4bb   : > { %v3576_v61 = vadd.f32 %v3575_v15, %v3146_v55  ;;  %3642 = vmatmul.f32.gmra.mxu3 %v10258_v63  ;;  %4341 = vmatmul.f32.gmra.mxu1 %v3277_v62  ;;  %v3287_v55 = vand.u32 4294901760, %v3286_v48  ;;  %v3293_v63 = vand.u32 4294901760, %v3292_v20  ;;  %v10285_v62 = vand.u32 4294901760, %v2863_v7 }
 0x4bd   : > { %v3877_v19 = vadd.f32 %v3876_v4, %v3576_v61  ;;  %3280 = vmatmul.f32.gmra.mxu2 %v3279_v26  ;;  %3960 = vmatmul.f32.gmra.mxu0 %v3276_v59  ;;  %13663 = vst [vmem:[#allocation40_spill] sm:$0xff] %v10285_v62  ;;  %v346_v59 = vld [vmem:[%s8426_s28 + $0x258] sm:$0xff]  ;;  %v3294_v61 = vsub.f32 %v3292_v20, %v3293_v63 }
 0x4be   : > { %v3579_v30 = vpop.f32.mrf.mxu3 }
 0x4bf   : > { %v10282_v2 = vadd.f32 %v4240_v16, %v3877_v19  ;;  %v3300_v16 = vsub.f32 %v2863_v7, %v10285_v62 }
 0x4c0   : > { %v3153_v56 = vpop.f32.mrf.mxu2  ;;  %v4252_v51 = vpop.f32.mrf.mxu1 }
 0x4c1   : > { %v3154_v15 = vadd.f32 %v3153_v56, %v9718_v50  ;;  %v2866_v50 = vsel %vm431_vm1, %v346_v59, 0 }
 0x4c2   : > { %v3886_v4 = vpop.f32.mrf.mxu0 }
 0x4c3   : > { %v3580_v26 = vadd.f32 %v3579_v30, %v3154_v15  ;;  %3646 = vmatmul.f32.gmra.mxu3 %v10267_v14  ;;  %4347 = vmatmul.f32.gmra.mxu1 %v3285_v24  ;;  %v3295_v15 = vand.u32 4294901760, %v3294_v61  ;;  %v3301_v14 = vand.u32 4294901760, %v3300_v16  ;;  %v10294_v24 = vand.u32 4294901760, %v2866_v50 }
 0x4c5   : > { %v3882_v46 = vadd.f32 %v3881_v32, %v3580_v26  ;;  %3288 = vmatmul.f32.gmra.mxu2 %v3287_v55  ;;  %3965 = vmatmul.f32.gmra.mxu0 %v3284_v21  ;;  %13664 = vst [vmem:[#allocation43_spill] sm:$0xff] %v10294_v24  ;;  %v347_v21 = vld [vmem:[%s8426_s28 + $0x260] sm:$0xff]  ;;  %v3302_v26 = vsub.f32 %v3300_v16, %v3301_v14 }
 0x4c6   : > { %v3583_v49 = vpop.f32.mrf.mxu3 }
 0x4c7   : > { %v10291_v19 = vadd.f32 %v4246_v25, %v3882_v46  ;;  %v3308_v25 = vsub.f32 %v2866_v50, %v10294_v24 }
 0x4c8   : > { %v3161_v48 = vpop.f32.mrf.mxu2  ;;  %v4258_v56 = vpop.f32.mrf.mxu1 }
 0x4c9   : > { %v3162_v30 = vadd.f32 %v3161_v48, %v9727_v43  ;;  %v2869_v43 = vsel %vm431_vm1, %v347_v21, 0 }
 0x4ca   : > { %v3891_v32 = vpop.f32.mrf.mxu0 }
 0x4cb   : > { %v3584_v55 = vadd.f32 %v3583_v49, %v3162_v30  ;;  %3650 = vmatmul.f32.gmra.mxu3 %v10276_v5  ;;  %4353 = vmatmul.f32.gmra.mxu1 %v3293_v63  ;;  %v3303_v30 = vand.u32 4294901760, %v3302_v26  ;;  %v3309_v5 = vand.u32 4294901760, %v3308_v25  ;;  %v10303_v63 = vand.u32 4294901760, %v2869_v43 }
 0x4cd   : > { %v3887_v7 = vadd.f32 %v3886_v4, %v3584_v55  ;;  %3296 = vmatmul.f32.gmra.mxu2 %v3295_v15  ;;  %3970 = vmatmul.f32.gmra.mxu0 %v3292_v20  ;;  %13665 = vst [vmem:[#allocation42_spill] sm:$0xff] %v10303_v63  ;;  %v348_v20 = vld [vmem:[%s8426_s28 + $0x270] sm:$0xff]  ;;  %v3310_v55 = vsub.f32 %v3308_v25, %v3309_v5 }
 0x4ce   : > { %v3587_v59 = vpop.f32.mrf.mxu3 }
 0x4cf   : > { %v10300_v46 = vadd.f32 %v4252_v51, %v3887_v7  ;;  %v3316_v51 = vsub.f32 %v2869_v43, %v10303_v63 }
 0x4d0   : > { %v3169_v61 = vpop.f32.mrf.mxu2  ;;  %v4264_v48 = vpop.f32.mrf.mxu1 }
 0x4d1   : > { %v3170_v49 = vadd.f32 %v3169_v61, %v9736_v34  ;;  %v2872_v34 = vsel %vm431_vm1, %v348_v20, 0 }
 0x4d2   : > { %v3896_v4 = vpop.f32.mrf.mxu0 }
 0x4d3   : > { %v3588_v15 = vadd.f32 %v3587_v59, %v3170_v49  ;;  %3654 = vmatmul.f32.gmra.mxu3 %v10285_v62  ;;  %4359 = vmatmul.f32.gmra.mxu1 %v3301_v14  ;;  %v3311_v49 = vand.u32 4294901760, %v3310_v55  ;;  %v3317_v62 = vand.u32 4294901760, %v3316_v51  ;;  %v10312_v14 = vand.u32 4294901760, %v2872_v34 }
 0x4d5   : > { %v3892_v50 = vadd.f32 %v3891_v32, %v3588_v15  ;;  %3304 = vmatmul.f32.gmra.mxu2 %v3303_v30  ;;  %3975 = vmatmul.f32.gmra.mxu0 %v3300_v16  ;;  %13666 = vst [vmem:[#allocation52_spill] sm:$0xff] %v10312_v14  ;;  %v349_v16 = vld [vmem:[%s8426_s28 + $0x278] sm:$0xff]  ;;  %v3318_v15 = vsub.f32 %v3316_v51, %v3317_v62 }
 0x4d6   : > { %v3591_v21 = vpop.f32.mrf.mxu3 }
 0x4d7   : > { %v10309_v7 = vadd.f32 %v4258_v56, %v3892_v50  ;;  %v3324_v56 = vsub.f32 %v2872_v34, %v10312_v14 }
 0x4d8   : > { %v3177_v26 = vpop.f32.mrf.mxu2  ;;  %v4270_v61 = vpop.f32.mrf.mxu1 }
 0x4d9   : > { %v3178_v59 = vadd.f32 %v3177_v26, %v9745_v11  ;;  %v2875_v11 = vsel %vm431_vm1, %v349_v16, 0 }
 0x4da   : > { %v3901_v32 = vpop.f32.mrf.mxu0 }
 0x4db   : > { %v3592_v30 = vadd.f32 %v3591_v21, %v3178_v59  ;;  %3658 = vmatmul.f32.gmra.mxu3 %v10294_v24  ;;  %4365 = vmatmul.f32.gmra.mxu1 %v3309_v5  ;;  %v3319_v59 = vand.u32 4294901760, %v3318_v15  ;;  %v3325_v24 = vand.u32 4294901760, %v3324_v56  ;;  %v10321_v5 = vand.u32 4294901760, %v2875_v11 }
 0x4dd   : > { %v3897_v43 = vadd.f32 %v3896_v4, %v3592_v30  ;;  %3312 = vmatmul.f32.gmra.mxu2 %v3311_v49  ;;  %3980 = vmatmul.f32.gmra.mxu0 %v3308_v25  ;;  %13667 = vst [vmem:[#allocation45_spill] sm:$0xff] %v10321_v5  ;;  %v350_v25 = vld [vmem:[%s8426_s28 + $0x288] sm:$0xff]  ;;  %v3326_v30 = vsub.f32 %v3324_v56, %v3325_v24 }
 0x4de   : > { %v3595_v20 = vpop.f32.mrf.mxu3 }
 0x4df   : > { %v10318_v50 = vadd.f32 %v4264_v48, %v3897_v43  ;;  %v3332_v48 = vsub.f32 %v2875_v11, %v10321_v5 }
 0x4e0   : > { %v3185_v55 = vpop.f32.mrf.mxu2  ;;  %v4276_v26 = vpop.f32.mrf.mxu1 }
 0x4e1   : > { %v3186_v21 = vadd.f32 %v3185_v55, %v9754_v47  ;;  %v2878_v47 = vsel %vm431_vm1, %v350_v25, 0 }
 0x4e2   : > { %v3906_v4 = vpop.f32.mrf.mxu0 }
 0x4e3   : > { %v3596_v49 = vadd.f32 %v3595_v20, %v3186_v21  ;;  %3662 = vmatmul.f32.gmra.mxu3 %v10303_v63  ;;  %4371 = vmatmul.f32.gmra.mxu1 %v3317_v62  ;;  %v3327_v21 = vand.u32 4294901760, %v3326_v30  ;;  %v3333_v63 = vand.u32 4294901760, %v3332_v48  ;;  %v10330_v62 = vand.u32 4294901760, %v2878_v47 }
 0x4e5   : > { %v3902_v34 = vadd.f32 %v3901_v32, %v3596_v49  ;;  %3320 = vmatmul.f32.gmra.mxu2 %v3319_v59  ;;  %3985 = vmatmul.f32.gmra.mxu0 %v3316_v51  ;;  %13668 = vst [vmem:[#allocation44_spill] sm:$0xff] %v10330_v62  ;;  %v351_v51 = vld [vmem:[%s8426_s28 + $0x290] sm:$0xff]  ;;  %v3334_v49 = vsub.f32 %v3332_v48, %v3333_v63 }
 0x4e6   : > { %v3599_v16 = vpop.f32.mrf.mxu3 }
 0x4e7   : > { %v10327_v43 = vadd.f32 %v4270_v61, %v3902_v34  ;;  %v3340_v61 = vsub.f32 %v2878_v47, %v10330_v62 }
 0x4e8   : > { %v3193_v15 = vpop.f32.mrf.mxu2  ;;  %v4282_v55 = vpop.f32.mrf.mxu1 }
 0x4e9   : > { %v3194_v20 = vadd.f32 %v3193_v15, %v9761_v35  ;;  %v2881_v35 = vsel %vm431_vm1, %v351_v51, 0 }
 0x4ea   : > { %v3911_v32 = vpop.f32.mrf.mxu0 }
 0x4eb   : > { %v3600_v59 = vadd.f32 %v3599_v16, %v3194_v20  ;;  %3666 = vmatmul.f32.gmra.mxu3 %v10312_v14  ;;  %4377 = vmatmul.f32.gmra.mxu1 %v3325_v24  ;;  %v3335_v20 = vand.u32 4294901760, %v3334_v49  ;;  %v3341_v14 = vand.u32 4294901760, %v3340_v61  ;;  %v10339_v24 = vand.u32 4294901760, %v2881_v35 }
 0x4ed   : > { %v3907_v11 = vadd.f32 %v3906_v4, %v3600_v59  ;;  %3328 = vmatmul.f32.gmra.mxu2 %v3327_v21  ;;  %3990 = vmatmul.f32.gmra.mxu0 %v3324_v56  ;;  %13669 = vst [vmem:[#allocation58_spill] sm:$0xff] %v10339_v24  ;;  %v352_v56 = vld [vmem:[%s8426_s28 + $0x2a0] sm:$0xff]  ;;  %v3342_v59 = vsub.f32 %v3340_v61, %v3341_v14 }
 0x4ee   : > { %v3603_v25 = vpop.f32.mrf.mxu3 }
 0x4ef   : > { %v10336_v34 = vadd.f32 %v4276_v26, %v3907_v11  ;;  %v3348_v26 = vsub.f32 %v2881_v35, %v10339_v24 }
 0x4f0   : > { %v3201_v30 = vpop.f32.mrf.mxu2  ;;  %v4288_v15 = vpop.f32.mrf.mxu1 }
 0x4f1   : > { %v3202_v16 = vadd.f32 %v3201_v30, %v9769_v45  ;;  %v2884_v45 = vsel %vm431_vm1, %v352_v56, 0 }
 0x4f2   : > { %v3916_v4 = vpop.f32.mrf.mxu0 }
 0x4f3   : > { %v3604_v21 = vadd.f32 %v3603_v25, %v3202_v16  ;;  %3670 = vmatmul.f32.gmra.mxu3 %v10321_v5  ;;  %4383 = vmatmul.f32.gmra.mxu1 %v3333_v63  ;;  %v3343_v16 = vand.u32 4294901760, %v3342_v59  ;;  %v3349_v5 = vand.u32 4294901760, %v3348_v26  ;;  %v10348_v63 = vand.u32 4294901760, %v2884_v45 }
 0x4f5   : > { %v3912_v47 = vadd.f32 %v3911_v32, %v3604_v21  ;;  %3336 = vmatmul.f32.gmra.mxu2 %v3335_v20  ;;  %3995 = vmatmul.f32.gmra.mxu0 %v3332_v48  ;;  %13670 = vst [vmem:[#allocation48_spill] sm:$0xff] %v10348_v63  ;;  %v353_v48 = vld [vmem:[%s8426_s28 + $0x2a8] sm:$0xff]  ;;  %v3350_v21 = vsub.f32 %v3348_v26, %v3349_v5 }
 0x4f6   : > { %v3607_v51 = vpop.f32.mrf.mxu3 }
 0x4f7   : > { %v10345_v11 = vadd.f32 %v4282_v55, %v3912_v47  ;;  %v3356_v55 = vsub.f32 %v2884_v45, %v10348_v63 }
 0x4f8   : > { %v3209_v49 = vpop.f32.mrf.mxu2  ;;  %v4294_v30 = vpop.f32.mrf.mxu1 }
 0x4f9   : > { %v3210_v25 = vadd.f32 %v3209_v49, %v9777_v58  ;;  %v2887_v58 = vsel %vm431_vm1, %v353_v48, 0 }
 0x4fa   : > { %v3921_v32 = vpop.f32.mrf.mxu0 }
 0x4fb   : > { %v3608_v20 = vadd.f32 %v3607_v51, %v3210_v25  ;;  %3674 = vmatmul.f32.gmra.mxu3 %v10330_v62  ;;  %4389 = vmatmul.f32.gmra.mxu1 %v3341_v14  ;;  %v3351_v25 = vand.u32 4294901760, %v3350_v21  ;;  %v3357_v62 = vand.u32 4294901760, %v3356_v55  ;;  %v10357_v14 = vand.u32 4294901760, %v2887_v58 }
 0x4fd   : > { %v3917_v35 = vadd.f32 %v3916_v4, %v3608_v20  ;;  %3344 = vmatmul.f32.gmra.mxu2 %v3343_v16  ;;  %4000 = vmatmul.f32.gmra.mxu0 %v3340_v61  ;;  %13671 = vst [vmem:[#allocation46_spill] sm:$0xff] %v10357_v14  ;;  %v354_v61 = vld [vmem:[%s8426_s28 + $0x2b8] sm:$0xff]  ;;  %v3358_v20 = vsub.f32 %v3356_v55, %v3357_v62 }
 0x4fe   : > { %v3611_v56 = vpop.f32.mrf.mxu3 }
 0x4ff   : > { %v10354_v47 = vadd.f32 %v4288_v15, %v3917_v35  ;;  %v3364_v15 = vsub.f32 %v2887_v58, %v10357_v14 }
 0x500   : > { %v3217_v59 = vpop.f32.mrf.mxu2  ;;  %v4300_v49 = vpop.f32.mrf.mxu1 }
 0x501   : > { %v3218_v51 = vadd.f32 %v3217_v59, %v9785_v9  ;;  %v2890_v9 = vsel %vm431_vm1, %v354_v61, 0 }
 0x502   : > { %v3926_v4 = vpop.f32.mrf.mxu0 }
 0x503   : > { %v3612_v16 = vadd.f32 %v3611_v56, %v3218_v51  ;;  %3678 = vmatmul.f32.gmra.mxu3 %v10339_v24  ;;  %4395 = vmatmul.f32.gmra.mxu1 %v3349_v5  ;;  %v3359_v51 = vand.u32 4294901760, %v3358_v20  ;;  %v3365_v24 = vand.u32 4294901760, %v3364_v15  ;;  %v10366_v5 = vand.u32 4294901760, %v2890_v9 }
 0x505   : > { %v3922_v45 = vadd.f32 %v3921_v32, %v3612_v16  ;;  %3352 = vmatmul.f32.gmra.mxu2 %v3351_v25  ;;  %4005 = vmatmul.f32.gmra.mxu0 %v3348_v26  ;;  %13672 = vst [vmem:[#allocation65_spill] sm:$0xff] %v10366_v5  ;;  %v355_v26 = vld [vmem:[%s8426_s28 + $0x2c0] sm:$0xff]  ;;  %v3366_v16 = vsub.f32 %v3364_v15, %v3365_v24 }
 0x506   : > { %v3615_v48 = vpop.f32.mrf.mxu3 }
 0x507   : > { %v10363_v35 = vadd.f32 %v4294_v30, %v3922_v45  ;;  %v3372_v30 = vsub.f32 %v2890_v9, %v10366_v5 }
 0x508   : > { %v3225_v21 = vpop.f32.mrf.mxu2  ;;  %v4306_v59 = vpop.f32.mrf.mxu1 }
 0x509   : > { %v3226_v56 = vadd.f32 %v3225_v21, %v9793_v37  ;;  %v2893_v37 = vsel %vm431_vm1, %v355_v26, 0 }
 0x50a   : > { %v3931_v32 = vpop.f32.mrf.mxu0 }
 0x50b   : > { %v3616_v25 = vadd.f32 %v3615_v48, %v3226_v56  ;;  %3682 = vmatmul.f32.gmra.mxu3 %v10348_v63  ;;  %4401 = vmatmul.f32.gmra.mxu1 %v3357_v62  ;;  %v3367_v56 = vand.u32 4294901760, %v3366_v16  ;;  %v3373_v63 = vand.u32 4294901760, %v3372_v30  ;;  %v10375_v62 = vand.u32 4294901760, %v2893_v37 }
 0x50d   : > { %v3927_v58 = vadd.f32 %v3926_v4, %v3616_v25  ;;  %3360 = vmatmul.f32.gmra.mxu2 %v3359_v51  ;;  %4010 = vmatmul.f32.gmra.mxu0 %v3356_v55  ;;  %13673 = vst [vmem:[#allocation54_spill] sm:$0xff] %v10375_v62  ;;  %v356_v55 = vld [vmem:[%s8426_s28 + $0x2d0] sm:$0xff]  ;;  %v3374_v25 = vsub.f32 %v3372_v30, %v3373_v63 }
 0x50e   : > { %v3619_v61 = vpop.f32.mrf.mxu3 }
 0x50f   : > { %v10372_v45 = vadd.f32 %v4300_v49, %v3927_v58  ;;  %v3380_v49 = vsub.f32 %v2893_v37, %v10375_v62 }
 0x510   : > { %v3233_v20 = vpop.f32.mrf.mxu2  ;;  %v4312_v21 = vpop.f32.mrf.mxu1 }
 0x511   : > { %v3234_v48 = vadd.f32 %v3233_v20, %v9801_v17  ;;  %v2896_v17 = vsel %vm431_vm1, %v356_v55, 0 }
 0x512   : > { %v3936_v4 = vpop.f32.mrf.mxu0 }
 0x513   : > { %v3620_v51 = vadd.f32 %v3619_v61, %v3234_v48  ;;  %3686 = vmatmul.f32.gmra.mxu3 %v10357_v14  ;;  %4407 = vmatmul.f32.gmra.mxu1 %v3365_v24  ;;  %v3375_v48 = vand.u32 4294901760, %v3374_v25  ;;  %v3381_v14 = vand.u32 4294901760, %v3380_v49  ;;  %v10384_v24 = vand.u32 4294901760, %v2896_v17 }
 0x515   : > { %v3932_v9 = vadd.f32 %v3931_v32, %v3620_v51  ;;  %3368 = vmatmul.f32.gmra.mxu2 %v3367_v56  ;;  %4015 = vmatmul.f32.gmra.mxu0 %v3364_v15  ;;  %13674 = vst [vmem:[#allocation51_spill] sm:$0xff] %v10384_v24  ;;  %v357_v15 = vld [vmem:[%s8426_s28 + $0x2d8] sm:$0xff]  ;;  %v3382_v51 = vsub.f32 %v3380_v49, %v3381_v14 }
 0x516   : > { %v3623_v26 = vpop.f32.mrf.mxu3 }
 0x517   : > { %v10381_v58 = vadd.f32 %v4306_v59, %v3932_v9  ;;  %v3388_v59 = vsub.f32 %v2896_v17, %v10384_v24 }
 0x518   : > { %v3241_v16 = vpop.f32.mrf.mxu2  ;;  %v4318_v20 = vpop.f32.mrf.mxu1 }
 0x519   : > { %v3242_v61 = vadd.f32 %v3241_v16, %v9809_v13  ;;  %v2899_v13 = vsel %vm431_vm1, %v357_v15, 0 }
 0x51a   : > { %v3941_v32 = vpop.f32.mrf.mxu0 }
 0x51b   : > { %v3624_v56 = vadd.f32 %v3623_v26, %v3242_v61  ;;  %3690 = vmatmul.f32.gmra.mxu3 %v10366_v5  ;;  %4413 = vmatmul.f32.gmra.mxu1 %v3373_v63  ;;  %v3383_v61 = vand.u32 4294901760, %v3382_v51  ;;  %v3389_v5 = vand.u32 4294901760, %v3388_v59  ;;  %v10393_v63 = vand.u32 4294901760, %v2899_v13 }
 0x51d   : > { %v3937_v37 = vadd.f32 %v3936_v4, %v3624_v56  ;;  %3376 = vmatmul.f32.gmra.mxu2 %v3375_v48  ;;  %4020 = vmatmul.f32.gmra.mxu0 %v3372_v30  ;;  %13675 = vst [vmem:[#allocation72_spill] sm:$0xff] %v10393_v63  ;;  %v358_v30 = vld [vmem:[%s8426_s28 + $0x2e8] sm:$0xff]  ;;  %v3390_v56 = vsub.f32 %v3388_v59, %v3389_v5 }
 0x51e   : > { %v3627_v55 = vpop.f32.mrf.mxu3 }
 0x51f   : > { %v10390_v9 = vadd.f32 %v4312_v21, %v3937_v37  ;;  %v3396_v21 = vsub.f32 %v2899_v13, %v10393_v63 }
 0x520   : > { %v3249_v25 = vpop.f32.mrf.mxu2  ;;  %v4324_v16 = vpop.f32.mrf.mxu1 }
 0x521   : > { %v3250_v26 = vadd.f32 %v3249_v25, %v9817_v44  ;;  %v2902_v44 = vsel %vm431_vm1, %v358_v30, 0 }
 0x522   : > { %v3946_v4 = vpop.f32.mrf.mxu0 }
 0x523   : > { %v3628_v48 = vadd.f32 %v3627_v55, %v3250_v26  ;;  %3694 = vmatmul.f32.gmra.mxu3 %v10375_v62  ;;  %4419 = vmatmul.f32.gmra.mxu1 %v3381_v14  ;;  %v3391_v26 = vand.u32 4294901760, %v3390_v56  ;;  %v3397_v62 = vand.u32 4294901760, %v3396_v21  ;;  %v10402_v14 = vand.u32 4294901760, %v2902_v44 }
 0x525   : > { %v3942_v17 = vadd.f32 %v3941_v32, %v3628_v48  ;;  %3384 = vmatmul.f32.gmra.mxu2 %v3383_v61  ;;  %4025 = vmatmul.f32.gmra.mxu0 %v3380_v49  ;;  %13676 = vst [vmem:[#allocation61_spill] sm:$0xff] %v10402_v14  ;;  %v359_v49 = vld [vmem:[%s8426_s28 + $0x2f0] sm:$0xff]  ;;  %v3398_v48 = vsub.f32 %v3396_v21, %v3397_v62 }
 0x526   : > { %v3631_v15 = vpop.f32.mrf.mxu3 }
 0x527   : > { %v10399_v37 = vadd.f32 %v4318_v20, %v3942_v17  ;;  %v3404_v20 = vsub.f32 %v2902_v44, %v10402_v14 }
 0x528   : > { %v3257_v51 = vpop.f32.mrf.mxu2  ;;  %v4330_v25 = vpop.f32.mrf.mxu1 }
 0x529   : > { %v3258_v55 = vadd.f32 %v3257_v51, %v9825_v31  ;;  %v2905_v31 = vsel %vm431_vm1, %v359_v49, 0 }
 0x52a   : > { %v3951_v32 = vpop.f32.mrf.mxu0 }
 0x52b   : > { %v3632_v61 = vadd.f32 %v3631_v15, %v3258_v55  ;;  %3698 = vmatmul.f32.gmra.mxu3 %v10384_v24  ;;  %4425 = vmatmul.f32.gmra.mxu1 %v3389_v5  ;;  %v3399_v55 = vand.u32 4294901760, %v3398_v48  ;;  %v3405_v24 = vand.u32 4294901760, %v3404_v20  ;;  %v10411_v5 = vand.u32 4294901760, %v2905_v31 }
 0x52d   : > { %v3947_v13 = vadd.f32 %v3946_v4, %v3632_v61  ;;  %3392 = vmatmul.f32.gmra.mxu2 %v3391_v26  ;;  %4030 = vmatmul.f32.gmra.mxu0 %v3388_v59  ;;  %13677 = vst [vmem:[#allocation57_spill] sm:$0xff] %v10411_v5  ;;  %v360_v59 = vld [vmem:[%s8426_s28 + $0x300] sm:$0xff]  ;;  %v3406_v61 = vsub.f32 %v3404_v20, %v3405_v24 }
 0x52e   : > { %v3635_v30 = vpop.f32.mrf.mxu3 }
 0x52f   : > { %v10408_v17 = vadd.f32 %v4324_v16, %v3947_v13  ;;  %v3412_v16 = vsub.f32 %v2905_v31, %v10411_v5 }
 0x530   : > { %v3265_v56 = vpop.f32.mrf.mxu2  ;;  %v4336_v51 = vpop.f32.mrf.mxu1 }
 0x531   : > { %v3266_v15 = vadd.f32 %v3265_v56, %v9833_v41  ;;  %v2908_v41 = vsel %vm431_vm1, %v360_v59, 0 }
 0x532   : > { %v3956_v4 = vpop.f32.mrf.mxu0 }
 0x533   : > { %v3636_v26 = vadd.f32 %v3635_v30, %v3266_v15  ;;  %3702 = vmatmul.f32.gmra.mxu3 %v10393_v63  ;;  %4431 = vmatmul.f32.gmra.mxu1 %v3397_v62  ;;  %v3407_v15 = vand.u32 4294901760, %v3406_v61  ;;  %v3413_v63 = vand.u32 4294901760, %v3412_v16  ;;  %v10420_v62 = vand.u32 4294901760, %v2908_v41 }
 0x535   : > { %v3952_v44 = vadd.f32 %v3951_v32, %v3636_v26  ;;  %3400 = vmatmul.f32.gmra.mxu2 %v3399_v55  ;;  %4035 = vmatmul.f32.gmra.mxu0 %v3396_v21  ;;  %13678 = vst [vmem:[#allocation79_spill] sm:$0xff] %v10420_v62  ;;  %v361_v21 = vld [vmem:[%s8426_s28 + $0x308] sm:$0xff]  ;;  %v3414_v26 = vsub.f32 %v3412_v16, %v3413_v63 }
 0x536   : > { %v3639_v49 = vpop.f32.mrf.mxu3 }
 0x537   : > { %v10417_v13 = vadd.f32 %v4330_v25, %v3952_v44  ;;  %v3420_v25 = vsub.f32 %v2908_v41, %v10420_v62 }
 0x538   : > { %v3273_v48 = vpop.f32.mrf.mxu2  ;;  %v4342_v56 = vpop.f32.mrf.mxu1 }
 0x539   : > { %v3274_v30 = vadd.f32 %v3273_v48, %v9841_v40  ;;  %v2911_v40 = vsel %vm431_vm1, %v361_v21, 0 }
 0x53a   : > { %v3961_v32 = vpop.f32.mrf.mxu0 }
 0x53b   : > { %v3640_v55 = vadd.f32 %v3639_v49, %v3274_v30  ;;  %3706 = vmatmul.f32.gmra.mxu3 %v10402_v14  ;;  %4437 = vmatmul.f32.gmra.mxu1 %v3405_v24  ;;  %v3415_v30 = vand.u32 4294901760, %v3414_v26  ;;  %v3421_v14 = vand.u32 4294901760, %v3420_v25  ;;  %v10429_v24 = vand.u32 4294901760, %v2911_v40 }
 0x53d   : > { %v3957_v31 = vadd.f32 %v3956_v4, %v3640_v55  ;;  %3408 = vmatmul.f32.gmra.mxu2 %v3407_v15  ;;  %4040 = vmatmul.f32.gmra.mxu0 %v3404_v20  ;;  %13679 = vst [vmem:[#allocation68_spill] sm:$0xff] %v10429_v24  ;;  %v362_v20 = vld [vmem:[%s8426_s28 + $0x318] sm:$0xff]  ;;  %v3422_v55 = vsub.f32 %v3420_v25, %v3421_v14 }
 0x53e   : > { %v3643_v59 = vpop.f32.mrf.mxu3 }
 0x53f   : > { %v10426_v44 = vadd.f32 %v4336_v51, %v3957_v31  ;;  %v3428_v51 = vsub.f32 %v2911_v40, %v10429_v24 }
 0x540   : > { %v3281_v61 = vpop.f32.mrf.mxu2  ;;  %v4348_v48 = vpop.f32.mrf.mxu1 }
 0x541   : > { %v3282_v49 = vadd.f32 %v3281_v61, %v9849_v18  ;;  %v2914_v18 = vsel %vm431_vm1, %v362_v20, 0 }
 0x542   : > { %v3966_v4 = vpop.f32.mrf.mxu0 }
 0x543   : > { %v3644_v15 = vadd.f32 %v3643_v59, %v3282_v49  ;;  %3710 = vmatmul.f32.gmra.mxu3 %v10411_v5  ;;  %4443 = vmatmul.f32.gmra.mxu1 %v3413_v63  ;;  %v3423_v49 = vand.u32 4294901760, %v3422_v55  ;;  %v3429_v5 = vand.u32 4294901760, %v3428_v51  ;;  %v10438_v63 = vand.u32 4294901760, %v2914_v18 }
 0x545   : > { %v3962_v41 = vadd.f32 %v3961_v32, %v3644_v15  ;;  %3416 = vmatmul.f32.gmra.mxu2 %v3415_v30  ;;  %4045 = vmatmul.f32.gmra.mxu0 %v3412_v16  ;;  %v363_v16 = vld [vmem:[%s8426_s28 + $0x320] sm:$0xff]  ;;  %v3430_v15 = vsub.f32 %v3428_v51, %v3429_v5 }
 0x546   : > { %v3647_v21 = vpop.f32.mrf.mxu3 }
 0x547   : > { %v10435_v31 = vadd.f32 %v4342_v56, %v3962_v41  ;;  %v3436_v56 = vsub.f32 %v2914_v18, %v10438_v63 }
 0x548   : > { %v3289_v26 = vpop.f32.mrf.mxu2  ;;  %v4354_v61 = vpop.f32.mrf.mxu1 }
 0x549   : > { %v3290_v59 = vadd.f32 %v3289_v26, %v9857_v29  ;;  %v2917_v29 = vsel %vm431_vm1, %v363_v16, 0 }
 0x54a   : > { %v3971_v32 = vpop.f32.mrf.mxu0 }
 0x54b   : > { %v3648_v30 = vadd.f32 %v3647_v21, %v3290_v59  ;;  %3714 = vmatmul.f32.gmra.mxu3 %v10420_v62  ;;  %4449 = vmatmul.f32.gmra.mxu1 %v3421_v14  ;;  %v3431_v59 = vand.u32 4294901760, %v3430_v15  ;;  %v3437_v62 = vand.u32 4294901760, %v3436_v56  ;;  %v10447_v14 = vand.u32 4294901760, %v2917_v29 }
 0x54d   : > { %v3967_v40 = vadd.f32 %v3966_v4, %v3648_v30  ;;  %3424 = vmatmul.f32.gmra.mxu2 %v3423_v49  ;;  %4050 = vmatmul.f32.gmra.mxu0 %v3420_v25  ;;  %v5021_v25 = vld [vmem:[%s8426_s28 + $0x2] sm:$0xff]  ;;  %v3438_v30 = vsub.f32 %v3436_v56, %v3437_v62 }
 0x54e   : > { %v3651_v20 = vpop.f32.mrf.mxu3 }
 0x54f   : > { %v10444_v41 = vadd.f32 %v4348_v48, %v3967_v40  ;;  %v3444_v48 = vsub.f32 %v2917_v29, %v10447_v14 }
 0x550   : > { %v3297_v55 = vpop.f32.mrf.mxu2  ;;  %v4360_v26 = vpop.f32.mrf.mxu1 }
 0x551   : > { %v3298_v21 = vadd.f32 %v3297_v55, %v9867_v33  ;;  %v5088_v33 = vsel %vm431_vm1, %v5021_v25, 0 }
 0x552   : > { %v3976_v4 = vpop.f32.mrf.mxu0 }
 0x553   : > { %v3652_v49 = vadd.f32 %v3651_v20, %v3298_v21  ;;  %3718 = vmatmul.f32.gmra.mxu3 %v10429_v24  ;;  %4455 = vmatmul.f32.gmra.mxu1 %v3429_v5  ;;  %v3439_v21 = vand.u32 4294901760, %v3438_v30  ;;  %v3445_v24 = vand.u32 4294901760, %v3444_v48  ;;  %v10456_v5 = vand.u32 4294901760, %v5088_v33 }
 0x555   : > { %v3972_v18 = vadd.f32 %v3971_v32, %v3652_v49  ;;  %3432 = vmatmul.f32.gmra.mxu2 %v3431_v59  ;;  %4055 = vmatmul.f32.gmra.mxu0 %v3428_v51  ;;  %13680 = vst [vmem:[#allocation64_spill] sm:$0xff] %v10456_v5  ;;  %v5022_v51 = vld [vmem:[%s8426_s28 + $0xa] sm:$0xff]  ;;  %v3446_v49 = vsub.f32 %v3444_v48, %v3445_v24 }
 0x556   : > { %v3655_v16 = vpop.f32.mrf.mxu3 }
 0x557   : > { %v10453_v40 = vadd.f32 %v4354_v61, %v3972_v18  ;;  %v10461_v61 = vsub.f32 %v5088_v33, %v10456_v5 }
 0x558   : > { %v3305_v15 = vpop.f32.mrf.mxu2  ;;  %v4366_v55 = vpop.f32.mrf.mxu1 }
 0x559   : > { %v3306_v20 = vadd.f32 %v3305_v15, %v9882_v53  ;;  %13681 = vst [vmem:[#allocation86_spill] sm:$0xff] %v10461_v61  ;;  %v5091_v53 = vsel %vm431_vm1, %v5022_v51, 0 }
 0x55a   : > { %v3981_v32 = vpop.f32.mrf.mxu0 }
 0x55b   : > { %v3656_v59 = vadd.f32 %v3655_v16, %v3306_v20  ;;  %3722 = vmatmul.f32.gmra.mxu3 %v10438_v63  ;;  %4461 = vmatmul.f32.gmra.mxu1 %v3437_v62  ;;  %v3447_v20 = vand.u32 4294901760, %v3446_v49  ;;  %v12988_v62 = vand.u32 4294901760, %v10461_v61 }
 0x55d   : > { %v3977_v29 = vadd.f32 %v3976_v4, %v3656_v59  ;;  %3440 = vmatmul.f32.gmra.mxu2 %v3439_v21  ;;  %4060 = vmatmul.f32.gmra.mxu0 %v3436_v56  ;;  %v10468_v4 = vand.u32 4294901760, %v5091_v53  ;;  %v5023_v56 = vld [vmem:[%s8426_s28 + $0x1a] sm:$0xff] }
 0x55e   : > { %v3659_v25 = vpop.f32.mrf.mxu3 }
 0x55f   : > { %v10464_v18 = vadd.f32 %v4360_v26, %v3977_v29  ;;  %13682 = vst [vmem:[#allocation75_spill] sm:$0xff] %v10468_v4  ;;  %v5302_v26 = vsub.f32 %v10461_v61, %v12988_v62  ;;  %v5094_v29 = vsel %vm431_vm1, %v5023_v56, 0 }
 0x560   : > { %v3313_v30 = vpop.f32.mrf.mxu2  ;;  %v4372_v15 = vpop.f32.mrf.mxu1 }
 0x561   : > { %v3314_v16 = vadd.f32 %v3313_v30, %v9895_v8  ;;  %v10476_v8 = vsub.f32 %v5091_v53, %v10468_v4  ;;  %v5024_v53 = vld [vmem:[%s8426_s28 + $0x22] sm:$0xff] }
 0x562   : > { %v3986_v21 = vpop.f32.mrf.mxu0 }
 0x563   : > { %v3660_v59 = vadd.f32 %v3659_v25, %v3314_v16  ;;  %3726 = vmatmul.f32.gmra.mxu3 %v10447_v14  ;;  %4467 = vmatmul.f32.gmra.mxu1 %v3445_v24  ;;  %13683 = vst [vmem:[#allocation71_spill] sm:$0xff] %v10476_v8  ;;  %v10483_v16 = vand.u32 4294901760, %v5094_v29 }
 0x565   : > { %v3982_v33 = vadd.f32 %v3981_v32, %v3660_v59  ;;  %3448 = vmatmul.f32.gmra.mxu2 %v3447_v20  ;;  %4065 = vmatmul.f32.gmra.mxu0 %v3444_v48  ;;  %v5303_v32 = vand.u32 4294901760, %v5302_v26  ;;  %v12993_v48 = vand.u32 4294901760, %v10476_v8  ;;  %13684 = vst [vmem:[#allocation93_spill] sm:$0xff] %v10483_v16 }
 0x566   : > { %v3663_v51 = vpop.f32.mrf.mxu3 }
 0x567   : > { %v10479_v49 = vadd.f32 %v4366_v55, %v3982_v33  ;;  %v10493_v55 = vsub.f32 %v5094_v29, %v10483_v16  ;;  %v5097_v33 = vsel %vm431_vm1, %v5024_v53, 0  ;;  %v5025_v29 = vld [vmem:[%s8426_s28 + $0x32] sm:$0xff] }
 0x568   : > { %v3321_v25 = vpop.f32.mrf.mxu2  ;;  %v4378_v30 = vpop.f32.mrf.mxu1 }
 0x569   : > { %v3322_v24 = vadd.f32 %v3321_v25, %v9904_v1  ;;  %v5310_v1 = vsub.f32 %v10476_v8, %v12993_v48  ;;  %13685 = vst [vmem:[#allocation82_spill] sm:$0xff] %v10493_v55  ;;  %v13689_v48 = vld [vmem:[#allocation74_spill] sm:$0xff] }
 0x56a   : > { %v3991_v20 = vpop.f32.mrf.mxu0 }
 0x56b   : > { %v3664_v59 = vadd.f32 %v3663_v51, %v3322_v24  ;;  %4765 = vmatmul.f32.vlgmr.msrb.gmra.mxu3 %v9872_v60  ;;  %5834 = vmatmul.f32.vlgmr.msrb.gmra.mxu1 %v10456_v5  ;;  %v13687_v24 = vld [vmem:[#allocation66_spill] sm:$0xff] }
 0x56d   : > { %v3987_v62 = vadd.f32 %v3986_v21, %v3664_v59  ;;  %4491 = vmatmul.f32.vlgmr.msrb.gmra.mxu2 %v9872_v60  ;;  %5304 = vmatmul.f32.vlgmr.msrb.gmra.mxu0 %v5303_v32  ;;  %v5311_v59 = vand.u32 4294901760, %v5310_v1  ;;  %v12998_v60 = vand.u32 4294901760, %v10493_v55  ;;  %v10500_v32 = vand.u32 4294901760, %v5097_v33 }
 0x56e   : > { %v3667_v56 = vpop.f32.mrf.mxu3  ;;  %v5100_v1 = vsel %vm431_vm1, %v5025_v29, 0 }
 0x56f   : > { %v10496_v26 = vadd.f32 %v4372_v15, %v3987_v62  ;;  %13688 = vst [vmem:[#allocation100_spill] sm:$0xff] %v10500_v32  ;;  %v5318_v15 = vsub.f32 %v10493_v55, %v12998_v60  ;;  %v10510_v62 = vsub.f32 %v5097_v33, %v10500_v32  ;;  %v13694_v60 = vld [vmem:[#allocation70_spill] sm:$0xff]  ;;  %v5026_v33 = vld [vmem:[%s8426_s28 + $0x3a] sm:$0xff] }
 0x570   : > { %v3329_v51 = vpop.f32.mrf.mxu2  ;;  %v4384_v25 = vpop.f32.mrf.mxu1 }
 0x571   : > { %13686 = vst [vmem:[#allocation78_spill] sm:$0xff] %v10496_v26  ;;  %v3330_v21 = vadd.f32 %v3329_v51, %v13687_v24 }
 0x572   : > { %v3996_v5 = vpop.f32.mrf.mxu0  ;;  %13690 = vst [vmem:[#allocation89_spill] sm:$0xff] %v10510_v62 }
 0x573   : > { %v3668_v61 = vadd.f32 %v3667_v56, %v3330_v21  ;;  %4769 = vmatmul.f32.gmra.mxu3 %v13689_v48  ;;  %5838 = vmatmul.f32.gmra.mxu1 %v10468_v4  ;;  %v13692_v21 = vld [vmem:[#allocation77_spill] sm:$0xff] }
 0x575   : > { %v3992_v8 = vadd.f32 %v3991_v20, %v3668_v61  ;;  %4495 = vmatmul.f32.gmra.mxu2 %v13689_v48  ;;  %5312 = vmatmul.f32.gmra.mxu0 %v5311_v59  ;;  %v5319_v20 = vand.u32 4294901760, %v5318_v15  ;;  %v13003_v48 = vand.u32 4294901760, %v10510_v62  ;;  %v10517_v59 = vand.u32 4294901760, %v5100_v1 }
 0x576   : > { %v3671_v53 = vpop.f32.mrf.mxu3  ;;  %v5103_v15 = vsel %vm431_vm1, %v5026_v33, 0 }
 0x577   : > { %v10513_v56 = vadd.f32 %v4378_v30, %v3992_v8  ;;  %13693 = vst [vmem:[#allocation107_spill] sm:$0xff] %v10517_v59  ;;  %v5326_v8 = vsub.f32 %v10510_v62, %v13003_v48  ;;  %v10527_v30 = vsub.f32 %v5100_v1, %v10517_v59  ;;  %v13699_v48 = vld [vmem:[#allocation69_spill] sm:$0xff]  ;;  %v5027_v1 = vld [vmem:[%s8426_s28 + $0x4a] sm:$0xff] }
 0x578   : > { %v3337_v51 = vpop.f32.mrf.mxu2  ;;  %v4390_v24 = vpop.f32.mrf.mxu1 }
 0x579   : > { %13691 = vst [vmem:[#allocation85_spill] sm:$0xff] %v10513_v56  ;;  %v3338_v61 = vadd.f32 %v3337_v51, %v13692_v21 }
 0x57a   : > { %v4001_v4 = vpop.f32.mrf.mxu0  ;;  %13695 = vst [vmem:[#allocation96_spill] sm:$0xff] %v10527_v30 }
 0x57b   : > { %v3672_v26 = vadd.f32 %v3671_v53, %v3338_v61  ;;  %4773 = vmatmul.f32.gmra.mxu3 %v13694_v60  ;;  %5842 = vmatmul.f32.gmra.mxu1 %v10483_v16  ;;  %v13697_v61 = vld [vmem:[#allocation73_spill] sm:$0xff] }
 0x57d   : > { %v3997_v55 = vadd.f32 %v3996_v5, %v3672_v26  ;;  %4499 = vmatmul.f32.gmra.mxu2 %v13694_v60  ;;  %5320 = vmatmul.f32.gmra.mxu0 %v5319_v20  ;;  %v5327_v26 = vand.u32 4294901760, %v5326_v8  ;;  %v13008_v60 = vand.u32 4294901760, %v10527_v30  ;;  %v10534_v20 = vand.u32 4294901760, %v5103_v15 }
 0x57e   : > { %v3675_v29 = vpop.f32.mrf.mxu3  ;;  %v5106_v8 = vsel %vm431_vm1, %v5027_v1, 0 }
 0x57f   : > { %v10530_v53 = vadd.f32 %v4384_v25, %v3997_v55  ;;  %13698 = vst [vmem:[#allocation114_spill] sm:$0xff] %v10534_v20  ;;  %v5334_v55 = vsub.f32 %v10527_v30, %v13008_v60  ;;  %v10544_v25 = vsub.f32 %v5103_v15, %v10534_v20  ;;  %v13704_v60 = vld [vmem:[#allocation81_spill] sm:$0xff]  ;;  %v5028_v15 = vld [vmem:[%s8426_s28 + $0x52] sm:$0xff] }
 0x580   : > { %v3345_v51 = vpop.f32.mrf.mxu2  ;;  %v4396_v21 = vpop.f32.mrf.mxu1 }
 0x581   : > { %13696 = vst [vmem:[#allocation92_spill] sm:$0xff] %v10530_v53  ;;  %v3346_v5 = vadd.f32 %v3345_v51, %v13697_v61 }
 0x582   : > { %v4006_v16 = vpop.f32.mrf.mxu0  ;;  %13700 = vst [vmem:[#allocation103_spill] sm:$0xff] %v10544_v25 }
 0x583   : > { %v3676_v56 = vadd.f32 %v3675_v29, %v3346_v5  ;;  %4777 = vmatmul.f32.gmra.mxu3 %v13699_v48  ;;  %5846 = vmatmul.f32.gmra.mxu1 %v10500_v32  ;;  %v13702_v5 = vld [vmem:[#allocation84_spill] sm:$0xff] }
 0x585   : > { %v4002_v62 = vadd.f32 %v4001_v4, %v3676_v56  ;;  %4503 = vmatmul.f32.gmra.mxu2 %v13699_v48  ;;  %5328 = vmatmul.f32.gmra.mxu0 %v5327_v26  ;;  %v5335_v56 = vand.u32 4294901760, %v5334_v55  ;;  %v13013_v48 = vand.u32 4294901760, %v10544_v25  ;;  %v10551_v26 = vand.u32 4294901760, %v5106_v8 }
 0x586   : > { %v3679_v33 = vpop.f32.mrf.mxu3  ;;  %v5109_v55 = vsel %vm431_vm1, %v5028_v15, 0 }
 0x587   : > { %v10547_v29 = vadd.f32 %v4390_v24, %v4002_v62  ;;  %13703 = vst [vmem:[#allocation122_spill] sm:$0xff] %v10551_v26  ;;  %v5342_v62 = vsub.f32 %v10544_v25, %v13013_v48  ;;  %v10561_v24 = vsub.f32 %v5106_v8, %v10551_v26  ;;  %v13709_v48 = vld [vmem:[#allocation76_spill] sm:$0xff]  ;;  %v5029_v8 = vld [vmem:[%s8426_s28 + $0x62] sm:$0xff] }
 0x588   : > { %v3353_v51 = vpop.f32.mrf.mxu2  ;;  %v4402_v61 = vpop.f32.mrf.mxu1 }
 0x589   : > { %13701 = vst [vmem:[#allocation99_spill] sm:$0xff] %v10547_v29  ;;  %v3354_v4 = vadd.f32 %v3353_v51, %v13702_v5 }
 0x58a   : > { %v4011_v32 = vpop.f32.mrf.mxu0  ;;  %13705 = vst [vmem:[#allocation110_spill] sm:$0xff] %v10561_v24 }
 0x58b   : > { %v3680_v53 = vadd.f32 %v3679_v33, %v3354_v4  ;;  %4781 = vmatmul.f32.gmra.mxu3 %v13704_v60  ;;  %5850 = vmatmul.f32.gmra.mxu1 %v10517_v59  ;;  %v13707_v4 = vld [vmem:[#allocation80_spill] sm:$0xff] }
 0x58d   : > { %v4007_v30 = vadd.f32 %v4006_v16, %v3680_v53  ;;  %4507 = vmatmul.f32.gmra.mxu2 %v13704_v60  ;;  %5336 = vmatmul.f32.gmra.mxu0 %v5335_v56  ;;  %v5343_v53 = vand.u32 4294901760, %v5342_v62  ;;  %v13018_v60 = vand.u32 4294901760, %v10561_v24  ;;  %v10568_v56 = vand.u32 4294901760, %v5109_v55 }
 0x58e   : > { %v3683_v1 = vpop.f32.mrf.mxu3  ;;  %v5112_v62 = vsel %vm431_vm1, %v5029_v8, 0 }
 0x58f   : > { %v10564_v33 = vadd.f32 %v4396_v21, %v4007_v30  ;;  %13708 = vst [vmem:[#allocation127_spill] sm:$0xff] %v10568_v56  ;;  %v5350_v30 = vsub.f32 %v10561_v24, %v13018_v60  ;;  %v10578_v21 = vsub.f32 %v5109_v55, %v10568_v56  ;;  %v13714_v60 = vld [vmem:[#allocation88_spill] sm:$0xff]  ;;  %v5030_v55 = vld [vmem:[%s8426_s28 + $0x6a] sm:$0xff] }
 0x590   : > { %v3361_v51 = vpop.f32.mrf.mxu2  ;;  %v4408_v5 = vpop.f32.mrf.mxu1 }
 0x591   : > { %13706 = vst [vmem:[#allocation106_spill] sm:$0xff] %v10564_v33  ;;  %v3362_v16 = vadd.f32 %v3361_v51, %v13707_v4 }
 0x592   : > { %v4016_v59 = vpop.f32.mrf.mxu0  ;;  %13710 = vst [vmem:[#allocation117_spill] sm:$0xff] %v10578_v21 }
 0x593   : > { %v3684_v29 = vadd.f32 %v3683_v1, %v3362_v16  ;;  %4785 = vmatmul.f32.gmra.mxu3 %v13709_v48  ;;  %5854 = vmatmul.f32.gmra.mxu1 %v10534_v20  ;;  %v13712_v16 = vld [vmem:[#allocation91_spill] sm:$0xff] }
 0x595   : > { %v4012_v25 = vadd.f32 %v4011_v32, %v3684_v29  ;;  %4511 = vmatmul.f32.gmra.mxu2 %v13709_v48  ;;  %5344 = vmatmul.f32.gmra.mxu0 %v5343_v53  ;;  %v5351_v29 = vand.u32 4294901760, %v5350_v30  ;;  %v13023_v48 = vand.u32 4294901760, %v10578_v21  ;;  %v10585_v53 = vand.u32 4294901760, %v5112_v62 }
 0x596   : > { %v3687_v15 = vpop.f32.mrf.mxu3  ;;  %v5115_v30 = vsel %vm431_vm1, %v5030_v55, 0 }
 0x597   : > { %v10581_v1 = vadd.f32 %v4402_v61, %v4012_v25  ;;  %13713 = vst [vmem:[#allocation132_spill] sm:$0xff] %v10585_v53  ;;  %v5358_v25 = vsub.f32 %v10578_v21, %v13023_v48  ;;  %v10595_v61 = vsub.f32 %v5112_v62, %v10585_v53  ;;  %v13719_v48 = vld [vmem:[#allocation83_spill] sm:$0xff]  ;;  %v5031_v62 = vld [vmem:[%s8426_s28 + $0x7a] sm:$0xff] }
 0x598   : > { %v3369_v51 = vpop.f32.mrf.mxu2  ;;  %v4414_v4 = vpop.f32.mrf.mxu1 }
 0x599   : > { %13711 = vst [vmem:[#allocation113_spill] sm:$0xff] %v10581_v1  ;;  %v3370_v32 = vadd.f32 %v3369_v51, %v13712_v16 }
 0x59a   : > { %v4021_v20 = vpop.f32.mrf.mxu0  ;;  %13715 = vst [vmem:[#allocation124_spill] sm:$0xff] %v10595_v61 }
 0x59b   : > { %v3688_v33 = vadd.f32 %v3687_v15, %v3370_v32  ;;  %4789 = vmatmul.f32.gmra.mxu3 %v13714_v60  ;;  %5858 = vmatmul.f32.gmra.mxu1 %v10551_v26  ;;  %v13717_v32 = vld [vmem:[#allocation87_spill] sm:$0xff] }
 0x59d   : > { %v4017_v24 = vadd.f32 %v4016_v59, %v3688_v33  ;;  %4515 = vmatmul.f32.gmra.mxu2 %v13714_v60  ;;  %5352 = vmatmul.f32.gmra.mxu0 %v5351_v29  ;;  %v5359_v33 = vand.u32 4294901760, %v5358_v25  ;;  %v13028_v60 = vand.u32 4294901760, %v10595_v61  ;;  %v10602_v29 = vand.u32 4294901760, %v5115_v30 }
 0x59e   : > { %v3691_v8 = vpop.f32.mrf.mxu3  ;;  %v5118_v25 = vsel %vm431_vm1, %v5031_v62, 0 }
 0x59f   : > { %v10598_v15 = vadd.f32 %v4408_v5, %v4017_v24  ;;  %13718 = vst [vmem:[#allocation129_spill] sm:$0xff] %v10602_v29  ;;  %v5366_v24 = vsub.f32 %v10595_v61, %v13028_v60  ;;  %v10612_v5 = vsub.f32 %v5115_v30, %v10602_v29  ;;  %v13724_v60 = vld [vmem:[#allocation95_spill] sm:$0xff]  ;;  %v5032_v30 = vld [vmem:[%s8426_s28 + $0x82] sm:$0xff] }
 0x5a0   : > { %v3377_v51 = vpop.f32.mrf.mxu2  ;;  %v4420_v16 = vpop.f32.mrf.mxu1 }
 0x5a1   : > { %13716 = vst [vmem:[#allocation120_spill] sm:$0xff] %v10598_v15  ;;  %v3378_v59 = vadd.f32 %v3377_v51, %v13717_v32 }
 0x5a2   : > { %v4026_v26 = vpop.f32.mrf.mxu0  ;;  %13720 = vst [vmem:[#allocation134_spill] sm:$0xff] %v10612_v5 }
 0x5a3   : > { %v3692_v1 = vadd.f32 %v3691_v8, %v3378_v59  ;;  %4793 = vmatmul.f32.gmra.mxu3 %v13719_v48  ;;  %5862 = vmatmul.f32.gmra.mxu1 %v10568_v56  ;;  %v13722_v59 = vld [vmem:[#allocation98_spill] sm:$0xff] }
 0x5a5   : > { %v4022_v21 = vadd.f32 %v4021_v20, %v3692_v1  ;;  %4519 = vmatmul.f32.gmra.mxu2 %v13719_v48  ;;  %5360 = vmatmul.f32.gmra.mxu0 %v5359_v33  ;;  %v5367_v1 = vand.u32 4294901760, %v5366_v24  ;;  %v13033_v48 = vand.u32 4294901760, %v10612_v5  ;;  %v10619_v33 = vand.u32 4294901760, %v5118_v25 }
 0x5a6   : > { %v3695_v55 = vpop.f32.mrf.mxu3  ;;  %v5121_v24 = vsel %vm431_vm1, %v5032_v30, 0 }
 0x5a7   : > { %v10615_v8 = vadd.f32 %v4414_v4, %v4022_v21  ;;  %13723 = vst [vmem:[#allocation135_spill] sm:$0xff] %v10619_v33  ;;  %v5374_v21 = vsub.f32 %v10612_v5, %v13033_v48  ;;  %v10629_v4 = vsub.f32 %v5118_v25, %v10619_v33  ;;  %v13729_v48 = vld [vmem:[#allocation90_spill] sm:$0xff]  ;;  %v5033_v25 = vld [vmem:[%s8426_s28 + $0x92] sm:$0xff] }
 0x5a8   : > { %v3385_v51 = vpop.f32.mrf.mxu2  ;;  %v4426_v32 = vpop.f32.mrf.mxu1 }
 0x5a9   : > { %13721 = vst [vmem:[#allocation131_spill] sm:$0xff] %v10615_v8  ;;  %v3386_v20 = vadd.f32 %v3385_v51, %v13722_v59 }
 0x5aa   : > { %v4031_v56 = vpop.f32.mrf.mxu0  ;;  %13725 = vst [vmem:[#allocation136_spill] sm:$0xff] %v10629_v4 }
 0x5ab   : > { %v3696_v15 = vadd.f32 %v3695_v55, %v3386_v20  ;;  %4797 = vmatmul.f32.gmra.mxu3 %v13724_v60  ;;  %5866 = vmatmul.f32.gmra.mxu1 %v10585_v53  ;;  %v13727_v20 = vld [vmem:[#allocation94_spill] sm:$0xff] }
 0x5ad   : > { %v4027_v61 = vadd.f32 %v4026_v26, %v3696_v15  ;;  %4523 = vmatmul.f32.gmra.mxu2 %v13724_v60  ;;  %5368 = vmatmul.f32.gmra.mxu0 %v5367_v1  ;;  %v5375_v15 = vand.u32 4294901760, %v5374_v21  ;;  %v13038_v60 = vand.u32 4294901760, %v10629_v4  ;;  %v10636_v1 = vand.u32 4294901760, %v5121_v24 }
 0x5ae   : > { %v3699_v62 = vpop.f32.mrf.mxu3  ;;  %v5124_v21 = vsel %vm431_vm1, %v5033_v25, 0 }
 0x5af   : > { %v10632_v55 = vadd.f32 %v4420_v16, %v4027_v61  ;;  %13728 = vst [vmem:[#allocation138_spill] sm:$0xff] %v10636_v1  ;;  %v5382_v61 = vsub.f32 %v10629_v4, %v13038_v60  ;;  %v10646_v16 = vsub.f32 %v5121_v24, %v10636_v1  ;;  %v13734_v60 = vld [vmem:[#allocation102_spill] sm:$0xff]  ;;  %v5034_v24 = vld [vmem:[%s8426_s28 + $0x9a] sm:$0xff] }
 0x5b0   : > { %v3393_v51 = vpop.f32.mrf.mxu2  ;;  %v4432_v59 = vpop.f32.mrf.mxu1 }
 0x5b1   : > { %13726 = vst [vmem:[#allocation137_spill] sm:$0xff] %v10632_v55  ;;  %v3394_v26 = vadd.f32 %v3393_v51, %v13727_v20 }
 0x5b2   : > { %v4036_v53 = vpop.f32.mrf.mxu0  ;;  %13730 = vst [vmem:[#allocation139_spill] sm:$0xff] %v10646_v16 }
 0x5b3   : > { %v3700_v8 = vadd.f32 %v3699_v62, %v3394_v26  ;;  %4801 = vmatmul.f32.gmra.mxu3 %v13729_v48  ;;  %5870 = vmatmul.f32.gmra.mxu1 %v10602_v29  ;;  %v13732_v26 = vld [vmem:[#allocation105_spill] sm:$0xff] }
 0x5b5   : > { %v4032_v5 = vadd.f32 %v4031_v56, %v3700_v8  ;;  %4527 = vmatmul.f32.gmra.mxu2 %v13729_v48  ;;  %5376 = vmatmul.f32.gmra.mxu0 %v5375_v15  ;;  %v5383_v8 = vand.u32 4294901760, %v5382_v61  ;;  %v13043_v48 = vand.u32 4294901760, %v10646_v16  ;;  %v10653_v15 = vand.u32 4294901760, %v5124_v21 }
 0x5b6   : > { %v3703_v30 = vpop.f32.mrf.mxu3  ;;  %v5127_v61 = vsel %vm431_vm1, %v5034_v24, 0 }
 0x5b7   : > { %v10649_v62 = vadd.f32 %v4426_v32, %v4032_v5  ;;  %13733 = vst [vmem:[#allocation141_spill] sm:$0xff] %v10653_v15  ;;  %v5390_v5 = vsub.f32 %v10646_v16, %v13043_v48  ;;  %v10663_v32 = vsub.f32 %v5124_v21, %v10653_v15  ;;  %v13739_v48 = vld [vmem:[#allocation97_spill] sm:$0xff]  ;;  %v5035_v21 = vld [vmem:[%s8426_s28 + $0xaa] sm:$0xff] }
 0x5b8   : > { %v3401_v51 = vpop.f32.mrf.mxu2  ;;  %v4438_v20 = vpop.f32.mrf.mxu1 }
 0x5b9   : > { %13731 = vst [vmem:[#allocation140_spill] sm:$0xff] %v10649_v62  ;;  %v3402_v56 = vadd.f32 %v3401_v51, %v13732_v26 }
 0x5ba   : > { %v4041_v29 = vpop.f32.mrf.mxu0  ;;  %13735 = vst [vmem:[#allocation142_spill] sm:$0xff] %v10663_v32 }
 0x5bb   : > { %v3704_v55 = vadd.f32 %v3703_v30, %v3402_v56  ;;  %4805 = vmatmul.f32.gmra.mxu3 %v13734_v60  ;;  %5874 = vmatmul.f32.gmra.mxu1 %v10619_v33  ;;  %v13737_v56 = vld [vmem:[#allocation101_spill] sm:$0xff] }
 0x5bd   : > { %v4037_v4 = vadd.f32 %v4036_v53, %v3704_v55  ;;  %4531 = vmatmul.f32.gmra.mxu2 %v13734_v60  ;;  %5384 = vmatmul.f32.gmra.mxu0 %v5383_v8  ;;  %v5391_v55 = vand.u32 4294901760, %v5390_v5  ;;  %v13048_v60 = vand.u32 4294901760, %v10663_v32  ;;  %v10670_v8 = vand.u32 4294901760, %v5127_v61 }
 0x5be   : > { %v3707_v25 = vpop.f32.mrf.mxu3  ;;  %v5130_v5 = vsel %vm431_vm1, %v5035_v21, 0 }
 0x5bf   : > { %v10666_v30 = vadd.f32 %v4432_v59, %v4037_v4  ;;  %13738 = vst [vmem:[#allocation144_spill] sm:$0xff] %v10670_v8  ;;  %v5398_v4 = vsub.f32 %v10663_v32, %v13048_v60  ;;  %v10680_v59 = vsub.f32 %v5127_v61, %v10670_v8  ;;  %v13744_v60 = vld [vmem:[#allocation109_spill] sm:$0xff]  ;;  %v5036_v61 = vld [vmem:[%s8426_s28 + $0xb2] sm:$0xff] }
 0x5c0   : > { %v3409_v51 = vpop.f32.mrf.mxu2  ;;  %v4444_v26 = vpop.f32.mrf.mxu1 }
 0x5c1   : > { %13736 = vst [vmem:[#allocation143_spill] sm:$0xff] %v10666_v30  ;;  %v3410_v53 = vadd.f32 %v3409_v51, %v13737_v56 }
 0x5c2   : > { %v4046_v33 = vpop.f32.mrf.mxu0  ;;  %13740 = vst [vmem:[#allocation145_spill] sm:$0xff] %v10680_v59 }
 0x5c3   : > { %v3708_v62 = vadd.f32 %v3707_v25, %v3410_v53  ;;  %4809 = vmatmul.f32.gmra.mxu3 %v13739_v48  ;;  %5878 = vmatmul.f32.gmra.mxu1 %v10636_v1  ;;  %v13742_v53 = vld [vmem:[#allocation112_spill] sm:$0xff] }
 0x5c5   : > { %v4042_v16 = vadd.f32 %v4041_v29, %v3708_v62  ;;  %4535 = vmatmul.f32.gmra.mxu2 %v13739_v48  ;;  %5392 = vmatmul.f32.gmra.mxu0 %v5391_v55  ;;  %v5399_v62 = vand.u32 4294901760, %v5398_v4  ;;  %v13053_v48 = vand.u32 4294901760, %v10680_v59  ;;  %v10687_v55 = vand.u32 4294901760, %v5130_v5 }
 0x5c6   : > { %v3711_v24 = vpop.f32.mrf.mxu3  ;;  %v5133_v4 = vsel %vm431_vm1, %v5036_v61, 0 }
 0x5c7   : > { %v10683_v25 = vadd.f32 %v4438_v20, %v4042_v16  ;;  %13743 = vst [vmem:[#allocation147_spill] sm:$0xff] %v10687_v55  ;;  %v5406_v16 = vsub.f32 %v10680_v59, %v13053_v48  ;;  %v10697_v20 = vsub.f32 %v5130_v5, %v10687_v55  ;;  %v13749_v48 = vld [vmem:[#allocation104_spill] sm:$0xff]  ;;  %v5037_v5 = vld [vmem:[%s8426_s28 + $0xc2] sm:$0xff] }
 0x5c8   : > { %v3417_v51 = vpop.f32.mrf.mxu2  ;;  %v4450_v56 = vpop.f32.mrf.mxu1 }
 0x5c9   : > { %13741 = vst [vmem:[#allocation146_spill] sm:$0xff] %v10683_v25  ;;  %v3418_v29 = vadd.f32 %v3417_v51, %v13742_v53 }
 0x5ca   : > { %v4051_v1 = vpop.f32.mrf.mxu0  ;;  %13745 = vst [vmem:[#allocation148_spill] sm:$0xff] %v10697_v20 }
 0x5cb   : > { %v3712_v30 = vadd.f32 %v3711_v24, %v3418_v29  ;;  %4813 = vmatmul.f32.gmra.mxu3 %v13744_v60  ;;  %5882 = vmatmul.f32.gmra.mxu1 %v10653_v15  ;;  %v13747_v29 = vld [vmem:[#allocation108_spill] sm:$0xff] }
 0x5cd   : > { %v4047_v32 = vadd.f32 %v4046_v33, %v3712_v30  ;;  %4539 = vmatmul.f32.gmra.mxu2 %v13744_v60  ;;  %5400 = vmatmul.f32.gmra.mxu0 %v5399_v62  ;;  %v5407_v30 = vand.u32 4294901760, %v5406_v16  ;;  %v13058_v60 = vand.u32 4294901760, %v10697_v20  ;;  %v10704_v62 = vand.u32 4294901760, %v5133_v4 }
 0x5ce   : > { %v3715_v21 = vpop.f32.mrf.mxu3  ;;  %v5136_v16 = vsel %vm431_vm1, %v5037_v5, 0 }
 0x5cf   : > { %v10700_v24 = vadd.f32 %v4444_v26, %v4047_v32  ;;  %13748 = vst [vmem:[#allocation150_spill] sm:$0xff] %v10704_v62  ;;  %v5414_v32 = vsub.f32 %v10697_v20, %v13058_v60  ;;  %v10714_v26 = vsub.f32 %v5133_v4, %v10704_v62  ;;  %v13754_v60 = vld [vmem:[#allocation116_spill] sm:$0xff]  ;;  %v5038_v4 = vld [vmem:[%s8426_s28 + $0xca] sm:$0xff] }
 0x5d0   : > { %v3425_v51 = vpop.f32.mrf.mxu2  ;;  %v4456_v53 = vpop.f32.mrf.mxu1 }
 0x5d1   : > { %13746 = vst [vmem:[#allocation149_spill] sm:$0xff] %v10700_v24  ;;  %v3426_v33 = vadd.f32 %v3425_v51, %v13747_v29 }
 0x5d2   : > { %v4056_v15 = vpop.f32.mrf.mxu0  ;;  %13750 = vst [vmem:[#allocation151_spill] sm:$0xff] %v10714_v26 }
 0x5d3   : > { %v3716_v25 = vadd.f32 %v3715_v21, %v3426_v33  ;;  %4817 = vmatmul.f32.gmra.mxu3 %v13749_v48  ;;  %5886 = vmatmul.f32.gmra.mxu1 %v10670_v8  ;;  %v13752_v33 = vld [vmem:[#allocation119_spill] sm:$0xff] }
 0x5d5   : > { %v4052_v59 = vadd.f32 %v4051_v1, %v3716_v25  ;;  %4543 = vmatmul.f32.gmra.mxu2 %v13749_v48  ;;  %5408 = vmatmul.f32.gmra.mxu0 %v5407_v30  ;;  %v5415_v25 = vand.u32 4294901760, %v5414_v32  ;;  %v13063_v48 = vand.u32 4294901760, %v10714_v26  ;;  %v10721_v30 = vand.u32 4294901760, %v5136_v16 }
 0x5d6   : > { %v3719_v61 = vpop.f32.mrf.mxu3  ;;  %v5139_v32 = vsel %vm431_vm1, %v5038_v4, 0 }
 0x5d7   : > { %v10717_v21 = vadd.f32 %v4450_v56, %v4052_v59  ;;  %13753 = vst [vmem:[#allocation49_spill] sm:$0xff] %v10721_v30  ;;  %v5422_v59 = vsub.f32 %v10714_v26, %v13063_v48  ;;  %v10731_v56 = vsub.f32 %v5136_v16, %v10721_v30  ;;  %v13757_v48 = vld [vmem:[#allocation111_spill] sm:$0xff]  ;;  %v5039_v16 = vld [vmem:[%s8426_s28 + $0xda] sm:$0xff] }
 0x5d8   : > { %v3433_v51 = vpop.f32.mrf.mxu2  ;;  %v4462_v29 = vpop.f32.mrf.mxu1 }
 0x5d9   : > { %13751 = vst [vmem:[#allocation50_spill] sm:$0xff] %v10717_v21  ;;  %v3434_v1 = vadd.f32 %v3433_v51, %v13752_v33 }
 0x5da   : > { %v4061_v8 = vpop.f32.mrf.mxu0 }
 0x5db   : > { %v3720_v24 = vadd.f32 %v3719_v61, %v3434_v1  ;;  %4821 = vmatmul.f32.gmra.mxu3 %v13754_v60  ;;  %5890 = vmatmul.f32.gmra.mxu1 %v10687_v55  ;;  %v13755_v1 = vld [vmem:[#allocation115_spill] sm:$0xff] }
 0x5dd   : > { %v4057_v20 = vadd.f32 %v4056_v15, %v3720_v24  ;;  %4547 = vmatmul.f32.gmra.mxu2 %v13754_v60  ;;  %5416 = vmatmul.f32.gmra.mxu0 %v5415_v25  ;;  %v5423_v24 = vand.u32 4294901760, %v5422_v59  ;;  %v13068_v60 = vand.u32 4294901760, %v10731_v56  ;;  %v10738_v25 = vand.u32 4294901760, %v5139_v32 }
 0x5de   : > { %v3723_v5 = vpop.f32.mrf.mxu3  ;;  %v5142_v59 = vsel %vm431_vm1, %v5039_v16, 0  ;;  %v5040_v16 = vld [vmem:[%s8426_s28 + $0xe2] sm:$0xff] }
 0x5df   : > { %v10734_v61 = vadd.f32 %v4456_v53, %v4057_v20  ;;  %13756 = vst [vmem:[#allocation47_spill] sm:$0xff] %v10738_v25  ;;  %v5430_v20 = vsub.f32 %v10731_v56, %v13068_v60  ;;  %v10748_v53 = vsub.f32 %v5139_v32, %v10738_v25  ;;  %v13762_v32 = vld [vmem:[#allocation123_spill] sm:$0xff] }
 0x5e0   : > { %v3441_v51 = vpop.f32.mrf.mxu2  ;;  %v4468_v33 = vpop.f32.mrf.mxu1 }
 0x5e1   : > { %v3442_v15 = vadd.f32 %v3441_v51, %v13755_v1 }
 0x5e2   : > { %v4066_v55 = vpop.f32.mrf.mxu0 }
 0x5e3   : > { %v3724_v21 = vadd.f32 %v3723_v5, %v3442_v15  ;;  %4825 = vmatmul.f32.gmra.mxu3 %v13757_v48  ;;  %5894 = vmatmul.f32.gmra.mxu1 %v10704_v62  ;;  %v13071_v15 = vand.u32 4294901760, %v10748_v53 }
 0x5e5   : > { %v4062_v26 = vadd.f32 %v4061_v8, %v3724_v21  ;;  %4551 = vmatmul.f32.gmra.mxu2 %v13757_v48  ;;  %5424 = vmatmul.f32.gmra.mxu0 %v5423_v24  ;;  %v13759_v8 = vld [vmem:[#allocation126_spill] sm:$0xff]  ;;  %v5431_v48 = vand.u32 4294901760, %v5430_v20  ;;  %v10757_v24 = vand.u32 4294901760, %v5142_v59 }
 0x5e6   : > { %v3727_v4 = vpop.f32.mrf.mxu3 }
 0x5e7   : > { %v10751_v5 = vadd.f32 %v4462_v29, %v4062_v26  ;;  %13760 = vst [vmem:[#allocation56_spill] sm:$0xff] %v10757_v24  ;;  %v5438_v29 = vsub.f32 %v10748_v53, %v13071_v15  ;;  %v10769_v20 = vsub.f32 %v5142_v59, %v10757_v24  ;;  %v13769_v59 = vld [vmem:[#allocation118_spill] sm:$0xff] }
 0x5e8   : > { %v3449_v51 = vpop.f32.mrf.mxu2  ;;  %v10753_v1 = vpop.f32.mrf.mxu1 }
 0x5e9   : > { %13758 = vst [vmem:[#allocation60_spill] sm:$0xff] %v10753_v1  ;;  %v3450_v21 = vadd.f32 %v3449_v51, %v13759_v8 }
 0x5ea   : > { %v10759_v62 = vpop.f32.mrf.mxu0  ;;  %13763 = vst [vmem:[#allocation53_spill] sm:$0xff] %v10769_v20 }
 0x5eb   : > { %13761 = vst [vmem:[#allocation55_spill] sm:$0xff] %v10759_v62  ;;  %v3728_v60 = vadd.f32 %v3727_v4, %v3450_v21  ;;  %4829 = vmatmul.f32.gmra.mxu3 %v13762_v32  ;;  %5898 = vmatmul.f32.gmra.mxu1 %v10721_v30  ;;  %v5145_v4 = vsel %vm431_vm1, %v5040_v16, 0 }
 0x5ec   : > { %v10778_v62 = vand.u32 4294901760, %v5145_v4 }
 0x5ed   : > { %v4067_v26 = vadd.f32 %v4066_v55, %v3728_v60  ;;  %4555 = vmatmul.f32.gmra.mxu2 %v13762_v32  ;;  %5432 = vmatmul.f32.gmra.mxu0 %v5431_v48  ;;  %v13765_v55 = vld [vmem:[#allocation121_spill] sm:$0xff]  ;;  %v5439_v32 = vand.u32 4294901760, %v5438_v29  ;;  %v13074_v48 = vand.u32 4294901760, %v10769_v20 }
 0x5ee   : > { %v4766_v51 = vpop.f32.mrf.mxu3  ;;  %13766 = vst [vmem:[#allocation63_spill] sm:$0xff] %v10778_v62 }
 0x5ef   : > { %v10772_v8 = vadd.f32 %v4468_v33, %v4067_v26  ;;  %v5041_v33 = vld [vmem:[%s8426_s28 + $0xf2] sm:$0xff]  ;;  %v5446_v16 = vsub.f32 %v10769_v20, %v13074_v48  ;;  %v10792_v26 = vsub.f32 %v5145_v4, %v10778_v62  ;;  %v5042_v4 = vld [vmem:[%s8426_s28 + $0xfa] sm:$0xff] }
 0x5f0   : > { %v4492_v21 = vpop.f32.mrf.mxu2  ;;  %v10774_v1 = vpop.f32.mrf.mxu1  ;;  %v13776_v48 = vld [vmem:[#allocation128_spill] sm:$0xff] }
 0x5f1   : > { %13764 = vst [vmem:[#allocation67_spill] sm:$0xff] %v10774_v1  ;;  %v4493_v60 = vadd.f32 %v4492_v21, %v13765_v55  ;;  %v5447_v1 = vand.u32 4294901760, %v5446_v16 }
 0x5f2   : > { %v10780_v30 = vpop.f32.mrf.mxu0  ;;  %13770 = vst [vmem:[#allocation66_spill] sm:$0xff] %v10792_v26 }
 0x5f3   : > { %13767 = vst [vmem:[#allocation62_spill] sm:$0xff] %v10780_v30  ;;  %v10782_v15 = vadd.f32 %v4766_v51, %v4493_v60  ;;  %4833 = vmatmul.f32.gmra.mxu3 %v13769_v59  ;;  %5902 = vmatmul.f32.gmra.mxu1 %v10738_v25  ;;  %v5148_v51 = vsel %vm431_vm1, %v5041_v33, 0  ;;  %v13772_v60 = vld [vmem:[#allocation130_spill] sm:$0xff] }
 0x5f4   : > { %v10799_v30 = vand.u32 4294901760, %v5148_v51 }
 0x5f5   : > { %13768 = vst [vmem:[#allocation59_spill] sm:$0xff] %v10782_v15  ;;  %4559 = vmatmul.f32.gmra.mxu2 %v13769_v59  ;;  %5440 = vmatmul.f32.gmra.mxu0 %v5439_v32  ;;  %v13079_v59 = vand.u32 4294901760, %v10792_v26 }
 0x5f6   : > { %v4770_v29 = vpop.f32.mrf.mxu3  ;;  %13773 = vst [vmem:[#allocation77_spill] sm:$0xff] %v10799_v30  ;;  %v10813_v16 = vsub.f32 %v5148_v51, %v10799_v30  ;;  %v5043_v51 = vld [vmem:[%s8426_s28 + $0x10a] sm:$0xff] }
 0x5f7   : > { %v5454_v33 = vsub.f32 %v10792_v26, %v13079_v59  ;;  %v13783_v59 = vld [vmem:[#allocation125_spill] sm:$0xff] }
 0x5f8   : > { %v4496_v21 = vpop.f32.mrf.mxu2  ;;  %v10795_v55 = vpop.f32.mrf.mxu1  ;;  %13777 = vst [vmem:[#allocation69_spill] sm:$0xff] %v10813_v16 }
 0x5f9   : > { %13771 = vst [vmem:[#allocation74_spill] sm:$0xff] %v10795_v55  ;;  %v4497_v15 = vadd.f32 %v4496_v21, %v13772_v60 }
 0x5fa   : > { %v10801_v32 = vpop.f32.mrf.mxu0 }
 0x5fb   : > { %13774 = vst [vmem:[#allocation70_spill] sm:$0xff] %v10801_v32  ;;  %v10803_v25 = vadd.f32 %v4770_v29, %v4497_v15  ;;  %4837 = vmatmul.f32.gmra.mxu3 %v13776_v48  ;;  %5906 = vmatmul.f32.gmra.mxu1 %v10757_v24  ;;  %v5151_v15 = vsel %vm431_vm1, %v5042_v4, 0  ;;  %v5455_v32 = vand.u32 4294901760, %v5454_v33 }
 0x5fc   : > { %v10820_v24 = vand.u32 4294901760, %v5151_v15 }
 0x5fd   : > { %13775 = vst [vmem:[#allocation73_spill] sm:$0xff] %v10803_v25  ;;  %4563 = vmatmul.f32.gmra.mxu2 %v13776_v48  ;;  %5448 = vmatmul.f32.gmra.mxu0 %v5447_v1  ;;  %v13779_v25 = vld [vmem:[#allocation10_spill] sm:$0xff]  ;;  %v13084_v48 = vand.u32 4294901760, %v10813_v16 }
 0x5fe   : > { %v4774_v21 = vpop.f32.mrf.mxu3  ;;  %13780 = vst [vmem:[#allocation81_spill] sm:$0xff] %v10820_v24  ;;  %v10834_v4 = vsub.f32 %v5151_v15, %v10820_v24  ;;  %v5044_v15 = vld [vmem:[%s8426_s28 + $0x112] sm:$0xff] }
 0x600   : > { %v4500_v29 = vpop.f32.mrf.mxu2  ;;  %v10816_v60 = vpop.f32.mrf.mxu1  ;;  %13784 = vst [vmem:[#allocation91_spill] sm:$0xff] %v10834_v4 }
 0x601   : > { %13778 = vst [vmem:[#allocation84_spill] sm:$0xff] %v10816_v60  ;;  %v4501_v55 = vadd.f32 %v4500_v29, %v13779_v25  ;;  %v5462_v25 = vsub.f32 %v10813_v16, %v13084_v48  ;;  %v13790_v48 = vld [vmem:[#allocation133_spill] sm:$0xff] }
 0x602   : > { %v10822_v1 = vpop.f32.mrf.mxu0 }
 0x603   : > { %13781 = vst [vmem:[#allocation80_spill] sm:$0xff] %v10822_v1  ;;  %v10824_v20 = vadd.f32 %v4774_v21, %v4501_v55  ;;  %4841 = vmatmul.f32.gmra.mxu3 %v13783_v59  ;;  %5910 = vmatmul.f32.gmra.mxu1 %v10778_v62  ;;  %v5154_v55 = vsel %vm431_vm1, %v5043_v51, 0  ;;  %v5463_v1 = vand.u32 4294901760, %v5462_v25 }
 0x604   : > { %v10841_v62 = vand.u32 4294901760, %v5154_v55 }
 0x605   : > { %13782 = vst [vmem:[#allocation76_spill] sm:$0xff] %v10824_v20  ;;  %4567 = vmatmul.f32.gmra.mxu2 %v13783_v59  ;;  %5456 = vmatmul.f32.gmra.mxu0 %v5455_v32  ;;  %v13786_v20 = vld [vmem:[#allocation11_spill] sm:$0xff]  ;;  %v13089_v59 = vand.u32 4294901760, %v10834_v4 }
 0x606   : > { %v4778_v33 = vpop.f32.mrf.mxu3  ;;  %13787 = vst [vmem:[#allocation87_spill] sm:$0xff] %v10841_v62  ;;  %v10855_v51 = vsub.f32 %v5154_v55, %v10841_v62  ;;  %v5045_v55 = vld [vmem:[%s8426_s28 + $0x122] sm:$0xff] }
 0x608   : > { %v4504_v21 = vpop.f32.mrf.mxu2  ;;  %v10837_v29 = vpop.f32.mrf.mxu1  ;;  %13791 = vst [vmem:[#allocation95_spill] sm:$0xff] %v10855_v51 }
 0x609   : > { %13785 = vst [vmem:[#allocation88_spill] sm:$0xff] %v10837_v29  ;;  %v4505_v60 = vadd.f32 %v4504_v21, %v13786_v20  ;;  %v5470_v20 = vsub.f32 %v10834_v4, %v13089_v59  ;;  %v13797_v59 = vld [vmem:[#allocation12_spill] sm:$0xff] }
 0x60a   : > { %v10843_v32 = vpop.f32.mrf.mxu0 }
 0x60b   : > { %13788 = vst [vmem:[#allocation83_spill] sm:$0xff] %v10843_v32  ;;  %v10845_v26 = vadd.f32 %v4778_v33, %v4505_v60  ;;  %4845 = vmatmul.f32.gmra.mxu3 %v13790_v48  ;;  %5914 = vmatmul.f32.gmra.mxu1 %v10799_v30  ;;  %v5157_v60 = vsel %vm431_vm1, %v5044_v15, 0  ;;  %v5471_v32 = vand.u32 4294901760, %v5470_v20 }
 0x60c   : > { %v10862_v30 = vand.u32 4294901760, %v5157_v60 }
 0x60d   : > { %13789 = vst [vmem:[#allocation98_spill] sm:$0xff] %v10845_v26  ;;  %4571 = vmatmul.f32.gmra.mxu2 %v13790_v48  ;;  %5464 = vmatmul.f32.gmra.mxu0 %v5463_v1  ;;  %v13793_v26 = vld [vmem:[#allocation14_spill] sm:$0xff]  ;;  %v13094_v48 = vand.u32 4294901760, %v10855_v51 }
 0x60e   : > { %v4782_v25 = vpop.f32.mrf.mxu3  ;;  %13794 = vst [vmem:[#allocation90_spill] sm:$0xff] %v10862_v30  ;;  %v10876_v15 = vsub.f32 %v5157_v60, %v10862_v30  ;;  %v5046_v60 = vld [vmem:[%s8426_s28 + $0x12a] sm:$0xff] }
 0x610   : > { %v4508_v33 = vpop.f32.mrf.mxu2  ;;  %v10858_v21 = vpop.f32.mrf.mxu1  ;;  %13798 = vst [vmem:[#allocation101_spill] sm:$0xff] %v10876_v15 }
 0x611   : > { %13792 = vst [vmem:[#allocation94_spill] sm:$0xff] %v10858_v21  ;;  %v4509_v29 = vadd.f32 %v4508_v33, %v13793_v26  ;;  %v5478_v26 = vsub.f32 %v10855_v51, %v13094_v48  ;;  %v13804_v48 = vld [vmem:[#allocation13_spill] sm:$0xff] }
 0x612   : > { %v10864_v1 = vpop.f32.mrf.mxu0 }
 0x613   : > { %13795 = vst [vmem:[#allocation105_spill] sm:$0xff] %v10864_v1  ;;  %v10866_v16 = vadd.f32 %v4782_v25, %v4509_v29  ;;  %4849 = vmatmul.f32.gmra.mxu3 %v13797_v59  ;;  %5918 = vmatmul.f32.gmra.mxu1 %v10820_v24  ;;  %v5160_v29 = vsel %vm431_vm1, %v5045_v55, 0  ;;  %v5479_v1 = vand.u32 4294901760, %v5478_v26 }
 0x614   : > { %v10883_v24 = vand.u32 4294901760, %v5160_v29 }
 0x615   : > { %13796 = vst [vmem:[#allocation102_spill] sm:$0xff] %v10866_v16  ;;  %4575 = vmatmul.f32.gmra.mxu2 %v13797_v59  ;;  %5472 = vmatmul.f32.gmra.mxu0 %v5471_v32  ;;  %v13800_v16 = vld [vmem:[#allocation16_spill] sm:$0xff]  ;;  %v13099_v59 = vand.u32 4294901760, %v10876_v15 }
 0x616   : > { %v4786_v20 = vpop.f32.mrf.mxu3  ;;  %13801 = vst [vmem:[#allocation112_spill] sm:$0xff] %v10883_v24  ;;  %v10897_v55 = vsub.f32 %v5160_v29, %v10883_v24  ;;  %v5047_v29 = vld [vmem:[%s8426_s28 + $0x13a] sm:$0xff] }
 0x618   : > { %v4512_v25 = vpop.f32.mrf.mxu2  ;;  %v10879_v33 = vpop.f32.mrf.mxu1  ;;  %13805 = vst [vmem:[#allocation104_spill] sm:$0xff] %v10897_v55 }
 0x619   : > { %13799 = vst [vmem:[#allocation97_spill] sm:$0xff] %v10879_v33  ;;  %v4513_v21 = vadd.f32 %v4512_v25, %v13800_v16  ;;  %v5486_v16 = vsub.f32 %v10876_v15, %v13099_v59  ;;  %v13811_v59 = vld [vmem:[#allocation15_spill] sm:$0xff] }
 0x61a   : > { %v10885_v32 = vpop.f32.mrf.mxu0 }
 0x61b   : > { %13802 = vst [vmem:[#allocation109_spill] sm:$0xff] %v10885_v32  ;;  %v10887_v4 = vadd.f32 %v4786_v20, %v4513_v21  ;;  %4853 = vmatmul.f32.gmra.mxu3 %v13804_v48  ;;  %5922 = vmatmul.f32.gmra.mxu1 %v10841_v62  ;;  %v5163_v21 = vsel %vm431_vm1, %v5046_v60, 0  ;;  %v5487_v32 = vand.u32 4294901760, %v5486_v16 }
 0x61c   : > { %v10904_v62 = vand.u32 4294901760, %v5163_v21 }
 0x61d   : > { %13803 = vst [vmem:[#allocation108_spill] sm:$0xff] %v10887_v4  ;;  %4579 = vmatmul.f32.gmra.mxu2 %v13804_v48  ;;  %5480 = vmatmul.f32.gmra.mxu0 %v5479_v1  ;;  %v13807_v4 = vld [vmem:[#allocation18_spill] sm:$0xff]  ;;  %v13104_v48 = vand.u32 4294901760, %v10897_v55 }
 0x61e   : > { %v4790_v26 = vpop.f32.mrf.mxu3  ;;  %13808 = vst [vmem:[#allocation116_spill] sm:$0xff] %v10904_v62  ;;  %v10918_v60 = vsub.f32 %v5163_v21, %v10904_v62  ;;  %v5048_v21 = vld [vmem:[%s8426_s28 + $0x142] sm:$0xff] }
 0x620   : > { %v4516_v20 = vpop.f32.mrf.mxu2  ;;  %v10900_v25 = vpop.f32.mrf.mxu1 }
 0x621   : > { %13806 = vst [vmem:[#allocation119_spill] sm:$0xff] %v10900_v25  ;;  %v4517_v33 = vadd.f32 %v4516_v20, %v13807_v4  ;;  %v5494_v4 = vsub.f32 %v10897_v55, %v13104_v48  ;;  %v13817_v48 = vld [vmem:[#allocation17_spill] sm:$0xff] }
 0x622   : > { %v10906_v1 = vpop.f32.mrf.mxu0 }
 0x623   : > { %13809 = vst [vmem:[#allocation115_spill] sm:$0xff] %v10906_v1  ;;  %v10908_v51 = vadd.f32 %v4790_v26, %v4517_v33  ;;  %4857 = vmatmul.f32.gmra.mxu3 %v13811_v59  ;;  %5926 = vmatmul.f32.gmra.mxu1 %v10862_v30  ;;  %v5166_v33 = vsel %vm431_vm1, %v5047_v29, 0  ;;  %v5495_v1 = vand.u32 4294901760, %v5494_v4 }
 0x624   : > { %v10925_v30 = vand.u32 4294901760, %v5166_v33 }
 0x625   : > { %13810 = vst [vmem:[#allocation111_spill] sm:$0xff] %v10908_v51  ;;  %4583 = vmatmul.f32.gmra.mxu2 %v13811_v59  ;;  %5488 = vmatmul.f32.gmra.mxu0 %v5487_v32  ;;  %v13813_v51 = vld [vmem:[#allocation20_spill] sm:$0xff]  ;;  %v13109_v59 = vand.u32 4294901760, %v10918_v60 }
 0x626   : > { %v4794_v16 = vpop.f32.mrf.mxu3  ;;  %13814 = vst [vmem:[#allocation123_spill] sm:$0xff] %v10925_v30  ;;  %v10939_v29 = vsub.f32 %v5166_v33, %v10925_v30  ;;  %v5049_v33 = vld [vmem:[%s8426_s28 + $0x152] sm:$0xff] }
 0x628   : > { %v4520_v26 = vpop.f32.mrf.mxu2  ;;  %v10921_v20 = vpop.f32.mrf.mxu1 }
 0x629   : > { %13812 = vst [vmem:[#allocation126_spill] sm:$0xff] %v10921_v20  ;;  %v4521_v25 = vadd.f32 %v4520_v26, %v13813_v51  ;;  %v5502_v51 = vsub.f32 %v10918_v60, %v13109_v59  ;;  %v13823_v59 = vld [vmem:[#allocation19_spill] sm:$0xff] }
 0x62a   : > { %v10927_v32 = vpop.f32.mrf.mxu0 }
 0x62b   : > { %13815 = vst [vmem:[#allocation121_spill] sm:$0xff] %v10927_v32  ;;  %v10929_v15 = vadd.f32 %v4794_v16, %v4521_v25  ;;  %4861 = vmatmul.f32.gmra.mxu3 %v13817_v48  ;;  %5930 = vmatmul.f32.gmra.mxu1 %v10883_v24  ;;  %v5169_v25 = vsel %vm431_vm1, %v5048_v21, 0  ;;  %v5503_v32 = vand.u32 4294901760, %v5502_v51 }
 0x62c   : > { %v10946_v24 = vand.u32 4294901760, %v5169_v25 }
 0x62d   : > { %13816 = vst [vmem:[#allocation118_spill] sm:$0xff] %v10929_v15  ;;  %4587 = vmatmul.f32.gmra.mxu2 %v13817_v48  ;;  %5496 = vmatmul.f32.gmra.mxu0 %v5495_v1  ;;  %v13819_v15 = vld [vmem:[#allocation22_spill] sm:$0xff]  ;;  %v13112_v48 = vand.u32 4294901760, %v10939_v29 }
 0x62e   : > { %v4798_v4 = vpop.f32.mrf.mxu3  ;;  %13820 = vst [vmem:[#allocation128_spill] sm:$0xff] %v10946_v24  ;;  %v10960_v21 = vsub.f32 %v5169_v25, %v10946_v24  ;;  %v5050_v25 = vld [vmem:[%s8426_s28 + $0x15a] sm:$0xff] }
 0x630   : > { %v4524_v16 = vpop.f32.mrf.mxu2  ;;  %v10942_v26 = vpop.f32.mrf.mxu1 }
 0x631   : > { %13818 = vst [vmem:[#allocation130_spill] sm:$0xff] %v10942_v26  ;;  %v4525_v20 = vadd.f32 %v4524_v16, %v13819_v15  ;;  %v5510_v15 = vsub.f32 %v10939_v29, %v13112_v48  ;;  %v13828_v48 = vld [vmem:[#allocation21_spill] sm:$0xff] }
 0x632   : > { %v10948_v1 = vpop.f32.mrf.mxu0 }
 0x633   : > { %13821 = vst [vmem:[#allocation10_spill] sm:$0xff] %v10948_v1  ;;  %v10950_v55 = vadd.f32 %v4798_v4, %v4525_v20  ;;  %4865 = vmatmul.f32.gmra.mxu3 %v13823_v59  ;;  %5934 = vmatmul.f32.gmra.mxu1 %v10904_v62  ;;  %v5172_v20 = vsel %vm431_vm1, %v5049_v33, 0  ;;  %v5511_v26 = vand.u32 4294901760, %v5510_v15 }
 0x634   : > { %v10967_v1 = vand.u32 4294901760, %v5172_v20 }
 0x635   : > { %13822 = vst [vmem:[#allocation125_spill] sm:$0xff] %v10950_v55  ;;  %4591 = vmatmul.f32.gmra.mxu2 %v13823_v59  ;;  %5504 = vmatmul.f32.gmra.mxu0 %v5503_v32  ;;  %v13115_v59 = vand.u32 4294901760, %v10960_v21 }
 0x636   : > { %v4802_v51 = vpop.f32.mrf.mxu3  ;;  %13825 = vst [vmem:[#allocation133_spill] sm:$0xff] %v10967_v1  ;;  %v10981_v33 = vsub.f32 %v5172_v20, %v10967_v1  ;;  %v5051_v20 = vld [vmem:[%s8426_s28 + $0x16a] sm:$0xff] }
 0x638   : > { %v4528_v4 = vpop.f32.mrf.mxu2  ;;  %v10963_v16 = vpop.f32.mrf.mxu1 }
 0x639   : > { %13824 = vst [vmem:[#allocation11_spill] sm:$0xff] %v10963_v16  ;;  %v4529_v55 = vadd.f32 %v4528_v4, %v10138_v10  ;;  %v5518_v10 = vsub.f32 %v10960_v21, %v13115_v59  ;;  %v13833_v59 = vld [vmem:[#allocation23_spill] sm:$0xff] }
 0x63a   : > { %v10969_v32 = vpop.f32.mrf.mxu0 }
 0x63b   : > { %13826 = vst [vmem:[#allocation14_spill] sm:$0xff] %v10969_v32  ;;  %v10971_v62 = vadd.f32 %v4802_v51, %v4529_v55  ;;  %4869 = vmatmul.f32.gmra.mxu3 %v13828_v48  ;;  %5938 = vmatmul.f32.gmra.mxu1 %v10925_v30  ;;  %v5175_v55 = vsel %vm431_vm1, %v5050_v25, 0  ;;  %v5519_v16 = vand.u32 4294901760, %v5518_v10 }
 0x63c   : > { %v10988_v32 = vand.u32 4294901760, %v5175_v55 }
 0x63d   : > { %13827 = vst [vmem:[#allocation12_spill] sm:$0xff] %v10971_v62  ;;  %4595 = vmatmul.f32.gmra.mxu2 %v13828_v48  ;;  %5512 = vmatmul.f32.gmra.mxu0 %v5511_v26  ;;  %v13118_v48 = vand.u32 4294901760, %v10981_v33 }
 0x63e   : > { %v4806_v15 = vpop.f32.mrf.mxu3  ;;  %13830 = vst [vmem:[#allocation13_spill] sm:$0xff] %v10988_v32  ;;  %v11002_v25 = vsub.f32 %v5175_v55, %v10988_v32  ;;  %v5052_v55 = vld [vmem:[%s8426_s28 + $0x172] sm:$0xff] }
 0x640   : > { %v4532_v51 = vpop.f32.mrf.mxu2  ;;  %v10984_v4 = vpop.f32.mrf.mxu1 }
 0x641   : > { %13829 = vst [vmem:[#allocation16_spill] sm:$0xff] %v10984_v4  ;;  %v4533_v62 = vadd.f32 %v4532_v51, %v10147_v3  ;;  %v5526_v3 = vsub.f32 %v10981_v33, %v13118_v48  ;;  %v13838_v48 = vld [vmem:[#allocation25_spill] sm:$0xff] }
 0x642   : > { %v10990_v26 = vpop.f32.mrf.mxu0 }
 0x643   : > { %13831 = vst [vmem:[#allocation18_spill] sm:$0xff] %v10990_v26  ;;  %v10992_v30 = vadd.f32 %v4806_v15, %v4533_v62  ;;  %4873 = vmatmul.f32.gmra.mxu3 %v13833_v59  ;;  %5942 = vmatmul.f32.gmra.mxu1 %v10946_v24  ;;  %v5178_v62 = vsel %vm431_vm1, %v5051_v20, 0  ;;  %v5527_v4 = vand.u32 4294901760, %v5526_v3 }
 0x644   : > { %v11009_v26 = vand.u32 4294901760, %v5178_v62 }
 0x645   : > { %13832 = vst [vmem:[#allocation15_spill] sm:$0xff] %v10992_v30  ;;  %4599 = vmatmul.f32.gmra.mxu2 %v13833_v59  ;;  %5520 = vmatmul.f32.gmra.mxu0 %v5519_v16  ;;  %v13121_v59 = vand.u32 4294901760, %v11002_v25 }
 0x646   : > { %v4810_v10 = vpop.f32.mrf.mxu3  ;;  %13835 = vst [vmem:[#allocation17_spill] sm:$0xff] %v11009_v26  ;;  %v11023_v20 = vsub.f32 %v5178_v62, %v11009_v26  ;;  %v5053_v62 = vld [vmem:[%s8426_s28 + $0x1b2] sm:$0xff] }
 0x648   : > { %v4536_v15 = vpop.f32.mrf.mxu2  ;;  %v11005_v51 = vpop.f32.mrf.mxu1 }
 0x649   : > { %13834 = vst [vmem:[#allocation20_spill] sm:$0xff] %v11005_v51  ;;  %v4537_v30 = vadd.f32 %v4536_v15, %v10156_v28  ;;  %v5534_v28 = vsub.f32 %v11002_v25, %v13121_v59  ;;  %v13843_v59 = vld [vmem:[#allocation24_spill] sm:$0xff] }
 0x64a   : > { %v11011_v16 = vpop.f32.mrf.mxu0 }
 0x64b   : > { %13836 = vst [vmem:[#allocation22_spill] sm:$0xff] %v11011_v16  ;;  %v11013_v24 = vadd.f32 %v4810_v10, %v4537_v30  ;;  %4877 = vmatmul.f32.gmra.mxu3 %v13838_v48  ;;  %5946 = vmatmul.f32.gmra.mxu1 %v10967_v1  ;;  %v5181_v30 = vsel %vm431_vm1, %v5052_v55, 0  ;;  %v5535_v51 = vand.u32 4294901760, %v5534_v28 }
 0x64c   : > { %v11030_v16 = vand.u32 4294901760, %v5181_v30 }
 0x64d   : > { %13837 = vst [vmem:[#allocation19_spill] sm:$0xff] %v11013_v24  ;;  %4603 = vmatmul.f32.gmra.mxu2 %v13838_v48  ;;  %5528 = vmatmul.f32.gmra.mxu0 %v5527_v4  ;;  %v13124_v48 = vand.u32 4294901760, %v11023_v20 }
 0x64e   : > { %v4814_v3 = vpop.f32.mrf.mxu3  ;;  %13840 = vst [vmem:[#allocation23_spill] sm:$0xff] %v11030_v16  ;;  %v11044_v55 = vsub.f32 %v5181_v30, %v11030_v16  ;;  %v5054_v30 = vld [vmem:[%s8426_s28 + $0x1ba] sm:$0xff] }
 0x650   : > { %v4540_v10 = vpop.f32.mrf.mxu2  ;;  %v11026_v15 = vpop.f32.mrf.mxu1 }
 0x651   : > { %13839 = vst [vmem:[#allocation21_spill] sm:$0xff] %v11026_v15  ;;  %v4541_v24 = vadd.f32 %v4540_v10, %v10165_v57  ;;  %v5542_v57 = vsub.f32 %v11023_v20, %v13124_v48  ;;  %v13848_v48 = vld [vmem:[#allocation27_spill] sm:$0xff] }
 0x652   : > { %v11032_v4 = vpop.f32.mrf.mxu0 }
 0x653   : > { %13841 = vst [vmem:[#allocation25_spill] sm:$0xff] %v11032_v4  ;;  %v11034_v1 = vadd.f32 %v4814_v3, %v4541_v24  ;;  %4881 = vmatmul.f32.gmra.mxu3 %v13843_v59  ;;  %5950 = vmatmul.f32.gmra.mxu1 %v10988_v32  ;;  %v5184_v24 = vsel %vm431_vm1, %v5053_v62, 0  ;;  %v5543_v15 = vand.u32 4294901760, %v5542_v57 }
 0x654   : > { %v11051_v4 = vand.u32 4294901760, %v5184_v24 }
 0x655   : > { %13842 = vst [vmem:[#allocation152_spill] sm:$0xff] %v11034_v1  ;;  %4607 = vmatmul.f32.gmra.mxu2 %v13843_v59  ;;  %5536 = vmatmul.f32.gmra.mxu0 %v5535_v51  ;;  %v13127_v59 = vand.u32 4294901760, %v11044_v55 }
 0x656   : > { %v4818_v28 = vpop.f32.mrf.mxu3  ;;  %13845 = vst [vmem:[#allocation153_spill] sm:$0xff] %v11051_v4  ;;  %v11065_v62 = vsub.f32 %v5184_v24, %v11051_v4  ;;  %v5055_v24 = vld [vmem:[%s8426_s28 + $0x1ca] sm:$0xff] }
 0x658   : > { %v4544_v3 = vpop.f32.mrf.mxu2  ;;  %v11047_v10 = vpop.f32.mrf.mxu1 }
 0x659   : > { %13844 = vst [vmem:[#allocation24_spill] sm:$0xff] %v11047_v10  ;;  %v4545_v1 = vadd.f32 %v4544_v3, %v10174_v23  ;;  %v5550_v23 = vsub.f32 %v11044_v55, %v13127_v59  ;;  %v13853_v59 = vld [vmem:[#allocation26_spill] sm:$0xff] }
 0x65a   : > { %v11053_v51 = vpop.f32.mrf.mxu0 }
 0x65b   : > { %13846 = vst [vmem:[#allocation154_spill] sm:$0xff] %v11053_v51  ;;  %v11055_v32 = vadd.f32 %v4818_v28, %v4545_v1  ;;  %4885 = vmatmul.f32.gmra.mxu3 %v13848_v48  ;;  %5954 = vmatmul.f32.gmra.mxu1 %v11009_v26  ;;  %v5187_v1 = vsel %vm431_vm1, %v5054_v30, 0  ;;  %v5551_v10 = vand.u32 4294901760, %v5550_v23 }
 0x65c   : > { %v11072_v51 = vand.u32 4294901760, %v5187_v1 }
 0x65d   : > { %13847 = vst [vmem:[#allocation155_spill] sm:$0xff] %v11055_v32  ;;  %4611 = vmatmul.f32.gmra.mxu2 %v13848_v48  ;;  %5544 = vmatmul.f32.gmra.mxu0 %v5543_v15  ;;  %v13130_v48 = vand.u32 4294901760, %v11065_v62 }
 0x65e   : > { %v4822_v57 = vpop.f32.mrf.mxu3  ;;  %13850 = vst [vmem:[#allocation156_spill] sm:$0xff] %v11072_v51  ;;  %v11086_v30 = vsub.f32 %v5187_v1, %v11072_v51  ;;  %v5056_v1 = vld [vmem:[%s8426_s28 + $0x1d2] sm:$0xff] }
 0x660   : > { %v4548_v28 = vpop.f32.mrf.mxu2  ;;  %v11068_v3 = vpop.f32.mrf.mxu1 }
 0x661   : > { %13849 = vst [vmem:[#allocation27_spill] sm:$0xff] %v11068_v3  ;;  %v4549_v32 = vadd.f32 %v4548_v28, %v10183_v6  ;;  %v5558_v6 = vsub.f32 %v11065_v62, %v13130_v48  ;;  %v13858_v48 = vld [vmem:[#allocation29_spill] sm:$0xff] }
 0x662   : > { %v11074_v15 = vpop.f32.mrf.mxu0 }
 0x663   : > { %13851 = vst [vmem:[#allocation157_spill] sm:$0xff] %v11074_v15  ;;  %v11076_v26 = vadd.f32 %v4822_v57, %v4549_v32  ;;  %4889 = vmatmul.f32.gmra.mxu3 %v13853_v59  ;;  %5958 = vmatmul.f32.gmra.mxu1 %v11030_v16  ;;  %v5190_v32 = vsel %vm431_vm1, %v5055_v24, 0  ;;  %v5559_v3 = vand.u32 4294901760, %v5558_v6 }
 0x664   : > { %v11093_v15 = vand.u32 4294901760, %v5190_v32 }
 0x665   : > { %13852 = vst [vmem:[#allocation158_spill] sm:$0xff] %v11076_v26  ;;  %4615 = vmatmul.f32.gmra.mxu2 %v13853_v59  ;;  %5552 = vmatmul.f32.gmra.mxu0 %v5551_v10  ;;  %v13133_v59 = vand.u32 4294901760, %v11086_v30 }
 0x666   : > { %v4826_v23 = vpop.f32.mrf.mxu3  ;;  %13855 = vst [vmem:[#allocation159_spill] sm:$0xff] %v11093_v15  ;;  %v11107_v24 = vsub.f32 %v5190_v32, %v11093_v15  ;;  %v5057_v32 = vld [vmem:[%s8426_s28 + $0x1e2] sm:$0xff] }
 0x668   : > { %v4552_v57 = vpop.f32.mrf.mxu2  ;;  %v11089_v28 = vpop.f32.mrf.mxu1 }
 0x669   : > { %13854 = vst [vmem:[#allocation26_spill] sm:$0xff] %v11089_v28  ;;  %v4553_v26 = vadd.f32 %v4552_v57, %v10192_v27  ;;  %v5566_v27 = vsub.f32 %v11086_v30, %v13133_v59  ;;  %v13863_v59 = vld [vmem:[#allocation28_spill] sm:$0xff] }
 0x66a   : > { %v11095_v10 = vpop.f32.mrf.mxu0 }
 0x66b   : > { %13856 = vst [vmem:[#allocation160_spill] sm:$0xff] %v11095_v10  ;;  %v11097_v16 = vadd.f32 %v4826_v23, %v4553_v26  ;;  %4893 = vmatmul.f32.gmra.mxu3 %v13858_v48  ;;  %5962 = vmatmul.f32.gmra.mxu1 %v11051_v4  ;;  %v5193_v26 = vsel %vm431_vm1, %v5056_v1, 0  ;;  %v5567_v28 = vand.u32 4294901760, %v5566_v27 }
 0x66c   : > { %v11114_v10 = vand.u32 4294901760, %v5193_v26 }
 0x66d   : > { %13857 = vst [vmem:[#allocation161_spill] sm:$0xff] %v11097_v16  ;;  %4619 = vmatmul.f32.gmra.mxu2 %v13858_v48  ;;  %5560 = vmatmul.f32.gmra.mxu0 %v5559_v3  ;;  %v13136_v48 = vand.u32 4294901760, %v11107_v24 }
 0x66e   : > { %v4830_v6 = vpop.f32.mrf.mxu3  ;;  %13860 = vst [vmem:[#allocation162_spill] sm:$0xff] %v11114_v10  ;;  %v11128_v1 = vsub.f32 %v5193_v26, %v11114_v10  ;;  %v5058_v26 = vld [vmem:[%s8426_s28 + $0x1ea] sm:$0xff] }
 0x670   : > { %v4556_v23 = vpop.f32.mrf.mxu2  ;;  %v11110_v57 = vpop.f32.mrf.mxu1 }
 0x671   : > { %13859 = vst [vmem:[#allocation29_spill] sm:$0xff] %v11110_v57  ;;  %v4557_v16 = vadd.f32 %v4556_v23, %v10201_v38  ;;  %v5574_v38 = vsub.f32 %v11107_v24, %v13136_v48  ;;  %v13868_v48 = vld [vmem:[#allocation31_spill] sm:$0xff] }
 0x672   : > { %v11116_v3 = vpop.f32.mrf.mxu0 }
 0x673   : > { %13861 = vst [vmem:[#allocation163_spill] sm:$0xff] %v11116_v3  ;;  %v11118_v4 = vadd.f32 %v4830_v6, %v4557_v16  ;;  %4897 = vmatmul.f32.gmra.mxu3 %v13863_v59  ;;  %5966 = vmatmul.f32.gmra.mxu1 %v11072_v51  ;;  %v5196_v16 = vsel %vm431_vm1, %v5057_v32, 0  ;;  %v5575_v57 = vand.u32 4294901760, %v5574_v38 }
 0x674   : > { %v11135_v3 = vand.u32 4294901760, %v5196_v16 }
 0x675   : > { %13862 = vst [vmem:[#allocation164_spill] sm:$0xff] %v11118_v4  ;;  %4623 = vmatmul.f32.gmra.mxu2 %v13863_v59  ;;  %5568 = vmatmul.f32.gmra.mxu0 %v5567_v28  ;;  %v13139_v59 = vand.u32 4294901760, %v11128_v1 }
 0x676   : > { %v4834_v27 = vpop.f32.mrf.mxu3  ;;  %13865 = vst [vmem:[#allocation165_spill] sm:$0xff] %v11135_v3  ;;  %v11149_v32 = vsub.f32 %v5196_v16, %v11135_v3  ;;  %v5059_v16 = vld [vmem:[%s8426_s28 + $0x1fa] sm:$0xff] }
 0x678   : > { %v4560_v6 = vpop.f32.mrf.mxu2  ;;  %v11131_v23 = vpop.f32.mrf.mxu1 }
 0x679   : > { %13864 = vst [vmem:[#allocation28_spill] sm:$0xff] %v11131_v23  ;;  %v4561_v4 = vadd.f32 %v4560_v6, %v10210_v54  ;;  %v5582_v54 = vsub.f32 %v11128_v1, %v13139_v59  ;;  %v13873_v59 = vld [vmem:[#allocation30_spill] sm:$0xff] }
 0x67a   : > { %v11137_v28 = vpop.f32.mrf.mxu0 }
 0x67b   : > { %13866 = vst [vmem:[#allocation166_spill] sm:$0xff] %v11137_v28  ;;  %v11139_v51 = vadd.f32 %v4834_v27, %v4561_v4  ;;  %4901 = vmatmul.f32.gmra.mxu3 %v13868_v48  ;;  %5970 = vmatmul.f32.gmra.mxu1 %v11093_v15  ;;  %v5199_v4 = vsel %vm431_vm1, %v5058_v26, 0  ;;  %v5583_v23 = vand.u32 4294901760, %v5582_v54 }
 0x67c   : > { %v11156_v28 = vand.u32 4294901760, %v5199_v4 }
 0x67d   : > { %13867 = vst [vmem:[#allocation167_spill] sm:$0xff] %v11139_v51  ;;  %4627 = vmatmul.f32.gmra.mxu2 %v13868_v48  ;;  %5576 = vmatmul.f32.gmra.mxu0 %v5575_v57  ;;  %v13142_v48 = vand.u32 4294901760, %v11149_v32 }
 0x67e   : > { %v4838_v38 = vpop.f32.mrf.mxu3  ;;  %13870 = vst [vmem:[#allocation168_spill] sm:$0xff] %v11156_v28  ;;  %v11170_v26 = vsub.f32 %v5199_v4, %v11156_v28  ;;  %v5060_v4 = vld [vmem:[%s8426_s28 + $0x202] sm:$0xff] }
 0x680   : > { %v4564_v27 = vpop.f32.mrf.mxu2  ;;  %v11152_v6 = vpop.f32.mrf.mxu1 }
 0x681   : > { %13869 = vst [vmem:[#allocation31_spill] sm:$0xff] %v11152_v6  ;;  %v4565_v51 = vadd.f32 %v4564_v27, %v10219_v22  ;;  %v5590_v22 = vsub.f32 %v11149_v32, %v13142_v48  ;;  %v13878_v48 = vld [vmem:[#allocation33_spill] sm:$0xff] }
 0x682   : > { %v11158_v57 = vpop.f32.mrf.mxu0 }
 0x683   : > { %13871 = vst [vmem:[#allocation169_spill] sm:$0xff] %v11158_v57  ;;  %v11160_v15 = vadd.f32 %v4838_v38, %v4565_v51  ;;  %4905 = vmatmul.f32.gmra.mxu3 %v13873_v59  ;;  %5974 = vmatmul.f32.gmra.mxu1 %v11114_v10  ;;  %v5202_v51 = vsel %vm431_vm1, %v5059_v16, 0  ;;  %v5591_v6 = vand.u32 4294901760, %v5590_v22 }
 0x684   : > { %v11177_v57 = vand.u32 4294901760, %v5202_v51 }
 0x685   : > { %13872 = vst [vmem:[#allocation170_spill] sm:$0xff] %v11160_v15  ;;  %4631 = vmatmul.f32.gmra.mxu2 %v13873_v59  ;;  %5584 = vmatmul.f32.gmra.mxu0 %v5583_v23  ;;  %v13145_v59 = vand.u32 4294901760, %v11170_v26 }
 0x686   : > { %v4842_v54 = vpop.f32.mrf.mxu3  ;;  %13875 = vst [vmem:[#allocation171_spill] sm:$0xff] %v11177_v57  ;;  %v11191_v16 = vsub.f32 %v5202_v51, %v11177_v57  ;;  %v5061_v51 = vld [vmem:[%s8426_s28 + $0x212] sm:$0xff] }
 0x688   : > { %v4568_v38 = vpop.f32.mrf.mxu2  ;;  %v11173_v27 = vpop.f32.mrf.mxu1 }
 0x689   : > { %13874 = vst [vmem:[#allocation30_spill] sm:$0xff] %v11173_v27  ;;  %v4569_v15 = vadd.f32 %v4568_v38, %v10228_v0  ;;  %v5598_v0 = vsub.f32 %v11170_v26, %v13145_v59  ;;  %v13883_v59 = vld [vmem:[#allocation32_spill] sm:$0xff] }
 0x68a   : > { %v11179_v23 = vpop.f32.mrf.mxu0 }
 0x68b   : > { %13876 = vst [vmem:[#allocation172_spill] sm:$0xff] %v11179_v23  ;;  %v11181_v10 = vadd.f32 %v4842_v54, %v4569_v15  ;;  %4909 = vmatmul.f32.gmra.mxu3 %v13878_v48  ;;  %5978 = vmatmul.f32.gmra.mxu1 %v11135_v3  ;;  %v5205_v15 = vsel %vm431_vm1, %v5060_v4, 0  ;;  %v5599_v27 = vand.u32 4294901760, %v5598_v0 }
 0x68c   : > { %v11198_v23 = vand.u32 4294901760, %v5205_v15 }
 0x68d   : > { %13877 = vst [vmem:[#allocation173_spill] sm:$0xff] %v11181_v10  ;;  %4635 = vmatmul.f32.gmra.mxu2 %v13878_v48  ;;  %5592 = vmatmul.f32.gmra.mxu0 %v5591_v6  ;;  %v13148_v48 = vand.u32 4294901760, %v11191_v16 }
 0x68e   : > { %v4846_v22 = vpop.f32.mrf.mxu3  ;;  %13880 = vst [vmem:[#allocation174_spill] sm:$0xff] %v11198_v23  ;;  %v11212_v4 = vsub.f32 %v5205_v15, %v11198_v23  ;;  %v5062_v15 = vld [vmem:[%s8426_s28 + $0x21a] sm:$0xff] }
 0x690   : > { %v4572_v54 = vpop.f32.mrf.mxu2  ;;  %v11194_v38 = vpop.f32.mrf.mxu1 }
 0x691   : > { %13879 = vst [vmem:[#allocation33_spill] sm:$0xff] %v11194_v38  ;;  %v4573_v10 = vadd.f32 %v4572_v54, %v10237_v39  ;;  %v5606_v39 = vsub.f32 %v11191_v16, %v13148_v48  ;;  %v13888_v48 = vld [vmem:[#allocation35_spill] sm:$0xff] }
 0x692   : > { %v11200_v6 = vpop.f32.mrf.mxu0 }
 0x693   : > { %13881 = vst [vmem:[#allocation175_spill] sm:$0xff] %v11200_v6  ;;  %v11202_v3 = vadd.f32 %v4846_v22, %v4573_v10  ;;  %4913 = vmatmul.f32.gmra.mxu3 %v13883_v59  ;;  %5982 = vmatmul.f32.gmra.mxu1 %v11156_v28  ;;  %v5208_v10 = vsel %vm431_vm1, %v5061_v51, 0  ;;  %v5607_v38 = vand.u32 4294901760, %v5606_v39 }
 0x694   : > { %v11219_v6 = vand.u32 4294901760, %v5208_v10 }
 0x695   : > { %13882 = vst [vmem:[#allocation176_spill] sm:$0xff] %v11202_v3  ;;  %4639 = vmatmul.f32.gmra.mxu2 %v13883_v59  ;;  %5600 = vmatmul.f32.gmra.mxu0 %v5599_v27  ;;  %v13151_v59 = vand.u32 4294901760, %v11212_v4 }
 0x696   : > { %v4850_v0 = vpop.f32.mrf.mxu3  ;;  %13885 = vst [vmem:[#allocation177_spill] sm:$0xff] %v11219_v6  ;;  %v11233_v51 = vsub.f32 %v5208_v10, %v11219_v6  ;;  %v5063_v10 = vld [vmem:[%s8426_s28 + $0x22a] sm:$0xff] }
 0x698   : > { %v4576_v22 = vpop.f32.mrf.mxu2  ;;  %v11215_v54 = vpop.f32.mrf.mxu1 }
 0x699   : > { %13884 = vst [vmem:[#allocation32_spill] sm:$0xff] %v11215_v54  ;;  %v4577_v3 = vadd.f32 %v4576_v22, %v10246_v42  ;;  %v5614_v42 = vsub.f32 %v11212_v4, %v13151_v59  ;;  %v13893_v59 = vld [vmem:[#allocation34_spill] sm:$0xff] }
 0x69a   : > { %v11221_v27 = vpop.f32.mrf.mxu0 }
 0x69b   : > { %13886 = vst [vmem:[#allocation178_spill] sm:$0xff] %v11221_v27  ;;  %v11223_v28 = vadd.f32 %v4850_v0, %v4577_v3  ;;  %4917 = vmatmul.f32.gmra.mxu3 %v13888_v48  ;;  %5986 = vmatmul.f32.gmra.mxu1 %v11177_v57  ;;  %v5211_v3 = vsel %vm431_vm1, %v5062_v15, 0  ;;  %v5615_v54 = vand.u32 4294901760, %v5614_v42 }
 0x69c   : > { %v11240_v27 = vand.u32 4294901760, %v5211_v3 }
 0x69d   : > { %13887 = vst [vmem:[#allocation179_spill] sm:$0xff] %v11223_v28  ;;  %4643 = vmatmul.f32.gmra.mxu2 %v13888_v48  ;;  %5608 = vmatmul.f32.gmra.mxu0 %v5607_v38  ;;  %v13154_v48 = vand.u32 4294901760, %v11233_v51 }
 0x69e   : > { %v4854_v39 = vpop.f32.mrf.mxu3  ;;  %13890 = vst [vmem:[#allocation180_spill] sm:$0xff] %v11240_v27  ;;  %v11254_v15 = vsub.f32 %v5211_v3, %v11240_v27  ;;  %v5064_v3 = vld [vmem:[%s8426_s28 + $0x232] sm:$0xff] }
 0x6a0   : > { %v4580_v0 = vpop.f32.mrf.mxu2  ;;  %v11236_v22 = vpop.f32.mrf.mxu1 }
 0x6a1   : > { %13889 = vst [vmem:[#allocation35_spill] sm:$0xff] %v11236_v22  ;;  %v4581_v28 = vadd.f32 %v4580_v0, %v10255_v12  ;;  %v5622_v12 = vsub.f32 %v11233_v51, %v13154_v48  ;;  %v13898_v48 = vld [vmem:[#allocation37_spill] sm:$0xff] }
 0x6a2   : > { %v11242_v38 = vpop.f32.mrf.mxu0 }
 0x6a3   : > { %13891 = vst [vmem:[#allocation181_spill] sm:$0xff] %v11242_v38  ;;  %v11244_v57 = vadd.f32 %v4854_v39, %v4581_v28  ;;  %4921 = vmatmul.f32.gmra.mxu3 %v13893_v59  ;;  %5990 = vmatmul.f32.gmra.mxu1 %v11198_v23  ;;  %v5214_v28 = vsel %vm431_vm1, %v5063_v10, 0  ;;  %v5623_v22 = vand.u32 4294901760, %v5622_v12 }
 0x6a4   : > { %v11261_v38 = vand.u32 4294901760, %v5214_v28 }
 0x6a5   : > { %13892 = vst [vmem:[#allocation182_spill] sm:$0xff] %v11244_v57  ;;  %4647 = vmatmul.f32.gmra.mxu2 %v13893_v59  ;;  %5616 = vmatmul.f32.gmra.mxu0 %v5615_v54  ;;  %v13157_v59 = vand.u32 4294901760, %v11254_v15 }
 0x6a6   : > { %v4858_v42 = vpop.f32.mrf.mxu3  ;;  %13895 = vst [vmem:[#allocation183_spill] sm:$0xff] %v11261_v38  ;;  %v11275_v10 = vsub.f32 %v5214_v28, %v11261_v38  ;;  %v5065_v28 = vld [vmem:[%s8426_s28 + $0x242] sm:$0xff] }
 0x6a8   : > { %v4584_v39 = vpop.f32.mrf.mxu2  ;;  %v11257_v0 = vpop.f32.mrf.mxu1 }
 0x6a9   : > { %13894 = vst [vmem:[#allocation34_spill] sm:$0xff] %v11257_v0  ;;  %v4585_v57 = vadd.f32 %v4584_v39, %v10264_v36  ;;  %v5630_v36 = vsub.f32 %v11254_v15, %v13157_v59  ;;  %v13903_v59 = vld [vmem:[#allocation36_spill] sm:$0xff] }
 0x6aa   : > { %v11263_v54 = vpop.f32.mrf.mxu0 }
 0x6ab   : > { %13896 = vst [vmem:[#allocation184_spill] sm:$0xff] %v11263_v54  ;;  %v11265_v23 = vadd.f32 %v4858_v42, %v4585_v57  ;;  %4925 = vmatmul.f32.gmra.mxu3 %v13898_v48  ;;  %5994 = vmatmul.f32.gmra.mxu1 %v11219_v6  ;;  %v5217_v57 = vsel %vm431_vm1, %v5064_v3, 0  ;;  %v5631_v0 = vand.u32 4294901760, %v5630_v36 }
 0x6ac   : > { %v11282_v54 = vand.u32 4294901760, %v5217_v57 }
 0x6ad   : > { %13897 = vst [vmem:[#allocation185_spill] sm:$0xff] %v11265_v23  ;;  %4651 = vmatmul.f32.gmra.mxu2 %v13898_v48  ;;  %5624 = vmatmul.f32.gmra.mxu0 %v5623_v22  ;;  %v13160_v48 = vand.u32 4294901760, %v11275_v10 }
 0x6ae   : > { %v4862_v12 = vpop.f32.mrf.mxu3  ;;  %13900 = vst [vmem:[#allocation186_spill] sm:$0xff] %v11282_v54  ;;  %v11296_v3 = vsub.f32 %v5217_v57, %v11282_v54  ;;  %v5066_v57 = vld [vmem:[%s8426_s28 + $0x24a] sm:$0xff] }
 0x6b0   : > { %v4588_v42 = vpop.f32.mrf.mxu2  ;;  %v11278_v39 = vpop.f32.mrf.mxu1 }
 0x6b1   : > { %13899 = vst [vmem:[#allocation37_spill] sm:$0xff] %v11278_v39  ;;  %v4589_v23 = vadd.f32 %v4588_v42, %v10273_v52  ;;  %v5638_v52 = vsub.f32 %v11275_v10, %v13160_v48  ;;  %v13908_v48 = vld [vmem:[#allocation39_spill] sm:$0xff] }
 0x6b2   : > { %v11284_v22 = vpop.f32.mrf.mxu0 }
 0x6b3   : > { %13901 = vst [vmem:[#allocation187_spill] sm:$0xff] %v11284_v22  ;;  %v11286_v6 = vadd.f32 %v4862_v12, %v4589_v23  ;;  %4929 = vmatmul.f32.gmra.mxu3 %v13903_v59  ;;  %5998 = vmatmul.f32.gmra.mxu1 %v11240_v27  ;;  %v5220_v23 = vsel %vm431_vm1, %v5065_v28, 0  ;;  %v5639_v39 = vand.u32 4294901760, %v5638_v52 }
 0x6b4   : > { %v11303_v22 = vand.u32 4294901760, %v5220_v23 }
 0x6b5   : > { %13902 = vst [vmem:[#allocation188_spill] sm:$0xff] %v11286_v6  ;;  %4655 = vmatmul.f32.gmra.mxu2 %v13903_v59  ;;  %5632 = vmatmul.f32.gmra.mxu0 %v5631_v0  ;;  %v13163_v59 = vand.u32 4294901760, %v11296_v3 }
 0x6b6   : > { %v4866_v36 = vpop.f32.mrf.mxu3  ;;  %13905 = vst [vmem:[#allocation189_spill] sm:$0xff] %v11303_v22  ;;  %v11317_v28 = vsub.f32 %v5220_v23, %v11303_v22  ;;  %v5067_v23 = vld [vmem:[%s8426_s28 + $0x25a] sm:$0xff] }
 0x6b8   : > { %v4592_v12 = vpop.f32.mrf.mxu2  ;;  %v11299_v42 = vpop.f32.mrf.mxu1 }
 0x6b9   : > { %13904 = vst [vmem:[#allocation36_spill] sm:$0xff] %v11299_v42  ;;  %v4593_v6 = vadd.f32 %v4592_v12, %v10282_v2  ;;  %v5646_v2 = vsub.f32 %v11296_v3, %v13163_v59  ;;  %v13913_v59 = vld [vmem:[#allocation38_spill] sm:$0xff] }
 0x6ba   : > { %v11305_v0 = vpop.f32.mrf.mxu0 }
 0x6bb   : > { %13906 = vst [vmem:[#allocation190_spill] sm:$0xff] %v11305_v0  ;;  %v11307_v27 = vadd.f32 %v4866_v36, %v4593_v6  ;;  %4933 = vmatmul.f32.gmra.mxu3 %v13908_v48  ;;  %6002 = vmatmul.f32.gmra.mxu1 %v11261_v38  ;;  %v5223_v6 = vsel %vm431_vm1, %v5066_v57, 0  ;;  %v5647_v42 = vand.u32 4294901760, %v5646_v2 }
 0x6bc   : > { %v11324_v0 = vand.u32 4294901760, %v5223_v6 }
 0x6bd   : > { %13907 = vst [vmem:[#allocation191_spill] sm:$0xff] %v11307_v27  ;;  %4659 = vmatmul.f32.gmra.mxu2 %v13908_v48  ;;  %5640 = vmatmul.f32.gmra.mxu0 %v5639_v39  ;;  %v13166_v48 = vand.u32 4294901760, %v11317_v28 }
 0x6be   : > { %v4870_v52 = vpop.f32.mrf.mxu3  ;;  %13910 = vst [vmem:[#allocation192_spill] sm:$0xff] %v11324_v0  ;;  %v11338_v57 = vsub.f32 %v5223_v6, %v11324_v0  ;;  %v5068_v6 = vld [vmem:[%s8426_s28 + $0x262] sm:$0xff] }
 0x6c0   : > { %v4596_v36 = vpop.f32.mrf.mxu2  ;;  %v11320_v12 = vpop.f32.mrf.mxu1 }
 0x6c1   : > { %13909 = vst [vmem:[#allocation39_spill] sm:$0xff] %v11320_v12  ;;  %v4597_v27 = vadd.f32 %v4596_v36, %v10291_v19  ;;  %v5654_v19 = vsub.f32 %v11317_v28, %v13166_v48  ;;  %v13918_v48 = vld [vmem:[#allocation41_spill] sm:$0xff] }
 0x6c2   : > { %v11326_v39 = vpop.f32.mrf.mxu0 }
 0x6c3   : > { %13911 = vst [vmem:[#allocation193_spill] sm:$0xff] %v11326_v39  ;;  %v11328_v38 = vadd.f32 %v4870_v52, %v4597_v27  ;;  %4937 = vmatmul.f32.gmra.mxu3 %v13913_v59  ;;  %6006 = vmatmul.f32.gmra.mxu1 %v11282_v54  ;;  %v5226_v27 = vsel %vm431_vm1, %v5067_v23, 0  ;;  %v5655_v12 = vand.u32 4294901760, %v5654_v19 }
 0x6c4   : > { %v11345_v39 = vand.u32 4294901760, %v5226_v27 }
 0x6c5   : > { %13912 = vst [vmem:[#allocation194_spill] sm:$0xff] %v11328_v38  ;;  %4663 = vmatmul.f32.gmra.mxu2 %v13913_v59  ;;  %5648 = vmatmul.f32.gmra.mxu0 %v5647_v42  ;;  %v13169_v59 = vand.u32 4294901760, %v11338_v57 }
 0x6c6   : > { %v4874_v2 = vpop.f32.mrf.mxu3  ;;  %13915 = vst [vmem:[#allocation195_spill] sm:$0xff] %v11345_v39  ;;  %v11359_v23 = vsub.f32 %v5226_v27, %v11345_v39  ;;  %v5069_v27 = vld [vmem:[%s8426_s28 + $0x272] sm:$0xff] }
 0x6c8   : > { %v4600_v52 = vpop.f32.mrf.mxu2  ;;  %v11341_v36 = vpop.f32.mrf.mxu1 }
 0x6c9   : > { %13914 = vst [vmem:[#allocation38_spill] sm:$0xff] %v11341_v36  ;;  %v4601_v38 = vadd.f32 %v4600_v52, %v10300_v46  ;;  %v5662_v46 = vsub.f32 %v11338_v57, %v13169_v59  ;;  %v13923_v59 = vld [vmem:[#allocation40_spill] sm:$0xff] }
 0x6ca   : > { %v11347_v42 = vpop.f32.mrf.mxu0 }
 0x6cb   : > { %13916 = vst [vmem:[#allocation196_spill] sm:$0xff] %v11347_v42  ;;  %v11349_v54 = vadd.f32 %v4874_v2, %v4601_v38  ;;  %4941 = vmatmul.f32.gmra.mxu3 %v13918_v48  ;;  %6010 = vmatmul.f32.gmra.mxu1 %v11303_v22  ;;  %v5229_v38 = vsel %vm431_vm1, %v5068_v6, 0  ;;  %v5663_v36 = vand.u32 4294901760, %v5662_v46 }
 0x6cc   : > { %v11366_v42 = vand.u32 4294901760, %v5229_v38 }
 0x6cd   : > { %13917 = vst [vmem:[#allocation197_spill] sm:$0xff] %v11349_v54  ;;  %4667 = vmatmul.f32.gmra.mxu2 %v13918_v48  ;;  %5656 = vmatmul.f32.gmra.mxu0 %v5655_v12  ;;  %v13172_v48 = vand.u32 4294901760, %v11359_v23 }
 0x6ce   : > { %v4878_v19 = vpop.f32.mrf.mxu3  ;;  %13920 = vst [vmem:[#allocation198_spill] sm:$0xff] %v11366_v42  ;;  %v11380_v6 = vsub.f32 %v5229_v38, %v11366_v42  ;;  %v5070_v38 = vld [vmem:[%s8426_s28 + $0x27a] sm:$0xff] }
 0x6d0   : > { %v4604_v2 = vpop.f32.mrf.mxu2  ;;  %v11362_v52 = vpop.f32.mrf.mxu1 }
 0x6d1   : > { %13919 = vst [vmem:[#allocation41_spill] sm:$0xff] %v11362_v52  ;;  %v4605_v54 = vadd.f32 %v4604_v2, %v10309_v7  ;;  %v5670_v7 = vsub.f32 %v11359_v23, %v13172_v48  ;;  %v13928_v48 = vld [vmem:[#allocation43_spill] sm:$0xff] }
 0x6d2   : > { %v11368_v12 = vpop.f32.mrf.mxu0 }
 0x6d3   : > { %13921 = vst [vmem:[#allocation199_spill] sm:$0xff] %v11368_v12  ;;  %v11370_v22 = vadd.f32 %v4878_v19, %v4605_v54  ;;  %4945 = vmatmul.f32.gmra.mxu3 %v13923_v59  ;;  %6014 = vmatmul.f32.gmra.mxu1 %v11324_v0  ;;  %v5232_v54 = vsel %vm431_vm1, %v5069_v27, 0  ;;  %v5671_v52 = vand.u32 4294901760, %v5670_v7 }
 0x6d4   : > { %v11387_v12 = vand.u32 4294901760, %v5232_v54 }
 0x6d5   : > { %13922 = vst [vmem:[#allocation200_spill] sm:$0xff] %v11370_v22  ;;  %4671 = vmatmul.f32.gmra.mxu2 %v13923_v59  ;;  %5664 = vmatmul.f32.gmra.mxu0 %v5663_v36  ;;  %v13175_v59 = vand.u32 4294901760, %v11380_v6 }
 0x6d6   : > { %v4882_v46 = vpop.f32.mrf.mxu3  ;;  %13925 = vst [vmem:[#allocation201_spill] sm:$0xff] %v11387_v12  ;;  %v11401_v27 = vsub.f32 %v5232_v54, %v11387_v12  ;;  %v5071_v54 = vld [vmem:[%s8426_s28 + $0x28a] sm:$0xff] }
 0x6d8   : > { %v4608_v19 = vpop.f32.mrf.mxu2  ;;  %v11383_v2 = vpop.f32.mrf.mxu1 }
 0x6d9   : > { %13924 = vst [vmem:[#allocation40_spill] sm:$0xff] %v11383_v2  ;;  %v4609_v22 = vadd.f32 %v4608_v19, %v10318_v50  ;;  %v5678_v50 = vsub.f32 %v11380_v6, %v13175_v59  ;;  %v13933_v59 = vld [vmem:[#allocation42_spill] sm:$0xff] }
 0x6da   : > { %v11389_v36 = vpop.f32.mrf.mxu0 }
 0x6db   : > { %13926 = vst [vmem:[#allocation202_spill] sm:$0xff] %v11389_v36  ;;  %v11391_v0 = vadd.f32 %v4882_v46, %v4609_v22  ;;  %4949 = vmatmul.f32.gmra.mxu3 %v13928_v48  ;;  %6018 = vmatmul.f32.gmra.mxu1 %v11345_v39  ;;  %v5235_v22 = vsel %vm431_vm1, %v5070_v38, 0  ;;  %v5679_v2 = vand.u32 4294901760, %v5678_v50 }
 0x6dc   : > { %v11408_v36 = vand.u32 4294901760, %v5235_v22 }
 0x6dd   : > { %13927 = vst [vmem:[#allocation203_spill] sm:$0xff] %v11391_v0  ;;  %4675 = vmatmul.f32.gmra.mxu2 %v13928_v48  ;;  %5672 = vmatmul.f32.gmra.mxu0 %v5671_v52  ;;  %v13178_v48 = vand.u32 4294901760, %v11401_v27 }
 0x6de   : > { %v4886_v7 = vpop.f32.mrf.mxu3  ;;  %13930 = vst [vmem:[#allocation204_spill] sm:$0xff] %v11408_v36  ;;  %v11422_v38 = vsub.f32 %v5235_v22, %v11408_v36  ;;  %v5072_v22 = vld [vmem:[%s8426_s28 + $0x292] sm:$0xff] }
 0x6e0   : > { %v4612_v46 = vpop.f32.mrf.mxu2  ;;  %v11404_v19 = vpop.f32.mrf.mxu1 }
 0x6e1   : > { %13929 = vst [vmem:[#allocation43_spill] sm:$0xff] %v11404_v19  ;;  %v4613_v0 = vadd.f32 %v4612_v46, %v10327_v43  ;;  %v5686_v43 = vsub.f32 %v11401_v27, %v13178_v48  ;;  %v13938_v48 = vld [vmem:[#allocation52_spill] sm:$0xff] }
 0x6e2   : > { %v11410_v52 = vpop.f32.mrf.mxu0 }
 0x6e3   : > { %13931 = vst [vmem:[#allocation205_spill] sm:$0xff] %v11410_v52  ;;  %v11412_v39 = vadd.f32 %v4886_v7, %v4613_v0  ;;  %4953 = vmatmul.f32.gmra.mxu3 %v13933_v59  ;;  %6022 = vmatmul.f32.gmra.mxu1 %v11366_v42  ;;  %v5238_v0 = vsel %vm431_vm1, %v5071_v54, 0  ;;  %v5687_v19 = vand.u32 4294901760, %v5686_v43 }
 0x6e4   : > { %v11429_v52 = vand.u32 4294901760, %v5238_v0 }
 0x6e5   : > { %13932 = vst [vmem:[#allocation206_spill] sm:$0xff] %v11412_v39  ;;  %4679 = vmatmul.f32.gmra.mxu2 %v13933_v59  ;;  %5680 = vmatmul.f32.gmra.mxu0 %v5679_v2  ;;  %v13181_v59 = vand.u32 4294901760, %v11422_v38 }
 0x6e6   : > { %v4890_v50 = vpop.f32.mrf.mxu3  ;;  %13935 = vst [vmem:[#allocation207_spill] sm:$0xff] %v11429_v52  ;;  %v11443_v54 = vsub.f32 %v5238_v0, %v11429_v52  ;;  %v5073_v0 = vld [vmem:[%s8426_s28 + $0x2a2] sm:$0xff] }
 0x6e8   : > { %v4616_v7 = vpop.f32.mrf.mxu2  ;;  %v11425_v46 = vpop.f32.mrf.mxu1 }
 0x6e9   : > { %13934 = vst [vmem:[#allocation42_spill] sm:$0xff] %v11425_v46  ;;  %v4617_v39 = vadd.f32 %v4616_v7, %v10336_v34  ;;  %v5694_v34 = vsub.f32 %v11422_v38, %v13181_v59  ;;  %v13943_v59 = vld [vmem:[#allocation45_spill] sm:$0xff] }
 0x6ea   : > { %v11431_v2 = vpop.f32.mrf.mxu0 }
 0x6eb   : > { %13936 = vst [vmem:[#allocation208_spill] sm:$0xff] %v11431_v2  ;;  %v11433_v42 = vadd.f32 %v4890_v50, %v4617_v39  ;;  %4957 = vmatmul.f32.gmra.mxu3 %v13938_v48  ;;  %6026 = vmatmul.f32.gmra.mxu1 %v11387_v12  ;;  %v5241_v39 = vsel %vm431_vm1, %v5072_v22, 0  ;;  %v5695_v46 = vand.u32 4294901760, %v5694_v34 }
 0x6ec   : > { %v11450_v2 = vand.u32 4294901760, %v5241_v39 }
 0x6ed   : > { %13937 = vst [vmem:[#allocation209_spill] sm:$0xff] %v11433_v42  ;;  %4683 = vmatmul.f32.gmra.mxu2 %v13938_v48  ;;  %5688 = vmatmul.f32.gmra.mxu0 %v5687_v19  ;;  %v13184_v48 = vand.u32 4294901760, %v11443_v54 }
 0x6ee   : > { %v4894_v43 = vpop.f32.mrf.mxu3  ;;  %13940 = vst [vmem:[#allocation210_spill] sm:$0xff] %v11450_v2  ;;  %v11464_v22 = vsub.f32 %v5241_v39, %v11450_v2  ;;  %v5074_v39 = vld [vmem:[%s8426_s28 + $0x2aa] sm:$0xff] }
 0x6f0   : > { %v4620_v50 = vpop.f32.mrf.mxu2  ;;  %v11446_v7 = vpop.f32.mrf.mxu1 }
 0x6f1   : > { %13939 = vst [vmem:[#allocation52_spill] sm:$0xff] %v11446_v7  ;;  %v4621_v42 = vadd.f32 %v4620_v50, %v10345_v11  ;;  %v5702_v11 = vsub.f32 %v11443_v54, %v13184_v48  ;;  %v13948_v48 = vld [vmem:[#allocation44_spill] sm:$0xff] }
 0x6f2   : > { %v11452_v19 = vpop.f32.mrf.mxu0 }
 0x6f3   : > { %13941 = vst [vmem:[#allocation211_spill] sm:$0xff] %v11452_v19  ;;  %v11454_v12 = vadd.f32 %v4894_v43, %v4621_v42  ;;  %4961 = vmatmul.f32.gmra.mxu3 %v13943_v59  ;;  %6030 = vmatmul.f32.gmra.mxu1 %v11408_v36  ;;  %v5244_v42 = vsel %vm431_vm1, %v5073_v0, 0  ;;  %v5703_v7 = vand.u32 4294901760, %v5702_v11 }
 0x6f4   : > { %v11471_v19 = vand.u32 4294901760, %v5244_v42 }
 0x6f5   : > { %13942 = vst [vmem:[#allocation212_spill] sm:$0xff] %v11454_v12  ;;  %4687 = vmatmul.f32.gmra.mxu2 %v13943_v59  ;;  %5696 = vmatmul.f32.gmra.mxu0 %v5695_v46  ;;  %v13187_v59 = vand.u32 4294901760, %v11464_v22 }
 0x6f6   : > { %v4898_v34 = vpop.f32.mrf.mxu3  ;;  %13945 = vst [vmem:[#allocation213_spill] sm:$0xff] %v11471_v19  ;;  %v11485_v0 = vsub.f32 %v5244_v42, %v11471_v19  ;;  %v5075_v42 = vld [vmem:[%s8426_s28 + $0x2ba] sm:$0xff] }
 0x6f8   : > { %v4624_v43 = vpop.f32.mrf.mxu2  ;;  %v11467_v50 = vpop.f32.mrf.mxu1 }
 0x6f9   : > { %13944 = vst [vmem:[#allocation45_spill] sm:$0xff] %v11467_v50  ;;  %v4625_v12 = vadd.f32 %v4624_v43, %v10354_v47  ;;  %v5710_v47 = vsub.f32 %v11464_v22, %v13187_v59  ;;  %v13953_v59 = vld [vmem:[#allocation58_spill] sm:$0xff] }
 0x6fa   : > { %v11473_v46 = vpop.f32.mrf.mxu0 }
 0x6fb   : > { %13946 = vst [vmem:[#allocation214_spill] sm:$0xff] %v11473_v46  ;;  %v11475_v36 = vadd.f32 %v4898_v34, %v4625_v12  ;;  %4965 = vmatmul.f32.gmra.mxu3 %v13948_v48  ;;  %6034 = vmatmul.f32.gmra.mxu1 %v11429_v52  ;;  %v5247_v12 = vsel %vm431_vm1, %v5074_v39, 0  ;;  %v5711_v50 = vand.u32 4294901760, %v5710_v47 }
 0x6fc   : > { %v11492_v46 = vand.u32 4294901760, %v5247_v12 }
 0x6fd   : > { %13947 = vst [vmem:[#allocation215_spill] sm:$0xff] %v11475_v36  ;;  %4691 = vmatmul.f32.gmra.mxu2 %v13948_v48  ;;  %5704 = vmatmul.f32.gmra.mxu0 %v5703_v7  ;;  %v13190_v48 = vand.u32 4294901760, %v11485_v0 }
 0x6fe   : > { %v4902_v11 = vpop.f32.mrf.mxu3  ;;  %13950 = vst [vmem:[#allocation216_spill] sm:$0xff] %v11492_v46  ;;  %v11506_v39 = vsub.f32 %v5247_v12, %v11492_v46  ;;  %v5076_v12 = vld [vmem:[%s8426_s28 + $0x2c2] sm:$0xff] }
 0x700   : > { %v4628_v34 = vpop.f32.mrf.mxu2  ;;  %v11488_v43 = vpop.f32.mrf.mxu1 }
 0x701   : > { %13949 = vst [vmem:[#allocation44_spill] sm:$0xff] %v11488_v43  ;;  %v4629_v36 = vadd.f32 %v4628_v34, %v10363_v35  ;;  %v5718_v35 = vsub.f32 %v11485_v0, %v13190_v48  ;;  %v13958_v48 = vld [vmem:[#allocation48_spill] sm:$0xff] }
 0x702   : > { %v11494_v7 = vpop.f32.mrf.mxu0 }
 0x703   : > { %13951 = vst [vmem:[#allocation217_spill] sm:$0xff] %v11494_v7  ;;  %v11496_v52 = vadd.f32 %v4902_v11, %v4629_v36  ;;  %4969 = vmatmul.f32.gmra.mxu3 %v13953_v59  ;;  %6038 = vmatmul.f32.gmra.mxu1 %v11450_v2  ;;  %v5250_v36 = vsel %vm431_vm1, %v5075_v42, 0  ;;  %v5719_v43 = vand.u32 4294901760, %v5718_v35 }
 0x704   : > { %v11513_v7 = vand.u32 4294901760, %v5250_v36 }
 0x705   : > { %13952 = vst [vmem:[#allocation218_spill] sm:$0xff] %v11496_v52  ;;  %4695 = vmatmul.f32.gmra.mxu2 %v13953_v59  ;;  %5712 = vmatmul.f32.gmra.mxu0 %v5711_v50  ;;  %v13193_v59 = vand.u32 4294901760, %v11506_v39 }
 0x706   : > { %v4906_v47 = vpop.f32.mrf.mxu3  ;;  %13955 = vst [vmem:[#allocation219_spill] sm:$0xff] %v11513_v7  ;;  %v11527_v42 = vsub.f32 %v5250_v36, %v11513_v7  ;;  %v5077_v36 = vld [vmem:[%s8426_s28 + $0x2d2] sm:$0xff] }
 0x708   : > { %v4632_v11 = vpop.f32.mrf.mxu2  ;;  %v11509_v34 = vpop.f32.mrf.mxu1 }
 0x709   : > { %13954 = vst [vmem:[#allocation58_spill] sm:$0xff] %v11509_v34  ;;  %v4633_v52 = vadd.f32 %v4632_v11, %v10372_v45  ;;  %v5726_v45 = vsub.f32 %v11506_v39, %v13193_v59  ;;  %v13963_v59 = vld [vmem:[#allocation46_spill] sm:$0xff] }
 0x70a   : > { %v11515_v50 = vpop.f32.mrf.mxu0 }
 0x70b   : > { %13956 = vst [vmem:[#allocation220_spill] sm:$0xff] %v11515_v50  ;;  %v11517_v2 = vadd.f32 %v4906_v47, %v4633_v52  ;;  %4973 = vmatmul.f32.gmra.mxu3 %v13958_v48  ;;  %6042 = vmatmul.f32.gmra.mxu1 %v11471_v19  ;;  %v5253_v52 = vsel %vm431_vm1, %v5076_v12, 0  ;;  %v5727_v34 = vand.u32 4294901760, %v5726_v45 }
 0x70c   : > { %v11534_v50 = vand.u32 4294901760, %v5253_v52 }
 0x70d   : > { %13957 = vst [vmem:[#allocation221_spill] sm:$0xff] %v11517_v2  ;;  %4699 = vmatmul.f32.gmra.mxu2 %v13958_v48  ;;  %5720 = vmatmul.f32.gmra.mxu0 %v5719_v43  ;;  %v13196_v48 = vand.u32 4294901760, %v11527_v42 }
 0x70e   : > { %v4910_v35 = vpop.f32.mrf.mxu3  ;;  %13960 = vst [vmem:[#allocation222_spill] sm:$0xff] %v11534_v50  ;;  %v11548_v12 = vsub.f32 %v5253_v52, %v11534_v50  ;;  %v5078_v52 = vld [vmem:[%s8426_s28 + $0x2da] sm:$0xff] }
 0x710   : > { %v4636_v47 = vpop.f32.mrf.mxu2  ;;  %v11530_v11 = vpop.f32.mrf.mxu1 }
 0x711   : > { %13959 = vst [vmem:[#allocation48_spill] sm:$0xff] %v11530_v11  ;;  %v4637_v2 = vadd.f32 %v4636_v47, %v10381_v58  ;;  %v5734_v58 = vsub.f32 %v11527_v42, %v13196_v48  ;;  %v13968_v48 = vld [vmem:[#allocation65_spill] sm:$0xff] }
 0x712   : > { %v11536_v43 = vpop.f32.mrf.mxu0 }
 0x713   : > { %13961 = vst [vmem:[#allocation223_spill] sm:$0xff] %v11536_v43  ;;  %v11538_v19 = vadd.f32 %v4910_v35, %v4637_v2  ;;  %4977 = vmatmul.f32.gmra.mxu3 %v13963_v59  ;;  %6046 = vmatmul.f32.gmra.mxu1 %v11492_v46  ;;  %v5256_v2 = vsel %vm431_vm1, %v5077_v36, 0  ;;  %v5735_v11 = vand.u32 4294901760, %v5734_v58 }
 0x714   : > { %v11555_v43 = vand.u32 4294901760, %v5256_v2 }
 0x715   : > { %13962 = vst [vmem:[#allocation224_spill] sm:$0xff] %v11538_v19  ;;  %4703 = vmatmul.f32.gmra.mxu2 %v13963_v59  ;;  %5728 = vmatmul.f32.gmra.mxu0 %v5727_v34  ;;  %v13199_v59 = vand.u32 4294901760, %v11548_v12 }
 0x716   : > { %v4914_v45 = vpop.f32.mrf.mxu3  ;;  %13965 = vst [vmem:[#allocation225_spill] sm:$0xff] %v11555_v43  ;;  %v11569_v36 = vsub.f32 %v5256_v2, %v11555_v43  ;;  %v5079_v2 = vld [vmem:[%s8426_s28 + $0x2ea] sm:$0xff] }
 0x718   : > { %v4640_v35 = vpop.f32.mrf.mxu2  ;;  %v11551_v47 = vpop.f32.mrf.mxu1 }
 0x719   : > { %13964 = vst [vmem:[#allocation46_spill] sm:$0xff] %v11551_v47  ;;  %v4641_v19 = vadd.f32 %v4640_v35, %v10390_v9  ;;  %v5742_v9 = vsub.f32 %v11548_v12, %v13199_v59  ;;  %v13973_v59 = vld [vmem:[#allocation54_spill] sm:$0xff] }
 0x71a   : > { %v11557_v34 = vpop.f32.mrf.mxu0 }
 0x71b   : > { %13966 = vst [vmem:[#allocation226_spill] sm:$0xff] %v11557_v34  ;;  %v11559_v46 = vadd.f32 %v4914_v45, %v4641_v19  ;;  %4981 = vmatmul.f32.gmra.mxu3 %v13968_v48  ;;  %6050 = vmatmul.f32.gmra.mxu1 %v11513_v7  ;;  %v5259_v19 = vsel %vm431_vm1, %v5078_v52, 0  ;;  %v5743_v47 = vand.u32 4294901760, %v5742_v9 }
 0x71c   : > { %v11576_v34 = vand.u32 4294901760, %v5259_v19 }
 0x71d   : > { %13967 = vst [vmem:[#allocation227_spill] sm:$0xff] %v11559_v46  ;;  %4707 = vmatmul.f32.gmra.mxu2 %v13968_v48  ;;  %5736 = vmatmul.f32.gmra.mxu0 %v5735_v11  ;;  %v13202_v48 = vand.u32 4294901760, %v11569_v36 }
 0x71e   : > { %v4918_v58 = vpop.f32.mrf.mxu3  ;;  %13970 = vst [vmem:[#allocation228_spill] sm:$0xff] %v11576_v34  ;;  %v11590_v52 = vsub.f32 %v5259_v19, %v11576_v34  ;;  %v5080_v19 = vld [vmem:[%s8426_s28 + $0x2f2] sm:$0xff] }
 0x720   : > { %v4644_v45 = vpop.f32.mrf.mxu2  ;;  %v11572_v35 = vpop.f32.mrf.mxu1 }
 0x721   : > { %13969 = vst [vmem:[#allocation65_spill] sm:$0xff] %v11572_v35  ;;  %v4645_v46 = vadd.f32 %v4644_v45, %v10399_v37  ;;  %v5750_v37 = vsub.f32 %v11569_v36, %v13202_v48  ;;  %v13978_v48 = vld [vmem:[#allocation51_spill] sm:$0xff] }
 0x722   : > { %v11578_v11 = vpop.f32.mrf.mxu0 }
 0x723   : > { %13971 = vst [vmem:[#allocation229_spill] sm:$0xff] %v11578_v11  ;;  %v11580_v7 = vadd.f32 %v4918_v58, %v4645_v46  ;;  %4985 = vmatmul.f32.gmra.mxu3 %v13973_v59  ;;  %6054 = vmatmul.f32.gmra.mxu1 %v11534_v50  ;;  %v5262_v46 = vsel %vm431_vm1, %v5079_v2, 0  ;;  %v5751_v35 = vand.u32 4294901760, %v5750_v37 }
 0x724   : > { %v11597_v11 = vand.u32 4294901760, %v5262_v46 }
 0x725   : > { %13972 = vst [vmem:[#allocation230_spill] sm:$0xff] %v11580_v7  ;;  %4711 = vmatmul.f32.gmra.mxu2 %v13973_v59  ;;  %5744 = vmatmul.f32.gmra.mxu0 %v5743_v47  ;;  %v13205_v59 = vand.u32 4294901760, %v11590_v52 }
 0x726   : > { %v4922_v9 = vpop.f32.mrf.mxu3  ;;  %13975 = vst [vmem:[#allocation231_spill] sm:$0xff] %v11597_v11  ;;  %v11611_v2 = vsub.f32 %v5262_v46, %v11597_v11  ;;  %v5081_v46 = vld [vmem:[%s8426_s28 + $0x302] sm:$0xff] }
 0x728   : > { %v4648_v58 = vpop.f32.mrf.mxu2  ;;  %v11593_v45 = vpop.f32.mrf.mxu1 }
 0x729   : > { %13974 = vst [vmem:[#allocation54_spill] sm:$0xff] %v11593_v45  ;;  %v4649_v7 = vadd.f32 %v4648_v58, %v10408_v17  ;;  %v5758_v17 = vsub.f32 %v11590_v52, %v13205_v59  ;;  %v13983_v59 = vld [vmem:[#allocation72_spill] sm:$0xff] }
 0x72a   : > { %v11599_v47 = vpop.f32.mrf.mxu0 }
 0x72b   : > { %13976 = vst [vmem:[#allocation232_spill] sm:$0xff] %v11599_v47  ;;  %v11601_v50 = vadd.f32 %v4922_v9, %v4649_v7  ;;  %4989 = vmatmul.f32.gmra.mxu3 %v13978_v48  ;;  %6058 = vmatmul.f32.gmra.mxu1 %v11555_v43  ;;  %v5265_v7 = vsel %vm431_vm1, %v5080_v19, 0  ;;  %v5759_v45 = vand.u32 4294901760, %v5758_v17 }
 0x72c   : > { %v11618_v47 = vand.u32 4294901760, %v5265_v7 }
 0x72d   : > { %13977 = vst [vmem:[#allocation233_spill] sm:$0xff] %v11601_v50  ;;  %4715 = vmatmul.f32.gmra.mxu2 %v13978_v48  ;;  %5752 = vmatmul.f32.gmra.mxu0 %v5751_v35  ;;  %v13208_v48 = vand.u32 4294901760, %v11611_v2 }
 0x72e   : > { %v4926_v37 = vpop.f32.mrf.mxu3  ;;  %13980 = vst [vmem:[#allocation234_spill] sm:$0xff] %v11618_v47  ;;  %v11632_v19 = vsub.f32 %v5265_v7, %v11618_v47  ;;  %v5082_v7 = vld [vmem:[%s8426_s28 + $0x30a] sm:$0xff] }
 0x730   : > { %v4652_v9 = vpop.f32.mrf.mxu2  ;;  %v11614_v58 = vpop.f32.mrf.mxu1 }
 0x731   : > { %13979 = vst [vmem:[#allocation51_spill] sm:$0xff] %v11614_v58  ;;  %v4653_v50 = vadd.f32 %v4652_v9, %v10417_v13  ;;  %v5766_v13 = vsub.f32 %v11611_v2, %v13208_v48  ;;  %v13988_v48 = vld [vmem:[#allocation61_spill] sm:$0xff] }
 0x732   : > { %v11620_v35 = vpop.f32.mrf.mxu0 }
 0x733   : > { %13981 = vst [vmem:[#allocation235_spill] sm:$0xff] %v11620_v35  ;;  %v11622_v43 = vadd.f32 %v4926_v37, %v4653_v50  ;;  %4993 = vmatmul.f32.gmra.mxu3 %v13983_v59  ;;  %6062 = vmatmul.f32.gmra.mxu1 %v11576_v34  ;;  %v5268_v50 = vsel %vm431_vm1, %v5081_v46, 0  ;;  %v5767_v58 = vand.u32 4294901760, %v5766_v13 }
 0x734   : > { %v11639_v35 = vand.u32 4294901760, %v5268_v50 }
 0x735   : > { %13982 = vst [vmem:[#allocation236_spill] sm:$0xff] %v11622_v43  ;;  %4719 = vmatmul.f32.gmra.mxu2 %v13983_v59  ;;  %5760 = vmatmul.f32.gmra.mxu0 %v5759_v45  ;;  %v13211_v59 = vand.u32 4294901760, %v11632_v19 }
 0x736   : > { %v4930_v17 = vpop.f32.mrf.mxu3  ;;  %13985 = vst [vmem:[#allocation237_spill] sm:$0xff] %v11639_v35  ;;  %v11653_v46 = vsub.f32 %v5268_v50, %v11639_v35  ;;  %v5083_v50 = vld [vmem:[%s8426_s28 + $0x31a] sm:$0xff] }
 0x738   : > { %v4656_v37 = vpop.f32.mrf.mxu2  ;;  %v11635_v9 = vpop.f32.mrf.mxu1 }
 0x739   : > { %13984 = vst [vmem:[#allocation72_spill] sm:$0xff] %v11635_v9  ;;  %v4657_v43 = vadd.f32 %v4656_v37, %v10426_v44  ;;  %v5774_v44 = vsub.f32 %v11632_v19, %v13211_v59  ;;  %v13992_v59 = vld [vmem:[#allocation57_spill] sm:$0xff] }
 0x73a   : > { %v11641_v45 = vpop.f32.mrf.mxu0 }
 0x73b   : > { %13986 = vst [vmem:[#allocation238_spill] sm:$0xff] %v11641_v45  ;;  %v11643_v34 = vadd.f32 %v4930_v17, %v4657_v43  ;;  %4997 = vmatmul.f32.gmra.mxu3 %v13988_v48  ;;  %6066 = vmatmul.f32.gmra.mxu1 %v11597_v11  ;;  %v5271_v43 = vsel %vm431_vm1, %v5082_v7, 0  ;;  %v5775_v9 = vand.u32 4294901760, %v5774_v44 }
 0x73c   : > { %v11660_v45 = vand.u32 4294901760, %v5271_v43 }
 0x73d   : > { %13987 = vst [vmem:[#allocation239_spill] sm:$0xff] %v11643_v34  ;;  %4723 = vmatmul.f32.gmra.mxu2 %v13988_v48  ;;  %5768 = vmatmul.f32.gmra.mxu0 %v5767_v58  ;;  %v13214_v48 = vand.u32 4294901760, %v11653_v46 }
 0x73e   : > { %v4934_v13 = vpop.f32.mrf.mxu3  ;;  %v11674_v7 = vsub.f32 %v5271_v43, %v11660_v45  ;;  %v5084_v43 = vld [vmem:[%s8426_s28 + $0x322] sm:$0xff] }
 0x740   : > { %v4660_v17 = vpop.f32.mrf.mxu2  ;;  %v11656_v37 = vpop.f32.mrf.mxu1 }
 0x741   : > { %13989 = vst [vmem:[#allocation61_spill] sm:$0xff] %v11656_v37  ;;  %v4661_v34 = vadd.f32 %v4660_v17, %v10435_v31  ;;  %v5782_v31 = vsub.f32 %v11653_v46, %v13214_v48  ;;  %v13996_v48 = vld [vmem:[#allocation79_spill] sm:$0xff] }
 0x742   : > { %v11662_v58 = vpop.f32.mrf.mxu0 }
 0x743   : > { %13990 = vst [vmem:[#allocation240_spill] sm:$0xff] %v11662_v58  ;;  %v11664_v11 = vadd.f32 %v4934_v13, %v4661_v34  ;;  %5001 = vmatmul.f32.gmra.mxu3 %v13992_v59  ;;  %6070 = vmatmul.f32.gmra.mxu1 %v11618_v47  ;;  %v5274_v34 = vsel %vm431_vm1, %v5083_v50, 0  ;;  %v5783_v37 = vand.u32 4294901760, %v5782_v31 }
 0x744   : > { %v11681_v58 = vand.u32 4294901760, %v5274_v34 }
 0x745   : > { %13991 = vst [vmem:[#allocation241_spill] sm:$0xff] %v11664_v11  ;;  %4727 = vmatmul.f32.gmra.mxu2 %v13992_v59  ;;  %5776 = vmatmul.f32.gmra.mxu0 %v5775_v9  ;;  %v13217_v59 = vand.u32 4294901760, %v11674_v7 }
 0x746   : > { %v4938_v44 = vpop.f32.mrf.mxu3  ;;  %v11695_v50 = vsub.f32 %v5274_v34, %v11681_v58 }
 0x748   : > { %v4664_v13 = vpop.f32.mrf.mxu2  ;;  %v11677_v17 = vpop.f32.mrf.mxu1 }
 0x749   : > { %13993 = vst [vmem:[#allocation57_spill] sm:$0xff] %v11677_v17  ;;  %v4665_v11 = vadd.f32 %v4664_v13, %v10444_v41  ;;  %v5790_v41 = vsub.f32 %v11674_v7, %v13217_v59  ;;  %v5277_v13 = vsel %vm431_vm1, %v5084_v43, 0  ;;  %v14000_v59 = vld [vmem:[#allocation68_spill] sm:$0xff] }
 0x74a   : > { %v11683_v9 = vpop.f32.mrf.mxu0 }
 0x74b   : > { %13994 = vst [vmem:[#allocation242_spill] sm:$0xff] %v11683_v9  ;;  %v11685_v47 = vadd.f32 %v4938_v44, %v4665_v11  ;;  %5005 = vmatmul.f32.gmra.mxu3 %v13996_v48  ;;  %6074 = vmatmul.f32.gmra.mxu1 %v11639_v35  ;;  %v5791_v17 = vand.u32 4294901760, %v5790_v41  ;;  %v13218_v9 = vand.u32 4294901760, %v11695_v50 }
 0x74d   : > { %13995 = vst [vmem:[#allocation243_spill] sm:$0xff] %v11685_v47  ;;  %4731 = vmatmul.f32.gmra.mxu2 %v13996_v48  ;;  %5784 = vmatmul.f32.gmra.mxu0 %v5783_v37  ;;  %v11702_v48 = vand.u32 4294901760, %v5277_v13 }
 0x74e   : > { %v4942_v31 = vpop.f32.mrf.mxu3 }
 0x74f   : > { %13998 = vst [vmem:[#allocation244_spill] sm:$0xff] %v11702_v48  ;;  %v11715_v34 = vsub.f32 %v5277_v13, %v11702_v48 }
 0x750   : > { %v4668_v11 = vpop.f32.mrf.mxu2  ;;  %v11698_v44 = vpop.f32.mrf.mxu1 }
 0x751   : > { %13997 = vst [vmem:[#allocation79_spill] sm:$0xff] %v11698_v44  ;;  %v4669_v47 = vadd.f32 %v4668_v11, %v10453_v40  ;;  %v5798_v40 = vsub.f32 %v11695_v50, %v13218_v9 }
 0x752   : > { %v11704_v37 = vpop.f32.mrf.mxu0  ;;  %14001 = vst [vmem:[#allocation68_spill] sm:$0xff] %v11715_v34 }
 0x753   : > { %v11706_v35 = vadd.f32 %v4942_v31, %v4669_v47  ;;  %5009 = vmatmul.f32.gmra.mxu3 %v14000_v59  ;;  %6078 = vmatmul.f32.gmra.mxu1 %v11660_v45  ;;  %v5799_v31 = vand.u32 4294901760, %v5798_v40 }
 0x755   : > { %13999 = vst [vmem:[#allocation245_spill] sm:$0xff] %v11706_v35  ;;  %4735 = vmatmul.f32.gmra.mxu2 %v14000_v59  ;;  %5792 = vmatmul.f32.gmra.mxu0 %v5791_v17  ;;  %v13219_v35 = vand.u32 4294901760, %v11715_v34 }
 0x756   : > { %v4946_v43 = vpop.f32.mrf.mxu3 }
 0x757   : > { %v5806_v17 = vsub.f32 %v11715_v34, %v13219_v35  ;;  %v14009_v34 = vld [vmem:[#allocation78_spill] sm:$0xff] }
 0x758   : > { %v4672_v41 = vpop.f32.mrf.mxu2  ;;  %v11717_v11 = vpop.f32.mrf.mxu1 }
 0x759   : > { %14002 = vst [vmem:[#allocation246_spill] sm:$0xff] %v11717_v11  ;;  %v4673_v47 = vadd.f32 %v4672_v41, %v10464_v18  ;;  %v5807_v9 = vand.u32 4294901760, %v5806_v17  ;;  %v14012_v17 = vld [vmem:[#allocation86_spill] sm:$0xff] }
 0x75a   : > { %v11721_v44 = vpop.f32.mrf.mxu0 }
 0x75b   : > { %14003 = vst [vmem:[#allocation247_spill] sm:$0xff] %v11721_v44  ;;  %v11723_v59 = vadd.f32 %v4946_v43, %v4673_v47  ;;  %5013 = vmatmul.f32.gmra.mxu3 %v10438_v63  ;;  %6082 = vmatmul.f32.gmra.mxu1 %v11681_v58  ;;  %v14128_v44 = vld [vmem:[#allocation53_spill] sm:$0xff] }
 0x75d   : > { %14004 = vst [vmem:[#allocation248_spill] sm:$0xff] %v11723_v59  ;;  %4739 = vmatmul.f32.gmra.mxu2 %v10438_v63  ;;  %5800 = vmatmul.f32.gmra.mxu0 %v5799_v31 }
 0x75e   : > { %v4950_v13 = vpop.f32.mrf.mxu3 }
 0x760   : > { %v4676_v18 = vpop.f32.mrf.mxu2  ;;  %v11731_v40 = vpop.f32.mrf.mxu1 }
 0x761   : > { %14005 = vst [vmem:[#allocation249_spill] sm:$0xff] %v11731_v40  ;;  %v4677_v41 = vadd.f32 %v4676_v18, %v10479_v49  ;;  %v14014_v18 = vld [vmem:[#allocation64_spill] sm:$0xff] }
 0x762   : > { %v11734_v43 = vpop.f32.mrf.mxu0 }
 0x763   : > { %14006 = vst [vmem:[#allocation250_spill] sm:$0xff] %v11734_v43  ;;  %v11736_v47 = vadd.f32 %v4950_v13, %v4677_v41  ;;  %5017 = vmatmul.f32.gmra.mxu3 %v10447_v14  ;;  %6086 = vmatmul.f32.gmra.mxu1 %v11702_v48  ;;  %v14013_v13 = vand.u32 4294901760, %v14012_v17 }
 0x765   : > { %14007 = vst [vmem:[#allocation251_spill] sm:$0xff] %v11736_v47  ;;  %4743 = vmatmul.f32.gmra.mxu2 %v10447_v14  ;;  %5808 = vmatmul.f32.gmra.mxu0 %v5807_v9 }
 0x766   : > { %v4954_v63 = vpop.f32.mrf.mxu3 }
 0x768   : > { %v4680_v31 = vpop.f32.mrf.mxu2  ;;  %v11741_v35 = vpop.f32.mrf.mxu1 }
 0x769   : > { %14008 = vst [vmem:[#allocation252_spill] sm:$0xff] %v11741_v35  ;;  %v4681_v40 = vadd.f32 %v4680_v31, %v14009_v34  ;;  %v14016_v35 = vld [vmem:[#allocation85_spill] sm:$0xff] }
 0x76a   : > { %v11744_v59 = vpop.f32.mrf.mxu0 }
 0x76b   : > { %14010 = vst [vmem:[#allocation78_spill] sm:$0xff] %v11744_v59  ;;  %v11746_v49 = vadd.f32 %v4954_v63, %v4681_v40  ;;  %6449 = vmatmul.f32.vlgmr.msra.gmra.mxu3 %v14013_v13  ;;  %7125 = vmatmul.f32.vlgmr.msra.gmra.mxu1 %v14014_v18  ;;  %v14019_v40 = vld [vmem:[#allocation71_spill] sm:$0xff] }
 0x76c   : > { %v14020_v63 = vand.u32 4294901760, %v14019_v40  ;;  %v14021_v13 = vld [vmem:[#allocation75_spill] sm:$0xff] }
 0x76d   : > { %14011 = vst [vmem:[#allocation253_spill] sm:$0xff] %v11746_v49  ;;  %6110 = vmatmul.f32.vlgmr.msra.gmra.mxu2 %v14012_v17  ;;  %6851 = vmatmul.f32.vlgmr.msra.gmra.mxu0 %v14014_v18 }
 0x76e   : > { %v4958_v14 = vpop.f32.mrf.mxu3 }
 0x770   : > { %v4684_v9 = vpop.f32.mrf.mxu2  ;;  %v11753_v41 = vpop.f32.mrf.mxu1 }
 0x771   : > { %14015 = vst [vmem:[#allocation86_spill] sm:$0xff] %v11753_v41  ;;  %v4685_v47 = vadd.f32 %v4684_v9, %v14016_v35  ;;  %v14023_v41 = vld [vmem:[#allocation92_spill] sm:$0xff] }
 0x772   : > { %v11756_v34 = vpop.f32.mrf.mxu0 }
 0x773   : > { %14017 = vst [vmem:[#allocation64_spill] sm:$0xff] %v11756_v34  ;;  %v11758_v31 = vadd.f32 %v4958_v14, %v4685_v47  ;;  %6455 = vmatmul.f32.gmra.mxu3 %v14020_v63  ;;  %7129 = vmatmul.f32.gmra.mxu1 %v14021_v13  ;;  %v14026_v47 = vld [vmem:[#allocation82_spill] sm:$0xff]  ;;  %v14028_v63 = vld [vmem:[#allocation93_spill] sm:$0xff] }
 0x774   : > { %v14027_v14 = vand.u32 4294901760, %v14026_v47 }
 0x775   : > { %14018 = vst [vmem:[#allocation85_spill] sm:$0xff] %v11758_v31  ;;  %6115 = vmatmul.f32.gmra.mxu2 %v14019_v40  ;;  %6855 = vmatmul.f32.gmra.mxu0 %v14021_v13 }
 0x776   : > { %v4962_v17 = vpop.f32.mrf.mxu3 }
 0x778   : > { %v4688_v18 = vpop.f32.mrf.mxu2  ;;  %v11765_v49 = vpop.f32.mrf.mxu1 }
 0x779   : > { %14022 = vst [vmem:[#allocation71_spill] sm:$0xff] %v11765_v49  ;;  %v4689_v59 = vadd.f32 %v4688_v18, %v14023_v41  ;;  %v14030_v49 = vld [vmem:[#allocation99_spill] sm:$0xff] }
 0x77a   : > { %v11768_v35 = vpop.f32.mrf.mxu0 }
 0x77b   : > { %14024 = vst [vmem:[#allocation75_spill] sm:$0xff] %v11768_v35  ;;  %v11770_v9 = vadd.f32 %v4962_v17, %v4689_v59  ;;  %6461 = vmatmul.f32.gmra.mxu3 %v14027_v14  ;;  %7133 = vmatmul.f32.gmra.mxu1 %v14028_v63  ;;  %v14033_v59 = vld [vmem:[#allocation89_spill] sm:$0xff]  ;;  %v14035_v14 = vld [vmem:[#allocation100_spill] sm:$0xff] }
 0x77c   : > { %v14034_v17 = vand.u32 4294901760, %v14033_v59 }
 0x77d   : > { %14025 = vst [vmem:[#allocation92_spill] sm:$0xff] %v11770_v9  ;;  %6120 = vmatmul.f32.gmra.mxu2 %v14026_v47  ;;  %6859 = vmatmul.f32.gmra.mxu0 %v14028_v63 }
 0x77e   : > { %v4966_v40 = vpop.f32.mrf.mxu3 }
 0x780   : > { %v4692_v13 = vpop.f32.mrf.mxu2  ;;  %v11777_v31 = vpop.f32.mrf.mxu1 }
 0x781   : > { %14029 = vst [vmem:[#allocation82_spill] sm:$0xff] %v11777_v31  ;;  %v4693_v34 = vadd.f32 %v4692_v13, %v14030_v49  ;;  %v14037_v31 = vld [vmem:[#allocation106_spill] sm:$0xff] }
 0x782   : > { %v11780_v41 = vpop.f32.mrf.mxu0 }
 0x783   : > { %14031 = vst [vmem:[#allocation93_spill] sm:$0xff] %v11780_v41  ;;  %v11782_v18 = vadd.f32 %v4966_v40, %v4693_v34  ;;  %6467 = vmatmul.f32.gmra.mxu3 %v14034_v17  ;;  %7137 = vmatmul.f32.gmra.mxu1 %v14035_v14  ;;  %v14040_v34 = vld [vmem:[#allocation96_spill] sm:$0xff]  ;;  %v14042_v17 = vld [vmem:[#allocation107_spill] sm:$0xff] }
 0x784   : > { %v14041_v40 = vand.u32 4294901760, %v14040_v34 }
 0x785   : > { %14032 = vst [vmem:[#allocation99_spill] sm:$0xff] %v11782_v18  ;;  %6125 = vmatmul.f32.gmra.mxu2 %v14033_v59  ;;  %6863 = vmatmul.f32.gmra.mxu0 %v14035_v14 }
 0x786   : > { %v4970_v47 = vpop.f32.mrf.mxu3 }
 0x788   : > { %v4696_v63 = vpop.f32.mrf.mxu2  ;;  %v11789_v9 = vpop.f32.mrf.mxu1 }
 0x789   : > { %14036 = vst [vmem:[#allocation89_spill] sm:$0xff] %v11789_v9  ;;  %v4697_v35 = vadd.f32 %v4696_v63, %v14037_v31  ;;  %v14044_v9 = vld [vmem:[#allocation113_spill] sm:$0xff] }
 0x78a   : > { %v11792_v49 = vpop.f32.mrf.mxu0 }
 0x78b   : > { %14038 = vst [vmem:[#allocation100_spill] sm:$0xff] %v11792_v49  ;;  %v11794_v13 = vadd.f32 %v4970_v47, %v4697_v35  ;;  %6473 = vmatmul.f32.gmra.mxu3 %v14041_v40  ;;  %7141 = vmatmul.f32.gmra.mxu1 %v14042_v17  ;;  %v14047_v35 = vld [vmem:[#allocation103_spill] sm:$0xff]  ;;  %v14049_v40 = vld [vmem:[#allocation114_spill] sm:$0xff] }
 0x78c   : > { %v14048_v47 = vand.u32 4294901760, %v14047_v35 }
 0x78d   : > { %14039 = vst [vmem:[#allocation106_spill] sm:$0xff] %v11794_v13  ;;  %6130 = vmatmul.f32.gmra.mxu2 %v14040_v34  ;;  %6867 = vmatmul.f32.gmra.mxu0 %v14042_v17 }
 0x78e   : > { %v4974_v59 = vpop.f32.mrf.mxu3 }
 0x790   : > { %v4700_v14 = vpop.f32.mrf.mxu2  ;;  %v11801_v18 = vpop.f32.mrf.mxu1 }
 0x791   : > { %14043 = vst [vmem:[#allocation96_spill] sm:$0xff] %v11801_v18  ;;  %v4701_v41 = vadd.f32 %v4700_v14, %v14044_v9  ;;  %v14051_v18 = vld [vmem:[#allocation120_spill] sm:$0xff] }
 0x792   : > { %v11804_v31 = vpop.f32.mrf.mxu0 }
 0x793   : > { %14045 = vst [vmem:[#allocation107_spill] sm:$0xff] %v11804_v31  ;;  %v11806_v63 = vadd.f32 %v4974_v59, %v4701_v41  ;;  %6479 = vmatmul.f32.gmra.mxu3 %v14048_v47  ;;  %7145 = vmatmul.f32.gmra.mxu1 %v14049_v40  ;;  %v14054_v41 = vld [vmem:[#allocation110_spill] sm:$0xff] }
 0x794   : > { %v14055_v59 = vand.u32 4294901760, %v14054_v41  ;;  %v14056_v47 = vld [vmem:[#allocation122_spill] sm:$0xff] }
 0x795   : > { %14046 = vst [vmem:[#allocation113_spill] sm:$0xff] %v11806_v63  ;;  %6135 = vmatmul.f32.gmra.mxu2 %v14047_v35  ;;  %6871 = vmatmul.f32.gmra.mxu0 %v14049_v40 }
 0x796   : > { %v4978_v34 = vpop.f32.mrf.mxu3 }
 0x798   : > { %v4704_v17 = vpop.f32.mrf.mxu2  ;;  %v11813_v13 = vpop.f32.mrf.mxu1 }
 0x799   : > { %14050 = vst [vmem:[#allocation103_spill] sm:$0xff] %v11813_v13  ;;  %v4705_v49 = vadd.f32 %v4704_v17, %v14051_v18  ;;  %v14058_v13 = vld [vmem:[#allocation131_spill] sm:$0xff] }
 0x79a   : > { %v11816_v9 = vpop.f32.mrf.mxu0 }
 0x79b   : > { %14052 = vst [vmem:[#allocation114_spill] sm:$0xff] %v11816_v9  ;;  %v11818_v14 = vadd.f32 %v4978_v34, %v4705_v49  ;;  %6485 = vmatmul.f32.gmra.mxu3 %v14055_v59  ;;  %7149 = vmatmul.f32.gmra.mxu1 %v14056_v47  ;;  %v14061_v49 = vld [vmem:[#allocation117_spill] sm:$0xff]  ;;  %v14063_v59 = vld [vmem:[#allocation127_spill] sm:$0xff] }
 0x79c   : > { %v14062_v34 = vand.u32 4294901760, %v14061_v49 }
 0x79d   : > { %14053 = vst [vmem:[#allocation120_spill] sm:$0xff] %v11818_v14  ;;  %6140 = vmatmul.f32.gmra.mxu2 %v14054_v41  ;;  %6875 = vmatmul.f32.gmra.mxu0 %v14056_v47 }
 0x79e   : > { %v4982_v35 = vpop.f32.mrf.mxu3 }
 0x7a0   : > { %v4708_v40 = vpop.f32.mrf.mxu2  ;;  %v11825_v63 = vpop.f32.mrf.mxu1 }
 0x7a1   : > { %14057 = vst [vmem:[#allocation110_spill] sm:$0xff] %v11825_v63  ;;  %v4709_v31 = vadd.f32 %v4708_v40, %v14058_v13  ;;  %v14065_v63 = vld [vmem:[#allocation137_spill] sm:$0xff] }
 0x7a2   : > { %v11828_v18 = vpop.f32.mrf.mxu0 }
 0x7a3   : > { %14059 = vst [vmem:[#allocation122_spill] sm:$0xff] %v11828_v18  ;;  %v11830_v17 = vadd.f32 %v4982_v35, %v4709_v31  ;;  %6491 = vmatmul.f32.gmra.mxu3 %v14062_v34  ;;  %7153 = vmatmul.f32.gmra.mxu1 %v14063_v59  ;;  %v14068_v31 = vld [vmem:[#allocation124_spill] sm:$0xff] }
 0x7a4   : > { %v14069_v35 = vand.u32 4294901760, %v14068_v31  ;;  %v14070_v34 = vld [vmem:[#allocation132_spill] sm:$0xff] }
 0x7a5   : > { %14060 = vst [vmem:[#allocation131_spill] sm:$0xff] %v11830_v17  ;;  %6145 = vmatmul.f32.gmra.mxu2 %v14061_v49  ;;  %6879 = vmatmul.f32.gmra.mxu0 %v14063_v59 }
 0x7a6   : > { %v4986_v41 = vpop.f32.mrf.mxu3 }
 0x7a8   : > { %v4712_v47 = vpop.f32.mrf.mxu2  ;;  %v11837_v14 = vpop.f32.mrf.mxu1 }
 0x7a9   : > { %14064 = vst [vmem:[#allocation117_spill] sm:$0xff] %v11837_v14  ;;  %v4713_v9 = vadd.f32 %v4712_v47, %v14065_v63  ;;  %v14072_v14 = vld [vmem:[#allocation140_spill] sm:$0xff] }
 0x7aa   : > { %v11840_v13 = vpop.f32.mrf.mxu0 }
 0x7ab   : > { %14066 = vst [vmem:[#allocation127_spill] sm:$0xff] %v11840_v13  ;;  %v11842_v40 = vadd.f32 %v4986_v41, %v4713_v9  ;;  %6497 = vmatmul.f32.gmra.mxu3 %v14069_v35  ;;  %7157 = vmatmul.f32.gmra.mxu1 %v14070_v34  ;;  %v14075_v9 = vld [vmem:[#allocation134_spill] sm:$0xff]  ;;  %v14077_v35 = vld [vmem:[#allocation129_spill] sm:$0xff] }
 0x7ac   : > { %v14076_v41 = vand.u32 4294901760, %v14075_v9 }
 0x7ad   : > { %14067 = vst [vmem:[#allocation137_spill] sm:$0xff] %v11842_v40  ;;  %6150 = vmatmul.f32.gmra.mxu2 %v14068_v31  ;;  %6883 = vmatmul.f32.gmra.mxu0 %v14070_v34 }
 0x7ae   : > { %v4990_v49 = vpop.f32.mrf.mxu3 }
 0x7b0   : > { %v4716_v59 = vpop.f32.mrf.mxu2  ;;  %v11849_v17 = vpop.f32.mrf.mxu1 }
 0x7b1   : > { %14071 = vst [vmem:[#allocation124_spill] sm:$0xff] %v11849_v17  ;;  %v4717_v18 = vadd.f32 %v4716_v59, %v14072_v14  ;;  %v14079_v17 = vld [vmem:[#allocation143_spill] sm:$0xff] }
 0x7b2   : > { %v11852_v63 = vpop.f32.mrf.mxu0 }
 0x7b3   : > { %14073 = vst [vmem:[#allocation132_spill] sm:$0xff] %v11852_v63  ;;  %v11854_v47 = vadd.f32 %v4990_v49, %v4717_v18  ;;  %6503 = vmatmul.f32.gmra.mxu3 %v14076_v41  ;;  %7161 = vmatmul.f32.gmra.mxu1 %v14077_v35  ;;  %v14082_v18 = vld [vmem:[#allocation136_spill] sm:$0xff]  ;;  %v14084_v41 = vld [vmem:[#allocation135_spill] sm:$0xff] }
 0x7b4   : > { %v14083_v49 = vand.u32 4294901760, %v14082_v18 }
 0x7b5   : > { %14074 = vst [vmem:[#allocation140_spill] sm:$0xff] %v11854_v47  ;;  %6155 = vmatmul.f32.gmra.mxu2 %v14075_v9  ;;  %6887 = vmatmul.f32.gmra.mxu0 %v14077_v35 }
 0x7b6   : > { %v4994_v31 = vpop.f32.mrf.mxu3 }
 0x7b8   : > { %v4720_v34 = vpop.f32.mrf.mxu2  ;;  %v11861_v40 = vpop.f32.mrf.mxu1 }
 0x7b9   : > { %14078 = vst [vmem:[#allocation134_spill] sm:$0xff] %v11861_v40  ;;  %v4721_v13 = vadd.f32 %v4720_v34, %v14079_v17  ;;  %v14086_v40 = vld [vmem:[#allocation146_spill] sm:$0xff] }
 0x7ba   : > { %v11864_v14 = vpop.f32.mrf.mxu0 }
 0x7bb   : > { %14080 = vst [vmem:[#allocation129_spill] sm:$0xff] %v11864_v14  ;;  %v11866_v59 = vadd.f32 %v4994_v31, %v4721_v13  ;;  %6509 = vmatmul.f32.gmra.mxu3 %v14083_v49  ;;  %7165 = vmatmul.f32.gmra.mxu1 %v14084_v41  ;;  %v14089_v13 = vld [vmem:[#allocation139_spill] sm:$0xff]  ;;  %v14091_v49 = vld [vmem:[#allocation138_spill] sm:$0xff] }
 0x7bc   : > { %v14090_v31 = vand.u32 4294901760, %v14089_v13 }
 0x7bd   : > { %14081 = vst [vmem:[#allocation143_spill] sm:$0xff] %v11866_v59  ;;  %6160 = vmatmul.f32.gmra.mxu2 %v14082_v18  ;;  %6891 = vmatmul.f32.gmra.mxu0 %v14084_v41 }
 0x7be   : > { %v4998_v9 = vpop.f32.mrf.mxu3 }
 0x7c0   : > { %v4724_v35 = vpop.f32.mrf.mxu2  ;;  %v11873_v47 = vpop.f32.mrf.mxu1 }
 0x7c1   : > { %14085 = vst [vmem:[#allocation136_spill] sm:$0xff] %v11873_v47  ;;  %v4725_v63 = vadd.f32 %v4724_v35, %v14086_v40  ;;  %v14093_v47 = vld [vmem:[#allocation149_spill] sm:$0xff] }
 0x7c2   : > { %v11876_v17 = vpop.f32.mrf.mxu0 }
 0x7c3   : > { %14087 = vst [vmem:[#allocation135_spill] sm:$0xff] %v11876_v17  ;;  %v11878_v34 = vadd.f32 %v4998_v9, %v4725_v63  ;;  %6515 = vmatmul.f32.gmra.mxu3 %v14090_v31  ;;  %7169 = vmatmul.f32.gmra.mxu1 %v14091_v49  ;;  %v14096_v63 = vld [vmem:[#allocation142_spill] sm:$0xff]  ;;  %v14098_v31 = vld [vmem:[#allocation141_spill] sm:$0xff] }
 0x7c4   : > { %v14097_v9 = vand.u32 4294901760, %v14096_v63 }
 0x7c5   : > { %14088 = vst [vmem:[#allocation146_spill] sm:$0xff] %v11878_v34  ;;  %6165 = vmatmul.f32.gmra.mxu2 %v14089_v13  ;;  %6895 = vmatmul.f32.gmra.mxu0 %v14091_v49 }
 0x7c6   : > { %v5002_v18 = vpop.f32.mrf.mxu3 }
 0x7c8   : > { %v4728_v41 = vpop.f32.mrf.mxu2  ;;  %v11885_v59 = vpop.f32.mrf.mxu1 }
 0x7c9   : > { %14092 = vst [vmem:[#allocation139_spill] sm:$0xff] %v11885_v59  ;;  %v4729_v14 = vadd.f32 %v4728_v41, %v14093_v47  ;;  %v14100_v59 = vld [vmem:[#allocation50_spill] sm:$0xff] }
 0x7ca   : > { %v11888_v40 = vpop.f32.mrf.mxu0 }
 0x7cb   : > { %14094 = vst [vmem:[#allocation138_spill] sm:$0xff] %v11888_v40  ;;  %v11890_v35 = vadd.f32 %v5002_v18, %v4729_v14  ;;  %6521 = vmatmul.f32.gmra.mxu3 %v14097_v9  ;;  %7173 = vmatmul.f32.gmra.mxu1 %v14098_v31  ;;  %v14103_v14 = vld [vmem:[#allocation145_spill] sm:$0xff]  ;;  %v14105_v9 = vld [vmem:[#allocation144_spill] sm:$0xff] }
 0x7cc   : > { %v14104_v18 = vand.u32 4294901760, %v14103_v14 }
 0x7cd   : > { %14095 = vst [vmem:[#allocation149_spill] sm:$0xff] %v11890_v35  ;;  %6170 = vmatmul.f32.gmra.mxu2 %v14096_v63  ;;  %6899 = vmatmul.f32.gmra.mxu0 %v14098_v31 }
 0x7ce   : > { %v5006_v13 = vpop.f32.mrf.mxu3 }
 0x7d0   : > { %v4732_v49 = vpop.f32.mrf.mxu2  ;;  %v11897_v34 = vpop.f32.mrf.mxu1 }
 0x7d1   : > { %14099 = vst [vmem:[#allocation142_spill] sm:$0xff] %v11897_v34  ;;  %v4733_v17 = vadd.f32 %v4732_v49, %v14100_v59 }
 0x7d2   : > { %v11900_v47 = vpop.f32.mrf.mxu0 }
 0x7d3   : > { %14101 = vst [vmem:[#allocation141_spill] sm:$0xff] %v11900_v47  ;;  %v11902_v41 = vadd.f32 %v5006_v13, %v4733_v17  ;;  %6527 = vmatmul.f32.gmra.mxu3 %v14104_v18  ;;  %7177 = vmatmul.f32.gmra.mxu1 %v14105_v9  ;;  %v14109_v17 = vld [vmem:[#allocation148_spill] sm:$0xff]  ;;  %v14111_v18 = vld [vmem:[#allocation147_spill] sm:$0xff] }
 0x7d4   : > { %v14110_v13 = vand.u32 4294901760, %v14109_v17 }
 0x7d5   : > { %14102 = vst [vmem:[#allocation50_spill] sm:$0xff] %v11902_v41  ;;  %6175 = vmatmul.f32.gmra.mxu2 %v14103_v14  ;;  %6903 = vmatmul.f32.gmra.mxu0 %v14105_v9 }
 0x7d6   : > { %v5010_v63 = vpop.f32.mrf.mxu3 }
 0x7d8   : > { %v4736_v31 = vpop.f32.mrf.mxu2  ;;  %v11909_v35 = vpop.f32.mrf.mxu1 }
 0x7d9   : > { %14106 = vst [vmem:[#allocation145_spill] sm:$0xff] %v11909_v35  ;;  %v4737_v34 = vadd.f32 %v4736_v31, %v10734_v61 }
 0x7da   : > { %v11912_v59 = vpop.f32.mrf.mxu0 }
 0x7db   : > { %14107 = vst [vmem:[#allocation144_spill] sm:$0xff] %v11912_v59  ;;  %v11914_v49 = vadd.f32 %v5010_v63, %v4737_v34  ;;  %6533 = vmatmul.f32.gmra.mxu3 %v14110_v13  ;;  %7181 = vmatmul.f32.gmra.mxu1 %v14111_v18  ;;  %v14115_v34 = vld [vmem:[#allocation151_spill] sm:$0xff]  ;;  %v14117_v13 = vld [vmem:[#allocation150_spill] sm:$0xff] }
 0x7dc   : > { %v14116_v63 = vand.u32 4294901760, %v14115_v34 }
 0x7dd   : > { %14108 = vst [vmem:[#allocation254_spill] sm:$0xff] %v11914_v49  ;;  %6180 = vmatmul.f32.gmra.mxu2 %v14109_v17  ;;  %6907 = vmatmul.f32.gmra.mxu0 %v14111_v18 }
 0x7de   : > { %v5014_v14 = vpop.f32.mrf.mxu3 }
 0x7e0   : > { %v4740_v9 = vpop.f32.mrf.mxu2  ;;  %v11921_v41 = vpop.f32.mrf.mxu1 }
 0x7e1   : > { %14112 = vst [vmem:[#allocation148_spill] sm:$0xff] %v11921_v41  ;;  %v4741_v35 = vadd.f32 %v4740_v9, %v10751_v5 }
 0x7e2   : > { %v11924_v61 = vpop.f32.mrf.mxu0 }
 0x7e3   : > { %14113 = vst [vmem:[#allocation147_spill] sm:$0xff] %v11924_v61  ;;  %v11926_v31 = vadd.f32 %v5014_v14, %v4741_v35  ;;  %6539 = vmatmul.f32.gmra.mxu3 %v14116_v63  ;;  %7185 = vmatmul.f32.gmra.mxu1 %v14117_v13  ;;  %v14119_v35 = vand.u32 4294901760, %v10731_v56  ;;  %v14120_v14 = vld [vmem:[#allocation49_spill] sm:$0xff]  ;;  %v14122_v63 = vld [vmem:[#allocation60_spill] sm:$0xff] }
 0x7e5   : > { %14114 = vst [vmem:[#allocation255_spill] sm:$0xff] %v11926_v31  ;;  %6185 = vmatmul.f32.gmra.mxu2 %v14115_v34  ;;  %6911 = vmatmul.f32.gmra.mxu0 %v14117_v13  ;;  %v14121_v34 = vld [vmem:[#allocation55_spill] sm:$0xff] }
 0x7e6   : > { %v5018_v17 = vpop.f32.mrf.mxu3  ;;  %v5836_v13 = vadd.f32 %v14122_v63, %v14121_v34  ;;  %v7445_v63 = vld [vmem:[#allocation2 + $0xb0] sm:$0xff] }
 0x7e8   : > { %v4744_v18 = vpop.f32.mrf.mxu2  ;;  %v7126_v49 = vpop.f32.mrf.mxu1 }
 0x7e9   : > { %v4745_v41 = vadd.f32 %v4744_v18, %v10772_v8 }
 0x7ea   : > { %v6852_v59 = vpop.f32.mrf.mxu0 }
 0x7eb   : > { %v11934_v5 = vadd.f32 %v5018_v17, %v4745_v41  ;;  %6545 = vmatmul.f32.gmra.mxu3 %v14119_v35  ;;  %7189 = vmatmul.f32.gmra.mxu1 %v14120_v14  ;;  %v14123_v41 = vand.u32 4294901760, %v10748_v53  ;;  %v14124_v17 = vld [vmem:[#allocation47_spill] sm:$0xff] }
 0x7ed   : > { %14118 = vst [vmem:[#allocation151_spill] sm:$0xff] %v11934_v5  ;;  %6190 = vmatmul.f32.gmra.mxu2 %v10731_v56  ;;  %6915 = vmatmul.f32.gmra.mxu0 %v14120_v14  ;;  %v14125_v14 = vld [vmem:[#allocation62_spill] sm:$0xff]  ;;  %v14126_v5 = vld [vmem:[#allocation67_spill] sm:$0xff] }
 0x7ee   : > { %v6450_v9 = vpop.f32.mrf.mxu3  ;;  %v5840_v40 = vadd.f32 %v14126_v5, %v14125_v14  ;;  %v14131_v5 = vld [vmem:[#allocation70_spill] sm:$0xff] }
 0x7f0   : > { %v6111_v31 = vpop.f32.mrf.mxu2  ;;  %v7130_v61 = vpop.f32.mrf.mxu1 }
 0x7f1   : > { %v6112_v47 = vadd.f32 %v6111_v31, %v5836_v13  ;;  %v14127_v13 = vld [vmem:[#allocation59_spill] sm:$0xff] }
 0x7f2   : > { %v6856_v8 = vpop.f32.mrf.mxu0 }
 0x7f3   : > { %v6451_v18 = vadd.f32 %v6450_v9, %v6112_v47  ;;  %6551 = vmatmul.f32.gmra.mxu3 %v14123_v41  ;;  %7193 = vmatmul.f32.gmra.mxu1 %v14124_v17 }
 0x7f5   : > { %v6853_v35 = vadd.f32 %v6852_v59, %v6451_v18  ;;  %6195 = vmatmul.f32.gmra.mxu2 %v10748_v53  ;;  %6919 = vmatmul.f32.gmra.mxu0 %v14124_v17  ;;  %v14129_v59 = vand.u32 4294901760, %v14128_v44  ;;  %v14130_v53 = vld [vmem:[#allocation56_spill] sm:$0xff]  ;;  %v14132_v17 = vld [vmem:[#allocation74_spill] sm:$0xff] }
 0x7f6   : > { %v6456_v56 = vpop.f32.mrf.mxu3 }
 0x7f7   : > { %v7127_v34 = vadd.f32 %v7126_v49, %v6853_v35  ;;  %v5844_v35 = vadd.f32 %v14132_v17, %v14131_v5 }
 0x7f8   : > { %v6116_v43 = vpop.f32.mrf.mxu2  ;;  %v7134_v31 = vpop.f32.mrf.mxu1 }
 0x7f9   : > { %v7381_v47 = vadd.f32 %v7127_v34, %v14127_v13  ;;  %v6117_v9 = vadd.f32 %v6116_v43, %v5840_v40  ;;  %v7446_v43 = vld [vmem:[#allocation2 + $0x1b0] sm:$0xff] }
 0x7fa   : > { %v6860_v48 = vpop.f32.mrf.mxu0 }
 0x7fb   : > { %v7509_v41 = vadd.f32 %v7445_v63, %v7381_v47  ;;  %v6457_v11 = vadd.f32 %v6456_v56, %v6117_v9  ;;  %6557 = vmatmul.f32.gmra.mxu3 %v14129_v59  ;;  %7197 = vmatmul.f32.gmra.mxu1 %v14130_v53  ;;  %v14133_v56 = vld [vmem:[#allocation73_spill] sm:$0xff] }
 0x7fd   : > { %7573 = vst [vmem:[#allocation2 + $0xb0] sm:$0xff] %v7509_v41  ;;  %v6857_v18 = vadd.f32 %v6856_v8, %v6457_v11  ;;  %6200 = vmatmul.f32.gmra.mxu2 %v14128_v44  ;;  %6923 = vmatmul.f32.gmra.mxu0 %v14130_v53  ;;  %v14134_v41 = vld [vmem:[#allocation66_spill] sm:$0xff]  ;;  %v14136_v44 = vld [vmem:[#allocation63_spill] sm:$0xff]  ;;  %v14137_v53 = vld [vmem:[#allocation80_spill] sm:$0xff] }
 0x7fe   : > { %v6462_v49 = vpop.f32.mrf.mxu3  ;;  %v14135_v11 = vand.u32 4294901760, %v14134_v41 }
 0x7ff   : > { %v7131_v14 = vadd.f32 %v7130_v61, %v6857_v18  ;;  %v14138_v18 = vld [vmem:[#allocation84_spill] sm:$0xff] }
 0x800   : > { %v6121_v40 = vpop.f32.mrf.mxu2  ;;  %v7138_v34 = vpop.f32.mrf.mxu1  ;;  %v5848_v5 = vadd.f32 %v14138_v18, %v14137_v53 }
 0x801   : > { %v7382_v63 = vadd.f32 %v7131_v14, %v14133_v56  ;;  %v6122_v13 = vadd.f32 %v6121_v40, %v5844_v35  ;;  %v7447_v35 = vld [vmem:[#allocation2 + $0xd8] sm:$0xff] }
 0x802   : > { %v6864_v47 = vpop.f32.mrf.mxu0 }
 0x803   : > { %v7510_v9 = vadd.f32 %v7446_v43, %v7382_v63  ;;  %v6463_v59 = vadd.f32 %v6462_v49, %v6122_v13  ;;  %6563 = vmatmul.f32.gmra.mxu3 %v14135_v11  ;;  %7201 = vmatmul.f32.gmra.mxu1 %v14136_v44  ;;  %v14139_v49 = vld [vmem:[#allocation76_spill] sm:$0xff] }
 0x805   : > { %7574 = vst [vmem:[#allocation2 + $0x1b0] sm:$0xff] %v7510_v9  ;;  %v6861_v8 = vadd.f32 %v6860_v48, %v6463_v59  ;;  %6205 = vmatmul.f32.gmra.mxu2 %v14134_v41  ;;  %6927 = vmatmul.f32.gmra.mxu0 %v14136_v44  ;;  %v14140_v9 = vld [vmem:[#allocation69_spill] sm:$0xff]  ;;  %v14143_v44 = vld [vmem:[#allocation83_spill] sm:$0xff] }
 0x806   : > { %v6468_v61 = vpop.f32.mrf.mxu3  ;;  %v14141_v48 = vand.u32 4294901760, %v14140_v9  ;;  %v14142_v59 = vld [vmem:[#allocation77_spill] sm:$0xff] }
 0x807   : > { %v7135_v17 = vadd.f32 %v7134_v31, %v6861_v8  ;;  %v14144_v8 = vld [vmem:[#allocation88_spill] sm:$0xff] }
 0x808   : > { %v6126_v14 = vpop.f32.mrf.mxu2  ;;  %v7142_v43 = vpop.f32.mrf.mxu1  ;;  %v5852_v53 = vadd.f32 %v14144_v8, %v14143_v44 }
 0x809   : > { %v7383_v40 = vadd.f32 %v7135_v17, %v14139_v49  ;;  %v6127_v56 = vadd.f32 %v6126_v14, %v5848_v5  ;;  %v7448_v5 = vld [vmem:[#allocation2 + $0x18] sm:$0xff] }
 0x80a   : > { %v6868_v63 = vpop.f32.mrf.mxu0 }
 0x80b   : > { %v7511_v13 = vadd.f32 %v7447_v35, %v7383_v40  ;;  %v6469_v11 = vadd.f32 %v6468_v61, %v6127_v56  ;;  %6569 = vmatmul.f32.gmra.mxu3 %v14141_v48  ;;  %7205 = vmatmul.f32.gmra.mxu1 %v14142_v59  ;;  %v14145_v61 = vld [vmem:[#allocation98_spill] sm:$0xff] }
 0x80d   : > { %7575 = vst [vmem:[#allocation2 + $0xd8] sm:$0xff] %v7511_v13  ;;  %v6865_v41 = vadd.f32 %v6864_v47, %v6469_v11  ;;  %6210 = vmatmul.f32.gmra.mxu2 %v14140_v9  ;;  %6931 = vmatmul.f32.gmra.mxu0 %v14142_v59  ;;  %v14146_v13 = vld [vmem:[#allocation91_spill] sm:$0xff]  ;;  %v14148_v11 = vld [vmem:[#allocation81_spill] sm:$0xff] }
 0x80e   : > { %v6474_v31 = vpop.f32.mrf.mxu3  ;;  %v14147_v47 = vand.u32 4294901760, %v14146_v13  ;;  %v14149_v59 = vld [vmem:[#allocation105_spill] sm:$0xff] }
 0x80f   : > { %v7139_v18 = vadd.f32 %v7138_v34, %v6865_v41  ;;  %v14150_v41 = vld [vmem:[#allocation94_spill] sm:$0xff] }
 0x810   : > { %v6131_v17 = vpop.f32.mrf.mxu2  ;;  %v7146_v35 = vpop.f32.mrf.mxu1  ;;  %v5856_v44 = vadd.f32 %v14150_v41, %v14149_v59 }
 0x811   : > { %v7384_v14 = vadd.f32 %v7139_v18, %v14145_v61  ;;  %v6132_v49 = vadd.f32 %v6131_v17, %v5852_v53  ;;  %v7449_v53 = vld [vmem:[#allocation2 + $0x50] sm:$0xff] }
 0x812   : > { %v6872_v40 = vpop.f32.mrf.mxu0 }
 0x813   : > { %v7512_v56 = vadd.f32 %v7448_v5, %v7384_v14  ;;  %v6475_v48 = vadd.f32 %v6474_v31, %v6132_v49  ;;  %6575 = vmatmul.f32.gmra.mxu3 %v14147_v47  ;;  %7209 = vmatmul.f32.gmra.mxu1 %v14148_v11  ;;  %v14151_v31 = vld [vmem:[#allocation102_spill] sm:$0xff] }
 0x815   : > { %7576 = vst [vmem:[#allocation2 + $0x18] sm:$0xff] %v7512_v56  ;;  %v6869_v9 = vadd.f32 %v6868_v63, %v6475_v48  ;;  %6215 = vmatmul.f32.gmra.mxu2 %v14146_v13  ;;  %6935 = vmatmul.f32.gmra.mxu0 %v14148_v11  ;;  %v14152_v56 = vld [vmem:[#allocation95_spill] sm:$0xff]  ;;  %v14155_v11 = vld [vmem:[#allocation109_spill] sm:$0xff] }
 0x816   : > { %v6480_v34 = vpop.f32.mrf.mxu3  ;;  %v14153_v63 = vand.u32 4294901760, %v14152_v56  ;;  %v14154_v48 = vld [vmem:[#allocation87_spill] sm:$0xff] }
 0x817   : > { %v7143_v8 = vadd.f32 %v7142_v43, %v6869_v9  ;;  %v14156_v9 = vld [vmem:[#allocation97_spill] sm:$0xff] }
 0x818   : > { %v6136_v18 = vpop.f32.mrf.mxu2  ;;  %v7150_v5 = vpop.f32.mrf.mxu1  ;;  %v5860_v59 = vadd.f32 %v14156_v9, %v14155_v11 }
 0x819   : > { %v7385_v17 = vadd.f32 %v7143_v8, %v14151_v31  ;;  %v6137_v61 = vadd.f32 %v6136_v18, %v5856_v44  ;;  %v7450_v44 = vld [vmem:[#allocation2 + $0x168] sm:$0xff] }
 0x81a   : > { %v6876_v14 = vpop.f32.mrf.mxu0 }
 0x81b   : > { %v7513_v49 = vadd.f32 %v7449_v53, %v7385_v17  ;;  %v6481_v47 = vadd.f32 %v6480_v34, %v6137_v61  ;;  %6581 = vmatmul.f32.gmra.mxu3 %v14153_v63  ;;  %7213 = vmatmul.f32.gmra.mxu1 %v14154_v48  ;;  %v14157_v34 = vld [vmem:[#allocation108_spill] sm:$0xff] }
 0x81d   : > { %7577 = vst [vmem:[#allocation2 + $0x50] sm:$0xff] %v7513_v49  ;;  %v6873_v13 = vadd.f32 %v6872_v40, %v6481_v47  ;;  %6220 = vmatmul.f32.gmra.mxu2 %v14152_v56  ;;  %6939 = vmatmul.f32.gmra.mxu0 %v14154_v48  ;;  %v14158_v49 = vld [vmem:[#allocation101_spill] sm:$0xff]  ;;  %v14160_v47 = vld [vmem:[#allocation90_spill] sm:$0xff]  ;;  %v14161_v48 = vld [vmem:[#allocation115_spill] sm:$0xff] }
 0x81e   : > { %v6486_v43 = vpop.f32.mrf.mxu3  ;;  %v14159_v40 = vand.u32 4294901760, %v14158_v49 }
 0x81f   : > { %v7147_v41 = vadd.f32 %v7146_v35, %v6873_v13  ;;  %v14162_v13 = vld [vmem:[#allocation119_spill] sm:$0xff] }
 0x820   : > { %v6141_v8 = vpop.f32.mrf.mxu2  ;;  %v7154_v53 = vpop.f32.mrf.mxu1  ;;  %v5864_v11 = vadd.f32 %v14162_v13, %v14161_v48 }
 0x821   : > { %v7386_v18 = vadd.f32 %v7147_v41, %v14157_v34  ;;  %v6142_v31 = vadd.f32 %v6141_v8, %v5860_v59  ;;  %v7451_v59 = vld [vmem:[#allocation2 + $0x130] sm:$0xff] }
 0x822   : > { %v6880_v17 = vpop.f32.mrf.mxu0 }
 0x823   : > { %v7514_v61 = vadd.f32 %v7450_v44, %v7386_v18  ;;  %v6487_v63 = vadd.f32 %v6486_v43, %v6142_v31  ;;  %6587 = vmatmul.f32.gmra.mxu3 %v14159_v40  ;;  %7217 = vmatmul.f32.gmra.mxu1 %v14160_v47  ;;  %v14163_v43 = vld [vmem:[#allocation111_spill] sm:$0xff] }
 0x825   : > { %7578 = vst [vmem:[#allocation2 + $0x168] sm:$0xff] %v7514_v61  ;;  %v6877_v56 = vadd.f32 %v6876_v14, %v6487_v63  ;;  %6225 = vmatmul.f32.gmra.mxu2 %v14158_v49  ;;  %6943 = vmatmul.f32.gmra.mxu0 %v14160_v47  ;;  %v14164_v61 = vld [vmem:[#allocation104_spill] sm:$0xff]  ;;  %v14167_v47 = vld [vmem:[#allocation121_spill] sm:$0xff] }
 0x826   : > { %v6492_v35 = vpop.f32.mrf.mxu3  ;;  %v14165_v14 = vand.u32 4294901760, %v14164_v61  ;;  %v14166_v63 = vld [vmem:[#allocation112_spill] sm:$0xff] }
 0x827   : > { %v7151_v9 = vadd.f32 %v7150_v5, %v6877_v56  ;;  %v14168_v56 = vld [vmem:[#allocation126_spill] sm:$0xff] }
 0x828   : > { %v6146_v41 = vpop.f32.mrf.mxu2  ;;  %v7158_v44 = vpop.f32.mrf.mxu1  ;;  %v5868_v48 = vadd.f32 %v14168_v56, %v14167_v47  ;;  %v7453_v56 = vld [vmem:[#allocation2 + $0x180] sm:$0xff] }
 0x829   : > { %v7387_v8 = vadd.f32 %v7151_v9, %v14163_v43  ;;  %v6147_v34 = vadd.f32 %v6146_v41, %v5864_v11  ;;  %v7452_v11 = vld [vmem:[#allocation2 + $0x48] sm:$0xff] }
 0x82a   : > { %v6884_v18 = vpop.f32.mrf.mxu0 }
 0x82b   : > { %v7515_v31 = vadd.f32 %v7451_v59, %v7387_v8  ;;  %v6493_v40 = vadd.f32 %v6492_v35, %v6147_v34  ;;  %6593 = vmatmul.f32.gmra.mxu3 %v14165_v14  ;;  %7221 = vmatmul.f32.gmra.mxu1 %v14166_v63  ;;  %v14169_v35 = vld [vmem:[#allocation118_spill] sm:$0xff] }
 0x82d   : > { %7579 = vst [vmem:[#allocation2 + $0x130] sm:$0xff] %v7515_v31  ;;  %v6881_v49 = vadd.f32 %v6880_v17, %v6493_v40  ;;  %6230 = vmatmul.f32.gmra.mxu2 %v14164_v61  ;;  %6947 = vmatmul.f32.gmra.mxu0 %v14166_v63  ;;  %v14170_v17 = vand.u32 4294901760, %v10918_v60  ;;  %v14171_v31 = vld [vmem:[#allocation116_spill] sm:$0xff]  ;;  %v14172_v61 = vld [vmem:[#allocation10_spill] sm:$0xff] }
 0x82e   : > { %v6498_v5 = vpop.f32.mrf.mxu3  ;;  %v14173_v63 = vld [vmem:[#allocation130_spill] sm:$0xff] }
 0x82f   : > { %v7155_v13 = vadd.f32 %v7154_v53, %v6881_v49  ;;  %v5872_v49 = vadd.f32 %v14173_v63, %v14172_v61  ;;  %v7454_v61 = vld [vmem:[#allocation2 + $0x110] sm:$0xff] }
 0x830   : > { %v6151_v9 = vpop.f32.mrf.mxu2  ;;  %v7162_v59 = vpop.f32.mrf.mxu1 }
 0x831   : > { %v7388_v41 = vadd.f32 %v7155_v13, %v14169_v35  ;;  %v6152_v43 = vadd.f32 %v6151_v9, %v5868_v48 }
 0x832   : > { %v6888_v8 = vpop.f32.mrf.mxu0 }
 0x833   : > { %v7516_v34 = vadd.f32 %v7452_v11, %v7388_v41  ;;  %v6499_v14 = vadd.f32 %v6498_v5, %v6152_v43  ;;  %6599 = vmatmul.f32.gmra.mxu3 %v14170_v17  ;;  %7225 = vmatmul.f32.gmra.mxu1 %v14171_v31  ;;  %v14174_v5 = vld [vmem:[#allocation125_spill] sm:$0xff]  ;;  %v14178_v17 = vld [vmem:[#allocation11_spill] sm:$0xff] }
 0x835   : > { %7580 = vst [vmem:[#allocation2 + $0x48] sm:$0xff] %v7516_v34  ;;  %v6885_v40 = vadd.f32 %v6884_v18, %v6499_v14  ;;  %6235 = vmatmul.f32.gmra.mxu2 %v10918_v60  ;;  %6951 = vmatmul.f32.gmra.mxu0 %v14171_v31  ;;  %v14175_v18 = vand.u32 4294901760, %v10939_v29  ;;  %v14176_v60 = vld [vmem:[#allocation123_spill] sm:$0xff]  ;;  %v14177_v14 = vld [vmem:[#allocation14_spill] sm:$0xff] }
 0x836   : > { %v6504_v53 = vpop.f32.mrf.mxu3  ;;  %v5876_v31 = vadd.f32 %v14178_v17, %v14177_v14 }
 0x837   : > { %v7159_v47 = vadd.f32 %v7158_v44, %v6885_v40 }
 0x838   : > { %v6156_v48 = vpop.f32.mrf.mxu2  ;;  %v7166_v13 = vpop.f32.mrf.mxu1 }
 0x839   : > { %v7389_v11 = vadd.f32 %v7159_v47, %v14174_v5  ;;  %v6157_v9 = vadd.f32 %v6156_v48, %v5872_v49 }
 0x83a   : > { %v6892_v35 = vpop.f32.mrf.mxu0 }
 0x83b   : > { %v7517_v41 = vadd.f32 %v7453_v56, %v7389_v11  ;;  %v6505_v43 = vadd.f32 %v6504_v53, %v6157_v9  ;;  %6605 = vmatmul.f32.gmra.mxu3 %v14175_v18  ;;  %7229 = vmatmul.f32.gmra.mxu1 %v14176_v60  ;;  %v14179_v53 = vld [vmem:[#allocation12_spill] sm:$0xff] }
 0x83d   : > { %7581 = vst [vmem:[#allocation2 + $0x180] sm:$0xff] %v7517_v41  ;;  %v6889_v34 = vadd.f32 %v6888_v8, %v6505_v43  ;;  %6240 = vmatmul.f32.gmra.mxu2 %v10939_v29  ;;  %6955 = vmatmul.f32.gmra.mxu0 %v14176_v60  ;;  %v14180_v8 = vand.u32 4294901760, %v10960_v21  ;;  %v14181_v29 = vld [vmem:[#allocation128_spill] sm:$0xff]  ;;  %v14182_v41 = vld [vmem:[#allocation18_spill] sm:$0xff] }
 0x83e   : > { %v6510_v44 = vpop.f32.mrf.mxu3  ;;  %v14183_v43 = vld [vmem:[#allocation16_spill] sm:$0xff] }
 0x83f   : > { %v7163_v40 = vadd.f32 %v7162_v59, %v6889_v34  ;;  %v5880_v18 = vadd.f32 %v14183_v43, %v14182_v41  ;;  %v7455_v34 = vld [vmem:[#allocation2 + $0x118] sm:$0xff] }
 0x840   : > { %v6161_v63 = vpop.f32.mrf.mxu2  ;;  %v7170_v49 = vpop.f32.mrf.mxu1 }
 0x841   : > { %v7390_v47 = vadd.f32 %v7163_v40, %v14179_v53  ;;  %v6162_v56 = vadd.f32 %v6161_v63, %v5876_v31 }
 0x842   : > { %v6896_v48 = vpop.f32.mrf.mxu0 }
 0x843   : > { %v7518_v5 = vadd.f32 %v7454_v61, %v7390_v47  ;;  %v6511_v11 = vadd.f32 %v6510_v44, %v6162_v56  ;;  %6611 = vmatmul.f32.gmra.mxu3 %v14180_v8  ;;  %7233 = vmatmul.f32.gmra.mxu1 %v14181_v29  ;;  %v14184_v44 = vld [vmem:[#allocation15_spill] sm:$0xff]  ;;  %v14187_v56 = vld [vmem:[#allocation22_spill] sm:$0xff] }
 0x845   : > { %7582 = vst [vmem:[#allocation2 + $0x110] sm:$0xff] %v7518_v5  ;;  %v6893_v9 = vadd.f32 %v6892_v35, %v6511_v11  ;;  %6245 = vmatmul.f32.gmra.mxu2 %v10960_v21  ;;  %6959 = vmatmul.f32.gmra.mxu0 %v14181_v29  ;;  %v14185_v35 = vand.u32 4294901760, %v10981_v33  ;;  %v14186_v21 = vld [vmem:[#allocation133_spill] sm:$0xff]  ;;  %v14188_v5 = vld [vmem:[#allocation20_spill] sm:$0xff] }
 0x846   : > { %v6516_v59 = vpop.f32.mrf.mxu3  ;;  %v5884_v11 = vadd.f32 %v14188_v5, %v14187_v56  ;;  %v7456_v29 = vld [vmem:[#allocation2 + $0x98] sm:$0xff] }
 0x847   : > { %v7167_v60 = vadd.f32 %v7166_v13, %v6893_v9 }
 0x848   : > { %v6166_v14 = vpop.f32.mrf.mxu2  ;;  %v7174_v17 = vpop.f32.mrf.mxu1 }
 0x849   : > { %v7391_v31 = vadd.f32 %v7167_v60, %v14184_v44  ;;  %v6167_v40 = vadd.f32 %v6166_v14, %v5880_v18 }
 0x84a   : > { %v6900_v61 = vpop.f32.mrf.mxu0 }
 0x84b   : > { %v7519_v63 = vadd.f32 %v7455_v34, %v7391_v31  ;;  %v6517_v53 = vadd.f32 %v6516_v59, %v6167_v40  ;;  %6617 = vmatmul.f32.gmra.mxu3 %v14185_v35  ;;  %7237 = vmatmul.f32.gmra.mxu1 %v14186_v21  ;;  %v14189_v59 = vld [vmem:[#allocation19_spill] sm:$0xff]  ;;  %v14192_v31 = vld [vmem:[#allocation25_spill] sm:$0xff] }
 0x84c   : > { %v14193_v40 = vld [vmem:[#allocation21_spill] sm:$0xff] }
 0x84d   : > { %7583 = vst [vmem:[#allocation2 + $0x118] sm:$0xff] %v7519_v63  ;;  %v6897_v47 = vadd.f32 %v6896_v48, %v6517_v53  ;;  %6250 = vmatmul.f32.gmra.mxu2 %v10981_v33  ;;  %6963 = vmatmul.f32.gmra.mxu0 %v14186_v21  ;;  %v14190_v48 = vand.u32 4294901760, %v11002_v25  ;;  %v14191_v33 = vld [vmem:[#allocation13_spill] sm:$0xff]  ;;  %v5888_v63 = vadd.f32 %v14193_v40, %v14192_v31 }
 0x84e   : > { %v6522_v13 = vpop.f32.mrf.mxu3  ;;  %v7457_v35 = vld [vmem:[#allocation2 + $0x120] sm:$0xff] }
 0x84f   : > { %v7171_v8 = vadd.f32 %v7170_v49, %v6897_v47 }
 0x850   : > { %v6171_v9 = vpop.f32.mrf.mxu2  ;;  %v7178_v41 = vpop.f32.mrf.mxu1 }
 0x851   : > { %v7392_v43 = vadd.f32 %v7171_v8, %v14189_v59  ;;  %v6172_v18 = vadd.f32 %v6171_v9, %v5884_v11  ;;  %v14197_v59 = vld [vmem:[#allocation154_spill] sm:$0xff] }
 0x852   : > { %v6904_v60 = vpop.f32.mrf.mxu0 }
 0x853   : > { %v7520_v34 = vadd.f32 %v7456_v29, %v7392_v43  ;;  %v6523_v14 = vadd.f32 %v6522_v13, %v6172_v18  ;;  %6623 = vmatmul.f32.gmra.mxu3 %v14190_v48  ;;  %7241 = vmatmul.f32.gmra.mxu1 %v14191_v33  ;;  %v14194_v13 = vld [vmem:[#allocation152_spill] sm:$0xff] }
 0x854   : > { %v14198_v43 = vld [vmem:[#allocation24_spill] sm:$0xff] }
 0x855   : > { %7584 = vst [vmem:[#allocation2 + $0x98] sm:$0xff] %v7520_v34  ;;  %v6901_v44 = vadd.f32 %v6900_v61, %v6523_v14  ;;  %6255 = vmatmul.f32.gmra.mxu2 %v11002_v25  ;;  %6967 = vmatmul.f32.gmra.mxu0 %v14191_v33  ;;  %v14195_v61 = vand.u32 4294901760, %v11023_v20  ;;  %v14196_v25 = vld [vmem:[#allocation17_spill] sm:$0xff]  ;;  %v5892_v18 = vadd.f32 %v14198_v43, %v14197_v59  ;;  %v7458_v14 = vld [vmem:[#allocation2 + $0x150] sm:$0xff] }
 0x856   : > { %v6528_v49 = vpop.f32.mrf.mxu3 }
 0x857   : > { %v7175_v53 = vadd.f32 %v7174_v17, %v6901_v44  ;;  %v14199_v44 = vld [vmem:[#allocation155_spill] sm:$0xff] }
 0x858   : > { %v6176_v21 = vpop.f32.mrf.mxu2  ;;  %v7182_v47 = vpop.f32.mrf.mxu1 }
 0x859   : > { %v7393_v56 = vadd.f32 %v7175_v53, %v14194_v13  ;;  %v6177_v5 = vadd.f32 %v6176_v21, %v5888_v63  ;;  %v14202_v21 = vld [vmem:[#allocation157_spill] sm:$0xff]  ;;  %v14203_v13 = vld [vmem:[#allocation27_spill] sm:$0xff] }
 0x85a   : > { %v6908_v11 = vpop.f32.mrf.mxu0 }
 0x85b   : > { %v7521_v8 = vadd.f32 %v7457_v35, %v7393_v56  ;;  %v6529_v29 = vadd.f32 %v6528_v49, %v6177_v5  ;;  %6629 = vmatmul.f32.gmra.mxu3 %v14195_v61  ;;  %7245 = vmatmul.f32.gmra.mxu1 %v14196_v25  ;;  %v5896_v56 = vadd.f32 %v14203_v13, %v14202_v21 }
 0x85d   : > { %7585 = vst [vmem:[#allocation2 + $0x120] sm:$0xff] %v7521_v8  ;;  %v6905_v9 = vadd.f32 %v6904_v60, %v6529_v29  ;;  %6260 = vmatmul.f32.gmra.mxu2 %v11023_v20  ;;  %6971 = vmatmul.f32.gmra.mxu0 %v14196_v25  ;;  %v14200_v60 = vand.u32 4294901760, %v11044_v55  ;;  %v14201_v20 = vld [vmem:[#allocation23_spill] sm:$0xff]  ;;  %v14204_v25 = vld [vmem:[#allocation158_spill] sm:$0xff] }
 0x85e   : > { %v6534_v17 = vpop.f32.mrf.mxu3  ;;  %v7459_v8 = vld [vmem:[#allocation2 + $0x108] sm:$0xff] }
 0x85f   : > { %v7179_v34 = vadd.f32 %v7178_v41, %v6905_v9 }
 0x860   : > { %v6181_v48 = vpop.f32.mrf.mxu2  ;;  %v7186_v33 = vpop.f32.mrf.mxu1 }
 0x861   : > { %v7394_v49 = vadd.f32 %v7179_v34, %v14199_v44  ;;  %v6182_v31 = vadd.f32 %v6181_v48, %v5892_v18  ;;  %v14208_v48 = vld [vmem:[#allocation26_spill] sm:$0xff] }
 0x862   : > { %v6912_v40 = vpop.f32.mrf.mxu0 }
 0x863   : > { %v7522_v63 = vadd.f32 %v7458_v14, %v7394_v49  ;;  %v6535_v53 = vadd.f32 %v6534_v17, %v6182_v31  ;;  %6635 = vmatmul.f32.gmra.mxu3 %v14200_v60  ;;  %7249 = vmatmul.f32.gmra.mxu1 %v14201_v20  ;;  %v14207_v14 = vld [vmem:[#allocation160_spill] sm:$0xff]  ;;  %v7460_v31 = vld [vmem:[#allocation2 + $0x60] sm:$0xff] }
 0x864   : > { %v5900_v44 = vadd.f32 %v14208_v48, %v14207_v14  ;;  %v14209_v60 = vld [vmem:[#allocation161_spill] sm:$0xff] }
 0x865   : > { %7586 = vst [vmem:[#allocation2 + $0x150] sm:$0xff] %v7522_v63  ;;  %v6909_v35 = vadd.f32 %v6908_v11, %v6535_v53  ;;  %6265 = vmatmul.f32.gmra.mxu2 %v11044_v55  ;;  %6975 = vmatmul.f32.gmra.mxu0 %v14201_v20  ;;  %v14205_v11 = vand.u32 4294901760, %v11065_v62  ;;  %v14206_v55 = vld [vmem:[#allocation153_spill] sm:$0xff] }
 0x866   : > { %v6540_v41 = vpop.f32.mrf.mxu3 }
 0x867   : > { %v7183_v5 = vadd.f32 %v7182_v47, %v6909_v35 }
 0x868   : > { %v6186_v29 = vpop.f32.mrf.mxu2  ;;  %v7190_v61 = vpop.f32.mrf.mxu1 }
 0x869   : > { %v7395_v9 = vadd.f32 %v7183_v5, %v14204_v25  ;;  %v6187_v17 = vadd.f32 %v6186_v29, %v5896_v56  ;;  %v14212_v5 = vld [vmem:[#allocation163_spill] sm:$0xff] }
 0x86a   : > { %v6916_v59 = vpop.f32.mrf.mxu0 }
 0x86b   : > { %v7523_v43 = vadd.f32 %v7459_v8, %v7395_v9  ;;  %v6541_v18 = vadd.f32 %v6540_v41, %v6187_v17  ;;  %6641 = vmatmul.f32.gmra.mxu3 %v14205_v11  ;;  %7253 = vmatmul.f32.gmra.mxu1 %v14206_v55  ;;  %v14213_v8 = vld [vmem:[#allocation29_spill] sm:$0xff] }
 0x86c   : > { %v5904_v29 = vadd.f32 %v14213_v8, %v14212_v5  ;;  %v7461_v9 = vld [vmem:[#allocation2 + $0xe0] sm:$0xff] }
 0x86d   : > { %7587 = vst [vmem:[#allocation2 + $0x108] sm:$0xff] %v7523_v43  ;;  %v6913_v34 = vadd.f32 %v6912_v40, %v6541_v18  ;;  %6270 = vmatmul.f32.gmra.mxu2 %v11065_v62  ;;  %6979 = vmatmul.f32.gmra.mxu0 %v14206_v55  ;;  %v14210_v40 = vand.u32 4294901760, %v11086_v30  ;;  %v14211_v62 = vld [vmem:[#allocation156_spill] sm:$0xff]  ;;  %v14222_v8 = vld [vmem:[#allocation169_spill] sm:$0xff] }
 0x86e   : > { %v6546_v47 = vpop.f32.mrf.mxu3  ;;  %v14214_v18 = vld [vmem:[#allocation164_spill] sm:$0xff] }
 0x86f   : > { %v7187_v49 = vadd.f32 %v7186_v33, %v6913_v34 }
 0x870   : > { %v6191_v63 = vpop.f32.mrf.mxu2  ;;  %v7194_v53 = vpop.f32.mrf.mxu1 }
 0x871   : > { %v7396_v20 = vadd.f32 %v7187_v49, %v14209_v60  ;;  %v6192_v35 = vadd.f32 %v6191_v63, %v5900_v44  ;;  %v14217_v44 = vld [vmem:[#allocation166_spill] sm:$0xff]  ;;  %v14218_v49 = vld [vmem:[#allocation28_spill] sm:$0xff] }
 0x872   : > { %v6920_v41 = vpop.f32.mrf.mxu0  ;;  %v7462_v60 = vld [vmem:[#allocation2 + $0x188] sm:$0xff] }
 0x873   : > { %v7524_v21 = vadd.f32 %v7460_v31, %v7396_v20  ;;  %v6547_v13 = vadd.f32 %v6546_v47, %v6192_v35  ;;  %6647 = vmatmul.f32.gmra.mxu3 %v14210_v40  ;;  %7257 = vmatmul.f32.gmra.mxu1 %v14211_v62  ;;  %v5908_v31 = vadd.f32 %v14218_v49, %v14217_v44  ;;  %v14227_v44 = vld [vmem:[#allocation172_spill] sm:$0xff]  ;;  %v14228_v49 = vld [vmem:[#allocation30_spill] sm:$0xff] }
 0x875   : > { %7588 = vst [vmem:[#allocation2 + $0x60] sm:$0xff] %v7524_v21  ;;  %v6917_v56 = vadd.f32 %v6916_v59, %v6547_v13  ;;  %6275 = vmatmul.f32.gmra.mxu2 %v11086_v30  ;;  %6983 = vmatmul.f32.gmra.mxu0 %v14211_v62  ;;  %v14215_v59 = vand.u32 4294901760, %v11107_v24  ;;  %v14216_v30 = vld [vmem:[#allocation159_spill] sm:$0xff] }
 0x876   : > { %v6552_v33 = vpop.f32.mrf.mxu3  ;;  %v14219_v21 = vld [vmem:[#allocation167_spill] sm:$0xff] }
 0x877   : > { %v7191_v25 = vadd.f32 %v7190_v61, %v6917_v56 }
 0x878   : > { %v6196_v17 = vpop.f32.mrf.mxu2  ;;  %v7198_v43 = vpop.f32.mrf.mxu1 }
 0x879   : > { %v7397_v11 = vadd.f32 %v7191_v25, %v14214_v18  ;;  %v6197_v55 = vadd.f32 %v6196_v17, %v5904_v29  ;;  %v14223_v29 = vld [vmem:[#allocation31_spill] sm:$0xff]  ;;  %v7463_v17 = vld [vmem:[#allocation2 + $0x138] sm:$0xff] }
 0x87a   : > { %v6924_v34 = vpop.f32.mrf.mxu0  ;;  %v5912_v25 = vadd.f32 %v14223_v29, %v14222_v8  ;;  %v14233_v8 = vld [vmem:[#allocation33_spill] sm:$0xff] }
 0x87b   : > { %v7525_v47 = vadd.f32 %v7461_v9, %v7397_v11  ;;  %v6553_v14 = vadd.f32 %v6552_v33, %v6197_v55  ;;  %6653 = vmatmul.f32.gmra.mxu3 %v14215_v59  ;;  %7261 = vmatmul.f32.gmra.mxu1 %v14216_v30  ;;  %v14224_v55 = vld [vmem:[#allocation170_spill] sm:$0xff] }
 0x87d   : > { %7589 = vst [vmem:[#allocation2 + $0xe0] sm:$0xff] %v7525_v47  ;;  %v6921_v48 = vadd.f32 %v6920_v41, %v6553_v14  ;;  %6280 = vmatmul.f32.gmra.mxu2 %v11107_v24  ;;  %6987 = vmatmul.f32.gmra.mxu0 %v14216_v30  ;;  %v14220_v41 = vand.u32 4294901760, %v11128_v1  ;;  %v14221_v24 = vld [vmem:[#allocation162_spill] sm:$0xff] }
 0x87e   : > { %v6558_v61 = vpop.f32.mrf.mxu3 }
 0x87f   : > { %v7195_v63 = vadd.f32 %v7194_v53, %v6921_v48 }
 0x880   : > { %v6201_v20 = vpop.f32.mrf.mxu2  ;;  %v7202_v35 = vpop.f32.mrf.mxu1 }
 0x881   : > { %v7398_v13 = vadd.f32 %v7195_v63, %v14219_v21  ;;  %v6202_v40 = vadd.f32 %v6201_v20, %v5908_v31  ;;  %v5916_v31 = vadd.f32 %v14228_v49, %v14227_v44 }
 0x882   : > { %v6928_v62 = vpop.f32.mrf.mxu0 }
 0x883   : > { %v7526_v56 = vadd.f32 %v7462_v60, %v7398_v13  ;;  %v6559_v33 = vadd.f32 %v6558_v61, %v6202_v40  ;;  %6659 = vmatmul.f32.gmra.mxu3 %v14220_v41  ;;  %7265 = vmatmul.f32.gmra.mxu1 %v14221_v24  ;;  %v7464_v60 = vld [vmem:[#allocation2 + $0x140] sm:$0xff] }
 0x884   : > { %v14229_v13 = vld [vmem:[#allocation173_spill] sm:$0xff] }
 0x885   : > { %7590 = vst [vmem:[#allocation2 + $0x188] sm:$0xff] %v7526_v56  ;;  %v6925_v5 = vadd.f32 %v6924_v34, %v6559_v33  ;;  %6285 = vmatmul.f32.gmra.mxu2 %v11128_v1  ;;  %6991 = vmatmul.f32.gmra.mxu0 %v14221_v24  ;;  %v14225_v34 = vand.u32 4294901760, %v11149_v32  ;;  %v14226_v1 = vld [vmem:[#allocation165_spill] sm:$0xff] }
 0x886   : > { %v6564_v53 = vpop.f32.mrf.mxu3 }
 0x887   : > { %v7199_v9 = vadd.f32 %v7198_v43, %v6925_v5 }
 0x888   : > { %v6206_v18 = vpop.f32.mrf.mxu2  ;;  %v7206_v11 = vpop.f32.mrf.mxu1 }
 0x889   : > { %v7399_v47 = vadd.f32 %v7199_v9, %v14224_v55  ;;  %v6207_v14 = vadd.f32 %v6206_v18, %v5912_v25  ;;  %v7465_v9 = vld [vmem:[#allocation2 + $0x80] sm:$0xff]  ;;  %v14234_v55 = vld [vmem:[#allocation176_spill] sm:$0xff] }
 0x88a   : > { %v6932_v59 = vpop.f32.mrf.mxu0 }
 0x88b   : > { %v7527_v30 = vadd.f32 %v7463_v17, %v7399_v47  ;;  %v6565_v48 = vadd.f32 %v6564_v53, %v6207_v14  ;;  %6665 = vmatmul.f32.gmra.mxu3 %v14225_v34  ;;  %7269 = vmatmul.f32.gmra.mxu1 %v14226_v1  ;;  %v14232_v53 = vld [vmem:[#allocation175_spill] sm:$0xff] }
 0x88c   : > { %v5920_v29 = vadd.f32 %v14233_v8, %v14232_v53  ;;  %v7467_v8 = vld [vmem:[#allocation2 + $0x1b8] sm:$0xff] }
 0x88d   : > { %7591 = vst [vmem:[#allocation2 + $0x138] sm:$0xff] %v7527_v30  ;;  %v6929_v61 = vadd.f32 %v6928_v62, %v6565_v48  ;;  %6290 = vmatmul.f32.gmra.mxu2 %v11149_v32  ;;  %6995 = vmatmul.f32.gmra.mxu0 %v14226_v1  ;;  %v14230_v62 = vand.u32 4294901760, %v11170_v26  ;;  %v14231_v32 = vld [vmem:[#allocation168_spill] sm:$0xff] }
 0x88e   : > { %v6570_v43 = vpop.f32.mrf.mxu3 }
 0x88f   : > { %v7203_v63 = vadd.f32 %v7202_v35, %v6929_v61  ;;  %v14237_v61 = vld [vmem:[#allocation178_spill] sm:$0xff] }
 0x890   : > { %v6211_v20 = vpop.f32.mrf.mxu2  ;;  %v7210_v21 = vpop.f32.mrf.mxu1 }
 0x891   : > { %v7400_v40 = vadd.f32 %v7203_v63, %v14229_v13  ;;  %v6212_v56 = vadd.f32 %v6211_v20, %v5916_v31  ;;  %v7466_v31 = vld [vmem:[#allocation2 + $0x1a8] sm:$0xff] }
 0x892   : > { %v6936_v33 = vpop.f32.mrf.mxu0  ;;  %v14239_v20 = vld [vmem:[#allocation179_spill] sm:$0xff] }
 0x893   : > { %v7528_v41 = vadd.f32 %v7464_v60, %v7400_v40  ;;  %v6571_v24 = vadd.f32 %v6570_v43, %v6212_v56  ;;  %6671 = vmatmul.f32.gmra.mxu3 %v14230_v62  ;;  %7273 = vmatmul.f32.gmra.mxu1 %v14231_v32  ;;  %v14238_v43 = vld [vmem:[#allocation32_spill] sm:$0xff] }
 0x894   : > { %v5924_v44 = vadd.f32 %v14238_v43, %v14237_v61  ;;  %v7468_v61 = vld [vmem:[#allocation2 + $0x28] sm:$0xff] }
 0x895   : > { %7592 = vst [vmem:[#allocation2 + $0x140] sm:$0xff] %v7528_v41  ;;  %v6933_v5 = vadd.f32 %v6932_v59, %v6571_v24  ;;  %6295 = vmatmul.f32.gmra.mxu2 %v11170_v26  ;;  %6999 = vmatmul.f32.gmra.mxu0 %v14231_v32  ;;  %v14235_v59 = vand.u32 4294901760, %v11191_v16  ;;  %v14236_v26 = vld [vmem:[#allocation171_spill] sm:$0xff]  ;;  %v14242_v32 = vld [vmem:[#allocation181_spill] sm:$0xff] }
 0x896   : > { %v6576_v35 = vpop.f32.mrf.mxu3 }
 0x897   : > { %v7207_v25 = vadd.f32 %v7206_v11, %v6933_v5  ;;  %v14243_v5 = vld [vmem:[#allocation35_spill] sm:$0xff] }
 0x898   : > { %v6216_v17 = vpop.f32.mrf.mxu2  ;;  %v7214_v18 = vpop.f32.mrf.mxu1 }
 0x899   : > { %v7401_v47 = vadd.f32 %v7207_v25, %v14234_v55  ;;  %v6217_v14 = vadd.f32 %v6216_v17, %v5920_v29 }
 0x89a   : > { %v6940_v30 = vpop.f32.mrf.mxu0 }
 0x89b   : > { %v7529_v48 = vadd.f32 %v7465_v9, %v7401_v47  ;;  %v6577_v34 = vadd.f32 %v6576_v35, %v6217_v14  ;;  %6677 = vmatmul.f32.gmra.mxu3 %v14235_v59  ;;  %7277 = vmatmul.f32.gmra.mxu1 %v14236_v26  ;;  %v5928_v35 = vadd.f32 %v14243_v5, %v14242_v32  ;;  %v14244_v9 = vld [vmem:[#allocation182_spill] sm:$0xff]  ;;  %v14247_v59 = vld [vmem:[#allocation184_spill] sm:$0xff] }
 0x89d   : > { %7593 = vst [vmem:[#allocation2 + $0x80] sm:$0xff] %v7529_v48  ;;  %v6937_v1 = vadd.f32 %v6936_v33, %v6577_v34  ;;  %6300 = vmatmul.f32.gmra.mxu2 %v11191_v16  ;;  %7003 = vmatmul.f32.gmra.mxu0 %v14236_v26  ;;  %v14240_v33 = vand.u32 4294901760, %v11212_v4  ;;  %v14241_v16 = vld [vmem:[#allocation174_spill] sm:$0xff] }
 0x89e   : > { %v6582_v11 = vpop.f32.mrf.mxu3  ;;  %v14248_v26 = vld [vmem:[#allocation34_spill] sm:$0xff] }
 0x89f   : > { %v7211_v49 = vadd.f32 %v7210_v21, %v6937_v1  ;;  %v5932_v1 = vadd.f32 %v14248_v26, %v14247_v59  ;;  %v14259_v26 = vld [vmem:[#allocation191_spill] sm:$0xff] }
 0x8a0   : > { %v6221_v63 = vpop.f32.mrf.mxu2  ;;  %v7218_v60 = vpop.f32.mrf.mxu1 }
 0x8a1   : > { %v7402_v13 = vadd.f32 %v7211_v49, %v14239_v20  ;;  %v6222_v40 = vadd.f32 %v6221_v63, %v5924_v44  ;;  %v14249_v49 = vld [vmem:[#allocation185_spill] sm:$0xff] }
 0x8a2   : > { %v6944_v56 = vpop.f32.mrf.mxu0 }
 0x8a3   : > { %v7530_v41 = vadd.f32 %v7466_v31, %v7402_v13  ;;  %v6583_v24 = vadd.f32 %v6582_v11, %v6222_v40  ;;  %6683 = vmatmul.f32.gmra.mxu3 %v14240_v33  ;;  %7281 = vmatmul.f32.gmra.mxu1 %v14241_v16  ;;  %v14253_v33 = vld [vmem:[#allocation37_spill] sm:$0xff] }
 0x8a5   : > { %7594 = vst [vmem:[#allocation2 + $0x1a8] sm:$0xff] %v7530_v41  ;;  %v6941_v62 = vadd.f32 %v6940_v30, %v6583_v24  ;;  %6305 = vmatmul.f32.gmra.mxu2 %v11212_v4  ;;  %7007 = vmatmul.f32.gmra.mxu0 %v14241_v16  ;;  %v14245_v30 = vand.u32 4294901760, %v11233_v51  ;;  %v14246_v4 = vld [vmem:[#allocation177_spill] sm:$0xff]  ;;  %v14252_v24 = vld [vmem:[#allocation187_spill] sm:$0xff] }
 0x8a6   : > { %v6588_v21 = vpop.f32.mrf.mxu3  ;;  %v5936_v16 = vadd.f32 %v14253_v33, %v14252_v24  ;;  %v14264_v24 = vld [vmem:[#allocation194_spill] sm:$0xff] }
 0x8a7   : > { %v7215_v53 = vadd.f32 %v7214_v18, %v6941_v62 }
 0x8a8   : > { %v6226_v29 = vpop.f32.mrf.mxu2  ;;  %v7222_v25 = vpop.f32.mrf.mxu1 }
 0x8a9   : > { %v7403_v17 = vadd.f32 %v7215_v53, %v14244_v9  ;;  %v6227_v55 = vadd.f32 %v6226_v29, %v5928_v35  ;;  %v14254_v35 = vld [vmem:[#allocation188_spill] sm:$0xff] }
 0x8aa   : > { %v6948_v47 = vpop.f32.mrf.mxu0 }
 0x8ab   : > { %v7531_v14 = vadd.f32 %v7467_v8, %v7403_v17  ;;  %v6589_v48 = vadd.f32 %v6588_v21, %v6227_v55  ;;  %6689 = vmatmul.f32.gmra.mxu3 %v14245_v30  ;;  %7285 = vmatmul.f32.gmra.mxu1 %v14246_v4  ;;  %v7469_v21 = vld [vmem:[#allocation2 + $0x1e8] sm:$0xff]  ;;  %v14255_v55 = vand.u32 4294901760, %v11275_v10 }
 0x8ad   : > { %7595 = vst [vmem:[#allocation2 + $0x1b8] sm:$0xff] %v7531_v14  ;;  %v6945_v34 = vadd.f32 %v6944_v56, %v6589_v48  ;;  %6310 = vmatmul.f32.gmra.mxu2 %v11233_v51  ;;  %7011 = vmatmul.f32.gmra.mxu0 %v14246_v4  ;;  %v14250_v56 = vand.u32 4294901760, %v11254_v15  ;;  %v14251_v51 = vld [vmem:[#allocation180_spill] sm:$0xff]  ;;  %v14257_v14 = vld [vmem:[#allocation190_spill] sm:$0xff] }
 0x8ae   : > { %v6594_v18 = vpop.f32.mrf.mxu3  ;;  %v14258_v48 = vld [vmem:[#allocation36_spill] sm:$0xff] }
 0x8af   : > { %v7219_v11 = vadd.f32 %v7218_v60, %v6945_v34  ;;  %v5940_v30 = vadd.f32 %v14258_v48, %v14257_v14  ;;  %v7470_v34 = vld [vmem:[#allocation2 + $0xf8] sm:$0xff] }
 0x8b0   : > { %v6231_v43 = vpop.f32.mrf.mxu2  ;;  %v7226_v44 = vpop.f32.mrf.mxu1 }
 0x8b1   : > { %v7404_v31 = vadd.f32 %v7219_v11, %v14249_v49  ;;  %v6232_v63 = vadd.f32 %v6231_v43, %v5932_v1 }
 0x8b2   : > { %v6952_v20 = vpop.f32.mrf.mxu0 }
 0x8b3   : > { %v7532_v13 = vadd.f32 %v7468_v61, %v7404_v31  ;;  %v6595_v40 = vadd.f32 %v6594_v18, %v6232_v63  ;;  %6695 = vmatmul.f32.gmra.mxu3 %v14250_v56  ;;  %7289 = vmatmul.f32.gmra.mxu1 %v14251_v51  ;;  %v14260_v31 = vand.u32 4294901760, %v11296_v3 }
 0x8b5   : > { %7596 = vst [vmem:[#allocation2 + $0x28] sm:$0xff] %v7532_v13  ;;  %v6949_v41 = vadd.f32 %v6948_v47, %v6595_v40  ;;  %6315 = vmatmul.f32.gmra.mxu2 %v11254_v15  ;;  %7015 = vmatmul.f32.gmra.mxu0 %v14251_v51  ;;  %v14256_v15 = vld [vmem:[#allocation183_spill] sm:$0xff]  ;;  %v7471_v51 = vld [vmem:[#allocation2 + $0x160] sm:$0xff] }
 0x8b6   : > { %v6600_v60 = vpop.f32.mrf.mxu3  ;;  %v14263_v13 = vld [vmem:[#allocation39_spill] sm:$0xff] }
 0x8b7   : > { %v7223_v62 = vadd.f32 %v7222_v25, %v6949_v41 }
 0x8b8   : > { %v6236_v32 = vpop.f32.mrf.mxu2  ;;  %v7230_v5 = vpop.f32.mrf.mxu1 }
 0x8b9   : > { %v7405_v53 = vadd.f32 %v7223_v62, %v14254_v35  ;;  %v6237_v8 = vadd.f32 %v6236_v32, %v5936_v16  ;;  %v14265_v35 = vand.u32 4294901760, %v11317_v28 }
 0x8ba   : > { %v6956_v29 = vpop.f32.mrf.mxu0 }
 0x8bb   : > { %v7533_v9 = vadd.f32 %v7469_v21, %v7405_v53  ;;  %v6601_v17 = vadd.f32 %v6600_v60, %v6237_v8  ;;  %6701 = vmatmul.f32.gmra.mxu3 %v14255_v55  ;;  %7293 = vmatmul.f32.gmra.mxu1 %v14256_v15  ;;  %v14267_v8 = vld [vmem:[#allocation196_spill] sm:$0xff] }
 0x8bc   : > { %v7472_v55 = vld [vmem:[#allocation2 + $0x30] sm:$0xff] }
 0x8bd   : > { %7597 = vst [vmem:[#allocation2 + $0x1e8] sm:$0xff] %v7533_v9  ;;  %v6953_v47 = vadd.f32 %v6952_v20, %v6601_v17  ;;  %6320 = vmatmul.f32.gmra.mxu2 %v11275_v10  ;;  %7019 = vmatmul.f32.gmra.mxu0 %v14256_v15  ;;  %v14261_v10 = vld [vmem:[#allocation186_spill] sm:$0xff]  ;;  %v14262_v20 = vld [vmem:[#allocation193_spill] sm:$0xff] }
 0x8be   : > { %v6606_v25 = vpop.f32.mrf.mxu3  ;;  %v5944_v40 = vadd.f32 %v14263_v13, %v14262_v20 }
 0x8bf   : > { %v7227_v4 = vadd.f32 %v7226_v44, %v6953_v47 }
 0x8c0   : > { %v6241_v18 = vpop.f32.mrf.mxu2  ;;  %v7234_v59 = vpop.f32.mrf.mxu1 }
 0x8c1   : > { %v7406_v1 = vadd.f32 %v7227_v4, %v14259_v26  ;;  %v6242_v11 = vadd.f32 %v6241_v18, %v5940_v30  ;;  %v14270_v18 = vand.u32 4294901760, %v11338_v57 }
 0x8c2   : > { %v6960_v61 = vpop.f32.mrf.mxu0 }
 0x8c3   : > { %v7534_v43 = vadd.f32 %v7470_v34, %v7406_v1  ;;  %v6607_v49 = vadd.f32 %v6606_v25, %v6242_v11  ;;  %6707 = vmatmul.f32.gmra.mxu3 %v14260_v31  ;;  %7297 = vmatmul.f32.gmra.mxu1 %v14261_v10  ;;  %v14269_v25 = vld [vmem:[#allocation197_spill] sm:$0xff]  ;;  %v14272_v1 = vld [vmem:[#allocation199_spill] sm:$0xff] }
 0x8c4   : > { %v14273_v11 = vld [vmem:[#allocation41_spill] sm:$0xff] }
 0x8c5   : > { %7598 = vst [vmem:[#allocation2 + $0xf8] sm:$0xff] %v7534_v43  ;;  %v6957_v63 = vadd.f32 %v6956_v29, %v6607_v49  ;;  %6325 = vmatmul.f32.gmra.mxu2 %v11296_v3  ;;  %7023 = vmatmul.f32.gmra.mxu0 %v14261_v10  ;;  %v14266_v3 = vld [vmem:[#allocation189_spill] sm:$0xff]  ;;  %v14268_v29 = vld [vmem:[#allocation38_spill] sm:$0xff] }
 0x8c6   : > { %v6612_v44 = vpop.f32.mrf.mxu3  ;;  %v5948_v9 = vadd.f32 %v14268_v29, %v14267_v8  ;;  %v7473_v49 = vld [vmem:[#allocation2 + $0x1e0] sm:$0xff] }
 0x8c7   : > { %v7231_v56 = vadd.f32 %v7230_v5, %v6957_v63  ;;  %v14274_v63 = vld [vmem:[#allocation200_spill] sm:$0xff] }
 0x8c8   : > { %v6246_v41 = vpop.f32.mrf.mxu2  ;;  %v7238_v60 = vpop.f32.mrf.mxu1 }
 0x8c9   : > { %v7407_v33 = vadd.f32 %v7231_v56, %v14264_v24  ;;  %v6247_v16 = vadd.f32 %v6246_v41, %v5944_v40  ;;  %v14277_v24 = vld [vmem:[#allocation202_spill] sm:$0xff] }
 0x8ca   : > { %v6964_v62 = vpop.f32.mrf.mxu0 }
 0x8cb   : > { %v7535_v21 = vadd.f32 %v7471_v51, %v7407_v33  ;;  %v6613_v32 = vadd.f32 %v6612_v44, %v6247_v16  ;;  %6713 = vmatmul.f32.gmra.mxu3 %v14265_v35  ;;  %7301 = vmatmul.f32.gmra.mxu1 %v14266_v3  ;;  %v14275_v51 = vand.u32 4294901760, %v11359_v23  ;;  %v14278_v33 = vld [vmem:[#allocation40_spill] sm:$0xff] }
 0x8cc   : > { %v5956_v16 = vadd.f32 %v14278_v33, %v14277_v24  ;;  %v14290_v33 = vand.u32 4294901760, %v11422_v38 }
 0x8cd   : > { %7599 = vst [vmem:[#allocation2 + $0x160] sm:$0xff] %v7535_v21  ;;  %v6961_v53 = vadd.f32 %v6960_v61, %v6613_v32  ;;  %6330 = vmatmul.f32.gmra.mxu2 %v11317_v28  ;;  %7027 = vmatmul.f32.gmra.mxu0 %v14266_v3  ;;  %v14271_v28 = vld [vmem:[#allocation192_spill] sm:$0xff]  ;;  %v5952_v61 = vadd.f32 %v14273_v11, %v14272_v1  ;;  %v7474_v21 = vld [vmem:[#allocation2] sm:$0xff]  ;;  %v14279_v3 = vld [vmem:[#allocation203_spill] sm:$0xff] }
 0x8ce   : > { %v6618_v5 = vpop.f32.mrf.mxu3 }
 0x8cf   : > { %v7235_v17 = vadd.f32 %v7234_v59, %v6961_v53 }
 0x8d0   : > { %v6251_v15 = vpop.f32.mrf.mxu2  ;;  %v7242_v47 = vpop.f32.mrf.mxu1 }
 0x8d1   : > { %v7408_v14 = vadd.f32 %v7235_v17, %v14269_v25  ;;  %v6252_v48 = vadd.f32 %v6251_v15, %v5948_v9  ;;  %v14280_v17 = vand.u32 4294901760, %v11380_v6  ;;  %v14283_v25 = vld [vmem:[#allocation43_spill] sm:$0xff] }
 0x8d2   : > { %v6968_v30 = vpop.f32.mrf.mxu0 }
 0x8d3   : > { %v7536_v4 = vadd.f32 %v7472_v55, %v7408_v14  ;;  %v6619_v34 = vadd.f32 %v6618_v5, %v6252_v48  ;;  %6719 = vmatmul.f32.gmra.mxu3 %v14270_v18  ;;  %7305 = vmatmul.f32.gmra.mxu1 %v14271_v28  ;;  %v14284_v18 = vld [vmem:[#allocation206_spill] sm:$0xff] }
 0x8d5   : > { %7600 = vst [vmem:[#allocation2 + $0x30] sm:$0xff] %v7536_v4  ;;  %v6965_v26 = vadd.f32 %v6964_v62, %v6619_v34  ;;  %6335 = vmatmul.f32.gmra.mxu2 %v11338_v57  ;;  %7031 = vmatmul.f32.gmra.mxu0 %v14271_v28  ;;  %v14276_v57 = vld [vmem:[#allocation195_spill] sm:$0xff] }
 0x8d6   : > { %v6624_v59 = vpop.f32.mrf.mxu3 }
 0x8d7   : > { %v7239_v43 = vadd.f32 %v7238_v60, %v6965_v26 }
 0x8d8   : > { %v6256_v31 = vpop.f32.mrf.mxu2  ;;  %v7246_v10 = vpop.f32.mrf.mxu1 }
 0x8d9   : > { %v7409_v44 = vadd.f32 %v7239_v43, %v14274_v63  ;;  %v6257_v20 = vadd.f32 %v6256_v31, %v5952_v61  ;;  %v14285_v61 = vand.u32 4294901760, %v11401_v27  ;;  %v14287_v31 = vld [vmem:[#allocation208_spill] sm:$0xff] }
 0x8da   : > { %v6972_v13 = vpop.f32.mrf.mxu0 }
 0x8db   : > { %v7537_v40 = vadd.f32 %v7473_v49, %v7409_v44  ;;  %v6625_v56 = vadd.f32 %v6624_v59, %v6257_v20  ;;  %6725 = vmatmul.f32.gmra.mxu3 %v14275_v51  ;;  %7309 = vmatmul.f32.gmra.mxu1 %v14276_v57  ;;  %v7476_v20 = vld [vmem:[#allocation2 + $0x8] sm:$0xff] }
 0x8dd   : > { %7601 = vst [vmem:[#allocation2 + $0x1e0] sm:$0xff] %v7537_v40  ;;  %v6969_v41 = vadd.f32 %v6968_v30, %v6625_v56  ;;  %6340 = vmatmul.f32.gmra.mxu2 %v11359_v23  ;;  %7035 = vmatmul.f32.gmra.mxu0 %v14276_v57  ;;  %v14281_v23 = vld [vmem:[#allocation198_spill] sm:$0xff]  ;;  %v7475_v30 = vld [vmem:[#allocation2 + $0xf0] sm:$0xff]  ;;  %v14289_v56 = vld [vmem:[#allocation209_spill] sm:$0xff] }
 0x8de   : > { %v6630_v60 = vpop.f32.mrf.mxu3 }
 0x8df   : > { %v7243_v62 = vadd.f32 %v7242_v47, %v6969_v41  ;;  %v14282_v47 = vld [vmem:[#allocation205_spill] sm:$0xff] }
 0x8e0   : > { %v6261_v32 = vpop.f32.mrf.mxu2  ;;  %v7250_v35 = vpop.f32.mrf.mxu1  ;;  %v5960_v14 = vadd.f32 %v14283_v25, %v14282_v47  ;;  %v14295_v47 = vand.u32 4294901760, %v11443_v54 }
 0x8e1   : > { %v7410_v53 = vadd.f32 %v7243_v62, %v14279_v3  ;;  %v6262_v5 = vadd.f32 %v6261_v32, %v5956_v16  ;;  %v14293_v32 = vld [vmem:[#allocation52_spill] sm:$0xff] }
 0x8e2   : > { %v6976_v8 = vpop.f32.mrf.mxu0 }
 0x8e3   : > { %v7538_v29 = vadd.f32 %v7474_v21, %v7410_v53  ;;  %v6631_v9 = vadd.f32 %v6630_v60, %v6262_v5  ;;  %6731 = vmatmul.f32.gmra.mxu3 %v14280_v17  ;;  %7313 = vmatmul.f32.gmra.mxu1 %v14281_v23  ;;  %v14292_v21 = vld [vmem:[#allocation211_spill] sm:$0xff] }
 0x8e4   : > { %v7477_v53 = vld [vmem:[#allocation2 + $0x148] sm:$0xff] }
 0x8e5   : > { %7602 = vst [vmem:[#allocation2] sm:$0xff] %v7538_v29  ;;  %v6973_v55 = vadd.f32 %v6972_v13, %v6631_v9  ;;  %6345 = vmatmul.f32.gmra.mxu2 %v11380_v6  ;;  %7039 = vmatmul.f32.gmra.mxu0 %v14281_v23  ;;  %v14286_v6 = vld [vmem:[#allocation201_spill] sm:$0xff]  ;;  %v14294_v29 = vld [vmem:[#allocation212_spill] sm:$0xff] }
 0x8e6   : > { %v6636_v15 = vpop.f32.mrf.mxu3 }
 0x8e7   : > { %v7247_v48 = vadd.f32 %v7246_v10, %v6973_v55  ;;  %v14288_v10 = vld [vmem:[#allocation42_spill] sm:$0xff] }
 0x8e8   : > { %v6266_v4 = vpop.f32.mrf.mxu2  ;;  %v7254_v34 = vpop.f32.mrf.mxu1  ;;  %v5964_v63 = vadd.f32 %v14288_v10, %v14287_v31 }
 0x8e9   : > { %v7411_v28 = vadd.f32 %v7247_v48, %v14284_v18  ;;  %v6267_v26 = vadd.f32 %v6266_v4, %v5960_v14  ;;  %v14297_v48 = vld [vmem:[#allocation214_spill] sm:$0xff]  ;;  %v7478_v18 = vld [vmem:[#allocation2 + $0x1d0] sm:$0xff] }
 0x8ea   : > { %v6980_v59 = vpop.f32.mrf.mxu0 }
 0x8eb   : > { %v7539_v1 = vadd.f32 %v7475_v30, %v7411_v28  ;;  %v6637_v11 = vadd.f32 %v6636_v15, %v6267_v26  ;;  %6737 = vmatmul.f32.gmra.mxu3 %v14285_v61  ;;  %7317 = vmatmul.f32.gmra.mxu1 %v14286_v6  ;;  %v14298_v30 = vld [vmem:[#allocation45_spill] sm:$0xff] }
 0x8ec   : > { %v5972_v4 = vadd.f32 %v14298_v30, %v14297_v48  ;;  %v14312_v48 = vld [vmem:[#allocation223_spill] sm:$0xff]  ;;  %v14313_v30 = vld [vmem:[#allocation48_spill] sm:$0xff] }
 0x8ed   : > { %7603 = vst [vmem:[#allocation2 + $0xf0] sm:$0xff] %v7539_v1  ;;  %v6977_v43 = vadd.f32 %v6976_v8, %v6637_v11  ;;  %6350 = vmatmul.f32.gmra.mxu2 %v11401_v27  ;;  %7043 = vmatmul.f32.gmra.mxu0 %v14286_v6  ;;  %v14291_v27 = vld [vmem:[#allocation204_spill] sm:$0xff] }
 0x8ee   : > { %v6642_v49 = vpop.f32.mrf.mxu3 }
 0x8ef   : > { %v7251_v44 = vadd.f32 %v7250_v35, %v6977_v43  ;;  %v5968_v35 = vadd.f32 %v14293_v32, %v14292_v21  ;;  %v14307_v32 = vld [vmem:[#allocation220_spill] sm:$0xff] }
 0x8f0   : > { %v6271_v13 = vpop.f32.mrf.mxu2  ;;  %v7258_v40 = vpop.f32.mrf.mxu1 }
 0x8f1   : > { %v7412_v51 = vadd.f32 %v7251_v44, %v14289_v56  ;;  %v6272_v57 = vadd.f32 %v6271_v13, %v5964_v63  ;;  %v14302_v63 = vld [vmem:[#allocation217_spill] sm:$0xff]  ;;  %v14303_v44 = vld [vmem:[#allocation44_spill] sm:$0xff] }
 0x8f2   : > { %v6984_v41 = vpop.f32.mrf.mxu0 }
 0x8f3   : > { %v7540_v60 = vadd.f32 %v7476_v20, %v7412_v51  ;;  %v6643_v24 = vadd.f32 %v6642_v49, %v6272_v57  ;;  %6743 = vmatmul.f32.gmra.mxu3 %v14290_v33  ;;  %7321 = vmatmul.f32.gmra.mxu1 %v14291_v27  ;;  %v14300_v49 = vand.u32 4294901760, %v11464_v22  ;;  %v5976_v20 = vadd.f32 %v14303_v44, %v14302_v63  ;;  %v14304_v57 = vld [vmem:[#allocation218_spill] sm:$0xff] }
 0x8f4   : > { %v14318_v63 = vld [vmem:[#allocation46_spill] sm:$0xff] }
 0x8f5   : > { %7604 = vst [vmem:[#allocation2 + $0x8] sm:$0xff] %v7540_v60  ;;  %v6981_v16 = vadd.f32 %v6980_v59, %v6643_v24  ;;  %6355 = vmatmul.f32.gmra.mxu2 %v11422_v38  ;;  %7047 = vmatmul.f32.gmra.mxu0 %v14291_v27  ;;  %v14296_v38 = vld [vmem:[#allocation207_spill] sm:$0xff] }
 0x8f6   : > { %v6648_v62 = vpop.f32.mrf.mxu3  ;;  %v14299_v59 = vld [vmem:[#allocation215_spill] sm:$0xff] }
 0x8f7   : > { %v7255_v3 = vadd.f32 %v7254_v34, %v6981_v16  ;;  %v14305_v16 = vand.u32 4294901760, %v11485_v0 }
 0x8f8   : > { %v6276_v5 = vpop.f32.mrf.mxu2  ;;  %v7262_v8 = vpop.f32.mrf.mxu1 }
 0x8f9   : > { %v7413_v9 = vadd.f32 %v7255_v3, %v14294_v29  ;;  %v6277_v17 = vadd.f32 %v6276_v5, %v5968_v35  ;;  %v14308_v35 = vld [vmem:[#allocation58_spill] sm:$0xff] }
 0x8fa   : > { %v6988_v23 = vpop.f32.mrf.mxu0  ;;  %v5980_v3 = vadd.f32 %v14308_v35, %v14307_v32  ;;  %v7480_v5 = vld [vmem:[#allocation2 + $0xc8] sm:$0xff] }
 0x8fb   : > { %v7541_v55 = vadd.f32 %v7477_v53, %v7413_v9  ;;  %v6649_v15 = vadd.f32 %v6648_v62, %v6277_v17  ;;  %6749 = vmatmul.f32.gmra.mxu3 %v14295_v47  ;;  %7325 = vmatmul.f32.gmra.mxu1 %v14296_v38  ;;  %v14309_v9 = vld [vmem:[#allocation221_spill] sm:$0xff] }
 0x8fd   : > { %7605 = vst [vmem:[#allocation2 + $0x148] sm:$0xff] %v7541_v55  ;;  %v6985_v25 = vadd.f32 %v6984_v41, %v6649_v15  ;;  %6360 = vmatmul.f32.gmra.mxu2 %v11443_v54  ;;  %7051 = vmatmul.f32.gmra.mxu0 %v14296_v38  ;;  %v14301_v54 = vld [vmem:[#allocation210_spill] sm:$0xff]  ;;  %v14310_v38 = vand.u32 4294901760, %v11506_v39 }
 0x8fe   : > { %v6654_v14 = vpop.f32.mrf.mxu3 }
 0x8ff   : > { %v7259_v34 = vadd.f32 %v7258_v40, %v6985_v25  ;;  %v7479_v40 = vld [vmem:[#allocation2 + $0x100] sm:$0xff] }
 0x900   : > { %v6281_v28 = vpop.f32.mrf.mxu2  ;;  %v7266_v26 = vpop.f32.mrf.mxu1 }
 0x901   : > { %v7414_v1 = vadd.f32 %v7259_v34, %v14299_v59  ;;  %v6282_v11 = vadd.f32 %v6281_v28, %v5972_v4  ;;  %v5984_v4 = vadd.f32 %v14313_v30, %v14312_v48  ;;  %v14314_v59 = vld [vmem:[#allocation224_spill] sm:$0xff]  ;;  %v7484_v30 = vld [vmem:[#allocation2 + $0x128] sm:$0xff] }
 0x902   : > { %v6992_v61 = vpop.f32.mrf.mxu0 }
 0x903   : > { %v7542_v6 = vadd.f32 %v7478_v18, %v7414_v1  ;;  %v6655_v43 = vadd.f32 %v6654_v14, %v6282_v11  ;;  %6755 = vmatmul.f32.gmra.mxu3 %v14300_v49  ;;  %7329 = vmatmul.f32.gmra.mxu1 %v14301_v54  ;;  %v7481_v18 = vld [vmem:[#allocation2 + $0x40] sm:$0xff]  ;;  %v14315_v49 = vand.u32 4294901760, %v11527_v42 }
 0x905   : > { %7606 = vst [vmem:[#allocation2 + $0x1d0] sm:$0xff] %v7542_v6  ;;  %v6989_v31 = vadd.f32 %v6988_v23, %v6655_v43  ;;  %6365 = vmatmul.f32.gmra.mxu2 %v11464_v22  ;;  %7055 = vmatmul.f32.gmra.mxu0 %v14301_v54  ;;  %v14306_v22 = vld [vmem:[#allocation213_spill] sm:$0xff] }
 0x906   : > { %v6660_v10 = vpop.f32.mrf.mxu3 }
 0x907   : > { %v7263_v13 = vadd.f32 %v7262_v8, %v6989_v31 }
 0x908   : > { %v6286_v56 = vpop.f32.mrf.mxu2  ;;  %v7270_v51 = vpop.f32.mrf.mxu1 }
 0x909   : > { %v7415_v41 = vadd.f32 %v7263_v13, %v14304_v57  ;;  %v6287_v60 = vadd.f32 %v6286_v56, %v5976_v20  ;;  %v7482_v13 = vld [vmem:[#allocation2 + $0x1f8] sm:$0xff] }
 0x90a   : > { %v6996_v24 = vpop.f32.mrf.mxu0 }
 0x90b   : > { %v7543_v33 = vadd.f32 %v7479_v40, %v7415_v41  ;;  %v6661_v27 = vadd.f32 %v6660_v10, %v6287_v60  ;;  %6761 = vmatmul.f32.gmra.mxu3 %v14305_v16  ;;  %7333 = vmatmul.f32.gmra.mxu1 %v14306_v22  ;;  %v14317_v10 = vld [vmem:[#allocation226_spill] sm:$0xff] }
 0x90c   : > { %v5988_v44 = vadd.f32 %v14318_v63, %v14317_v10  ;;  %v7485_v10 = vld [vmem:[#allocation2 + $0x1a0] sm:$0xff] }
 0x90d   : > { %7607 = vst [vmem:[#allocation2 + $0x100] sm:$0xff] %v7543_v33  ;;  %v6993_v62 = vadd.f32 %v6992_v61, %v6661_v27  ;;  %6370 = vmatmul.f32.gmra.mxu2 %v11485_v0  ;;  %7059 = vmatmul.f32.gmra.mxu0 %v14306_v22  ;;  %v14311_v0 = vld [vmem:[#allocation216_spill] sm:$0xff]  ;;  %v14320_v27 = vand.u32 4294901760, %v11548_v12 }
 0x90e   : > { %v6666_v21 = vpop.f32.mrf.mxu3 }
 0x90f   : > { %v7267_v53 = vadd.f32 %v7266_v26, %v6993_v62  ;;  %v14322_v62 = vld [vmem:[#allocation229_spill] sm:$0xff] }
 0x910   : > { %v6291_v8 = vpop.f32.mrf.mxu2  ;;  %v7274_v29 = vpop.f32.mrf.mxu1 }
 0x911   : > { %v7416_v17 = vadd.f32 %v7267_v53, %v14309_v9  ;;  %v6292_v23 = vadd.f32 %v6291_v8, %v5980_v3  ;;  %v7483_v3 = vld [vmem:[#allocation2 + $0x20] sm:$0xff] }
 0x912   : > { %v7000_v55 = vpop.f32.mrf.mxu0  ;;  %v14324_v8 = vld [vmem:[#allocation230_spill] sm:$0xff] }
 0x913   : > { %v7544_v15 = vadd.f32 %v7480_v5, %v7416_v17  ;;  %v6667_v47 = vadd.f32 %v6666_v21, %v6292_v23  ;;  %6767 = vmatmul.f32.gmra.mxu3 %v14310_v38  ;;  %7337 = vmatmul.f32.gmra.mxu1 %v14311_v0  ;;  %v14323_v21 = vld [vmem:[#allocation65_spill] sm:$0xff] }
 0x914   : > { %v5992_v32 = vadd.f32 %v14323_v21, %v14322_v62 }
 0x915   : > { %7608 = vst [vmem:[#allocation2 + $0xc8] sm:$0xff] %v7544_v15  ;;  %v6997_v25 = vadd.f32 %v6996_v24, %v6667_v47  ;;  %6375 = vmatmul.f32.gmra.mxu2 %v11506_v39  ;;  %7063 = vmatmul.f32.gmra.mxu0 %v14311_v0  ;;  %v14316_v39 = vld [vmem:[#allocation219_spill] sm:$0xff]  ;;  %v14325_v15 = vand.u32 4294901760, %v11569_v36  ;;  %v14327_v0 = vld [vmem:[#allocation232_spill] sm:$0xff] }
 0x916   : > { %v6672_v14 = vpop.f32.mrf.mxu3 }
 0x917   : > { %v7271_v34 = vadd.f32 %v7270_v51, %v6997_v25  ;;  %v14319_v51 = vld [vmem:[#allocation227_spill] sm:$0xff]  ;;  %v14328_v25 = vld [vmem:[#allocation54_spill] sm:$0xff] }
 0x918   : > { %v6296_v28 = vpop.f32.mrf.mxu2  ;;  %v7278_v26 = vpop.f32.mrf.mxu1 }
 0x919   : > { %v7417_v1 = vadd.f32 %v7271_v34, %v14314_v59  ;;  %v6297_v11 = vadd.f32 %v6296_v28, %v5984_v4 }
 0x91a   : > { %v7004_v61 = vpop.f32.mrf.mxu0 }
 0x91b   : > { %v7545_v6 = vadd.f32 %v7481_v18, %v7417_v1  ;;  %v6673_v43 = vadd.f32 %v6672_v14, %v6297_v11  ;;  %6773 = vmatmul.f32.gmra.mxu3 %v14315_v49  ;;  %7341 = vmatmul.f32.gmra.mxu1 %v14316_v39  ;;  %v5996_v14 = vadd.f32 %v14328_v25, %v14327_v0  ;;  %v14329_v18 = vld [vmem:[#allocation233_spill] sm:$0xff]  ;;  %v14332_v49 = vld [vmem:[#allocation235_spill] sm:$0xff] }
 0x91c   : > { %v14344_v25 = vld [vmem:[#allocation241_spill] sm:$0xff] }
 0x91d   : > { %7609 = vst [vmem:[#allocation2 + $0x40] sm:$0xff] %v7545_v6  ;;  %v7001_v54 = vadd.f32 %v7000_v55, %v6673_v43  ;;  %6380 = vmatmul.f32.gmra.mxu2 %v11527_v42  ;;  %7067 = vmatmul.f32.gmra.mxu0 %v14316_v39  ;;  %v14321_v42 = vld [vmem:[#allocation222_spill] sm:$0xff]  ;;  %v14333_v39 = vld [vmem:[#allocation51_spill] sm:$0xff] }
 0x91e   : > { %v6678_v31 = vpop.f32.mrf.mxu3 }
 0x91f   : > { %v7275_v20 = vadd.f32 %v7274_v29, %v7001_v54  ;;  %v6000_v54 = vadd.f32 %v14333_v39, %v14332_v49  ;;  %v14349_v49 = vld [vmem:[#allocation243_spill] sm:$0xff] }
 0x920   : > { %v6301_v40 = vpop.f32.mrf.mxu2  ;;  %v7282_v56 = vpop.f32.mrf.mxu1 }
 0x921   : > { %v7418_v57 = vadd.f32 %v7275_v20, %v14319_v51  ;;  %v6302_v41 = vadd.f32 %v6301_v40, %v5988_v44  ;;  %v14334_v20 = vld [vmem:[#allocation236_spill] sm:$0xff] }
 0x922   : > { %v7008_v60 = vpop.f32.mrf.mxu0 }
 0x923   : > { %v7546_v24 = vadd.f32 %v7482_v13, %v7418_v57  ;;  %v6679_v33 = vadd.f32 %v6678_v31, %v6302_v41  ;;  %6779 = vmatmul.f32.gmra.mxu3 %v14320_v27  ;;  %7345 = vmatmul.f32.gmra.mxu1 %v14321_v42  ;;  %v14335_v41 = vand.u32 4294901760, %v11611_v2  ;;  %v14338_v27 = vld [vmem:[#allocation72_spill] sm:$0xff] }
 0x925   : > { %7610 = vst [vmem:[#allocation2 + $0x1f8] sm:$0xff] %v7546_v24  ;;  %v7005_v16 = vadd.f32 %v7004_v61, %v6679_v33  ;;  %6385 = vmatmul.f32.gmra.mxu2 %v11548_v12  ;;  %7071 = vmatmul.f32.gmra.mxu0 %v14321_v42  ;;  %v14326_v12 = vld [vmem:[#allocation225_spill] sm:$0xff]  ;;  %v14330_v61 = vand.u32 4294901760, %v11590_v52  ;;  %v14337_v33 = vld [vmem:[#allocation238_spill] sm:$0xff] }
 0x926   : > { %v6684_v22 = vpop.f32.mrf.mxu3  ;;  %v6004_v42 = vadd.f32 %v14338_v27, %v14337_v33 }
 0x927   : > { %v7279_v35 = vadd.f32 %v7278_v26, %v7005_v16 }
 0x928   : > { %v6306_v53 = vpop.f32.mrf.mxu2  ;;  %v7286_v5 = vpop.f32.mrf.mxu1 }
 0x929   : > { %v7419_v29 = vadd.f32 %v7279_v35, %v14324_v8  ;;  %v6307_v9 = vadd.f32 %v6306_v53, %v5992_v32  ;;  %v14339_v32 = vld [vmem:[#allocation239_spill] sm:$0xff] }
 0x92a   : > { %v7012_v17 = vpop.f32.mrf.mxu0 }
 0x92b   : > { %v7547_v23 = vadd.f32 %v7483_v3, %v7419_v29  ;;  %v6685_v55 = vadd.f32 %v6684_v22, %v6307_v9  ;;  %6785 = vmatmul.f32.gmra.mxu3 %v14325_v15  ;;  %7349 = vmatmul.f32.gmra.mxu1 %v14326_v12  ;;  %v7486_v22 = vld [vmem:[#allocation2 + $0x1f0] sm:$0xff]  ;;  %v14340_v29 = vand.u32 4294901760, %v11632_v19 }
 0x92d   : > { %7611 = vst [vmem:[#allocation2 + $0x20] sm:$0xff] %v7547_v23  ;;  %v7009_v47 = vadd.f32 %v7008_v60, %v6685_v55  ;;  %6390 = vmatmul.f32.gmra.mxu2 %v11569_v36  ;;  %7075 = vmatmul.f32.gmra.mxu0 %v14326_v12  ;;  %v14331_v36 = vld [vmem:[#allocation228_spill] sm:$0xff]  ;;  %v14343_v55 = vld [vmem:[#allocation61_spill] sm:$0xff] }
 0x92e   : > { %v6690_v38 = vpop.f32.mrf.mxu3  ;;  %v14342_v23 = vld [vmem:[#allocation240_spill] sm:$0xff] }
 0x92f   : > { %v7283_v48 = vadd.f32 %v7282_v56, %v7009_v47  ;;  %v6008_v15 = vadd.f32 %v14343_v55, %v14342_v23  ;;  %v7487_v47 = vld [vmem:[#allocation2 + $0xe8] sm:$0xff] }
 0x930   : > { %v6311_v4 = vpop.f32.mrf.mxu2  ;;  %v7290_v34 = vpop.f32.mrf.mxu1 }
 0x931   : > { %v7420_v28 = vadd.f32 %v7283_v48, %v14329_v18  ;;  %v6312_v26 = vadd.f32 %v6311_v4, %v5996_v14  ;;  %v14345_v18 = vand.u32 4294901760, %v11653_v46 }
 0x932   : > { %v7016_v59 = vpop.f32.mrf.mxu0 }
 0x933   : > { %v7548_v1 = vadd.f32 %v7484_v30, %v7420_v28  ;;  %v6691_v11 = vadd.f32 %v6690_v38, %v6312_v26  ;;  %6791 = vmatmul.f32.gmra.mxu3 %v14330_v61  ;;  %7353 = vmatmul.f32.gmra.mxu1 %v14331_v36 }
 0x935   : > { %7612 = vst [vmem:[#allocation2 + $0x128] sm:$0xff] %v7548_v1  ;;  %v7013_v6 = vadd.f32 %v7012_v17, %v6691_v11  ;;  %6395 = vmatmul.f32.gmra.mxu2 %v11590_v52  ;;  %7079 = vmatmul.f32.gmra.mxu0 %v14331_v36  ;;  %v14336_v52 = vld [vmem:[#allocation231_spill] sm:$0xff]  ;;  %v14348_v1 = vld [vmem:[#allocation57_spill] sm:$0xff] }
 0x936   : > { %v6696_v43 = vpop.f32.mrf.mxu3  ;;  %v7488_v36 = vld [vmem:[#allocation2 + $0x78] sm:$0xff] }
 0x937   : > { %v7287_v31 = vadd.f32 %v7286_v5, %v7013_v6 }
 0x938   : > { %v6316_v63 = vpop.f32.mrf.mxu2  ;;  %v7294_v44 = vpop.f32.mrf.mxu1 }
 0x939   : > { %v7421_v13 = vadd.f32 %v7287_v31, %v14334_v20  ;;  %v6317_v40 = vadd.f32 %v6316_v63, %v6000_v54 }
 0x93a   : > { %v7020_v56 = vpop.f32.mrf.mxu0 }
 0x93b   : > { %v7549_v51 = vadd.f32 %v7485_v10, %v7421_v13  ;;  %v6697_v57 = vadd.f32 %v6696_v43, %v6317_v40  ;;  %6797 = vmatmul.f32.gmra.mxu3 %v14335_v41  ;;  %7357 = vmatmul.f32.gmra.mxu1 %v14336_v52  ;;  %v14351_v13 = vld [vmem:[#allocation79_spill] sm:$0xff] }
 0x93c   : > { %v6016_v40 = vadd.f32 %v14351_v13, %v11704_v37  ;;  %v14354_v37 = vld [vmem:[#allocation247_spill] sm:$0xff]  ;;  %v14367_v13 = vld [vmem:[#allocation86_spill] sm:$0xff] }
 0x93d   : > { %7613 = vst [vmem:[#allocation2 + $0x1a0] sm:$0xff] %v7549_v51  ;;  %v7017_v60 = vadd.f32 %v7016_v59, %v6697_v57  ;;  %6400 = vmatmul.f32.gmra.mxu2 %v11611_v2  ;;  %7083 = vmatmul.f32.gmra.mxu0 %v14336_v52  ;;  %v14341_v2 = vld [vmem:[#allocation234_spill] sm:$0xff]  ;;  %v7489_v51 = vld [vmem:[#allocation2 + $0x70] sm:$0xff]  ;;  %v14352_v52 = vld [vmem:[#allocation245_spill] sm:$0xff] }
 0x93e   : > { %v6702_v24 = vpop.f32.mrf.mxu3  ;;  %v14347_v59 = vld [vmem:[#allocation242_spill] sm:$0xff] }
 0x93f   : > { %v7291_v16 = vadd.f32 %v7290_v34, %v7017_v60  ;;  %v6012_v11 = vadd.f32 %v14348_v1, %v14347_v59  ;;  %v14363_v59 = vld [vmem:[#allocation78_spill] sm:$0xff]  ;;  %v14364_v1 = vld [vmem:[#allocation252_spill] sm:$0xff] }
 0x940   : > { %v6321_v62 = vpop.f32.mrf.mxu2  ;;  %v7298_v21 = vpop.f32.mrf.mxu1 }
 0x941   : > { %v7422_v35 = vadd.f32 %v7291_v16, %v14339_v32  ;;  %v6322_v3 = vadd.f32 %v6321_v62, %v6004_v42  ;;  %v14353_v16 = vand.u32 4294901760, %v11695_v50  ;;  %v7490_v32 = vld [vmem:[#allocation2 + $0x90] sm:$0xff] }
 0x942   : > { %v7024_v53 = vpop.f32.mrf.mxu0 }
 0x943   : > { %v7550_v5 = vadd.f32 %v7486_v22, %v7422_v35  ;;  %v6703_v8 = vadd.f32 %v6702_v24, %v6322_v3  ;;  %6803 = vmatmul.f32.gmra.mxu3 %v14340_v29  ;;  %7361 = vmatmul.f32.gmra.mxu1 %v14341_v2  ;;  %v14355_v22 = vld [vmem:[#allocation246_spill] sm:$0xff] }
 0x944   : > { %v6020_v62 = vadd.f32 %v14355_v22, %v14354_v37  ;;  %v14370_v37 = vld [vmem:[#allocation71_spill] sm:$0xff] }
 0x945   : > { %7614 = vst [vmem:[#allocation2 + $0x1f0] sm:$0xff] %v7550_v5  ;;  %v7021_v9 = vadd.f32 %v7020_v56, %v6703_v8  ;;  %6405 = vmatmul.f32.gmra.mxu2 %v11632_v19  ;;  %7087 = vmatmul.f32.gmra.mxu0 %v14341_v2  ;;  %v14346_v19 = vld [vmem:[#allocation237_spill] sm:$0xff] }
 0x946   : > { %v6708_v17 = vpop.f32.mrf.mxu3 }
 0x947   : > { %v7295_v12 = vadd.f32 %v7294_v44, %v7021_v9  ;;  %v14350_v44 = vand.u32 4294901760, %v11674_v7 }
 0x948   : > { %v6326_v38 = vpop.f32.mrf.mxu2  ;;  %v7302_v0 = vpop.f32.mrf.mxu1 }
 0x949   : > { %v7423_v14 = vadd.f32 %v7295_v12, %v14344_v25  ;;  %v6327_v48 = vadd.f32 %v6326_v38, %v6008_v15  ;;  %v14360_v15 = vld [vmem:[#allocation250_spill] sm:$0xff]  ;;  %v14361_v12 = vld [vmem:[#allocation249_spill] sm:$0xff] }
 0x94a   : > { %v7028_v30 = vpop.f32.mrf.mxu0 }
 0x94b   : > { %v7551_v4 = vadd.f32 %v7487_v47, %v7423_v14  ;;  %v6709_v34 = vadd.f32 %v6708_v17, %v6327_v48  ;;  %6809 = vmatmul.f32.gmra.mxu3 %v14345_v18  ;;  %7365 = vmatmul.f32.gmra.mxu1 %v14346_v19  ;;  %v14357_v17 = vld [vmem:[#allocation68_spill] sm:$0xff]  ;;  %v6024_v47 = vadd.f32 %v14361_v12, %v14360_v15  ;;  %v14362_v48 = vld [vmem:[#allocation251_spill] sm:$0xff] }
 0x94c   : > { %v14358_v23 = vand.u32 4294901760, %v14357_v17  ;;  %v7495_v15 = vld [vmem:[#allocation2 + $0xa8] sm:$0xff] }
 0x94d   : > { %7615 = vst [vmem:[#allocation2 + $0xe8] sm:$0xff] %v7551_v4  ;;  %v7025_v28 = vadd.f32 %v7024_v53, %v6709_v34  ;;  %6410 = vmatmul.f32.gmra.mxu2 %v11653_v46  ;;  %7091 = vmatmul.f32.gmra.mxu0 %v14346_v19  ;;  %v14356_v53 = vld [vmem:[#allocation248_spill] sm:$0xff] }
 0x94e   : > { %v6714_v26 = vpop.f32.mrf.mxu3 }
 0x94f   : > { %v7299_v61 = vadd.f32 %v7298_v21, %v7025_v28 }
 0x950   : > { %v6331_v6 = vpop.f32.mrf.mxu2  ;;  %v7306_v43 = vpop.f32.mrf.mxu1 }
 0x951   : > { %v7424_v39 = vadd.f32 %v7299_v61, %v14349_v49  ;;  %v6332_v54 = vadd.f32 %v6331_v6, %v6012_v11  ;;  %v6028_v11 = vadd.f32 %v14364_v1, %v14363_v59  ;;  %v14365_v49 = vld [vmem:[#allocation253_spill] sm:$0xff]  ;;  %v7496_v59 = vld [vmem:[#allocation2 + $0x1c8] sm:$0xff] }
 0x952   : > { %v7032_v31 = vpop.f32.mrf.mxu0 }
 0x953   : > { %v7552_v10 = vadd.f32 %v7488_v36, %v7424_v39  ;;  %v6715_v63 = vadd.f32 %v6714_v26, %v6332_v54  ;;  %6815 = vmatmul.f32.gmra.mxu3 %v14350_v44  ;;  %7369 = vmatmul.f32.gmra.mxu1 %v11660_v45  ;;  %v7492_v36 = vld [vmem:[#allocation2 + $0xd0] sm:$0xff] }
 0x955   : > { %7616 = vst [vmem:[#allocation2 + $0x78] sm:$0xff] %v7552_v10  ;;  %v7029_v46 = vadd.f32 %v7028_v30, %v6715_v63  ;;  %6415 = vmatmul.f32.gmra.mxu2 %v11674_v7  ;;  %7095 = vmatmul.f32.gmra.mxu0 %v11660_v45 }
 0x956   : > { %v6720_v20 = vpop.f32.mrf.mxu3 }
 0x957   : > { %v7303_v56 = vadd.f32 %v7302_v0, %v7029_v46  ;;  %v7491_v0 = vld [vmem:[#allocation2 + $0x1d8] sm:$0xff] }
 0x958   : > { %v6336_v57 = vpop.f32.mrf.mxu2  ;;  %v7310_v41 = vpop.f32.mrf.mxu1 }
 0x959   : > { %v7425_v60 = vadd.f32 %v7303_v56, %v14352_v52  ;;  %v6337_v24 = vadd.f32 %v6336_v57, %v6016_v40  ;;  %v14368_v52 = vld [vmem:[#allocation85_spill] sm:$0xff] }
 0x95a   : > { %v7036_v33 = vpop.f32.mrf.mxu0 }
 0x95b   : > { %v7553_v27 = vadd.f32 %v7489_v51, %v7425_v60  ;;  %v6721_v42 = vadd.f32 %v6720_v20, %v6337_v24  ;;  %6821 = vmatmul.f32.gmra.mxu3 %v14353_v16  ;;  %7373 = vmatmul.f32.gmra.mxu1 %v11681_v58  ;;  %v14366_v20 = vld [vmem:[#allocation64_spill] sm:$0xff] }
 0x95c   : > { %v6032_v40 = vadd.f32 %v14367_v13, %v14366_v20  ;;  %v7493_v51 = vld [vmem:[#allocation2 + $0xb8] sm:$0xff]  ;;  %v7497_v20 = vld [vmem:[#allocation2 + $0x170] sm:$0xff] }
 0x95d   : > { %7617 = vst [vmem:[#allocation2 + $0x70] sm:$0xff] %v7553_v27  ;;  %v7033_v45 = vadd.f32 %v7032_v31, %v6721_v42  ;;  %6420 = vmatmul.f32.gmra.mxu2 %v11695_v50  ;;  %7099 = vmatmul.f32.gmra.mxu0 %v11681_v58  ;;  %v14359_v50 = vld [vmem:[#allocation244_spill] sm:$0xff] }
 0x95e   : > { %v6726_v7 = vpop.f32.mrf.mxu3 }
 0x95f   : > { %v7307_v21 = vadd.f32 %v7306_v43, %v7033_v45 }
 0x960   : > { %v6341_v35 = vpop.f32.mrf.mxu2  ;;  %v7314_v3 = vpop.f32.mrf.mxu1 }
 0x961   : > { %v7426_v5 = vadd.f32 %v7307_v21, %v14356_v53  ;;  %v6342_v8 = vadd.f32 %v6341_v35, %v6020_v62  ;;  %v7494_v21 = vld [vmem:[#allocation2 + $0x88] sm:$0xff] }
 0x962   : > { %v7040_v29 = vpop.f32.mrf.mxu0 }
 0x963   : > { %v7554_v2 = vadd.f32 %v7490_v32, %v7426_v5  ;;  %v6727_v9 = vadd.f32 %v6726_v7, %v6342_v8  ;;  %6827 = vmatmul.f32.gmra.mxu3 %v14358_v23  ;;  %7377 = vmatmul.f32.gmra.mxu1 %v14359_v50  ;;  %v14369_v7 = vld [vmem:[#allocation75_spill] sm:$0xff]  ;;  %v14372_v23 = vld [vmem:[#allocation93_spill] sm:$0xff] }
 0x964   : > { %v6036_v22 = vadd.f32 %v14370_v37, %v14369_v7  ;;  %v7498_v7 = vld [vmem:[#allocation2 + $0x178] sm:$0xff] }
 0x965   : > { %7618 = vst [vmem:[#allocation2 + $0x90] sm:$0xff] %v7554_v2  ;;  %v7037_v58 = vadd.f32 %v7036_v33, %v6727_v9  ;;  %6425 = vmatmul.f32.gmra.mxu2 %v14357_v17  ;;  %7103 = vmatmul.f32.gmra.mxu0 %v14359_v50  ;;  %v14373_v50 = vld [vmem:[#allocation82_spill] sm:$0xff] }
 0x966   : > { %v6732_v55 = vpop.f32.mrf.mxu3 }
 0x967   : > { %v7311_v38 = vadd.f32 %v7310_v41, %v7037_v58  ;;  %v6040_v58 = vadd.f32 %v14373_v50, %v14372_v23  ;;  %v7499_v23 = vld [vmem:[#allocation2 + $0x68] sm:$0xff] }
 0x968   : > { %v6346_v25 = vpop.f32.mrf.mxu2  ;;  %v7318_v14 = vpop.f32.mrf.mxu1 }
 0x969   : > { %v7427_v30 = vadd.f32 %v7311_v38, %v14362_v48  ;;  %v6347_v4 = vadd.f32 %v6346_v25, %v6024_v47  ;;  %v14374_v38 = vld [vmem:[#allocation99_spill] sm:$0xff] }
 0x96a   : > { %v7044_v34 = vpop.f32.mrf.mxu0 }
 0x96b   : > { %v7555_v18 = vadd.f32 %v7491_v0, %v7427_v30  ;;  %v6733_v19 = vadd.f32 %v6732_v55, %v6347_v4 }
 0x96d   : > { %7619 = vst [vmem:[#allocation2 + $0x1d8] sm:$0xff] %v7555_v18  ;;  %v7041_v28 = vadd.f32 %v7040_v29, %v6733_v19  ;;  %v14375_v18 = vld [vmem:[#allocation100_spill] sm:$0xff]  ;;  %v14376_v19 = vld [vmem:[#allocation89_spill] sm:$0xff] }
 0x96e   : > { %v6738_v26 = vpop.f32.mrf.mxu3 }
 0x96f   : > { %v7315_v61 = vadd.f32 %v7314_v3, %v7041_v28  ;;  %v14371_v3 = vld [vmem:[#allocation92_spill] sm:$0xff]  ;;  %v6044_v28 = vadd.f32 %v14376_v19, %v14375_v18 }
 0x970   : > { %v6351_v6 = vpop.f32.mrf.mxu2  ;;  %v7322_v43 = vpop.f32.mrf.mxu1  ;;  %v7500_v18 = vld [vmem:[#allocation2 + $0x190] sm:$0xff] }
 0x971   : > { %v7428_v39 = vadd.f32 %v7315_v61, %v14365_v49  ;;  %v6352_v54 = vadd.f32 %v6351_v6, %v6028_v11  ;;  %v14377_v61 = vld [vmem:[#allocation106_spill] sm:$0xff] }
 0x972   : > { %v7048_v31 = vpop.f32.mrf.mxu0 }
 0x973   : > { %v7556_v10 = vadd.f32 %v7492_v36, %v7428_v39  ;;  %v6739_v63 = vadd.f32 %v6738_v26, %v6352_v54 }
 0x975   : > { %7620 = vst [vmem:[#allocation2 + $0xd0] sm:$0xff] %v7556_v10  ;;  %v7045_v44 = vadd.f32 %v7044_v34, %v6739_v63  ;;  %v14378_v10 = vld [vmem:[#allocation107_spill] sm:$0xff]  ;;  %v14379_v63 = vld [vmem:[#allocation96_spill] sm:$0xff] }
 0x976   : > { %v6744_v46 = vpop.f32.mrf.mxu3 }
 0x977   : > { %v7319_v56 = vadd.f32 %v7318_v14, %v7045_v44  ;;  %v6048_v44 = vadd.f32 %v14379_v63, %v14378_v10  ;;  %v7501_v10 = vld [vmem:[#allocation2 + $0x198] sm:$0xff] }
 0x978   : > { %v6356_v57 = vpop.f32.mrf.mxu2  ;;  %v7326_v41 = vpop.f32.mrf.mxu1 }
 0x979   : > { %v7429_v60 = vadd.f32 %v7319_v56, %v14368_v52  ;;  %v6357_v24 = vadd.f32 %v6356_v57, %v6032_v40  ;;  %v14380_v56 = vld [vmem:[#allocation113_spill] sm:$0xff] }
 0x97a   : > { %v7052_v33 = vpop.f32.mrf.mxu0 }
 0x97b   : > { %v7557_v27 = vadd.f32 %v7493_v51, %v7429_v60  ;;  %v6745_v42 = vadd.f32 %v6744_v46, %v6357_v24 }
 0x97d   : > { %7621 = vst [vmem:[#allocation2 + $0xb8] sm:$0xff] %v7557_v27  ;;  %v7049_v16 = vadd.f32 %v7048_v31, %v6745_v42  ;;  %v14381_v27 = vld [vmem:[#allocation114_spill] sm:$0xff]  ;;  %v14382_v42 = vld [vmem:[#allocation103_spill] sm:$0xff] }
 0x97e   : > { %v6750_v45 = vpop.f32.mrf.mxu3 }
 0x97f   : > { %v7323_v62 = vadd.f32 %v7322_v43, %v7049_v16  ;;  %v6052_v16 = vadd.f32 %v14382_v42, %v14381_v27  ;;  %v7502_v27 = vld [vmem:[#allocation2 + $0x38] sm:$0xff] }
 0x980   : > { %v6361_v32 = vpop.f32.mrf.mxu2  ;;  %v7330_v35 = vpop.f32.mrf.mxu1 }
 0x981   : > { %v7430_v53 = vadd.f32 %v7323_v62, %v14371_v3  ;;  %v6362_v5 = vadd.f32 %v6361_v32, %v6036_v22  ;;  %v14383_v62 = vld [vmem:[#allocation120_spill] sm:$0xff] }
 0x982   : > { %v7056_v8 = vpop.f32.mrf.mxu0 }
 0x983   : > { %v7558_v29 = vadd.f32 %v7494_v21, %v7430_v53  ;;  %v6751_v2 = vadd.f32 %v6750_v45, %v6362_v5 }
 0x985   : > { %7622 = vst [vmem:[#allocation2 + $0x88] sm:$0xff] %v7558_v29  ;;  %v7053_v9 = vadd.f32 %v7052_v33, %v6751_v2  ;;  %v14384_v29 = vld [vmem:[#allocation122_spill] sm:$0xff] }
 0x986   : > { %v6756_v17 = vpop.f32.mrf.mxu3  ;;  %v14385_v2 = vld [vmem:[#allocation110_spill] sm:$0xff] }
 0x987   : > { %v7327_v55 = vadd.f32 %v7326_v41, %v7053_v9  ;;  %v6056_v9 = vadd.f32 %v14385_v2, %v14384_v29  ;;  %v7503_v29 = vld [vmem:[#allocation2 + $0xc0] sm:$0xff] }
 0x988   : > { %v6366_v12 = vpop.f32.mrf.mxu2  ;;  %v7334_v47 = vpop.f32.mrf.mxu1 }
 0x989   : > { %v7431_v0 = vadd.f32 %v7327_v55, %v14374_v38  ;;  %v6367_v25 = vadd.f32 %v6366_v12, %v6040_v58  ;;  %v14386_v55 = vld [vmem:[#allocation131_spill] sm:$0xff] }
 0x98a   : > { %v7060_v14 = vpop.f32.mrf.mxu0 }
 0x98b   : > { %v7559_v48 = vadd.f32 %v7495_v15, %v7431_v0  ;;  %v6757_v30 = vadd.f32 %v6756_v17, %v6367_v25 }
 0x98d   : > { %7623 = vst [vmem:[#allocation2 + $0xa8] sm:$0xff] %v7559_v48  ;;  %v7057_v4 = vadd.f32 %v7056_v8, %v6757_v30  ;;  %v14387_v48 = vld [vmem:[#allocation127_spill] sm:$0xff]  ;;  %v14388_v30 = vld [vmem:[#allocation117_spill] sm:$0xff] }
 0x98e   : > { %v6762_v34 = vpop.f32.mrf.mxu3 }
 0x98f   : > { %v7331_v26 = vadd.f32 %v7330_v35, %v7057_v4  ;;  %v6060_v4 = vadd.f32 %v14388_v30, %v14387_v48  ;;  %v7504_v48 = vld [vmem:[#allocation2 + $0x1c0] sm:$0xff] }
 0x990   : > { %v6371_v1 = vpop.f32.mrf.mxu2  ;;  %v7338_v11 = vpop.f32.mrf.mxu1 }
 0x991   : > { %v7432_v36 = vadd.f32 %v7331_v26, %v14377_v61  ;;  %v6372_v6 = vadd.f32 %v6371_v1, %v6044_v28  ;;  %v14389_v26 = vld [vmem:[#allocation137_spill] sm:$0xff] }
 0x992   : > { %v7064_v43 = vpop.f32.mrf.mxu0 }
 0x993   : > { %v7560_v49 = vadd.f32 %v7496_v59, %v7432_v36  ;;  %v6763_v39 = vadd.f32 %v6762_v34, %v6372_v6 }
 0x995   : > { %7624 = vst [vmem:[#allocation2 + $0x1c8] sm:$0xff] %v7560_v49  ;;  %v7061_v54 = vadd.f32 %v7060_v14, %v6763_v39  ;;  %v14390_v49 = vld [vmem:[#allocation132_spill] sm:$0xff] }
 0x996   : > { %v6768_v31 = vpop.f32.mrf.mxu3  ;;  %v14391_v39 = vld [vmem:[#allocation124_spill] sm:$0xff] }
 0x997   : > { %v7335_v46 = vadd.f32 %v7334_v47, %v7061_v54  ;;  %v6064_v54 = vadd.f32 %v14391_v39, %v14390_v49 }
 0x998   : > { %v6376_v13 = vpop.f32.mrf.mxu2  ;;  %v7342_v40 = vpop.f32.mrf.mxu1 }
 0x999   : > { %v7433_v51 = vadd.f32 %v7335_v46, %v14380_v56  ;;  %v6377_v57 = vadd.f32 %v6376_v13, %v6048_v44  ;;  %v14392_v44 = vld [vmem:[#allocation140_spill] sm:$0xff] }
 0x99a   : > { %v7068_v41 = vpop.f32.mrf.mxu0 }
 0x99b   : > { %v7561_v52 = vadd.f32 %v7497_v20, %v7433_v51  ;;  %v6769_v60 = vadd.f32 %v6768_v31, %v6377_v57 }
 0x99d   : > { %7625 = vst [vmem:[#allocation2 + $0x170] sm:$0xff] %v7561_v52  ;;  %v7065_v24 = vadd.f32 %v7064_v43, %v6769_v60  ;;  %v14393_v52 = vld [vmem:[#allocation129_spill] sm:$0xff]  ;;  %v14394_v60 = vld [vmem:[#allocation134_spill] sm:$0xff] }
 0x99e   : > { %v6774_v33 = vpop.f32.mrf.mxu3 }
 0x99f   : > { %v7339_v45 = vadd.f32 %v7338_v11, %v7065_v24  ;;  %v6068_v24 = vadd.f32 %v14394_v60, %v14393_v52  ;;  %v14407_v60 = vld [vmem:[#allocation254_spill] sm:$0xff] }
 0x9a0   : > { %v6381_v37 = vpop.f32.mrf.mxu2  ;;  %v7346_v22 = vpop.f32.mrf.mxu1 }
 0x9a1   : > { %v7434_v21 = vadd.f32 %v7339_v45, %v14383_v62  ;;  %v6382_v32 = vadd.f32 %v6381_v37, %v6052_v16  ;;  %v14395_v16 = vld [vmem:[#allocation143_spill] sm:$0xff] }
 0x9a2   : > { %v7072_v35 = vpop.f32.mrf.mxu0 }
 0x9a3   : > { %v7562_v3 = vadd.f32 %v7498_v7, %v7434_v21  ;;  %v6775_v53 = vadd.f32 %v6774_v33, %v6382_v32 }
 0x9a5   : > { %7626 = vst [vmem:[#allocation2 + $0x178] sm:$0xff] %v7562_v3  ;;  %v7069_v5 = vadd.f32 %v7068_v41, %v6775_v53  ;;  %v14396_v3 = vld [vmem:[#allocation135_spill] sm:$0xff]  ;;  %v14397_v53 = vld [vmem:[#allocation136_spill] sm:$0xff] }
 0x9a6   : > { %v6780_v8 = vpop.f32.mrf.mxu3 }
 0x9a7   : > { %v7343_v17 = vadd.f32 %v7342_v40, %v7069_v5  ;;  %v6072_v5 = vadd.f32 %v14397_v53, %v14396_v3  ;;  %v14410_v3 = vld [vmem:[#allocation255_spill] sm:$0xff] }
 0x9a8   : > { %v6386_v50 = vpop.f32.mrf.mxu2  ;;  %v7350_v58 = vpop.f32.mrf.mxu1 }
 0x9a9   : > { %v7435_v15 = vadd.f32 %v7343_v17, %v14386_v55  ;;  %v6387_v12 = vadd.f32 %v6386_v50, %v6056_v9  ;;  %v14398_v9 = vld [vmem:[#allocation146_spill] sm:$0xff] }
 0x9aa   : > { %v7076_v47 = vpop.f32.mrf.mxu0 }
 0x9ab   : > { %v7563_v38 = vadd.f32 %v7499_v23, %v7435_v15  ;;  %v6781_v0 = vadd.f32 %v6780_v8, %v6387_v12 }
 0x9ad   : > { %7627 = vst [vmem:[#allocation2 + $0x68] sm:$0xff] %v7563_v38  ;;  %v7073_v25 = vadd.f32 %v7072_v35, %v6781_v0  ;;  %v14399_v38 = vld [vmem:[#allocation138_spill] sm:$0xff]  ;;  %v14400_v0 = vld [vmem:[#allocation139_spill] sm:$0xff] }
 0x9ae   : > { %v6786_v14 = vpop.f32.mrf.mxu3 }
 0x9af   : > { %v7347_v34 = vadd.f32 %v7346_v22, %v7073_v25  ;;  %v6076_v25 = vadd.f32 %v14400_v0, %v14399_v38 }
 0x9b0   : > { %v6391_v19 = vpop.f32.mrf.mxu2  ;;  %v7354_v28 = vpop.f32.mrf.mxu1 }
 0x9b1   : > { %v7436_v59 = vadd.f32 %v7347_v34, %v14389_v26  ;;  %v6392_v1 = vadd.f32 %v6391_v19, %v6060_v4  ;;  %v14401_v4 = vld [vmem:[#allocation149_spill] sm:$0xff] }
 0x9b2   : > { %v7080_v11 = vpop.f32.mrf.mxu0 }
 0x9b3   : > { %v7564_v61 = vadd.f32 %v7500_v18, %v7436_v59  ;;  %v6787_v36 = vadd.f32 %v6786_v14, %v6392_v1 }
 0x9b5   : > { %7628 = vst [vmem:[#allocation2 + $0x190] sm:$0xff] %v7564_v61  ;;  %v7077_v6 = vadd.f32 %v7076_v47, %v6787_v36  ;;  %v14403_v61 = vld [vmem:[#allocation142_spill] sm:$0xff] }
 0x9b6   : > { %v6792_v43 = vpop.f32.mrf.mxu3 }
 0x9b7   : > { %v7351_v31 = vadd.f32 %v7350_v58, %v7077_v6 }
 0x9b8   : > { %v6396_v63 = vpop.f32.mrf.mxu2  ;;  %v7358_v40 = vpop.f32.mrf.mxu1 }
 0x9b9   : > { %v7437_v46 = vadd.f32 %v7351_v31, %v14392_v44  ;;  %v6397_v20 = vadd.f32 %v6396_v63, %v6064_v54  ;;  %v14404_v54 = vld [vmem:[#allocation50_spill] sm:$0xff] }
 0x9ba   : > { %v7084_v13 = vpop.f32.mrf.mxu0 }
 0x9bb   : > { %v7565_v56 = vadd.f32 %v7501_v10, %v7437_v46  ;;  %v6793_v51 = vadd.f32 %v6792_v43, %v6397_v20  ;;  %v7505_v43 = vld [vmem:[#allocation2 + $0x158] sm:$0xff] }
 0x9bd   : > { %7629 = vst [vmem:[#allocation2 + $0x198] sm:$0xff] %v7565_v56  ;;  %v7081_v57 = vadd.f32 %v7080_v11, %v6793_v51  ;;  %v14402_v11 = vld [vmem:[#allocation141_spill] sm:$0xff] }
 0x9be   : > { %v6798_v41 = vpop.f32.mrf.mxu3  ;;  %v6080_v36 = vadd.f32 %v14403_v61, %v14402_v11 }
 0x9bf   : > { %v7355_v33 = vadd.f32 %v7354_v28, %v7081_v57  ;;  %v7506_v57 = vld [vmem:[#allocation2 + $0x10] sm:$0xff] }
 0x9c0   : > { %v6401_v42 = vpop.f32.mrf.mxu2  ;;  %v7362_v21 = vpop.f32.mrf.mxu1 }
 0x9c1   : > { %v7438_v45 = vadd.f32 %v7355_v33, %v14395_v16  ;;  %v6402_v7 = vadd.f32 %v6401_v42, %v6068_v24 }
 0x9c2   : > { %v7088_v37 = vpop.f32.mrf.mxu0 }
 0x9c3   : > { %v7566_v22 = vadd.f32 %v7502_v27, %v7438_v45  ;;  %v6799_v62 = vadd.f32 %v6798_v41, %v6402_v7  ;;  %v14408_v7 = vld [vmem:[#allocation147_spill] sm:$0xff] }
 0x9c5   : > { %7630 = vst [vmem:[#allocation2 + $0x38] sm:$0xff] %v7566_v22  ;;  %v7085_v32 = vadd.f32 %v7084_v13, %v6799_v62  ;;  %v14405_v13 = vld [vmem:[#allocation144_spill] sm:$0xff] }
 0x9c6   : > { %v6804_v35 = vpop.f32.mrf.mxu3 }
 0x9c7   : > { %v7359_v8 = vadd.f32 %v7358_v40, %v7085_v32  ;;  %v14406_v40 = vld [vmem:[#allocation145_spill] sm:$0xff] }
 0x9c8   : > { %v6406_v2 = vpop.f32.mrf.mxu2  ;;  %v7366_v47 = vpop.f32.mrf.mxu1  ;;  %v6084_v56 = vadd.f32 %v14406_v40, %v14405_v13 }
 0x9c9   : > { %v7439_v17 = vadd.f32 %v7359_v8, %v14398_v9  ;;  %v6407_v23 = vadd.f32 %v6406_v2, %v6072_v5 }
 0x9ca   : > { %v7092_v55 = vpop.f32.mrf.mxu0 }
 0x9cb   : > { %v7567_v50 = vadd.f32 %v7503_v29, %v7439_v17  ;;  %v6805_v58 = vadd.f32 %v6804_v35, %v6407_v23 }
 0x9cd   : > { %7631 = vst [vmem:[#allocation2 + $0xc0] sm:$0xff] %v7567_v50  ;;  %v7089_v15 = vadd.f32 %v7088_v37, %v6805_v58  ;;  %v14409_v37 = vld [vmem:[#allocation148_spill] sm:$0xff]  ;;  %v7508_v50 = vld [vmem:[#allocation2 + $0xa0] sm:$0xff]  ;;  %v14411_v58 = vld [vmem:[#allocation151_spill] sm:$0xff] }
 0x9ce   : > { %v6810_v12 = vpop.f32.mrf.mxu3  ;;  %v6088_v22 = vadd.f32 %v14409_v37, %v14408_v7 }
 0x9cf   : > { %v7363_v14 = vadd.f32 %v7362_v21, %v7089_v15  ;;  %v7507_v21 = vld [vmem:[#allocation2 + $0x58] sm:$0xff] }
 0x9d0   : > { %v6411_v30 = vpop.f32.mrf.mxu2  ;;  %v7370_v39 = vpop.f32.mrf.mxu1 }
 0x9d1   : > { %v7440_v34 = vadd.f32 %v7363_v14, %v14401_v4  ;;  %v6412_v18 = vadd.f32 %v6411_v30, %v6076_v25 }
 0x9d2   : > { %v7096_v1 = vpop.f32.mrf.mxu0 }
 0x9d3   : > { %v7568_v19 = vadd.f32 %v7504_v48, %v7440_v34  ;;  %v6811_v28 = vadd.f32 %v6810_v12, %v6412_v18 }
 0x9d5   : > { %7632 = vst [vmem:[#allocation2 + $0x1c0] sm:$0xff] %v7568_v19  ;;  %v7093_v26 = vadd.f32 %v7092_v55, %v6811_v28 }
 0x9d6   : > { %v6816_v59 = vpop.f32.mrf.mxu3 }
 0x9d7   : > { %v7367_v6 = vadd.f32 %v7366_v47, %v7093_v26 }
 0x9d8   : > { %v6416_v49 = vpop.f32.mrf.mxu2  ;;  %v7374_v27 = vpop.f32.mrf.mxu1 }
 0x9d9   : > { %v7441_v31 = vadd.f32 %v7367_v6, %v14404_v54  ;;  %v6417_v10 = vadd.f32 %v6416_v49, %v6080_v36 }
 0x9da   : > { %v7100_v52 = vpop.f32.mrf.mxu0 }
 0x9db   : > { %v7569_v63 = vadd.f32 %v7505_v43, %v7441_v31  ;;  %v6817_v44 = vadd.f32 %v6816_v59, %v6417_v10 }
 0x9dd   : > { %7633 = vst [vmem:[#allocation2 + $0x158] sm:$0xff] %v7569_v63  ;;  %v7097_v46 = vadd.f32 %v7096_v1, %v6817_v44 }
 0x9de   : > { %v6822_v20 = vpop.f32.mrf.mxu3 }
 0x9df   : > { %v7371_v51 = vadd.f32 %v7370_v39, %v7097_v46 }
 0x9e0   : > { %v6421_v41 = vpop.f32.mrf.mxu2  ;;  %v7378_v9 = vpop.f32.mrf.mxu1 }
 0x9e1   : > { %v7442_v24 = vadd.f32 %v7371_v51, %v14407_v60  ;;  %v6422_v33 = vadd.f32 %v6421_v41, %v6084_v56 }
 0x9e2   : > { %v7104_v8 = vpop.f32.mrf.mxu0 }
 0x9e3   : > { %v7570_v42 = vadd.f32 %v7506_v57, %v7442_v24  ;;  %v6823_v16 = vadd.f32 %v6822_v20, %v6422_v33 }
 0x9e5   : > { %7634 = vst [vmem:[#allocation2 + $0x10] sm:$0xff] %v7570_v42  ;;  %v7101_v45 = vadd.f32 %v7100_v52, %v6823_v16 }
 0x9e6   : > { %v6828_v35 = vpop.f32.mrf.mxu3 }
 0x9e7   : > { %v7375_v62 = vadd.f32 %v7374_v27, %v7101_v45 }
 0x9e8   : > { %v6426_v32 = vpop.f32.mrf.mxu2 }
 0x9e9   : > { %v7443_v53 = vadd.f32 %v7375_v62, %v14410_v3  ;;  %v6427_v5 = vadd.f32 %v6426_v32, %v6088_v22 }
 0x9eb   : > { %v7571_v29 = vadd.f32 %v7507_v21, %v7443_v53  ;;  %v6829_v2 = vadd.f32 %v6828_v35, %v6427_v5 }
 0x9ed   : > { %7635 = vst [vmem:[#allocation2 + $0x58] sm:$0xff] %v7571_v29  ;;  %v7105_v17 = vadd.f32 %v7104_v8, %v6829_v2 }
 0x9ef   : > { %v7379_v23 = vadd.f32 %v7378_v9, %v7105_v17 }
 0x9f1   : > { %v7444_v55 = vadd.f32 %v7379_v23, %v14411_v58  ;;  %7640 = sbr.rel (%p8116_p7) target bundleno = 2695 (0xa87), region = 40 }
 0x9f3   : > { %v7572_v15 = vadd.f32 %v7508_v50, %v7444_v55 }
 0x9f5   : > { %7636 = vst [vmem:[#allocation2 + $0xa0] sm:$0xff] %v7572_v15 }
 0x9f6   : > { %v7641_v12 = vld [vmem:[#allocation2 + $0xb0] sm:$0xff]  ;;  %v7643_v38 = vld [vmem:[#allocation2 + $0xd8] sm:$0xff]  ;;  %v7646_v28 = vld [vmem:[#allocation2 + $0x168] sm:$0xff] }
 0x9f7   : > { %v7642_v47 = vld [vmem:[#allocation2 + $0x1b0] sm:$0xff]  ;;  %7705 = vst [vmem:[#allocation3] sm:$0xff] %v7641_v12  ;;  %v7842_v0 = vmul.f32 %v7641_v12, %v7641_v12  ;;  %v7844_v48 = vmul.f32 %v7643_v38, %v7643_v38  ;;  %v7644_v30 = vld [vmem:[#allocation2 + $0x18] sm:$0xff]  ;;  %v7847_v6 = vmul.f32 %v7646_v28, %v7646_v28  ;;  %v7648_v43 = vld [vmem:[#allocation2 + $0x48] sm:$0xff] }
 0x9f8   : > { %v7770_v25 = vadd.f32 %v7642_v47, %v7641_v12  ;;  %v7843_v14 = vmul.f32 %v7642_v47, %v7642_v47  ;;  %7706 = vst [vmem:[#allocation3 + $0x8] sm:$0xff] %v7642_v47  ;;  %v7645_v4 = vld [vmem:[#allocation2 + $0x50] sm:$0xff]  ;;  %v7845_v19 = vmul.f32 %v7644_v30, %v7644_v30  ;;  %v7649_v49 = vld [vmem:[#allocation2 + $0x180] sm:$0xff]  ;;  %v7651_v63 = vld [vmem:[#allocation2 + $0x118] sm:$0xff]  ;;  %v7849_v20 = vmul.f32 %v7648_v43, %v7648_v43 }
 0x9f9   : > { %7707 = vst [vmem:[#allocation3 + $0x10] sm:$0xff] %v7643_v38  ;;  %v7846_v1 = vmul.f32 %v7645_v4, %v7645_v4  ;;  %v7647_v11 = vld [vmem:[#allocation2 + $0x130] sm:$0xff]  ;;  %v7652_v13 = vld [vmem:[#allocation2 + $0x98] sm:$0xff]  ;;  %v7653_v40 = vld [vmem:[#allocation2 + $0x120] sm:$0xff]  ;;  %v7850_v57 = vmul.f32 %v7649_v49, %v7649_v49  ;;  %v7852_v7 = vmul.f32 %v7651_v63, %v7651_v63 }
 0x9fa   : > { %v7906_v34 = vadd.f32 %v7843_v14, %v7842_v0  ;;  %v7771_v18 = vadd.f32 %v7770_v25, %v7643_v38  ;;  %7708 = vst [vmem:[#allocation3 + $0x18] sm:$0xff] %v7644_v30  ;;  %v7848_v31 = vmul.f32 %v7647_v11, %v7647_v11  ;;  %v7650_v10 = vld [vmem:[#allocation2 + $0x110] sm:$0xff]  ;;  %v7655_v52 = vld [vmem:[#allocation2 + $0x108] sm:$0xff]  ;;  %v7656_v27 = vld [vmem:[#allocation2 + $0x60] sm:$0xff]  ;;  %v7853_v32 = vmul.f32 %v7652_v13, %v7652_v13 }
 0x9fb   : > { %7709 = vst [vmem:[#allocation3 + $0x20] sm:$0xff] %v7645_v4  ;;  %v7654_v41 = vld [vmem:[#allocation2 + $0x150] sm:$0xff]  ;;  %v7851_v33 = vmul.f32 %v7650_v10, %v7650_v10  ;;  %v7657_v42 = vld [vmem:[#allocation2 + $0xe0] sm:$0xff]  ;;  %v7658_v37 = vld [vmem:[#allocation2 + $0x188] sm:$0xff]  ;;  %v7854_v8 = vmul.f32 %v7653_v40, %v7653_v40  ;;  %v7856_v12 = vmul.f32 %v7655_v52, %v7655_v52  ;;  %v7857_v14 = vmul.f32 %v7656_v27, %v7656_v27 }
 0x9fc   : > { %v7907_v26 = vadd.f32 %v7906_v34, %v7844_v48  ;;  %v7772_v59 = vadd.f32 %v7771_v18, %v7644_v30  ;;  %7710 = vst [vmem:[#allocation3 + $0x28] sm:$0xff] %v7646_v28  ;;  %v7659_v22 = vld [vmem:[#allocation2 + $0x138] sm:$0xff]  ;;  %v7660_v35 = vld [vmem:[#allocation2 + $0x140] sm:$0xff]  ;;  %v7662_v29 = vld [vmem:[#allocation2 + $0x1a8] sm:$0xff]  ;;  %v7855_v23 = vmul.f32 %v7654_v41, %v7654_v41  ;;  %v7858_v18 = vmul.f32 %v7657_v42, %v7657_v42 }
 0x9fd   : > { %7711 = vst [vmem:[#allocation3 + $0x30] sm:$0xff] %v7647_v11  ;;  %v7661_v3 = vld [vmem:[#allocation2 + $0x80] sm:$0xff]  ;;  %v12369_v2 = vld [vmem:[#allocation2 + $0x1b8] sm:$0xff]  ;;  %v12372_v50 = vld [vmem:[#allocation2 + $0x28] sm:$0xff] }
 0x9fe   : > { %v7908_v61 = vadd.f32 %v7907_v26, %v7845_v19  ;;  %v7773_v36 = vadd.f32 %v7772_v59, %v7645_v4  ;;  %7712 = vst [vmem:[#allocation3 + $0x38] sm:$0xff] %v7648_v43  ;;  %v12375_v58 = vld [vmem:[#allocation2 + $0x1e8] sm:$0xff]  ;;  %v12378_v47 = vld [vmem:[#allocation2 + $0xf8] sm:$0xff]  ;;  %v12381_v38 = vld [vmem:[#allocation2 + $0x160] sm:$0xff] }
 0x9ff   : > { %7713 = vst [vmem:[#allocation3 + $0x40] sm:$0xff] %v7649_v49  ;;  %v12384_v48 = vld [vmem:[#allocation2 + $0x30] sm:$0xff]  ;;  %v12387_v30 = vld [vmem:[#allocation2 + $0x1e0] sm:$0xff] }
 0xa00   : > { %v7909_v39 = vadd.f32 %v7908_v61, %v7846_v1  ;;  %v7774_v54 = vadd.f32 %v7773_v36, %v7646_v28  ;;  %7714 = vst [vmem:[#allocation3 + $0x48] sm:$0xff] %v7650_v10  ;;  %v12390_v19 = vld [vmem:[#allocation2] sm:$0xff]  ;;  %v12393_v28 = vld [vmem:[#allocation2 + $0xf0] sm:$0xff]  ;;  %v7859_v1 = vmul.f32 %v7658_v37, %v7658_v37  ;;  %v12399_v61 = vld [vmem:[#allocation2 + $0x148] sm:$0xff] }
 0xa01   : > { %7715 = vst [vmem:[#allocation3 + $0x50] sm:$0xff] %v7651_v63 }
 0xa02   : > { %v7910_v44 = vadd.f32 %v7909_v39, %v7847_v6  ;;  %v7775_v46 = vadd.f32 %v7774_v54, %v7647_v11  ;;  %7716 = vst [vmem:[#allocation3 + $0x58] sm:$0xff] %v7652_v13  ;;  %v12396_v11 = vld [vmem:[#allocation2 + $0x8] sm:$0xff]  ;;  %v12405_v39 = vld [vmem:[#allocation2 + $0x100] sm:$0xff] }
 0xa03   : > { %7717 = vst [vmem:[#allocation3 + $0x60] sm:$0xff] %v7653_v40 }
 0xa04   : > { %v7911_v56 = vadd.f32 %v7910_v44, %v7848_v31  ;;  %v7776_v51 = vadd.f32 %v7775_v46, %v7648_v43  ;;  %7718 = vst [vmem:[#allocation3 + $0x68] sm:$0xff] %v7654_v41  ;;  %v7860_v43 = vmul.f32 %v7659_v22, %v7659_v22 }
 0xa05   : > { %7719 = vst [vmem:[#allocation3 + $0x70] sm:$0xff] %v7655_v52 }
 0xa06   : > { %v7912_v60 = vadd.f32 %v7911_v56, %v7849_v20  ;;  %v7777_v24 = vadd.f32 %v7776_v51, %v7649_v49  ;;  %7720 = vst [vmem:[#allocation3 + $0x78] sm:$0xff] %v7656_v27  ;;  %v12402_v49 = vld [vmem:[#allocation2 + $0x1d0] sm:$0xff]  ;;  %v7862_v20 = vmul.f32 %v7661_v3, %v7661_v3  ;;  %v7863_v51 = vmul.f32 %v7662_v29, %v7662_v29 }
 0xa07   : > { %7721 = vst [vmem:[#allocation3 + $0x80] sm:$0xff] %v7657_v42 }
 0xa08   : > { %v7913_v16 = vadd.f32 %v7912_v60, %v7850_v57  ;;  %v7778_v45 = vadd.f32 %v7777_v24, %v7650_v10  ;;  %7722 = vst [vmem:[#allocation3 + $0x88] sm:$0xff] %v7658_v37  ;;  %v7861_v10 = vmul.f32 %v7660_v35, %v7660_v35  ;;  %v12414_v57 = vld [vmem:[#allocation2 + $0x1f8] sm:$0xff]  ;;  %v7864_v60 = vmul.f32 %v12369_v2, %v12369_v2  ;;  %v12419_v24 = vld [vmem:[#allocation2 + $0x20] sm:$0xff] }
 0xa09   : > { %7723 = vst [vmem:[#allocation3 + $0x90] sm:$0xff] %v7659_v22 }
 0xa0a   : > { %v7914_v62 = vadd.f32 %v7913_v16, %v7851_v33  ;;  %v7779_v21 = vadd.f32 %v7778_v45, %v7651_v63  ;;  %7724 = vst [vmem:[#allocation3 + $0x98] sm:$0xff] %v7660_v35  ;;  %v12408_v63 = vld [vmem:[#allocation2 + $0xc8] sm:$0xff] }
 0xa0b   : > { %7725 = vst [vmem:[#allocation3 + $0xa0] sm:$0xff] %v7661_v3  ;;  %v12425_v16 = vld [vmem:[#allocation2 + $0x128] sm:$0xff] }
 0xa0c   : > { %v7915_v53 = vadd.f32 %v7914_v62, %v7852_v7  ;;  %v7780_v5 = vadd.f32 %v7779_v21, %v7652_v13  ;;  %7726 = vst [vmem:[#allocation3 + $0xa8] sm:$0xff] %v7662_v29  ;;  %v12411_v13 = vld [vmem:[#allocation2 + $0x40] sm:$0xff] }
 0xa0d   : > { %7727 = vst [vmem:[#allocation3 + $0xb0] sm:$0xff] %v12369_v2 }
 0xa0e   : > { %v7916_v9 = vadd.f32 %v7915_v53, %v7853_v32  ;;  %v7781_v17 = vadd.f32 %v7780_v5, %v7653_v40  ;;  %7728 = vst [vmem:[#allocation3 + $0xb8] sm:$0xff] %v12372_v50  ;;  %v7867_v32 = vmul.f32 %v12378_v47, %v12378_v47  ;;  %v7868_v5 = vmul.f32 %v12381_v38, %v12381_v38 }
 0xa0f   : > { %7729 = vst [vmem:[#allocation3 + $0xc0] sm:$0xff] %v12375_v58 }
 0xa10   : > { %v7917_v55 = vadd.f32 %v7916_v9, %v7854_v8  ;;  %v7782_v15 = vadd.f32 %v7781_v17, %v7654_v41  ;;  %7730 = vst [vmem:[#allocation3 + $0xc8] sm:$0xff] %v12378_v47  ;;  %v12443_v8 = vld [vmem:[#allocation2 + $0xe8] sm:$0xff]  ;;  %v7869_v9 = vmul.f32 %v12384_v48, %v12384_v48  ;;  %v12449_v17 = vld [vmem:[#allocation2 + $0x78] sm:$0xff] }
 0xa11   : > { %7731 = vst [vmem:[#allocation3 + $0xd0] sm:$0xff] %v12381_v38 }
 0xa12   : > { %v7918_v0 = vadd.f32 %v7917_v55, %v7855_v23  ;;  %v7783_v25 = vadd.f32 %v7782_v15, %v7655_v52  ;;  %7732 = vst [vmem:[#allocation3 + $0xd8] sm:$0xff] %v12384_v48  ;;  %v12455_v55 = vld [vmem:[#allocation2 + $0x70] sm:$0xff] }
 0xa13   : > { %7733 = vst [vmem:[#allocation3 + $0xe0] sm:$0xff] %v12387_v30 }
 0xa14   : > { %v7919_v4 = vadd.f32 %v7918_v0, %v7856_v12  ;;  %v7784_v34 = vadd.f32 %v7783_v25, %v7656_v27  ;;  %7734 = vst [vmem:[#allocation3 + $0xe8] sm:$0xff] %v12390_v19 }
 0xa15   : > { %7735 = vst [vmem:[#allocation3 + $0xf0] sm:$0xff] %v12393_v28 }
 0xa16   : > { %v7920_v26 = vadd.f32 %v7919_v4, %v7857_v14  ;;  %v7785_v59 = vadd.f32 %v7784_v34, %v7657_v42  ;;  %7736 = vst [vmem:[#allocation3 + $0xf8] sm:$0xff] %v12396_v11  ;;  %v7865_v42 = vmul.f32 %v12372_v50, %v12372_v50  ;;  %v7872_v14 = vmul.f32 %v12393_v28, %v12393_v28 }
 0xa17   : > { %7737 = vst [vmem:[#allocation3 + $0x100] sm:$0xff] %v12399_v61  ;;  %v7873_v34 = vmul.f32 %v12396_v11, %v12396_v11 }
 0xa18   : > { %v7921_v36 = vadd.f32 %v7920_v26, %v7858_v18  ;;  %v7786_v6 = vadd.f32 %v7785_v59, %v7658_v37  ;;  %7738 = vst [vmem:[#allocation3 + $0x108] sm:$0xff] %v12402_v49  ;;  %v7866_v37 = vmul.f32 %v12375_v58, %v12375_v58  ;;  %v12473_v18 = vld [vmem:[#allocation2 + $0xd0] sm:$0xff]  ;;  %v7874_v59 = vmul.f32 %v12399_v61, %v12399_v61 }
 0xa19   : > { %7739 = vst [vmem:[#allocation3 + $0x110] sm:$0xff] %v12405_v39 }
 0xa1a   : > { %v7922_v54 = vadd.f32 %v7921_v36, %v7859_v1  ;;  %v7787_v31 = vadd.f32 %v7786_v6, %v7659_v22  ;;  %7740 = vst [vmem:[#allocation3 + $0x118] sm:$0xff] %v12408_v63  ;;  %v12431_v22 = vld [vmem:[#allocation2 + $0x1a0] sm:$0xff]  ;;  %v12479_v1 = vld [vmem:[#allocation2 + $0xb8] sm:$0xff]  ;;  %v7875_v6 = vmul.f32 %v12402_v49, %v12402_v49 }
 0xa1b   : > { %7741 = vst [vmem:[#allocation3 + $0x120] sm:$0xff] %v12411_v13 }
 0xa1c   : > { %v7923_v44 = vadd.f32 %v7922_v54, %v7860_v43  ;;  %v7788_v46 = vadd.f32 %v7787_v31, %v7660_v35  ;;  %7742 = vst [vmem:[#allocation3 + $0x128] sm:$0xff] %v12414_v57  ;;  %v12437_v35 = vld [vmem:[#allocation2 + $0x1f0] sm:$0xff]  ;;  %v12485_v43 = vld [vmem:[#allocation2 + $0x88] sm:$0xff]  ;;  %v7876_v31 = vmul.f32 %v12405_v39, %v12405_v39 }
 0xa1d   : > { %7743 = vst [vmem:[#allocation3 + $0x130] sm:$0xff] %v12419_v24 }
 0xa1e   : > { %v7924_v40 = vadd.f32 %v7923_v44, %v7861_v10  ;;  %v7789_v56 = vadd.f32 %v7788_v46, %v7661_v3  ;;  %7744 = vst [vmem:[#allocation3 + $0x138] sm:$0xff] %v12425_v16  ;;  %v12491_v10 = vld [vmem:[#allocation2 + $0xa8] sm:$0xff]  ;;  %v7877_v46 = vmul.f32 %v12408_v63, %v12408_v63 }
 0xa1f   : > { %7745 = vst [vmem:[#allocation3 + $0x140] sm:$0xff] %v12431_v22 }
 0xa20   : > { %v7925_v41 = vadd.f32 %v7924_v40, %v7862_v20  ;;  %v7790_v52 = vadd.f32 %v7789_v56, %v7662_v29  ;;  %7746 = vst [vmem:[#allocation3 + $0x148] sm:$0xff] %v12437_v35  ;;  %v12497_v20 = vld [vmem:[#allocation2 + $0x1c8] sm:$0xff]  ;;  %v7878_v56 = vmul.f32 %v12411_v13, %v12411_v13 }
 0xa21   : > { %7747 = vst [vmem:[#allocation3 + $0x150] sm:$0xff] %v12443_v8 }
 0xa22   : > { %v7926_v33 = vadd.f32 %v7925_v41, %v7863_v51  ;;  %v7791_v27 = vadd.f32 %v7790_v52, %v12369_v2  ;;  %7748 = vst [vmem:[#allocation3 + $0x158] sm:$0xff] %v12449_v17  ;;  %v12503_v51 = vld [vmem:[#allocation2 + $0x170] sm:$0xff]  ;;  %v7879_v52 = vmul.f32 %v12414_v57, %v12414_v57 }
 0xa23   : > { %7749 = vst [vmem:[#allocation3 + $0x160] sm:$0xff] %v12455_v55 }
 0xa24   : > { %v7927_v45 = vadd.f32 %v7926_v33, %v7864_v60  ;;  %v7792_v7 = vadd.f32 %v7791_v27, %v12372_v50  ;;  %7752 = vst [vmem:[#allocation3 + $0x178] sm:$0xff] %v12473_v18  ;;  %v12509_v60 = vld [vmem:[#allocation2 + $0x178] sm:$0xff]  ;;  %v7880_v27 = vmul.f32 %v12419_v24, %v12419_v24 }
 0xa25   : > { %7753 = vst [vmem:[#allocation3 + $0x180] sm:$0xff] %v12479_v1 }
 0xa26   : > { %v7928_v62 = vadd.f32 %v7927_v45, %v7865_v42  ;;  %v7793_v21 = vadd.f32 %v7792_v7, %v12375_v58  ;;  %v7870_v58 = vmul.f32 %v12387_v30, %v12387_v30  ;;  %7754 = vst [vmem:[#allocation3 + $0x188] sm:$0xff] %v12485_v43  ;;  %v12515_v42 = vld [vmem:[#allocation2 + $0x68] sm:$0xff]  ;;  %v7881_v7 = vmul.f32 %v12425_v16, %v12425_v16 }
 0xa27   : > { %7755 = vst [vmem:[#allocation3 + $0x190] sm:$0xff] %v12491_v10 }
 0xa28   : > { %v7929_v3 = vadd.f32 %v7928_v62, %v7866_v37  ;;  %v7794_v53 = vadd.f32 %v7793_v21, %v12378_v47  ;;  %v7871_v47 = vmul.f32 %v12390_v19, %v12390_v19  ;;  %7756 = vst [vmem:[#allocation3 + $0x198] sm:$0xff] %v12497_v20  ;;  %v12521_v37 = vld [vmem:[#allocation2 + $0x190] sm:$0xff]  ;;  %v7882_v21 = vmul.f32 %v12431_v22, %v12431_v22 }
 0xa29   : > { %7757 = vst [vmem:[#allocation3 + $0x1a0] sm:$0xff] %v12503_v51 }
 0xa2a   : > { %v7930_v29 = vadd.f32 %v7929_v3, %v7867_v32  ;;  %v7795_v2 = vadd.f32 %v7794_v53, %v12381_v38  ;;  %v12461_v38 = vld [vmem:[#allocation2 + $0x90] sm:$0xff]  ;;  %7758 = vst [vmem:[#allocation3 + $0x1a8] sm:$0xff] %v12509_v60  ;;  %v12527_v32 = vld [vmem:[#allocation2 + $0x198] sm:$0xff]  ;;  %v7883_v53 = vmul.f32 %v12437_v35, %v12437_v35 }
 0xa2b   : > { %7750 = vst [vmem:[#allocation3 + $0x168] sm:$0xff] %v12461_v38 }
 0xa2c   : > { %v7931_v23 = vadd.f32 %v7930_v29, %v7868_v5  ;;  %v7796_v50 = vadd.f32 %v7795_v2, %v12384_v48  ;;  %v12467_v48 = vld [vmem:[#allocation2 + $0x1d8] sm:$0xff]  ;;  %7759 = vst [vmem:[#allocation3 + $0x1b0] sm:$0xff] %v12515_v42  ;;  %v7884_v2 = vmul.f32 %v12443_v8, %v12443_v8 }
 0xa2d   : > { %7751 = vst [vmem:[#allocation3 + $0x170] sm:$0xff] %v12467_v48  ;;  %v12533_v5 = vld [vmem:[#allocation2 + $0x38] sm:$0xff] }
 0xa2e   : > { %v7932_v15 = vadd.f32 %v7931_v23, %v7869_v9  ;;  %v7797_v12 = vadd.f32 %v7796_v50, %v12387_v30  ;;  %7760 = vst [vmem:[#allocation3 + $0x1b8] sm:$0xff] %v12521_v37  ;;  %v7699_v9 = vld [vmem:[#allocation2 + $0xc0] sm:$0xff] }
 0xa2f   : > { %7761 = vst [vmem:[#allocation3 + $0x1c0] sm:$0xff] %v12527_v32 }
 0xa30   : > { %v7933_v0 = vadd.f32 %v7932_v15, %v7870_v58  ;;  %v7798_v25 = vadd.f32 %v7797_v12, %v12390_v19  ;;  %7762 = vst [vmem:[#allocation3 + $0x1c8] sm:$0xff] %v12533_v5  ;;  %v7700_v58 = vld [vmem:[#allocation2 + $0x1c0] sm:$0xff] }
 0xa31   : > { %7763 = vst [vmem:[#allocation3 + $0x1d0] sm:$0xff] %v7699_v9 }
 0xa32   : > { %v7934_v4 = vadd.f32 %v7933_v0, %v7871_v47  ;;  %v7799_v30 = vadd.f32 %v7798_v25, %v12393_v28  ;;  %7764 = vst [vmem:[#allocation3 + $0x1d8] sm:$0xff] %v7700_v58  ;;  %v7701_v47 = vld [vmem:[#allocation2 + $0x158] sm:$0xff] }
 0xa33   : > { %7765 = vst [vmem:[#allocation3 + $0x1e0] sm:$0xff] %v7701_v47 }
 0xa34   : > { %v7935_v26 = vadd.f32 %v7934_v4, %v7872_v14  ;;  %v7800_v19 = vadd.f32 %v7799_v30, %v12396_v11  ;;  %v7887_v14 = vmul.f32 %v12461_v38, %v12461_v38 }
 0xa36   : > { %v7936_v36 = vadd.f32 %v7935_v26, %v7873_v34  ;;  %v7801_v28 = vadd.f32 %v7800_v19, %v12399_v61  ;;  %v7888_v34 = vmul.f32 %v12467_v48, %v12467_v48 }
 0xa38   : > { %v7937_v54 = vadd.f32 %v7936_v36, %v7874_v59  ;;  %v7802_v11 = vadd.f32 %v7801_v28, %v12402_v49  ;;  %v7889_v59 = vmul.f32 %v12473_v18, %v12473_v18 }
 0xa3a   : > { %v7938_v44 = vadd.f32 %v7937_v54, %v7875_v6  ;;  %v7803_v61 = vadd.f32 %v7802_v11, %v12405_v39  ;;  %v7890_v6 = vmul.f32 %v12479_v1, %v12479_v1  ;;  %v7891_v11 = vmul.f32 %v12485_v43, %v12485_v43 }
 0xa3c   : > { %v7939_v40 = vadd.f32 %v7938_v44, %v7876_v31  ;;  %v7804_v49 = vadd.f32 %v7803_v61, %v12408_v63  ;;  %v7892_v44 = vmul.f32 %v12491_v10, %v12491_v10 }
 0xa3e   : > { %v7940_v41 = vadd.f32 %v7939_v40, %v7877_v46  ;;  %v7805_v39 = vadd.f32 %v7804_v49, %v12411_v13 }
 0xa40   : > { %v7941_v33 = vadd.f32 %v7940_v41, %v7878_v56  ;;  %v7806_v63 = vadd.f32 %v7805_v39, %v12414_v57 }
 0xa42   : > { %v7942_v45 = vadd.f32 %v7941_v33, %v7879_v52  ;;  %v7807_v13 = vadd.f32 %v7806_v63, %v12419_v24 }
 0xa44   : > { %v7943_v62 = vadd.f32 %v7942_v45, %v7880_v27  ;;  %v7808_v57 = vadd.f32 %v7807_v13, %v12425_v16 }
 0xa46   : > { %v7944_v3 = vadd.f32 %v7943_v62, %v7881_v7  ;;  %v7809_v24 = vadd.f32 %v7808_v57, %v12431_v22  ;;  %v7885_v22 = vmul.f32 %v12449_v17, %v12449_v17 }
 0xa48   : > { %v7945_v29 = vadd.f32 %v7944_v3, %v7882_v21  ;;  %v7810_v16 = vadd.f32 %v7809_v24, %v12437_v35  ;;  %v7886_v35 = vmul.f32 %v12455_v55, %v12455_v55  ;;  %v7900_v21 = vmul.f32 %v7699_v9, %v7699_v9 }
 0xa49   : > { %v7901_v24 = vmul.f32 %v7700_v58, %v7700_v58 }
 0xa4a   : > { %v7946_v23 = vadd.f32 %v7945_v29, %v7883_v53  ;;  %v7811_v50 = vadd.f32 %v7810_v16, %v12443_v8  ;;  %v7702_v8 = vld [vmem:[#allocation2 + $0x10] sm:$0xff]  ;;  %v7902_v16 = vmul.f32 %v7701_v47, %v7701_v47 }
 0xa4b   : > { %7766 = vst [vmem:[#allocation3 + $0x1e8] sm:$0xff] %v7702_v8 }
 0xa4c   : > { %v7947_v15 = vadd.f32 %v7946_v23, %v7884_v2  ;;  %v7812_v12 = vadd.f32 %v7811_v50, %v12449_v17  ;;  %v7703_v17 = vld [vmem:[#allocation2 + $0x58] sm:$0xff]  ;;  %v7903_v23 = vmul.f32 %v7702_v8, %v7702_v8 }
 0xa4d   : > { %7767 = vst [vmem:[#allocation3 + $0x1f0] sm:$0xff] %v7703_v17 }
 0xa4e   : > { %v7948_v0 = vadd.f32 %v7947_v15, %v7885_v22  ;;  %v7813_v25 = vadd.f32 %v7812_v12, %v12455_v55  ;;  %v7704_v55 = vld [vmem:[#allocation2 + $0xa0] sm:$0xff]  ;;  %v7904_v15 = vmul.f32 %v7703_v17, %v7703_v17 }
 0xa4f   : > { %7768 = vst [vmem:[#allocation3 + $0x1f8] sm:$0xff] %v7704_v55 }
 0xa50   : > { %v7949_v4 = vadd.f32 %v7948_v0, %v7886_v35  ;;  %v7814_v30 = vadd.f32 %v7813_v25, %v12461_v38  ;;  %v7905_v35 = vmul.f32 %v7704_v55, %v7704_v55 }
 0xa52   : > { %v7950_v26 = vadd.f32 %v7949_v4, %v7887_v14  ;;  %v7815_v19 = vadd.f32 %v7814_v30, %v12467_v48 }
 0xa54   : > { %v7951_v36 = vadd.f32 %v7950_v26, %v7888_v34  ;;  %v7816_v28 = vadd.f32 %v7815_v19, %v12473_v18  ;;  %v7893_v18 = vmul.f32 %v12497_v20, %v12497_v20 }
 0xa56   : > { %v7952_v38 = vadd.f32 %v7951_v36, %v7889_v59  ;;  %v7817_v54 = vadd.f32 %v7816_v28, %v12479_v1  ;;  %v7894_v1 = vmul.f32 %v12503_v51, %v12503_v51 }
 0xa58   : > { %v7953_v31 = vadd.f32 %v7952_v38, %v7890_v6  ;;  %v7818_v48 = vadd.f32 %v7817_v54, %v12485_v43  ;;  %v7895_v43 = vmul.f32 %v12509_v60, %v12509_v60 }
 0xa5a   : > { %v7954_v61 = vadd.f32 %v7953_v31, %v7891_v11  ;;  %v7819_v46 = vadd.f32 %v7818_v48, %v12491_v10  ;;  %v7896_v10 = vmul.f32 %v12515_v42, %v12515_v42 }
 0xa5c   : > { %v7955_v40 = vadd.f32 %v7954_v61, %v7892_v44  ;;  %v7820_v49 = vadd.f32 %v7819_v46, %v12497_v20  ;;  %v7897_v20 = vmul.f32 %v12521_v37, %v12521_v37 }
 0xa5e   : > { %v7956_v56 = vadd.f32 %v7955_v40, %v7893_v18  ;;  %v7821_v41 = vadd.f32 %v7820_v49, %v12503_v51  ;;  %v7898_v51 = vmul.f32 %v12527_v32, %v12527_v32 }
 0xa60   : > { %v7957_v39 = vadd.f32 %v7956_v56, %v7894_v1  ;;  %v7822_v52 = vadd.f32 %v7821_v41, %v12509_v60  ;;  %v7899_v60 = vmul.f32 %v12533_v5, %v12533_v5 }
 0xa62   : > { %v7958_v33 = vadd.f32 %v7957_v39, %v7895_v43  ;;  %v7823_v63 = vadd.f32 %v7822_v52, %v12515_v42 }
 0xa64   : > { %v7959_v27 = vadd.f32 %v7958_v33, %v7896_v10  ;;  %v7824_v45 = vadd.f32 %v7823_v63, %v12521_v37 }
 0xa66   : > { %v7960_v13 = vadd.f32 %v7959_v27, %v7897_v20  ;;  %v7825_v7 = vadd.f32 %v7824_v45, %v12527_v32 }
 0xa68   : > { %v7961_v62 = vadd.f32 %v7960_v13, %v7898_v51  ;;  %v7826_v57 = vadd.f32 %v7825_v7, %v12533_v5 }
 0xa6a   : > { %v7962_v42 = vadd.f32 %v7961_v62, %v7899_v60  ;;  %v7827_v3 = vadd.f32 %v7826_v57, %v7699_v9 }
 0xa6c   : > { %v7963_v53 = vadd.f32 %v7962_v42, %v7900_v21  ;;  %v7828_v29 = vadd.f32 %v7827_v3, %v7700_v58 }
 0xa6e   : > { %v7964_v37 = vadd.f32 %v7963_v53, %v7901_v24  ;;  %v7829_v2 = vadd.f32 %v7828_v29, %v7701_v47  ;;  %v7769_v47 = vld [vmem:[#allocation5] sm:$0x1] }
 0xa70   : > { %v7965_v50 = vadd.f32 %v7964_v37, %v7902_v16  ;;  %v7830_v22 = vadd.f32 %v7829_v2, %v7702_v8  ;;  %v7841_v8 = vld [vmem:[#allocation7] sm:$0x1] }
 0xa72   : > { %v7966_v32 = vadd.f32 %v7965_v50, %v7903_v23  ;;  %v7831_v12 = vadd.f32 %v7830_v22, %v7703_v17 }
 0xa74   : > { %v7967_v0 = vadd.f32 %v7966_v32, %v7904_v15  ;;  %v7832_v25 = vadd.f32 %v7831_v12, %v7704_v55 }
 0xa76   : > { %v7833_v14 = vrot.slane %v7832_v25, 4  ;;  %v7968_v5 = vadd.f32 %v7967_v0, %v7905_v35 }
 0xa78   : > { %v7834_v4 = vadd.f32 %v7833_v14, %v7832_v25  ;;  %v7969_v30 = vrot.slane %v7968_v5, 4 }
 0xa7a   : > { %v7835_v9 = vrot.slane %v7834_v4, 2  ;;  %v7970_v34 = vadd.f32 %v7969_v30, %v7968_v5 }
 0xa7c   : > { %v7836_v26 = vadd.f32 %v7835_v9, %v7834_v4  ;;  %v7971_v58 = vrot.slane %v7970_v34, 2 }
 0xa7e   : > { %v7837_v19 = vrot.slane %v7836_v26, 1  ;;  %v7972_v59 = vadd.f32 %v7971_v58, %v7970_v34 }
 0xa80   : > { %v7838_v36 = vadd.f32 %v7837_v19, %v7836_v26  ;;  %v7973_v28 = vrot.slane %v7972_v59, 1 }
 0xa82   : > { %v7839_v6 = vadd.f32 %v7838_v36, %v7769_v47  ;;  %v7974_v38 = vadd.f32 %v7973_v28, %v7972_v59 }
 0xa84   : > { %7840 = vst [vmem:[#allocation5] sm:$0x1] %v7839_v6  ;;  %v7975_v17 = vadd.f32 %v7974_v38, %v7841_v8 }
 0xa86   : > { %7976 = vst [vmem:[#allocation7] sm:$0x1] %v7975_v17 }
 0xa87 PF: > { %p12587_p8 = scmp.eq.s32.totalorder %s8106_s18, 2  ;;  %s8296_s30 = smov [#allocation5]  }
 0xa88   : > { %s8001_s5 = sshll.u32 %s8296_s30, 4  ;;  %s8003_s8 = sshll.u32 %s12626_s3, 4  ;;  %s8002_s5 = int_to_ptr.vmem [resolvable:$true] %s8001_s5  ;;  %s8004_s8 = int_to_ptr.hbm [resolvable:$true] %s8003_s8 }
 0xa89   : > { %8132 = dma.vmem_to_hbm [thread:$0]  (%p12587_p8), %s8002_s5, 16, %s8004_s8, [#allocation6]  }
 0xa8a   : > { %s8297_s9 = smov [#allocation3]   ;;  %s7988_s13 = sshll.u32 %s12625_s2, 4  ;;  %s7989_s13 = int_to_ptr.hbm [resolvable:$true] %s7988_s13 }
 0xa8b   : > { %s7986_s10 = sshll.u32 %s8297_s9, 4  ;;  %s8298_s14 = smov 128   ;;  %s7987_s10 = int_to_ptr.vmem [resolvable:$true] %s7986_s10 }
 0xa8c   : > { %s8299_s15 = smov 8   ;;  %s8015_s21 = sshll.u32 %s12627_s4, 4  ;;  %s8016_s21 = int_to_ptr.hbm [resolvable:$true] %s8015_s21 }
 0xa8d   : > { %8130 = dma.vmem_to_hbm [thread:$0]  (%p12587_p8), %s7987_s10, 8192, %s7989_s13, [#allocation4], %s8298_s14, %s8298_s14, %s8299_s15  }
 0xa8e   : > { %s8300_s22 = smov [#allocation7]  }
 0xa8f   : > { %s8013_s23 = sshll.u32 %s8300_s22, 4  ;;  %s8014_s23 = int_to_ptr.vmem [resolvable:$true] %s8013_s23 }
 0xa90   : > { %8134 = dma.vmem_to_hbm [thread:$0]  (%p12587_p8), %s8014_s23, 16, %s8016_s21, [#allocation6]  }
 0xa91   : > { %8275 = dma.done.wait (%p12587_p8), [#allocation4], 8192  }
 0xa92   : > { %8277 = vsyncadd (%p12587_p8), [#allocation4], 4294959104 }
 0xa93   : > { %8279 = dma.done.wait (%p12587_p8), [#allocation6], 32  }
 0xa94   : > { %8281 = vsyncadd (%p12587_p8), [#allocation6], 4294967264 }
 0xa95 PF: > { %s17_s17 = sadd.s32 1, %s8292_s17   ;;  %s14413_s15 = smov %s8288_s16 }
 0xa96   : > { %p14_p9 = scmp.ge.s32.totalorder %s17_s17, 5   ;;  %s14414_s16 = smov %s14416_s19 }
 0xa98   :  { %16 = sbr.rel (!%p14_p9) target bundleno = 3 (0x3), region = 90 }
 0xa9d   :  { %8039 = vsyncpa [#allocation4], 1 }
 0xa9e   :  { %8041 = vsyncpa [#allocation4 + $0x1], 1 }
 0xa9f   :  { %8042 = vsyncpa [#allocation6], 1 }

</bundles_post_ra>
